<compile_context>
chip_gen: v5e
topology: v5e:2x2
jax: 0.10.0
libtpu: 0.0.40
codegen_flags: <defaults>
</compile_context>

<pallas_src>
import functools

import jax
import jax.numpy as jnp
from jax.experimental import pallas as pl
from jax.experimental.pallas import tpu as pltpu


def _eresidual_kernel(x_ref, w1_ref, b1_ref, w2_ref, b2_ref, w3_ref, b3_ref,
                      o_ref, *, Hb, H, W, P, Cin, Cout):
    """One (image-group, row-band) step.

    x_ref block : (1, 1, Cin, Hb+4, Wp) bf16 — band with 2-row halo, P images
                  packed along the lane axis, each strip zero-padded by 2.
    o_ref block : (1, Cout, Hb, P*W) f32 — lane-dense packed output band.
    """
    Wp = P * (W + 4)          # packed padded width (lane axis)
    He, We = Hb + 2, Wp - 2   # conv1 extended grid (1-px frame == conv2 padding)
    Wz = Wp - 4               # conv2 / conv3 grid width (strip stride W+4)

    # ---- hoist every weight/bias scalar out of the tap loops (one SMEM read
    #      each instead of one per use). ----
    w1s = [w1_ref[i] for i in range(9 * Cin * Cout)]
    b1s = [b1_ref[i] for i in range(Cout)]
    w2s = [w2_ref[i] for i in range(9 * Cout * Cout)]
    b2s = [b2_ref[i] for i in range(Cout)]
    w3s = [w3_ref[i] for i in range(Cout * Cout)]
    b3s = [b3_ref[i] for i in range(Cout)]

    xp = x_ref[...][0, 0].astype(jnp.float32)            # (Cin, Hb+4, Wp)

    # Validity mask on the extended conv1 grid: keep only real conv1 outputs
    # (inside each packed strip's real columns AND inside the real image rows).
    # The zero frame this produces *is* conv2's zero padding; it also zeroes the
    # inter-strip gap columns.
    b = pl.program_id(1)
    row_e = jax.lax.broadcasted_iota(jnp.int32, (He, We), 0)
    col_j = jax.lax.broadcasted_iota(jnp.int32, (He, We), 1)
    g_row = b * Hb - 1 + row_e                            # global image row
    row_ok = (g_row >= 0) & (g_row <= H - 1)
    col_ok = col_j < 0                                    # all-False start
    for p in range(P):
        lo = p * (W + 4) + 1
        col_ok = col_ok | ((col_j >= lo) & (col_j <= lo + W - 1))
    keep = row_ok & col_ok

    # ---- conv1: 3x3, stride 1, pad 1, on the extended grid; + ReLU; zero the
    #      frame / gaps (== conv2's zero padding). ----
    h1e = []
    for co in range(Cout):
        acc = jnp.zeros((He, We), jnp.float32)
        for ci in range(Cin):
            for dy in range(3):
                for dx in range(3):
                    w = w1s[((dy * 3 + dx) * Cin + ci) * Cout + co]
                    acc = acc + w * xp[ci, dy:dy + He, dx:dx + We]
        h1e.append(jnp.where(keep, jnp.maximum(acc + b1s[co], 0.0), 0.0))

    # ---- conv2: 3x3, stride 1, pad 1 (padding supplied by h1e's zero frame);
    #      + ReLU.  Gap columns hold garbage but are never read or stored. ----
    h2 = []
    for co in range(Cout):
        acc = jnp.zeros((Hb, Wz), jnp.float32)
        for ci in range(Cout):
            for dy in range(3):
                for dx in range(3):
                    w = w2s[((dy * 3 + dx) * Cout + ci) * Cout + co]
                    acc = acc + w * h1e[ci][dy:dy + Hb, dx:dx + Wz]
        h2.append(jnp.maximum(acc + b2s[co], 0.0))

    # ---- conv3 (1x1) + residual add + final ReLU, then pack the P strips into
    #      one gap-free lane-dense row block and store. ----
    for co in range(Cout):
        acc = jnp.zeros((Hb, Wz), jnp.float32)
        for ci in range(Cout):
            acc = acc + w3s[ci * Cout + co] * h2[ci]
        y = acc + b3s[co] + xp[co, 2:2 + Hb, 2:2 + Wz]    # residual (bf16-rounded x)
        y = jnp.maximum(y, 0.0)
        if P > 1:
            packed = jnp.concatenate(
                [y[:, p * (W + 4):p * (W + 4) + W] for p in range(P)], axis=1)
        else:
            packed = y[:, :W]
        o_ref[0, co, :, :] = packed


def eresidual_block(x_nchw, params, *, band_rows=None, lane_target=128,
                    vmem_budget_bytes=24 * 1024 * 1024):
    """params = (w1[3,3,C,Co], b1[Co], w2[3,3,Co,Co], b2[Co], w3[Co,Co], b3[Co])."""
    w1, b1, w2, b2, w3, b3 = params
    N, C, H, W = x_nchw.shape
    Cout = w1.shape[-1]
    assert C == Cout, "residual add requires in_channels == out_channels"

    # ---- lane packing: P images side by side along the W/lane axis ----
    P = max(1, min(N, -(-lane_target // (W + 4))))
    G = -(-N // P)            # image groups (grid axis 0)
    Np = G * P
    Wp = P * (W + 4)

    # ---- H row-band size (multiple of 8 so output blocks tile cleanly) ----
    if band_rows is None:
        approx_bytes_per_row = 4 * Wp * (C + 3 * Cout + 6)
        band_rows = max(8, (vmem_budget_bytes // approx_bytes_per_row) // 8 * 8)
    if band_rows >= H:
        band_rows = H
    else:
        band_rows = -(-band_rows // 8) * 8
    Hb = band_rows
    B = -(-H // Hb)
    Hp = B * Hb               # H padded to a whole number of bands

    # ---- single host prep pass: bf16 cast + zero pad + lane pack + band/halo ----
    xb = x_nchw.astype(jnp.bfloat16)
    xb = jnp.pad(xb, ((0, Np - N), (0, 0), (2, 2 + Hp - H), (2, 2)))
    xb = xb.reshape(G, P, C, Hp + 4, W + 4)
    xb = jnp.transpose(xb, (0, 2, 3, 1, 4)).reshape(G, C, Hp + 4, Wp)
    xb = jnp.stack([xb[:, :, b * Hb:b * Hb + Hb + 4, :] for b in range(B)], axis=1)
    # xb: (G, B, C, Hb+4, Wp) — each band carries its own 2-row halo.

    # Tiny parameters: flatten to 1-D f32 for SMEM scalar access in the kernel.
    # w1 flat index: ((dy*3+dx)*Cin + ci)*Cout + co ; w3 flat index: ci*Cout + co.
    w1f = w1.astype(jnp.float32).reshape(-1)
    w2f = w2.astype(jnp.float32).reshape(-1)
    w3f = w3.astype(jnp.float32).reshape(-1)
    b1f = b1.astype(jnp.float32).reshape(-1)
    b2f = b2.astype(jnp.float32).reshape(-1)
    b3f = b3.astype(jnp.float32).reshape(-1)

    kernel = functools.partial(_eresidual_kernel, Hb=Hb, H=H, W=W, P=P,
                               Cin=C, Cout=Cout)
    smem = pl.BlockSpec(memory_space=pltpu.MemorySpace.SMEM)

    out_packed = pl.pallas_call(
        kernel,
        out_shape=jax.ShapeDtypeStruct((G, C, Hp, P * W), jnp.float32),
        grid_spec=pltpu.PrefetchScalarGridSpec(
            num_scalar_prefetch=0,
            grid=(G, B),
            in_specs=[
                pl.BlockSpec((1, 1, C, Hb + 4, Wp), lambda g, b: (g, b, 0, 0, 0)),
                smem, smem, smem, smem, smem, smem,
            ],
            out_specs=pl.BlockSpec((1, C, Hb, P * W), lambda g, b: (g, 0, b, 0)),
        ),
        compiler_params=pltpu.CompilerParams(
            dimension_semantics=("parallel", "parallel"),
            vmem_limit_bytes=40 * 1024 * 1024,
        ),
    )(xb, w1f, b1f, w2f, b2f, w3f, b3f)

    # Unpack the lane-packed, band-padded output back to (N, C, H, W).
    out = out_packed.reshape(G, C, Hp, P, W)
    out = jnp.transpose(out, (0, 3, 1, 2, 4)).reshape(Np, C, Hp, W)
    return out[:N, :, :H, :]


def _reference_forward(x_nchw, params):
    """Plain-JAX reference matching the PyTorch module semantics (NCHW).

    Input is rounded through bf16 exactly like the kernel boundary; convs run at
    HIGHEST precision (f32 accumulation) to match the kernel's f32 math."""
    w1, b1, w2, b2, w3, b3 = params
    x = x_nchw.astype(jnp.bfloat16).astype(jnp.float32)

    def conv(h, w_hwio, b, pad):
        y = jax.lax.conv_general_dilated(
            h, w_hwio, window_strides=(1, 1),
            padding=[(pad, pad), (pad, pad)],
            dimension_numbers=("NCHW", "HWIO", "NCHW"),
            precision=jax.lax.Precision.HIGHEST)
        return y + b.reshape(1, -1, 1, 1)

    h = jax.nn.relu(conv(x, w1, b1, 1))
    h = jax.nn.relu(conv(h, w2, b2, 1))
    h = conv(h, w3.reshape(1, 1, *w3.shape), b3, 0)
    return jax.nn.relu(h + x)


if __name__ == "__main__":
    key = jax.random.PRNGKey(0)
    N, C, H, W = 2, 4, 16, 16
    Cout = C  # group=1, in_channels == out_channels for the residual add

    ks = jax.random.split(key, 7)
    x = jax.random.normal(ks[0], (N, C, H, W), jnp.float32)
    w1 = jax.random.normal(ks[1], (3, 3, C, Cout), jnp.float32) * 0.1
    b1 = jax.random.normal(ks[2], (Cout,), jnp.float32) * 0.1
    w2 = jax.random.normal(ks[3], (3, 3, Cout, Cout), jnp.float32) * 0.1
    b2 = jax.random.normal(ks[4], (Cout,), jnp.float32) * 0.1
    w3 = jax.random.normal(ks[5], (Cout, Cout), jnp.float32) * 0.1
    b3 = jax.random.normal(ks[6], (Cout,), jnp.float32) * 0.1
    params = (w1, b1, w2, b2, w3, b3)

    # band_rows=8 exercises the H-band grid axis (2 bands) at this small shape.
    out = eresidual_block(x, params, band_rows=8)
    jax.block_until_ready(out)

    ref = _reference_forward(x, params)
    max_err = float(jnp.max(jnp.abs(out - ref)))
    assert jnp.allclose(out, ref, atol=1e-3, rtol=1e-3), f"max abs err = {max_err}"

    print("KERNEL_OK")
</pallas_src>

<mosaic_0001>
module attributes {stable_mosaic.version = 11 : i64} {
  func.func @_eresidual_kernel(%arg0: i32, %arg1: i32, %arg2: memref<1x1x4x12x40xbf16, #tpu.memory_space<vmem>>, %arg3: memref<144xf32, #tpu.memory_space<smem>>, %arg4: memref<4xf32, #tpu.memory_space<smem>>, %arg5: memref<144xf32, #tpu.memory_space<smem>>, %arg6: memref<4xf32, #tpu.memory_space<smem>>, %arg7: memref<16xf32, #tpu.memory_space<smem>>, %arg8: memref<4xf32, #tpu.memory_space<smem>>, %arg9: memref<1x4x8x32xf32, #tpu.memory_space<vmem>>) attributes {dimension_semantics = [#tpu.dimension_semantics<parallel>, #tpu.dimension_semantics<parallel>], iteration_bounds = array<i64: 1, 2>, scalar_prefetch = 0 : i64, scratch_operands = 0 : i64, tpu.core_type = #tpu.core_type<tc>, window_params = [{transform_indices = @transform_0, window_bounds = array<i64: 1, 1, 4, 12, 40>}, {transform_indices = @transform_1, window_bounds = array<i64: 144>}, {transform_indices = @transform_2, window_bounds = array<i64: 4>}, {transform_indices = @transform_3, window_bounds = array<i64: 144>}, {transform_indices = @transform_4, window_bounds = array<i64: 4>}, {transform_indices = @transform_5, window_bounds = array<i64: 16>}, {transform_indices = @transform_6, window_bounds = array<i64: 4>}, {transform_indices = @transform_7, window_bounds = array<i64: 1, 4, 8, 32>}]} {
    %c0 = arith.constant 0 : index
    %0 = memref.load %arg3[%c0] : memref<144xf32, #tpu.memory_space<smem>>
    %c1 = arith.constant 1 : index
    %1 = memref.load %arg3[%c1] : memref<144xf32, #tpu.memory_space<smem>>
    %c2 = arith.constant 2 : index
    %2 = memref.load %arg3[%c2] : memref<144xf32, #tpu.memory_space<smem>>
    %c3 = arith.constant 3 : index
    %3 = memref.load %arg3[%c3] : memref<144xf32, #tpu.memory_space<smem>>
    %c4 = arith.constant 4 : index
    %4 = memref.load %arg3[%c4] : memref<144xf32, #tpu.memory_space<smem>>
    %c5 = arith.constant 5 : index
    %5 = memref.load %arg3[%c5] : memref<144xf32, #tpu.memory_space<smem>>
    %c6 = arith.constant 6 : index
    %6 = memref.load %arg3[%c6] : memref<144xf32, #tpu.memory_space<smem>>
    %c7 = arith.constant 7 : index
    %7 = memref.load %arg3[%c7] : memref<144xf32, #tpu.memory_space<smem>>
    %c8 = arith.constant 8 : index
    %8 = memref.load %arg3[%c8] : memref<144xf32, #tpu.memory_space<smem>>
    %c9 = arith.constant 9 : index
    %9 = memref.load %arg3[%c9] : memref<144xf32, #tpu.memory_space<smem>>
    %c10 = arith.constant 10 : index
    %10 = memref.load %arg3[%c10] : memref<144xf32, #tpu.memory_space<smem>>
    %c11 = arith.constant 11 : index
    %11 = memref.load %arg3[%c11] : memref<144xf32, #tpu.memory_space<smem>>
    %c12 = arith.constant 12 : index
    %12 = memref.load %arg3[%c12] : memref<144xf32, #tpu.memory_space<smem>>
    %c13 = arith.constant 13 : index
    %13 = memref.load %arg3[%c13] : memref<144xf32, #tpu.memory_space<smem>>
    %c14 = arith.constant 14 : index
    %14 = memref.load %arg3[%c14] : memref<144xf32, #tpu.memory_space<smem>>
    %c15 = arith.constant 15 : index
    %15 = memref.load %arg3[%c15] : memref<144xf32, #tpu.memory_space<smem>>
    %c16 = arith.constant 16 : index
    %16 = memref.load %arg3[%c16] : memref<144xf32, #tpu.memory_space<smem>>
    %c17 = arith.constant 17 : index
    %17 = memref.load %arg3[%c17] : memref<144xf32, #tpu.memory_space<smem>>
    %c18 = arith.constant 18 : index
    %18 = memref.load %arg3[%c18] : memref<144xf32, #tpu.memory_space<smem>>
    %c19 = arith.constant 19 : index
    %19 = memref.load %arg3[%c19] : memref<144xf32, #tpu.memory_space<smem>>
    %c20 = arith.constant 20 : index
    %20 = memref.load %arg3[%c20] : memref<144xf32, #tpu.memory_space<smem>>
    %c21 = arith.constant 21 : index
    %21 = memref.load %arg3[%c21] : memref<144xf32, #tpu.memory_space<smem>>
    %c22 = arith.constant 22 : index
    %22 = memref.load %arg3[%c22] : memref<144xf32, #tpu.memory_space<smem>>
    %c23 = arith.constant 23 : index
    %23 = memref.load %arg3[%c23] : memref<144xf32, #tpu.memory_space<smem>>
    %c24 = arith.constant 24 : index
    %24 = memref.load %arg3[%c24] : memref<144xf32, #tpu.memory_space<smem>>
    %c25 = arith.constant 25 : index
    %25 = memref.load %arg3[%c25] : memref<144xf32, #tpu.memory_space<smem>>
    %c26 = arith.constant 26 : index
    %26 = memref.load %arg3[%c26] : memref<144xf32, #tpu.memory_space<smem>>
    %c27 = arith.constant 27 : index
    %27 = memref.load %arg3[%c27] : memref<144xf32, #tpu.memory_space<smem>>
    %c28 = arith.constant 28 : index
    %28 = memref.load %arg3[%c28] : memref<144xf32, #tpu.memory_space<smem>>
    %c29 = arith.constant 29 : index
    %29 = memref.load %arg3[%c29] : memref<144xf32, #tpu.memory_space<smem>>
    %c30 = arith.constant 30 : index
    %30 = memref.load %arg3[%c30] : memref<144xf32, #tpu.memory_space<smem>>
    %c31 = arith.constant 31 : index
    %31 = memref.load %arg3[%c31] : memref<144xf32, #tpu.memory_space<smem>>
    %c32 = arith.constant 32 : index
    %32 = memref.load %arg3[%c32] : memref<144xf32, #tpu.memory_space<smem>>
    %c33 = arith.constant 33 : index
    %33 = memref.load %arg3[%c33] : memref<144xf32, #tpu.memory_space<smem>>
    %c34 = arith.constant 34 : index
    %34 = memref.load %arg3[%c34] : memref<144xf32, #tpu.memory_space<smem>>
    %c35 = arith.constant 35 : index
    %35 = memref.load %arg3[%c35] : memref<144xf32, #tpu.memory_space<smem>>
    %c36 = arith.constant 36 : index
    %36 = memref.load %arg3[%c36] : memref<144xf32, #tpu.memory_space<smem>>
    %c37 = arith.constant 37 : index
    %37 = memref.load %arg3[%c37] : memref<144xf32, #tpu.memory_space<smem>>
    %c38 = arith.constant 38 : index
    %38 = memref.load %arg3[%c38] : memref<144xf32, #tpu.memory_space<smem>>
    %c39 = arith.constant 39 : index
    %39 = memref.load %arg3[%c39] : memref<144xf32, #tpu.memory_space<smem>>
    %c40 = arith.constant 40 : index
    %40 = memref.load %arg3[%c40] : memref<144xf32, #tpu.memory_space<smem>>
    %c41 = arith.constant 41 : index
    %41 = memref.load %arg3[%c41] : memref<144xf32, #tpu.memory_space<smem>>
    %c42 = arith.constant 42 : index
    %42 = memref.load %arg3[%c42] : memref<144xf32, #tpu.memory_space<smem>>
    %c43 = arith.constant 43 : index
    %43 = memref.load %arg3[%c43] : memref<144xf32, #tpu.memory_space<smem>>
    %c44 = arith.constant 44 : index
    %44 = memref.load %arg3[%c44] : memref<144xf32, #tpu.memory_space<smem>>
    %c45 = arith.constant 45 : index
    %45 = memref.load %arg3[%c45] : memref<144xf32, #tpu.memory_space<smem>>
    %c46 = arith.constant 46 : index
    %46 = memref.load %arg3[%c46] : memref<144xf32, #tpu.memory_space<smem>>
    %c47 = arith.constant 47 : index
    %47 = memref.load %arg3[%c47] : memref<144xf32, #tpu.memory_space<smem>>
    %c48 = arith.constant 48 : index
    %48 = memref.load %arg3[%c48] : memref<144xf32, #tpu.memory_space<smem>>
    %c49 = arith.constant 49 : index
    %49 = memref.load %arg3[%c49] : memref<144xf32, #tpu.memory_space<smem>>
    %c50 = arith.constant 50 : index
    %50 = memref.load %arg3[%c50] : memref<144xf32, #tpu.memory_space<smem>>
    %c51 = arith.constant 51 : index
    %51 = memref.load %arg3[%c51] : memref<144xf32, #tpu.memory_space<smem>>
    %c52 = arith.constant 52 : index
    %52 = memref.load %arg3[%c52] : memref<144xf32, #tpu.memory_space<smem>>
    %c53 = arith.constant 53 : index
    %53 = memref.load %arg3[%c53] : memref<144xf32, #tpu.memory_space<smem>>
    %c54 = arith.constant 54 : index
    %54 = memref.load %arg3[%c54] : memref<144xf32, #tpu.memory_space<smem>>
    %c55 = arith.constant 55 : index
    %55 = memref.load %arg3[%c55] : memref<144xf32, #tpu.memory_space<smem>>
    %c56 = arith.constant 56 : index
    %56 = memref.load %arg3[%c56] : memref<144xf32, #tpu.memory_space<smem>>
    %c57 = arith.constant 57 : index
    %57 = memref.load %arg3[%c57] : memref<144xf32, #tpu.memory_space<smem>>
    %c58 = arith.constant 58 : index
    %58 = memref.load %arg3[%c58] : memref<144xf32, #tpu.memory_space<smem>>
    %c59 = arith.constant 59 : index
    %59 = memref.load %arg3[%c59] : memref<144xf32, #tpu.memory_space<smem>>
    %c60 = arith.constant 60 : index
    %60 = memref.load %arg3[%c60] : memref<144xf32, #tpu.memory_space<smem>>
    %c61 = arith.constant 61 : index
    %61 = memref.load %arg3[%c61] : memref<144xf32, #tpu.memory_space<smem>>
    %c62 = arith.constant 62 : index
    %62 = memref.load %arg3[%c62] : memref<144xf32, #tpu.memory_space<smem>>
    %c63 = arith.constant 63 : index
    %63 = memref.load %arg3[%c63] : memref<144xf32, #tpu.memory_space<smem>>
    %c64 = arith.constant 64 : index
    %64 = memref.load %arg3[%c64] : memref<144xf32, #tpu.memory_space<smem>>
    %c65 = arith.constant 65 : index
    %65 = memref.load %arg3[%c65] : memref<144xf32, #tpu.memory_space<smem>>
    %c66 = arith.constant 66 : index
    %66 = memref.load %arg3[%c66] : memref<144xf32, #tpu.memory_space<smem>>
    %c67 = arith.constant 67 : index
    %67 = memref.load %arg3[%c67] : memref<144xf32, #tpu.memory_space<smem>>
    %c68 = arith.constant 68 : index
    %68 = memref.load %arg3[%c68] : memref<144xf32, #tpu.memory_space<smem>>
    %c69 = arith.constant 69 : index
    %69 = memref.load %arg3[%c69] : memref<144xf32, #tpu.memory_space<smem>>
    %c70 = arith.constant 70 : index
    %70 = memref.load %arg3[%c70] : memref<144xf32, #tpu.memory_space<smem>>
    %c71 = arith.constant 71 : index
    %71 = memref.load %arg3[%c71] : memref<144xf32, #tpu.memory_space<smem>>
    %c72 = arith.constant 72 : index
    %72 = memref.load %arg3[%c72] : memref<144xf32, #tpu.memory_space<smem>>
    %c73 = arith.constant 73 : index
    %73 = memref.load %arg3[%c73] : memref<144xf32, #tpu.memory_space<smem>>
    %c74 = arith.constant 74 : index
    %74 = memref.load %arg3[%c74] : memref<144xf32, #tpu.memory_space<smem>>
    %c75 = arith.constant 75 : index
    %75 = memref.load %arg3[%c75] : memref<144xf32, #tpu.memory_space<smem>>
    %c76 = arith.constant 76 : index
    %76 = memref.load %arg3[%c76] : memref<144xf32, #tpu.memory_space<smem>>
    %c77 = arith.constant 77 : index
    %77 = memref.load %arg3[%c77] : memref<144xf32, #tpu.memory_space<smem>>
    %c78 = arith.constant 78 : index
    %78 = memref.load %arg3[%c78] : memref<144xf32, #tpu.memory_space<smem>>
    %c79 = arith.constant 79 : index
    %79 = memref.load %arg3[%c79] : memref<144xf32, #tpu.memory_space<smem>>
    %c80 = arith.constant 80 : index
    %80 = memref.load %arg3[%c80] : memref<144xf32, #tpu.memory_space<smem>>
    %c81 = arith.constant 81 : index
    %81 = memref.load %arg3[%c81] : memref<144xf32, #tpu.memory_space<smem>>
    %c82 = arith.constant 82 : index
    %82 = memref.load %arg3[%c82] : memref<144xf32, #tpu.memory_space<smem>>
    %c83 = arith.constant 83 : index
    %83 = memref.load %arg3[%c83] : memref<144xf32, #tpu.memory_space<smem>>
    %c84 = arith.constant 84 : index
    %84 = memref.load %arg3[%c84] : memref<144xf32, #tpu.memory_space<smem>>
    %c85 = arith.constant 85 : index
    %85 = memref.load %arg3[%c85] : memref<144xf32, #tpu.memory_space<smem>>
    %c86 = arith.constant 86 : index
    %86 = memref.load %arg3[%c86] : memref<144xf32, #tpu.memory_space<smem>>
    %c87 = arith.constant 87 : index
    %87 = memref.load %arg3[%c87] : memref<144xf32, #tpu.memory_space<smem>>
    %c88 = arith.constant 88 : index
    %88 = memref.load %arg3[%c88] : memref<144xf32, #tpu.memory_space<smem>>
    %c89 = arith.constant 89 : index
    %89 = memref.load %arg3[%c89] : memref<144xf32, #tpu.memory_space<smem>>
    %c90 = arith.constant 90 : index
    %90 = memref.load %arg3[%c90] : memref<144xf32, #tpu.memory_space<smem>>
    %c91 = arith.constant 91 : index
    %91 = memref.load %arg3[%c91] : memref<144xf32, #tpu.memory_space<smem>>
    %c92 = arith.constant 92 : index
    %92 = memref.load %arg3[%c92] : memref<144xf32, #tpu.memory_space<smem>>
    %c93 = arith.constant 93 : index
    %93 = memref.load %arg3[%c93] : memref<144xf32, #tpu.memory_space<smem>>
    %c94 = arith.constant 94 : index
    %94 = memref.load %arg3[%c94] : memref<144xf32, #tpu.memory_space<smem>>
    %c95 = arith.constant 95 : index
    %95 = memref.load %arg3[%c95] : memref<144xf32, #tpu.memory_space<smem>>
    %c96 = arith.constant 96 : index
    %96 = memref.load %arg3[%c96] : memref<144xf32, #tpu.memory_space<smem>>
    %c97 = arith.constant 97 : index
    %97 = memref.load %arg3[%c97] : memref<144xf32, #tpu.memory_space<smem>>
    %c98 = arith.constant 98 : index
    %98 = memref.load %arg3[%c98] : memref<144xf32, #tpu.memory_space<smem>>
    %c99 = arith.constant 99 : index
    %99 = memref.load %arg3[%c99] : memref<144xf32, #tpu.memory_space<smem>>
    %c100 = arith.constant 100 : index
    %100 = memref.load %arg3[%c100] : memref<144xf32, #tpu.memory_space<smem>>
    %c101 = arith.constant 101 : index
    %101 = memref.load %arg3[%c101] : memref<144xf32, #tpu.memory_space<smem>>
    %c102 = arith.constant 102 : index
    %102 = memref.load %arg3[%c102] : memref<144xf32, #tpu.memory_space<smem>>
    %c103 = arith.constant 103 : index
    %103 = memref.load %arg3[%c103] : memref<144xf32, #tpu.memory_space<smem>>
    %c104 = arith.constant 104 : index
    %104 = memref.load %arg3[%c104] : memref<144xf32, #tpu.memory_space<smem>>
    %c105 = arith.constant 105 : index
    %105 = memref.load %arg3[%c105] : memref<144xf32, #tpu.memory_space<smem>>
    %c106 = arith.constant 106 : index
    %106 = memref.load %arg3[%c106] : memref<144xf32, #tpu.memory_space<smem>>
    %c107 = arith.constant 107 : index
    %107 = memref.load %arg3[%c107] : memref<144xf32, #tpu.memory_space<smem>>
    %c108 = arith.constant 108 : index
    %108 = memref.load %arg3[%c108] : memref<144xf32, #tpu.memory_space<smem>>
    %c109 = arith.constant 109 : index
    %109 = memref.load %arg3[%c109] : memref<144xf32, #tpu.memory_space<smem>>
    %c110 = arith.constant 110 : index
    %110 = memref.load %arg3[%c110] : memref<144xf32, #tpu.memory_space<smem>>
    %c111 = arith.constant 111 : index
    %111 = memref.load %arg3[%c111] : memref<144xf32, #tpu.memory_space<smem>>
    %c112 = arith.constant 112 : index
    %112 = memref.load %arg3[%c112] : memref<144xf32, #tpu.memory_space<smem>>
    %c113 = arith.constant 113 : index
    %113 = memref.load %arg3[%c113] : memref<144xf32, #tpu.memory_space<smem>>
    %c114 = arith.constant 114 : index
    %114 = memref.load %arg3[%c114] : memref<144xf32, #tpu.memory_space<smem>>
    %c115 = arith.constant 115 : index
    %115 = memref.load %arg3[%c115] : memref<144xf32, #tpu.memory_space<smem>>
    %c116 = arith.constant 116 : index
    %116 = memref.load %arg3[%c116] : memref<144xf32, #tpu.memory_space<smem>>
    %c117 = arith.constant 117 : index
    %117 = memref.load %arg3[%c117] : memref<144xf32, #tpu.memory_space<smem>>
    %c118 = arith.constant 118 : index
    %118 = memref.load %arg3[%c118] : memref<144xf32, #tpu.memory_space<smem>>
    %c119 = arith.constant 119 : index
    %119 = memref.load %arg3[%c119] : memref<144xf32, #tpu.memory_space<smem>>
    %c120 = arith.constant 120 : index
    %120 = memref.load %arg3[%c120] : memref<144xf32, #tpu.memory_space<smem>>
    %c121 = arith.constant 121 : index
    %121 = memref.load %arg3[%c121] : memref<144xf32, #tpu.memory_space<smem>>
    %c122 = arith.constant 122 : index
    %122 = memref.load %arg3[%c122] : memref<144xf32, #tpu.memory_space<smem>>
    %c123 = arith.constant 123 : index
    %123 = memref.load %arg3[%c123] : memref<144xf32, #tpu.memory_space<smem>>
    %c124 = arith.constant 124 : index
    %124 = memref.load %arg3[%c124] : memref<144xf32, #tpu.memory_space<smem>>
    %c125 = arith.constant 125 : index
    %125 = memref.load %arg3[%c125] : memref<144xf32, #tpu.memory_space<smem>>
    %c126 = arith.constant 126 : index
    %126 = memref.load %arg3[%c126] : memref<144xf32, #tpu.memory_space<smem>>
    %c127 = arith.constant 127 : index
    %127 = memref.load %arg3[%c127] : memref<144xf32, #tpu.memory_space<smem>>
    %c128 = arith.constant 128 : index
    %128 = memref.load %arg3[%c128] : memref<144xf32, #tpu.memory_space<smem>>
    %c129 = arith.constant 129 : index
    %129 = memref.load %arg3[%c129] : memref<144xf32, #tpu.memory_space<smem>>
    %c130 = arith.constant 130 : index
    %130 = memref.load %arg3[%c130] : memref<144xf32, #tpu.memory_space<smem>>
    %c131 = arith.constant 131 : index
    %131 = memref.load %arg3[%c131] : memref<144xf32, #tpu.memory_space<smem>>
    %c132 = arith.constant 132 : index
    %132 = memref.load %arg3[%c132] : memref<144xf32, #tpu.memory_space<smem>>
    %c133 = arith.constant 133 : index
    %133 = memref.load %arg3[%c133] : memref<144xf32, #tpu.memory_space<smem>>
    %c134 = arith.constant 134 : index
    %134 = memref.load %arg3[%c134] : memref<144xf32, #tpu.memory_space<smem>>
    %c135 = arith.constant 135 : index
    %135 = memref.load %arg3[%c135] : memref<144xf32, #tpu.memory_space<smem>>
    %c136 = arith.constant 136 : index
    %136 = memref.load %arg3[%c136] : memref<144xf32, #tpu.memory_space<smem>>
    %c137 = arith.constant 137 : index
    %137 = memref.load %arg3[%c137] : memref<144xf32, #tpu.memory_space<smem>>
    %c138 = arith.constant 138 : index
    %138 = memref.load %arg3[%c138] : memref<144xf32, #tpu.memory_space<smem>>
    %c139 = arith.constant 139 : index
    %139 = memref.load %arg3[%c139] : memref<144xf32, #tpu.memory_space<smem>>
    %c140 = arith.constant 140 : index
    %140 = memref.load %arg3[%c140] : memref<144xf32, #tpu.memory_space<smem>>
    %c141 = arith.constant 141 : index
    %141 = memref.load %arg3[%c141] : memref<144xf32, #tpu.memory_space<smem>>
    %c142 = arith.constant 142 : index
    %142 = memref.load %arg3[%c142] : memref<144xf32, #tpu.memory_space<smem>>
    %c143 = arith.constant 143 : index
    %143 = memref.load %arg3[%c143] : memref<144xf32, #tpu.memory_space<smem>>
    %c0_0 = arith.constant 0 : index
    %144 = memref.load %arg4[%c0_0] : memref<4xf32, #tpu.memory_space<smem>>
    %c1_1 = arith.constant 1 : index
    %145 = memref.load %arg4[%c1_1] : memref<4xf32, #tpu.memory_space<smem>>
    %c2_2 = arith.constant 2 : index
    %146 = memref.load %arg4[%c2_2] : memref<4xf32, #tpu.memory_space<smem>>
    %c3_3 = arith.constant 3 : index
    %147 = memref.load %arg4[%c3_3] : memref<4xf32, #tpu.memory_space<smem>>
    %c0_4 = arith.constant 0 : index
    %148 = memref.load %arg5[%c0_4] : memref<144xf32, #tpu.memory_space<smem>>
    %c1_5 = arith.constant 1 : index
    %149 = memref.load %arg5[%c1_5] : memref<144xf32, #tpu.memory_space<smem>>
    %c2_6 = arith.constant 2 : index
    %150 = memref.load %arg5[%c2_6] : memref<144xf32, #tpu.memory_space<smem>>
    %c3_7 = arith.constant 3 : index
    %151 = memref.load %arg5[%c3_7] : memref<144xf32, #tpu.memory_space<smem>>
    %c4_8 = arith.constant 4 : index
    %152 = memref.load %arg5[%c4_8] : memref<144xf32, #tpu.memory_space<smem>>
    %c5_9 = arith.constant 5 : index
    %153 = memref.load %arg5[%c5_9] : memref<144xf32, #tpu.memory_space<smem>>
    %c6_10 = arith.constant 6 : index
    %154 = memref.load %arg5[%c6_10] : memref<144xf32, #tpu.memory_space<smem>>
    %c7_11 = arith.constant 7 : index
    %155 = memref.load %arg5[%c7_11] : memref<144xf32, #tpu.memory_space<smem>>
    %c8_12 = arith.constant 8 : index
    %156 = memref.load %arg5[%c8_12] : memref<144xf32, #tpu.memory_space<smem>>
    %c9_13 = arith.constant 9 : index
    %157 = memref.load %arg5[%c9_13] : memref<144xf32, #tpu.memory_space<smem>>
    %c10_14 = arith.constant 10 : index
    %158 = memref.load %arg5[%c10_14] : memref<144xf32, #tpu.memory_space<smem>>
    %c11_15 = arith.constant 11 : index
    %159 = memref.load %arg5[%c11_15] : memref<144xf32, #tpu.memory_space<smem>>
    %c12_16 = arith.constant 12 : index
    %160 = memref.load %arg5[%c12_16] : memref<144xf32, #tpu.memory_space<smem>>
    %c13_17 = arith.constant 13 : index
    %161 = memref.load %arg5[%c13_17] : memref<144xf32, #tpu.memory_space<smem>>
    %c14_18 = arith.constant 14 : index
    %162 = memref.load %arg5[%c14_18] : memref<144xf32, #tpu.memory_space<smem>>
    %c15_19 = arith.constant 15 : index
    %163 = memref.load %arg5[%c15_19] : memref<144xf32, #tpu.memory_space<smem>>
    %c16_20 = arith.constant 16 : index
    %164 = memref.load %arg5[%c16_20] : memref<144xf32, #tpu.memory_space<smem>>
    %c17_21 = arith.constant 17 : index
    %165 = memref.load %arg5[%c17_21] : memref<144xf32, #tpu.memory_space<smem>>
    %c18_22 = arith.constant 18 : index
    %166 = memref.load %arg5[%c18_22] : memref<144xf32, #tpu.memory_space<smem>>
    %c19_23 = arith.constant 19 : index
    %167 = memref.load %arg5[%c19_23] : memref<144xf32, #tpu.memory_space<smem>>
    %c20_24 = arith.constant 20 : index
    %168 = memref.load %arg5[%c20_24] : memref<144xf32, #tpu.memory_space<smem>>
    %c21_25 = arith.constant 21 : index
    %169 = memref.load %arg5[%c21_25] : memref<144xf32, #tpu.memory_space<smem>>
    %c22_26 = arith.constant 22 : index
    %170 = memref.load %arg5[%c22_26] : memref<144xf32, #tpu.memory_space<smem>>
    %c23_27 = arith.constant 23 : index
    %171 = memref.load %arg5[%c23_27] : memref<144xf32, #tpu.memory_space<smem>>
    %c24_28 = arith.constant 24 : index
    %172 = memref.load %arg5[%c24_28] : memref<144xf32, #tpu.memory_space<smem>>
    %c25_29 = arith.constant 25 : index
    %173 = memref.load %arg5[%c25_29] : memref<144xf32, #tpu.memory_space<smem>>
    %c26_30 = arith.constant 26 : index
    %174 = memref.load %arg5[%c26_30] : memref<144xf32, #tpu.memory_space<smem>>
    %c27_31 = arith.constant 27 : index
    %175 = memref.load %arg5[%c27_31] : memref<144xf32, #tpu.memory_space<smem>>
    %c28_32 = arith.constant 28 : index
    %176 = memref.load %arg5[%c28_32] : memref<144xf32, #tpu.memory_space<smem>>
    %c29_33 = arith.constant 29 : index
    %177 = memref.load %arg5[%c29_33] : memref<144xf32, #tpu.memory_space<smem>>
    %c30_34 = arith.constant 30 : index
    %178 = memref.load %arg5[%c30_34] : memref<144xf32, #tpu.memory_space<smem>>
    %c31_35 = arith.constant 31 : index
    %179 = memref.load %arg5[%c31_35] : memref<144xf32, #tpu.memory_space<smem>>
    %c32_36 = arith.constant 32 : index
    %180 = memref.load %arg5[%c32_36] : memref<144xf32, #tpu.memory_space<smem>>
    %c33_37 = arith.constant 33 : index
    %181 = memref.load %arg5[%c33_37] : memref<144xf32, #tpu.memory_space<smem>>
    %c34_38 = arith.constant 34 : index
    %182 = memref.load %arg5[%c34_38] : memref<144xf32, #tpu.memory_space<smem>>
    %c35_39 = arith.constant 35 : index
    %183 = memref.load %arg5[%c35_39] : memref<144xf32, #tpu.memory_space<smem>>
    %c36_40 = arith.constant 36 : index
    %184 = memref.load %arg5[%c36_40] : memref<144xf32, #tpu.memory_space<smem>>
    %c37_41 = arith.constant 37 : index
    %185 = memref.load %arg5[%c37_41] : memref<144xf32, #tpu.memory_space<smem>>
    %c38_42 = arith.constant 38 : index
    %186 = memref.load %arg5[%c38_42] : memref<144xf32, #tpu.memory_space<smem>>
    %c39_43 = arith.constant 39 : index
    %187 = memref.load %arg5[%c39_43] : memref<144xf32, #tpu.memory_space<smem>>
    %c40_44 = arith.constant 40 : index
    %188 = memref.load %arg5[%c40_44] : memref<144xf32, #tpu.memory_space<smem>>
    %c41_45 = arith.constant 41 : index
    %189 = memref.load %arg5[%c41_45] : memref<144xf32, #tpu.memory_space<smem>>
    %c42_46 = arith.constant 42 : index
    %190 = memref.load %arg5[%c42_46] : memref<144xf32, #tpu.memory_space<smem>>
    %c43_47 = arith.constant 43 : index
    %191 = memref.load %arg5[%c43_47] : memref<144xf32, #tpu.memory_space<smem>>
    %c44_48 = arith.constant 44 : index
    %192 = memref.load %arg5[%c44_48] : memref<144xf32, #tpu.memory_space<smem>>
    %c45_49 = arith.constant 45 : index
    %193 = memref.load %arg5[%c45_49] : memref<144xf32, #tpu.memory_space<smem>>
    %c46_50 = arith.constant 46 : index
    %194 = memref.load %arg5[%c46_50] : memref<144xf32, #tpu.memory_space<smem>>
    %c47_51 = arith.constant 47 : index
    %195 = memref.load %arg5[%c47_51] : memref<144xf32, #tpu.memory_space<smem>>
    %c48_52 = arith.constant 48 : index
    %196 = memref.load %arg5[%c48_52] : memref<144xf32, #tpu.memory_space<smem>>
    %c49_53 = arith.constant 49 : index
    %197 = memref.load %arg5[%c49_53] : memref<144xf32, #tpu.memory_space<smem>>
    %c50_54 = arith.constant 50 : index
    %198 = memref.load %arg5[%c50_54] : memref<144xf32, #tpu.memory_space<smem>>
    %c51_55 = arith.constant 51 : index
    %199 = memref.load %arg5[%c51_55] : memref<144xf32, #tpu.memory_space<smem>>
    %c52_56 = arith.constant 52 : index
    %200 = memref.load %arg5[%c52_56] : memref<144xf32, #tpu.memory_space<smem>>
    %c53_57 = arith.constant 53 : index
    %201 = memref.load %arg5[%c53_57] : memref<144xf32, #tpu.memory_space<smem>>
    %c54_58 = arith.constant 54 : index
    %202 = memref.load %arg5[%c54_58] : memref<144xf32, #tpu.memory_space<smem>>
    %c55_59 = arith.constant 55 : index
    %203 = memref.load %arg5[%c55_59] : memref<144xf32, #tpu.memory_space<smem>>
    %c56_60 = arith.constant 56 : index
    %204 = memref.load %arg5[%c56_60] : memref<144xf32, #tpu.memory_space<smem>>
    %c57_61 = arith.constant 57 : index
    %205 = memref.load %arg5[%c57_61] : memref<144xf32, #tpu.memory_space<smem>>
    %c58_62 = arith.constant 58 : index
    %206 = memref.load %arg5[%c58_62] : memref<144xf32, #tpu.memory_space<smem>>
    %c59_63 = arith.constant 59 : index
    %207 = memref.load %arg5[%c59_63] : memref<144xf32, #tpu.memory_space<smem>>
    %c60_64 = arith.constant 60 : index
    %208 = memref.load %arg5[%c60_64] : memref<144xf32, #tpu.memory_space<smem>>
    %c61_65 = arith.constant 61 : index
    %209 = memref.load %arg5[%c61_65] : memref<144xf32, #tpu.memory_space<smem>>
    %c62_66 = arith.constant 62 : index
    %210 = memref.load %arg5[%c62_66] : memref<144xf32, #tpu.memory_space<smem>>
    %c63_67 = arith.constant 63 : index
    %211 = memref.load %arg5[%c63_67] : memref<144xf32, #tpu.memory_space<smem>>
    %c64_68 = arith.constant 64 : index
    %212 = memref.load %arg5[%c64_68] : memref<144xf32, #tpu.memory_space<smem>>
    %c65_69 = arith.constant 65 : index
    %213 = memref.load %arg5[%c65_69] : memref<144xf32, #tpu.memory_space<smem>>
    %c66_70 = arith.constant 66 : index
    %214 = memref.load %arg5[%c66_70] : memref<144xf32, #tpu.memory_space<smem>>
    %c67_71 = arith.constant 67 : index
    %215 = memref.load %arg5[%c67_71] : memref<144xf32, #tpu.memory_space<smem>>
    %c68_72 = arith.constant 68 : index
    %216 = memref.load %arg5[%c68_72] : memref<144xf32, #tpu.memory_space<smem>>
    %c69_73 = arith.constant 69 : index
    %217 = memref.load %arg5[%c69_73] : memref<144xf32, #tpu.memory_space<smem>>
    %c70_74 = arith.constant 70 : index
    %218 = memref.load %arg5[%c70_74] : memref<144xf32, #tpu.memory_space<smem>>
    %c71_75 = arith.constant 71 : index
    %219 = memref.load %arg5[%c71_75] : memref<144xf32, #tpu.memory_space<smem>>
    %c72_76 = arith.constant 72 : index
    %220 = memref.load %arg5[%c72_76] : memref<144xf32, #tpu.memory_space<smem>>
    %c73_77 = arith.constant 73 : index
    %221 = memref.load %arg5[%c73_77] : memref<144xf32, #tpu.memory_space<smem>>
    %c74_78 = arith.constant 74 : index
    %222 = memref.load %arg5[%c74_78] : memref<144xf32, #tpu.memory_space<smem>>
    %c75_79 = arith.constant 75 : index
    %223 = memref.load %arg5[%c75_79] : memref<144xf32, #tpu.memory_space<smem>>
    %c76_80 = arith.constant 76 : index
    %224 = memref.load %arg5[%c76_80] : memref<144xf32, #tpu.memory_space<smem>>
    %c77_81 = arith.constant 77 : index
    %225 = memref.load %arg5[%c77_81] : memref<144xf32, #tpu.memory_space<smem>>
    %c78_82 = arith.constant 78 : index
    %226 = memref.load %arg5[%c78_82] : memref<144xf32, #tpu.memory_space<smem>>
    %c79_83 = arith.constant 79 : index
    %227 = memref.load %arg5[%c79_83] : memref<144xf32, #tpu.memory_space<smem>>
    %c80_84 = arith.constant 80 : index
    %228 = memref.load %arg5[%c80_84] : memref<144xf32, #tpu.memory_space<smem>>
    %c81_85 = arith.constant 81 : index
    %229 = memref.load %arg5[%c81_85] : memref<144xf32, #tpu.memory_space<smem>>
    %c82_86 = arith.constant 82 : index
    %230 = memref.load %arg5[%c82_86] : memref<144xf32, #tpu.memory_space<smem>>
    %c83_87 = arith.constant 83 : index
    %231 = memref.load %arg5[%c83_87] : memref<144xf32, #tpu.memory_space<smem>>
    %c84_88 = arith.constant 84 : index
    %232 = memref.load %arg5[%c84_88] : memref<144xf32, #tpu.memory_space<smem>>
    %c85_89 = arith.constant 85 : index
    %233 = memref.load %arg5[%c85_89] : memref<144xf32, #tpu.memory_space<smem>>
    %c86_90 = arith.constant 86 : index
    %234 = memref.load %arg5[%c86_90] : memref<144xf32, #tpu.memory_space<smem>>
    %c87_91 = arith.constant 87 : index
    %235 = memref.load %arg5[%c87_91] : memref<144xf32, #tpu.memory_space<smem>>
    %c88_92 = arith.constant 88 : index
    %236 = memref.load %arg5[%c88_92] : memref<144xf32, #tpu.memory_space<smem>>
    %c89_93 = arith.constant 89 : index
    %237 = memref.load %arg5[%c89_93] : memref<144xf32, #tpu.memory_space<smem>>
    %c90_94 = arith.constant 90 : index
    %238 = memref.load %arg5[%c90_94] : memref<144xf32, #tpu.memory_space<smem>>
    %c91_95 = arith.constant 91 : index
    %239 = memref.load %arg5[%c91_95] : memref<144xf32, #tpu.memory_space<smem>>
    %c92_96 = arith.constant 92 : index
    %240 = memref.load %arg5[%c92_96] : memref<144xf32, #tpu.memory_space<smem>>
    %c93_97 = arith.constant 93 : index
    %241 = memref.load %arg5[%c93_97] : memref<144xf32, #tpu.memory_space<smem>>
    %c94_98 = arith.constant 94 : index
    %242 = memref.load %arg5[%c94_98] : memref<144xf32, #tpu.memory_space<smem>>
    %c95_99 = arith.constant 95 : index
    %243 = memref.load %arg5[%c95_99] : memref<144xf32, #tpu.memory_space<smem>>
    %c96_100 = arith.constant 96 : index
    %244 = memref.load %arg5[%c96_100] : memref<144xf32, #tpu.memory_space<smem>>
    %c97_101 = arith.constant 97 : index
    %245 = memref.load %arg5[%c97_101] : memref<144xf32, #tpu.memory_space<smem>>
    %c98_102 = arith.constant 98 : index
    %246 = memref.load %arg5[%c98_102] : memref<144xf32, #tpu.memory_space<smem>>
    %c99_103 = arith.constant 99 : index
    %247 = memref.load %arg5[%c99_103] : memref<144xf32, #tpu.memory_space<smem>>
    %c100_104 = arith.constant 100 : index
    %248 = memref.load %arg5[%c100_104] : memref<144xf32, #tpu.memory_space<smem>>
    %c101_105 = arith.constant 101 : index
    %249 = memref.load %arg5[%c101_105] : memref<144xf32, #tpu.memory_space<smem>>
    %c102_106 = arith.constant 102 : index
    %250 = memref.load %arg5[%c102_106] : memref<144xf32, #tpu.memory_space<smem>>
    %c103_107 = arith.constant 103 : index
    %251 = memref.load %arg5[%c103_107] : memref<144xf32, #tpu.memory_space<smem>>
    %c104_108 = arith.constant 104 : index
    %252 = memref.load %arg5[%c104_108] : memref<144xf32, #tpu.memory_space<smem>>
    %c105_109 = arith.constant 105 : index
    %253 = memref.load %arg5[%c105_109] : memref<144xf32, #tpu.memory_space<smem>>
    %c106_110 = arith.constant 106 : index
    %254 = memref.load %arg5[%c106_110] : memref<144xf32, #tpu.memory_space<smem>>
    %c107_111 = arith.constant 107 : index
    %255 = memref.load %arg5[%c107_111] : memref<144xf32, #tpu.memory_space<smem>>
    %c108_112 = arith.constant 108 : index
    %256 = memref.load %arg5[%c108_112] : memref<144xf32, #tpu.memory_space<smem>>
    %c109_113 = arith.constant 109 : index
    %257 = memref.load %arg5[%c109_113] : memref<144xf32, #tpu.memory_space<smem>>
    %c110_114 = arith.constant 110 : index
    %258 = memref.load %arg5[%c110_114] : memref<144xf32, #tpu.memory_space<smem>>
    %c111_115 = arith.constant 111 : index
    %259 = memref.load %arg5[%c111_115] : memref<144xf32, #tpu.memory_space<smem>>
    %c112_116 = arith.constant 112 : index
    %260 = memref.load %arg5[%c112_116] : memref<144xf32, #tpu.memory_space<smem>>
    %c113_117 = arith.constant 113 : index
    %261 = memref.load %arg5[%c113_117] : memref<144xf32, #tpu.memory_space<smem>>
    %c114_118 = arith.constant 114 : index
    %262 = memref.load %arg5[%c114_118] : memref<144xf32, #tpu.memory_space<smem>>
    %c115_119 = arith.constant 115 : index
    %263 = memref.load %arg5[%c115_119] : memref<144xf32, #tpu.memory_space<smem>>
    %c116_120 = arith.constant 116 : index
    %264 = memref.load %arg5[%c116_120] : memref<144xf32, #tpu.memory_space<smem>>
    %c117_121 = arith.constant 117 : index
    %265 = memref.load %arg5[%c117_121] : memref<144xf32, #tpu.memory_space<smem>>
    %c118_122 = arith.constant 118 : index
    %266 = memref.load %arg5[%c118_122] : memref<144xf32, #tpu.memory_space<smem>>
    %c119_123 = arith.constant 119 : index
    %267 = memref.load %arg5[%c119_123] : memref<144xf32, #tpu.memory_space<smem>>
    %c120_124 = arith.constant 120 : index
    %268 = memref.load %arg5[%c120_124] : memref<144xf32, #tpu.memory_space<smem>>
    %c121_125 = arith.constant 121 : index
    %269 = memref.load %arg5[%c121_125] : memref<144xf32, #tpu.memory_space<smem>>
    %c122_126 = arith.constant 122 : index
    %270 = memref.load %arg5[%c122_126] : memref<144xf32, #tpu.memory_space<smem>>
    %c123_127 = arith.constant 123 : index
    %271 = memref.load %arg5[%c123_127] : memref<144xf32, #tpu.memory_space<smem>>
    %c124_128 = arith.constant 124 : index
    %272 = memref.load %arg5[%c124_128] : memref<144xf32, #tpu.memory_space<smem>>
    %c125_129 = arith.constant 125 : index
    %273 = memref.load %arg5[%c125_129] : memref<144xf32, #tpu.memory_space<smem>>
    %c126_130 = arith.constant 126 : index
    %274 = memref.load %arg5[%c126_130] : memref<144xf32, #tpu.memory_space<smem>>
    %c127_131 = arith.constant 127 : index
    %275 = memref.load %arg5[%c127_131] : memref<144xf32, #tpu.memory_space<smem>>
    %c128_132 = arith.constant 128 : index
    %276 = memref.load %arg5[%c128_132] : memref<144xf32, #tpu.memory_space<smem>>
    %c129_133 = arith.constant 129 : index
    %277 = memref.load %arg5[%c129_133] : memref<144xf32, #tpu.memory_space<smem>>
    %c130_134 = arith.constant 130 : index
    %278 = memref.load %arg5[%c130_134] : memref<144xf32, #tpu.memory_space<smem>>
    %c131_135 = arith.constant 131 : index
    %279 = memref.load %arg5[%c131_135] : memref<144xf32, #tpu.memory_space<smem>>
    %c132_136 = arith.constant 132 : index
    %280 = memref.load %arg5[%c132_136] : memref<144xf32, #tpu.memory_space<smem>>
    %c133_137 = arith.constant 133 : index
    %281 = memref.load %arg5[%c133_137] : memref<144xf32, #tpu.memory_space<smem>>
    %c134_138 = arith.constant 134 : index
    %282 = memref.load %arg5[%c134_138] : memref<144xf32, #tpu.memory_space<smem>>
    %c135_139 = arith.constant 135 : index
    %283 = memref.load %arg5[%c135_139] : memref<144xf32, #tpu.memory_space<smem>>
    %c136_140 = arith.constant 136 : index
    %284 = memref.load %arg5[%c136_140] : memref<144xf32, #tpu.memory_space<smem>>
    %c137_141 = arith.constant 137 : index
    %285 = memref.load %arg5[%c137_141] : memref<144xf32, #tpu.memory_space<smem>>
    %c138_142 = arith.constant 138 : index
    %286 = memref.load %arg5[%c138_142] : memref<144xf32, #tpu.memory_space<smem>>
    %c139_143 = arith.constant 139 : index
    %287 = memref.load %arg5[%c139_143] : memref<144xf32, #tpu.memory_space<smem>>
    %c140_144 = arith.constant 140 : index
    %288 = memref.load %arg5[%c140_144] : memref<144xf32, #tpu.memory_space<smem>>
    %c141_145 = arith.constant 141 : index
    %289 = memref.load %arg5[%c141_145] : memref<144xf32, #tpu.memory_space<smem>>
    %c142_146 = arith.constant 142 : index
    %290 = memref.load %arg5[%c142_146] : memref<144xf32, #tpu.memory_space<smem>>
    %c143_147 = arith.constant 143 : index
    %291 = memref.load %arg5[%c143_147] : memref<144xf32, #tpu.memory_space<smem>>
    %c0_148 = arith.constant 0 : index
    %292 = memref.load %arg6[%c0_148] : memref<4xf32, #tpu.memory_space<smem>>
    %c1_149 = arith.constant 1 : index
    %293 = memref.load %arg6[%c1_149] : memref<4xf32, #tpu.memory_space<smem>>
    %c2_150 = arith.constant 2 : index
    %294 = memref.load %arg6[%c2_150] : memref<4xf32, #tpu.memory_space<smem>>
    %c3_151 = arith.constant 3 : index
    %295 = memref.load %arg6[%c3_151] : memref<4xf32, #tpu.memory_space<smem>>
    %c0_152 = arith.constant 0 : index
    %296 = memref.load %arg7[%c0_152] : memref<16xf32, #tpu.memory_space<smem>>
    %c1_153 = arith.constant 1 : index
    %297 = memref.load %arg7[%c1_153] : memref<16xf32, #tpu.memory_space<smem>>
    %c2_154 = arith.constant 2 : index
    %298 = memref.load %arg7[%c2_154] : memref<16xf32, #tpu.memory_space<smem>>
    %c3_155 = arith.constant 3 : index
    %299 = memref.load %arg7[%c3_155] : memref<16xf32, #tpu.memory_space<smem>>
    %c4_156 = arith.constant 4 : index
    %300 = memref.load %arg7[%c4_156] : memref<16xf32, #tpu.memory_space<smem>>
    %c5_157 = arith.constant 5 : index
    %301 = memref.load %arg7[%c5_157] : memref<16xf32, #tpu.memory_space<smem>>
    %c6_158 = arith.constant 6 : index
    %302 = memref.load %arg7[%c6_158] : memref<16xf32, #tpu.memory_space<smem>>
    %c7_159 = arith.constant 7 : index
    %303 = memref.load %arg7[%c7_159] : memref<16xf32, #tpu.memory_space<smem>>
    %c8_160 = arith.constant 8 : index
    %304 = memref.load %arg7[%c8_160] : memref<16xf32, #tpu.memory_space<smem>>
    %c9_161 = arith.constant 9 : index
    %305 = memref.load %arg7[%c9_161] : memref<16xf32, #tpu.memory_space<smem>>
    %c10_162 = arith.constant 10 : index
    %306 = memref.load %arg7[%c10_162] : memref<16xf32, #tpu.memory_space<smem>>
    %c11_163 = arith.constant 11 : index
    %307 = memref.load %arg7[%c11_163] : memref<16xf32, #tpu.memory_space<smem>>
    %c12_164 = arith.constant 12 : index
    %308 = memref.load %arg7[%c12_164] : memref<16xf32, #tpu.memory_space<smem>>
    %c13_165 = arith.constant 13 : index
    %309 = memref.load %arg7[%c13_165] : memref<16xf32, #tpu.memory_space<smem>>
    %c14_166 = arith.constant 14 : index
    %310 = memref.load %arg7[%c14_166] : memref<16xf32, #tpu.memory_space<smem>>
    %c15_167 = arith.constant 15 : index
    %311 = memref.load %arg7[%c15_167] : memref<16xf32, #tpu.memory_space<smem>>
    %c0_168 = arith.constant 0 : index
    %312 = memref.load %arg8[%c0_168] : memref<4xf32, #tpu.memory_space<smem>>
    %c1_169 = arith.constant 1 : index
    %313 = memref.load %arg8[%c1_169] : memref<4xf32, #tpu.memory_space<smem>>
    %c2_170 = arith.constant 2 : index
    %314 = memref.load %arg8[%c2_170] : memref<4xf32, #tpu.memory_space<smem>>
    %c3_171 = arith.constant 3 : index
    %315 = memref.load %arg8[%c3_171] : memref<4xf32, #tpu.memory_space<smem>>
    %c0_172 = arith.constant 0 : index
    %c0_173 = arith.constant 0 : index
    %c0_174 = arith.constant 0 : index
    %c0_175 = arith.constant 0 : index
    %c0_176 = arith.constant 0 : index
    %316 = vector.load %arg2[%c0_172, %c0_173, %c0_174, %c0_175, %c0_176] : memref<1x1x4x12x40xbf16, #tpu.memory_space<vmem>>, vector<1x1x4x12x40xbf16>
    %317 = vector.shape_cast %316 : vector<1x1x4x12x40xbf16> to vector<4x12x40xbf16>
    %318 = arith.extf %317 : vector<4x12x40xbf16> to vector<4x12x40xf32>
    %319 = tpu.iota {dimensions = array<i32: 0>} : vector<10x38xi32>
    %320 = tpu.iota {dimensions = array<i32: 1>} : vector<10x38xi32>
    %c8_i32 = arith.constant 8 : i32
    %321 = arith.muli %arg1, %c8_i32 : i32
    %c1_i32 = arith.constant 1 : i32
    %322 = arith.subi %321, %c1_i32 : i32
    %323 = vector.broadcast %322 : i32 to vector<10x38xi32>
    %324 = arith.addi %323, %319 : vector<10x38xi32>
    %c0_i32 = arith.constant 0 : i32
    %325 = vector.broadcast %c0_i32 : i32 to vector<10x38xi32>
    %326 = arith.cmpi sge, %324, %325 : vector<10x38xi32>
    %c15_i32 = arith.constant 15 : i32
    %327 = vector.broadcast %c15_i32 : i32 to vector<10x38xi32>
    %328 = arith.cmpi sle, %324, %327 : vector<10x38xi32>
    %329 = arith.andi %326, %328 : vector<10x38xi1>
    %c0_i32_177 = arith.constant 0 : i32
    %330 = vector.broadcast %c0_i32_177 : i32 to vector<10x38xi32>
    %331 = arith.cmpi slt, %320, %330 : vector<10x38xi32>
    %c1_i32_178 = arith.constant 1 : i32
    %332 = vector.broadcast %c1_i32_178 : i32 to vector<10x38xi32>
    %333 = arith.cmpi sge, %320, %332 : vector<10x38xi32>
    %c16_i32 = arith.constant 16 : i32
    %334 = vector.broadcast %c16_i32 : i32 to vector<10x38xi32>
    %335 = arith.cmpi sle, %320, %334 : vector<10x38xi32>
    %336 = arith.andi %333, %335 : vector<10x38xi1>
    %337 = arith.ori %331, %336 : vector<10x38xi1>
    %c21_i32 = arith.constant 21 : i32
    %338 = vector.broadcast %c21_i32 : i32 to vector<10x38xi32>
    %339 = arith.cmpi sge, %320, %338 : vector<10x38xi32>
    %c36_i32 = arith.constant 36 : i32
    %340 = vector.broadcast %c36_i32 : i32 to vector<10x38xi32>
    %341 = arith.cmpi sle, %320, %340 : vector<10x38xi32>
    %342 = arith.andi %339, %341 : vector<10x38xi1>
    %343 = arith.ori %337, %342 : vector<10x38xi1>
    %344 = arith.andi %329, %343 : vector<10x38xi1>
    %cst = arith.constant 0.000000e+00 : f32
    %345 = vector.broadcast %cst : f32 to vector<10x38xf32>
    %346 = vector.extract_strided_slice %318 {offsets = [0, 0, 0], sizes = [1, 10, 38], strides = [1, 1, 1]} : vector<4x12x40xf32> to vector<1x10x38xf32>
    %347 = vector.shape_cast %346 : vector<1x10x38xf32> to vector<10x38xf32>
    %348 = vector.broadcast %0 : f32 to vector<10x38xf32>
    %349 = arith.mulf %348, %347 : vector<10x38xf32>
    %350 = arith.addf %345, %349 : vector<10x38xf32>
    %351 = vector.extract_strided_slice %318 {offsets = [0, 0, 1], sizes = [1, 10, 38], strides = [1, 1, 1]} : vector<4x12x40xf32> to vector<1x10x38xf32>
    %352 = vector.shape_cast %351 : vector<1x10x38xf32> to vector<10x38xf32>
    %353 = vector.broadcast %16 : f32 to vector<10x38xf32>
    %354 = arith.mulf %353, %352 : vector<10x38xf32>
    %355 = arith.addf %350, %354 : vector<10x38xf32>
    %356 = vector.extract_strided_slice %318 {offsets = [0, 0, 2], sizes = [1, 10, 38], strides = [1, 1, 1]} : vector<4x12x40xf32> to vector<1x10x38xf32>
    %357 = vector.shape_cast %356 : vector<1x10x38xf32> to vector<10x38xf32>
    %358 = vector.broadcast %32 : f32 to vector<10x38xf32>
    %359 = arith.mulf %358, %357 : vector<10x38xf32>
    %360 = arith.addf %355, %359 : vector<10x38xf32>
    %361 = vector.extract_strided_slice %318 {offsets = [0, 1, 0], sizes = [1, 10, 38], strides = [1, 1, 1]} : vector<4x12x40xf32> to vector<1x10x38xf32>
    %362 = vector.shape_cast %361 : vector<1x10x38xf32> to vector<10x38xf32>
    %363 = vector.broadcast %48 : f32 to vector<10x38xf32>
    %364 = arith.mulf %363, %362 : vector<10x38xf32>
    %365 = arith.addf %360, %364 : vector<10x38xf32>
    %366 = vector.extract_strided_slice %318 {offsets = [0, 1, 1], sizes = [1, 10, 38], strides = [1, 1, 1]} : vector<4x12x40xf32> to vector<1x10x38xf32>
    %367 = vector.shape_cast %366 : vector<1x10x38xf32> to vector<10x38xf32>
    %368 = vector.broadcast %64 : f32 to vector<10x38xf32>
    %369 = arith.mulf %368, %367 : vector<10x38xf32>
    %370 = arith.addf %365, %369 : vector<10x38xf32>
    %371 = vector.extract_strided_slice %318 {offsets = [0, 1, 2], sizes = [1, 10, 38], strides = [1, 1, 1]} : vector<4x12x40xf32> to vector<1x10x38xf32>
    %372 = vector.shape_cast %371 : vector<1x10x38xf32> to vector<10x38xf32>
    %373 = vector.broadcast %80 : f32 to vector<10x38xf32>
    %374 = arith.mulf %373, %372 : vector<10x38xf32>
    %375 = arith.addf %370, %374 : vector<10x38xf32>
    %376 = vector.extract_strided_slice %318 {offsets = [0, 2, 0], sizes = [1, 10, 38], strides = [1, 1, 1]} : vector<4x12x40xf32> to vector<1x10x38xf32>
    %377 = vector.shape_cast %376 : vector<1x10x38xf32> to vector<10x38xf32>
    %378 = vector.broadcast %96 : f32 to vector<10x38xf32>
    %379 = arith.mulf %378, %377 : vector<10x38xf32>
    %380 = arith.addf %375, %379 : vector<10x38xf32>
    %381 = vector.extract_strided_slice %318 {offsets = [0, 2, 1], sizes = [1, 10, 38], strides = [1, 1, 1]} : vector<4x12x40xf32> to vector<1x10x38xf32>
    %382 = vector.shape_cast %381 : vector<1x10x38xf32> to vector<10x38xf32>
    %383 = vector.broadcast %112 : f32 to vector<10x38xf32>
    %384 = arith.mulf %383, %382 : vector<10x38xf32>
    %385 = arith.addf %380, %384 : vector<10x38xf32>
    %386 = vector.extract_strided_slice %318 {offsets = [0, 2, 2], sizes = [1, 10, 38], strides = [1, 1, 1]} : vector<4x12x40xf32> to vector<1x10x38xf32>
    %387 = vector.shape_cast %386 : vector<1x10x38xf32> to vector<10x38xf32>
    %388 = vector.broadcast %128 : f32 to vector<10x38xf32>
    %389 = arith.mulf %388, %387 : vector<10x38xf32>
    %390 = arith.addf %385, %389 : vector<10x38xf32>
    %391 = vector.extract_strided_slice %318 {offsets = [1, 0, 0], sizes = [1, 10, 38], strides = [1, 1, 1]} : vector<4x12x40xf32> to vector<1x10x38xf32>
    %392 = vector.shape_cast %391 : vector<1x10x38xf32> to vector<10x38xf32>
    %393 = vector.broadcast %4 : f32 to vector<10x38xf32>
    %394 = arith.mulf %393, %392 : vector<10x38xf32>
    %395 = arith.addf %390, %394 : vector<10x38xf32>
    %396 = vector.extract_strided_slice %318 {offsets = [1, 0, 1], sizes = [1, 10, 38], strides = [1, 1, 1]} : vector<4x12x40xf32> to vector<1x10x38xf32>
    %397 = vector.shape_cast %396 : vector<1x10x38xf32> to vector<10x38xf32>
    %398 = vector.broadcast %20 : f32 to vector<10x38xf32>
    %399 = arith.mulf %398, %397 : vector<10x38xf32>
    %400 = arith.addf %395, %399 : vector<10x38xf32>
    %401 = vector.extract_strided_slice %318 {offsets = [1, 0, 2], sizes = [1, 10, 38], strides = [1, 1, 1]} : vector<4x12x40xf32> to vector<1x10x38xf32>
    %402 = vector.shape_cast %401 : vector<1x10x38xf32> to vector<10x38xf32>
    %403 = vector.broadcast %36 : f32 to vector<10x38xf32>
    %404 = arith.mulf %403, %402 : vector<10x38xf32>
    %405 = arith.addf %400, %404 : vector<10x38xf32>
    %406 = vector.extract_strided_slice %318 {offsets = [1, 1, 0], sizes = [1, 10, 38], strides = [1, 1, 1]} : vector<4x12x40xf32> to vector<1x10x38xf32>
    %407 = vector.shape_cast %406 : vector<1x10x38xf32> to vector<10x38xf32>
    %408 = vector.broadcast %52 : f32 to vector<10x38xf32>
    %409 = arith.mulf %408, %407 : vector<10x38xf32>
    %410 = arith.addf %405, %409 : vector<10x38xf32>
    %411 = vector.extract_strided_slice %318 {offsets = [1, 1, 1], sizes = [1, 10, 38], strides = [1, 1, 1]} : vector<4x12x40xf32> to vector<1x10x38xf32>
    %412 = vector.shape_cast %411 : vector<1x10x38xf32> to vector<10x38xf32>
    %413 = vector.broadcast %68 : f32 to vector<10x38xf32>
    %414 = arith.mulf %413, %412 : vector<10x38xf32>
    %415 = arith.addf %410, %414 : vector<10x38xf32>
    %416 = vector.extract_strided_slice %318 {offsets = [1, 1, 2], sizes = [1, 10, 38], strides = [1, 1, 1]} : vector<4x12x40xf32> to vector<1x10x38xf32>
    %417 = vector.shape_cast %416 : vector<1x10x38xf32> to vector<10x38xf32>
    %418 = vector.broadcast %84 : f32 to vector<10x38xf32>
    %419 = arith.mulf %418, %417 : vector<10x38xf32>
    %420 = arith.addf %415, %419 : vector<10x38xf32>
    %421 = vector.extract_strided_slice %318 {offsets = [1, 2, 0], sizes = [1, 10, 38], strides = [1, 1, 1]} : vector<4x12x40xf32> to vector<1x10x38xf32>
    %422 = vector.shape_cast %421 : vector<1x10x38xf32> to vector<10x38xf32>
    %423 = vector.broadcast %100 : f32 to vector<10x38xf32>
    %424 = arith.mulf %423, %422 : vector<10x38xf32>
    %425 = arith.addf %420, %424 : vector<10x38xf32>
    %426 = vector.extract_strided_slice %318 {offsets = [1, 2, 1], sizes = [1, 10, 38], strides = [1, 1, 1]} : vector<4x12x40xf32> to vector<1x10x38xf32>
    %427 = vector.shape_cast %426 : vector<1x10x38xf32> to vector<10x38xf32>
    %428 = vector.broadcast %116 : f32 to vector<10x38xf32>
    %429 = arith.mulf %428, %427 : vector<10x38xf32>
    %430 = arith.addf %425, %429 : vector<10x38xf32>
    %431 = vector.extract_strided_slice %318 {offsets = [1, 2, 2], sizes = [1, 10, 38], strides = [1, 1, 1]} : vector<4x12x40xf32> to vector<1x10x38xf32>
    %432 = vector.shape_cast %431 : vector<1x10x38xf32> to vector<10x38xf32>
    %433 = vector.broadcast %132 : f32 to vector<10x38xf32>
    %434 = arith.mulf %433, %432 : vector<10x38xf32>
    %435 = arith.addf %430, %434 : vector<10x38xf32>
    %436 = vector.extract_strided_slice %318 {offsets = [2, 0, 0], sizes = [1, 10, 38], strides = [1, 1, 1]} : vector<4x12x40xf32> to vector<1x10x38xf32>
    %437 = vector.shape_cast %436 : vector<1x10x38xf32> to vector<10x38xf32>
    %438 = vector.broadcast %8 : f32 to vector<10x38xf32>
    %439 = arith.mulf %438, %437 : vector<10x38xf32>
    %440 = arith.addf %435, %439 : vector<10x38xf32>
    %441 = vector.extract_strided_slice %318 {offsets = [2, 0, 1], sizes = [1, 10, 38], strides = [1, 1, 1]} : vector<4x12x40xf32> to vector<1x10x38xf32>
    %442 = vector.shape_cast %441 : vector<1x10x38xf32> to vector<10x38xf32>
    %443 = vector.broadcast %24 : f32 to vector<10x38xf32>
    %444 = arith.mulf %443, %442 : vector<10x38xf32>
    %445 = arith.addf %440, %444 : vector<10x38xf32>
    %446 = vector.extract_strided_slice %318 {offsets = [2, 0, 2], sizes = [1, 10, 38], strides = [1, 1, 1]} : vector<4x12x40xf32> to vector<1x10x38xf32>
    %447 = vector.shape_cast %446 : vector<1x10x38xf32> to vector<10x38xf32>
    %448 = vector.broadcast %40 : f32 to vector<10x38xf32>
    %449 = arith.mulf %448, %447 : vector<10x38xf32>
    %450 = arith.addf %445, %449 : vector<10x38xf32>
    %451 = vector.extract_strided_slice %318 {offsets = [2, 1, 0], sizes = [1, 10, 38], strides = [1, 1, 1]} : vector<4x12x40xf32> to vector<1x10x38xf32>
    %452 = vector.shape_cast %451 : vector<1x10x38xf32> to vector<10x38xf32>
    %453 = vector.broadcast %56 : f32 to vector<10x38xf32>
    %454 = arith.mulf %453, %452 : vector<10x38xf32>
    %455 = arith.addf %450, %454 : vector<10x38xf32>
    %456 = vector.extract_strided_slice %318 {offsets = [2, 1, 1], sizes = [1, 10, 38], strides = [1, 1, 1]} : vector<4x12x40xf32> to vector<1x10x38xf32>
    %457 = vector.shape_cast %456 : vector<1x10x38xf32> to vector<10x38xf32>
    %458 = vector.broadcast %72 : f32 to vector<10x38xf32>
    %459 = arith.mulf %458, %457 : vector<10x38xf32>
    %460 = arith.addf %455, %459 : vector<10x38xf32>
    %461 = vector.extract_strided_slice %318 {offsets = [2, 1, 2], sizes = [1, 10, 38], strides = [1, 1, 1]} : vector<4x12x40xf32> to vector<1x10x38xf32>
    %462 = vector.shape_cast %461 : vector<1x10x38xf32> to vector<10x38xf32>
    %463 = vector.broadcast %88 : f32 to vector<10x38xf32>
    %464 = arith.mulf %463, %462 : vector<10x38xf32>
    %465 = arith.addf %460, %464 : vector<10x38xf32>
    %466 = vector.extract_strided_slice %318 {offsets = [2, 2, 0], sizes = [1, 10, 38], strides = [1, 1, 1]} : vector<4x12x40xf32> to vector<1x10x38xf32>
    %467 = vector.shape_cast %466 : vector<1x10x38xf32> to vector<10x38xf32>
    %468 = vector.broadcast %104 : f32 to vector<10x38xf32>
    %469 = arith.mulf %468, %467 : vector<10x38xf32>
    %470 = arith.addf %465, %469 : vector<10x38xf32>
    %471 = vector.extract_strided_slice %318 {offsets = [2, 2, 1], sizes = [1, 10, 38], strides = [1, 1, 1]} : vector<4x12x40xf32> to vector<1x10x38xf32>
    %472 = vector.shape_cast %471 : vector<1x10x38xf32> to vector<10x38xf32>
    %473 = vector.broadcast %120 : f32 to vector<10x38xf32>
    %474 = arith.mulf %473, %472 : vector<10x38xf32>
    %475 = arith.addf %470, %474 : vector<10x38xf32>
    %476 = vector.extract_strided_slice %318 {offsets = [2, 2, 2], sizes = [1, 10, 38], strides = [1, 1, 1]} : vector<4x12x40xf32> to vector<1x10x38xf32>
    %477 = vector.shape_cast %476 : vector<1x10x38xf32> to vector<10x38xf32>
    %478 = vector.broadcast %136 : f32 to vector<10x38xf32>
    %479 = arith.mulf %478, %477 : vector<10x38xf32>
    %480 = arith.addf %475, %479 : vector<10x38xf32>
    %481 = vector.extract_strided_slice %318 {offsets = [3, 0, 0], sizes = [1, 10, 38], strides = [1, 1, 1]} : vector<4x12x40xf32> to vector<1x10x38xf32>
    %482 = vector.shape_cast %481 : vector<1x10x38xf32> to vector<10x38xf32>
    %483 = vector.broadcast %12 : f32 to vector<10x38xf32>
    %484 = arith.mulf %483, %482 : vector<10x38xf32>
    %485 = arith.addf %480, %484 : vector<10x38xf32>
    %486 = vector.extract_strided_slice %318 {offsets = [3, 0, 1], sizes = [1, 10, 38], strides = [1, 1, 1]} : vector<4x12x40xf32> to vector<1x10x38xf32>
    %487 = vector.shape_cast %486 : vector<1x10x38xf32> to vector<10x38xf32>
    %488 = vector.broadcast %28 : f32 to vector<10x38xf32>
    %489 = arith.mulf %488, %487 : vector<10x38xf32>
    %490 = arith.addf %485, %489 : vector<10x38xf32>
    %491 = vector.extract_strided_slice %318 {offsets = [3, 0, 2], sizes = [1, 10, 38], strides = [1, 1, 1]} : vector<4x12x40xf32> to vector<1x10x38xf32>
    %492 = vector.shape_cast %491 : vector<1x10x38xf32> to vector<10x38xf32>
    %493 = vector.broadcast %44 : f32 to vector<10x38xf32>
    %494 = arith.mulf %493, %492 : vector<10x38xf32>
    %495 = arith.addf %490, %494 : vector<10x38xf32>
    %496 = vector.extract_strided_slice %318 {offsets = [3, 1, 0], sizes = [1, 10, 38], strides = [1, 1, 1]} : vector<4x12x40xf32> to vector<1x10x38xf32>
    %497 = vector.shape_cast %496 : vector<1x10x38xf32> to vector<10x38xf32>
    %498 = vector.broadcast %60 : f32 to vector<10x38xf32>
    %499 = arith.mulf %498, %497 : vector<10x38xf32>
    %500 = arith.addf %495, %499 : vector<10x38xf32>
    %501 = vector.extract_strided_slice %318 {offsets = [3, 1, 1], sizes = [1, 10, 38], strides = [1, 1, 1]} : vector<4x12x40xf32> to vector<1x10x38xf32>
    %502 = vector.shape_cast %501 : vector<1x10x38xf32> to vector<10x38xf32>
    %503 = vector.broadcast %76 : f32 to vector<10x38xf32>
    %504 = arith.mulf %503, %502 : vector<10x38xf32>
    %505 = arith.addf %500, %504 : vector<10x38xf32>
    %506 = vector.extract_strided_slice %318 {offsets = [3, 1, 2], sizes = [1, 10, 38], strides = [1, 1, 1]} : vector<4x12x40xf32> to vector<1x10x38xf32>
    %507 = vector.shape_cast %506 : vector<1x10x38xf32> to vector<10x38xf32>
    %508 = vector.broadcast %92 : f32 to vector<10x38xf32>
    %509 = arith.mulf %508, %507 : vector<10x38xf32>
    %510 = arith.addf %505, %509 : vector<10x38xf32>
    %511 = vector.extract_strided_slice %318 {offsets = [3, 2, 0], sizes = [1, 10, 38], strides = [1, 1, 1]} : vector<4x12x40xf32> to vector<1x10x38xf32>
    %512 = vector.shape_cast %511 : vector<1x10x38xf32> to vector<10x38xf32>
    %513 = vector.broadcast %108 : f32 to vector<10x38xf32>
    %514 = arith.mulf %513, %512 : vector<10x38xf32>
    %515 = arith.addf %510, %514 : vector<10x38xf32>
    %516 = vector.extract_strided_slice %318 {offsets = [3, 2, 1], sizes = [1, 10, 38], strides = [1, 1, 1]} : vector<4x12x40xf32> to vector<1x10x38xf32>
    %517 = vector.shape_cast %516 : vector<1x10x38xf32> to vector<10x38xf32>
    %518 = vector.broadcast %124 : f32 to vector<10x38xf32>
    %519 = arith.mulf %518, %517 : vector<10x38xf32>
    %520 = arith.addf %515, %519 : vector<10x38xf32>
    %521 = vector.extract_strided_slice %318 {offsets = [3, 2, 2], sizes = [1, 10, 38], strides = [1, 1, 1]} : vector<4x12x40xf32> to vector<1x10x38xf32>
    %522 = vector.shape_cast %521 : vector<1x10x38xf32> to vector<10x38xf32>
    %523 = vector.broadcast %140 : f32 to vector<10x38xf32>
    %524 = arith.mulf %523, %522 : vector<10x38xf32>
    %525 = arith.addf %520, %524 : vector<10x38xf32>
    %526 = vector.broadcast %144 : f32 to vector<10x38xf32>
    %527 = arith.addf %525, %526 : vector<10x38xf32>
    %cst_179 = arith.constant 0.000000e+00 : f32
    %528 = vector.broadcast %cst_179 : f32 to vector<10x38xf32>
    %529 = arith.maximumf %527, %528 : vector<10x38xf32>
    %cst_180 = arith.constant 0.000000e+00 : f32
    %530 = vector.broadcast %cst_180 : f32 to vector<10x38xf32>
    %531 = arith.select %344, %529, %530 : vector<10x38xi1>, vector<10x38xf32>
    %cst_181 = arith.constant 0.000000e+00 : f32
    %532 = vector.broadcast %cst_181 : f32 to vector<10x38xf32>
    %533 = vector.extract_strided_slice %318 {offsets = [0, 0, 0], sizes = [1, 10, 38], strides = [1, 1, 1]} : vector<4x12x40xf32> to vector<1x10x38xf32>
    %534 = vector.shape_cast %533 : vector<1x10x38xf32> to vector<10x38xf32>
    %535 = vector.broadcast %1 : f32 to vector<10x38xf32>
    %536 = arith.mulf %535, %534 : vector<10x38xf32>
    %537 = arith.addf %532, %536 : vector<10x38xf32>
    %538 = vector.extract_strided_slice %318 {offsets = [0, 0, 1], sizes = [1, 10, 38], strides = [1, 1, 1]} : vector<4x12x40xf32> to vector<1x10x38xf32>
    %539 = vector.shape_cast %538 : vector<1x10x38xf32> to vector<10x38xf32>
    %540 = vector.broadcast %17 : f32 to vector<10x38xf32>
    %541 = arith.mulf %540, %539 : vector<10x38xf32>
    %542 = arith.addf %537, %541 : vector<10x38xf32>
    %543 = vector.extract_strided_slice %318 {offsets = [0, 0, 2], sizes = [1, 10, 38], strides = [1, 1, 1]} : vector<4x12x40xf32> to vector<1x10x38xf32>
    %544 = vector.shape_cast %543 : vector<1x10x38xf32> to vector<10x38xf32>
    %545 = vector.broadcast %33 : f32 to vector<10x38xf32>
    %546 = arith.mulf %545, %544 : vector<10x38xf32>
    %547 = arith.addf %542, %546 : vector<10x38xf32>
    %548 = vector.extract_strided_slice %318 {offsets = [0, 1, 0], sizes = [1, 10, 38], strides = [1, 1, 1]} : vector<4x12x40xf32> to vector<1x10x38xf32>
    %549 = vector.shape_cast %548 : vector<1x10x38xf32> to vector<10x38xf32>
    %550 = vector.broadcast %49 : f32 to vector<10x38xf32>
    %551 = arith.mulf %550, %549 : vector<10x38xf32>
    %552 = arith.addf %547, %551 : vector<10x38xf32>
    %553 = vector.extract_strided_slice %318 {offsets = [0, 1, 1], sizes = [1, 10, 38], strides = [1, 1, 1]} : vector<4x12x40xf32> to vector<1x10x38xf32>
    %554 = vector.shape_cast %553 : vector<1x10x38xf32> to vector<10x38xf32>
    %555 = vector.broadcast %65 : f32 to vector<10x38xf32>
    %556 = arith.mulf %555, %554 : vector<10x38xf32>
    %557 = arith.addf %552, %556 : vector<10x38xf32>
    %558 = vector.extract_strided_slice %318 {offsets = [0, 1, 2], sizes = [1, 10, 38], strides = [1, 1, 1]} : vector<4x12x40xf32> to vector<1x10x38xf32>
    %559 = vector.shape_cast %558 : vector<1x10x38xf32> to vector<10x38xf32>
    %560 = vector.broadcast %81 : f32 to vector<10x38xf32>
    %561 = arith.mulf %560, %559 : vector<10x38xf32>
    %562 = arith.addf %557, %561 : vector<10x38xf32>
    %563 = vector.extract_strided_slice %318 {offsets = [0, 2, 0], sizes = [1, 10, 38], strides = [1, 1, 1]} : vector<4x12x40xf32> to vector<1x10x38xf32>
    %564 = vector.shape_cast %563 : vector<1x10x38xf32> to vector<10x38xf32>
    %565 = vector.broadcast %97 : f32 to vector<10x38xf32>
    %566 = arith.mulf %565, %564 : vector<10x38xf32>
    %567 = arith.addf %562, %566 : vector<10x38xf32>
    %568 = vector.extract_strided_slice %318 {offsets = [0, 2, 1], sizes = [1, 10, 38], strides = [1, 1, 1]} : vector<4x12x40xf32> to vector<1x10x38xf32>
    %569 = vector.shape_cast %568 : vector<1x10x38xf32> to vector<10x38xf32>
    %570 = vector.broadcast %113 : f32 to vector<10x38xf32>
    %571 = arith.mulf %570, %569 : vector<10x38xf32>
    %572 = arith.addf %567, %571 : vector<10x38xf32>
    %573 = vector.extract_strided_slice %318 {offsets = [0, 2, 2], sizes = [1, 10, 38], strides = [1, 1, 1]} : vector<4x12x40xf32> to vector<1x10x38xf32>
    %574 = vector.shape_cast %573 : vector<1x10x38xf32> to vector<10x38xf32>
    %575 = vector.broadcast %129 : f32 to vector<10x38xf32>
    %576 = arith.mulf %575, %574 : vector<10x38xf32>
    %577 = arith.addf %572, %576 : vector<10x38xf32>
    %578 = vector.extract_strided_slice %318 {offsets = [1, 0, 0], sizes = [1, 10, 38], strides = [1, 1, 1]} : vector<4x12x40xf32> to vector<1x10x38xf32>
    %579 = vector.shape_cast %578 : vector<1x10x38xf32> to vector<10x38xf32>
    %580 = vector.broadcast %5 : f32 to vector<10x38xf32>
    %581 = arith.mulf %580, %579 : vector<10x38xf32>
    %582 = arith.addf %577, %581 : vector<10x38xf32>
    %583 = vector.extract_strided_slice %318 {offsets = [1, 0, 1], sizes = [1, 10, 38], strides = [1, 1, 1]} : vector<4x12x40xf32> to vector<1x10x38xf32>
    %584 = vector.shape_cast %583 : vector<1x10x38xf32> to vector<10x38xf32>
    %585 = vector.broadcast %21 : f32 to vector<10x38xf32>
    %586 = arith.mulf %585, %584 : vector<10x38xf32>
    %587 = arith.addf %582, %586 : vector<10x38xf32>
    %588 = vector.extract_strided_slice %318 {offsets = [1, 0, 2], sizes = [1, 10, 38], strides = [1, 1, 1]} : vector<4x12x40xf32> to vector<1x10x38xf32>
    %589 = vector.shape_cast %588 : vector<1x10x38xf32> to vector<10x38xf32>
    %590 = vector.broadcast %37 : f32 to vector<10x38xf32>
    %591 = arith.mulf %590, %589 : vector<10x38xf32>
    %592 = arith.addf %587, %591 : vector<10x38xf32>
    %593 = vector.extract_strided_slice %318 {offsets = [1, 1, 0], sizes = [1, 10, 38], strides = [1, 1, 1]} : vector<4x12x40xf32> to vector<1x10x38xf32>
    %594 = vector.shape_cast %593 : vector<1x10x38xf32> to vector<10x38xf32>
    %595 = vector.broadcast %53 : f32 to vector<10x38xf32>
    %596 = arith.mulf %595, %594 : vector<10x38xf32>
    %597 = arith.addf %592, %596 : vector<10x38xf32>
    %598 = vector.extract_strided_slice %318 {offsets = [1, 1, 1], sizes = [1, 10, 38], strides = [1, 1, 1]} : vector<4x12x40xf32> to vector<1x10x38xf32>
    %599 = vector.shape_cast %598 : vector<1x10x38xf32> to vector<10x38xf32>
    %600 = vector.broadcast %69 : f32 to vector<10x38xf32>
    %601 = arith.mulf %600, %599 : vector<10x38xf32>
    %602 = arith.addf %597, %601 : vector<10x38xf32>
    %603 = vector.extract_strided_slice %318 {offsets = [1, 1, 2], sizes = [1, 10, 38], strides = [1, 1, 1]} : vector<4x12x40xf32> to vector<1x10x38xf32>
    %604 = vector.shape_cast %603 : vector<1x10x38xf32> to vector<10x38xf32>
    %605 = vector.broadcast %85 : f32 to vector<10x38xf32>
    %606 = arith.mulf %605, %604 : vector<10x38xf32>
    %607 = arith.addf %602, %606 : vector<10x38xf32>
    %608 = vector.extract_strided_slice %318 {offsets = [1, 2, 0], sizes = [1, 10, 38], strides = [1, 1, 1]} : vector<4x12x40xf32> to vector<1x10x38xf32>
    %609 = vector.shape_cast %608 : vector<1x10x38xf32> to vector<10x38xf32>
    %610 = vector.broadcast %101 : f32 to vector<10x38xf32>
    %611 = arith.mulf %610, %609 : vector<10x38xf32>
    %612 = arith.addf %607, %611 : vector<10x38xf32>
    %613 = vector.extract_strided_slice %318 {offsets = [1, 2, 1], sizes = [1, 10, 38], strides = [1, 1, 1]} : vector<4x12x40xf32> to vector<1x10x38xf32>
    %614 = vector.shape_cast %613 : vector<1x10x38xf32> to vector<10x38xf32>
    %615 = vector.broadcast %117 : f32 to vector<10x38xf32>
    %616 = arith.mulf %615, %614 : vector<10x38xf32>
    %617 = arith.addf %612, %616 : vector<10x38xf32>
    %618 = vector.extract_strided_slice %318 {offsets = [1, 2, 2], sizes = [1, 10, 38], strides = [1, 1, 1]} : vector<4x12x40xf32> to vector<1x10x38xf32>
    %619 = vector.shape_cast %618 : vector<1x10x38xf32> to vector<10x38xf32>
    %620 = vector.broadcast %133 : f32 to vector<10x38xf32>
    %621 = arith.mulf %620, %619 : vector<10x38xf32>
    %622 = arith.addf %617, %621 : vector<10x38xf32>
    %623 = vector.extract_strided_slice %318 {offsets = [2, 0, 0], sizes = [1, 10, 38], strides = [1, 1, 1]} : vector<4x12x40xf32> to vector<1x10x38xf32>
    %624 = vector.shape_cast %623 : vector<1x10x38xf32> to vector<10x38xf32>
    %625 = vector.broadcast %9 : f32 to vector<10x38xf32>
    %626 = arith.mulf %625, %624 : vector<10x38xf32>
    %627 = arith.addf %622, %626 : vector<10x38xf32>
    %628 = vector.extract_strided_slice %318 {offsets = [2, 0, 1], sizes = [1, 10, 38], strides = [1, 1, 1]} : vector<4x12x40xf32> to vector<1x10x38xf32>
    %629 = vector.shape_cast %628 : vector<1x10x38xf32> to vector<10x38xf32>
    %630 = vector.broadcast %25 : f32 to vector<10x38xf32>
    %631 = arith.mulf %630, %629 : vector<10x38xf32>
    %632 = arith.addf %627, %631 : vector<10x38xf32>
    %633 = vector.extract_strided_slice %318 {offsets = [2, 0, 2], sizes = [1, 10, 38], strides = [1, 1, 1]} : vector<4x12x40xf32> to vector<1x10x38xf32>
    %634 = vector.shape_cast %633 : vector<1x10x38xf32> to vector<10x38xf32>
    %635 = vector.broadcast %41 : f32 to vector<10x38xf32>
    %636 = arith.mulf %635, %634 : vector<10x38xf32>
    %637 = arith.addf %632, %636 : vector<10x38xf32>
    %638 = vector.extract_strided_slice %318 {offsets = [2, 1, 0], sizes = [1, 10, 38], strides = [1, 1, 1]} : vector<4x12x40xf32> to vector<1x10x38xf32>
    %639 = vector.shape_cast %638 : vector<1x10x38xf32> to vector<10x38xf32>
    %640 = vector.broadcast %57 : f32 to vector<10x38xf32>
    %641 = arith.mulf %640, %639 : vector<10x38xf32>
    %642 = arith.addf %637, %641 : vector<10x38xf32>
    %643 = vector.extract_strided_slice %318 {offsets = [2, 1, 1], sizes = [1, 10, 38], strides = [1, 1, 1]} : vector<4x12x40xf32> to vector<1x10x38xf32>
    %644 = vector.shape_cast %643 : vector<1x10x38xf32> to vector<10x38xf32>
    %645 = vector.broadcast %73 : f32 to vector<10x38xf32>
    %646 = arith.mulf %645, %644 : vector<10x38xf32>
    %647 = arith.addf %642, %646 : vector<10x38xf32>
    %648 = vector.extract_strided_slice %318 {offsets = [2, 1, 2], sizes = [1, 10, 38], strides = [1, 1, 1]} : vector<4x12x40xf32> to vector<1x10x38xf32>
    %649 = vector.shape_cast %648 : vector<1x10x38xf32> to vector<10x38xf32>
    %650 = vector.broadcast %89 : f32 to vector<10x38xf32>
    %651 = arith.mulf %650, %649 : vector<10x38xf32>
    %652 = arith.addf %647, %651 : vector<10x38xf32>
    %653 = vector.extract_strided_slice %318 {offsets = [2, 2, 0], sizes = [1, 10, 38], strides = [1, 1, 1]} : vector<4x12x40xf32> to vector<1x10x38xf32>
    %654 = vector.shape_cast %653 : vector<1x10x38xf32> to vector<10x38xf32>
    %655 = vector.broadcast %105 : f32 to vector<10x38xf32>
    %656 = arith.mulf %655, %654 : vector<10x38xf32>
    %657 = arith.addf %652, %656 : vector<10x38xf32>
    %658 = vector.extract_strided_slice %318 {offsets = [2, 2, 1], sizes = [1, 10, 38], strides = [1, 1, 1]} : vector<4x12x40xf32> to vector<1x10x38xf32>
    %659 = vector.shape_cast %658 : vector<1x10x38xf32> to vector<10x38xf32>
    %660 = vector.broadcast %121 : f32 to vector<10x38xf32>
    %661 = arith.mulf %660, %659 : vector<10x38xf32>
    %662 = arith.addf %657, %661 : vector<10x38xf32>
    %663 = vector.extract_strided_slice %318 {offsets = [2, 2, 2], sizes = [1, 10, 38], strides = [1, 1, 1]} : vector<4x12x40xf32> to vector<1x10x38xf32>
    %664 = vector.shape_cast %663 : vector<1x10x38xf32> to vector<10x38xf32>
    %665 = vector.broadcast %137 : f32 to vector<10x38xf32>
    %666 = arith.mulf %665, %664 : vector<10x38xf32>
    %667 = arith.addf %662, %666 : vector<10x38xf32>
    %668 = vector.extract_strided_slice %318 {offsets = [3, 0, 0], sizes = [1, 10, 38], strides = [1, 1, 1]} : vector<4x12x40xf32> to vector<1x10x38xf32>
    %669 = vector.shape_cast %668 : vector<1x10x38xf32> to vector<10x38xf32>
    %670 = vector.broadcast %13 : f32 to vector<10x38xf32>
    %671 = arith.mulf %670, %669 : vector<10x38xf32>
    %672 = arith.addf %667, %671 : vector<10x38xf32>
    %673 = vector.extract_strided_slice %318 {offsets = [3, 0, 1], sizes = [1, 10, 38], strides = [1, 1, 1]} : vector<4x12x40xf32> to vector<1x10x38xf32>
    %674 = vector.shape_cast %673 : vector<1x10x38xf32> to vector<10x38xf32>
    %675 = vector.broadcast %29 : f32 to vector<10x38xf32>
    %676 = arith.mulf %675, %674 : vector<10x38xf32>
    %677 = arith.addf %672, %676 : vector<10x38xf32>
    %678 = vector.extract_strided_slice %318 {offsets = [3, 0, 2], sizes = [1, 10, 38], strides = [1, 1, 1]} : vector<4x12x40xf32> to vector<1x10x38xf32>
    %679 = vector.shape_cast %678 : vector<1x10x38xf32> to vector<10x38xf32>
    %680 = vector.broadcast %45 : f32 to vector<10x38xf32>
    %681 = arith.mulf %680, %679 : vector<10x38xf32>
    %682 = arith.addf %677, %681 : vector<10x38xf32>
    %683 = vector.extract_strided_slice %318 {offsets = [3, 1, 0], sizes = [1, 10, 38], strides = [1, 1, 1]} : vector<4x12x40xf32> to vector<1x10x38xf32>
    %684 = vector.shape_cast %683 : vector<1x10x38xf32> to vector<10x38xf32>
    %685 = vector.broadcast %61 : f32 to vector<10x38xf32>
    %686 = arith.mulf %685, %684 : vector<10x38xf32>
    %687 = arith.addf %682, %686 : vector<10x38xf32>
    %688 = vector.extract_strided_slice %318 {offsets = [3, 1, 1], sizes = [1, 10, 38], strides = [1, 1, 1]} : vector<4x12x40xf32> to vector<1x10x38xf32>
    %689 = vector.shape_cast %688 : vector<1x10x38xf32> to vector<10x38xf32>
    %690 = vector.broadcast %77 : f32 to vector<10x38xf32>
    %691 = arith.mulf %690, %689 : vector<10x38xf32>
    %692 = arith.addf %687, %691 : vector<10x38xf32>
    %693 = vector.extract_strided_slice %318 {offsets = [3, 1, 2], sizes = [1, 10, 38], strides = [1, 1, 1]} : vector<4x12x40xf32> to vector<1x10x38xf32>
    %694 = vector.shape_cast %693 : vector<1x10x38xf32> to vector<10x38xf32>
    %695 = vector.broadcast %93 : f32 to vector<10x38xf32>
    %696 = arith.mulf %695, %694 : vector<10x38xf32>
    %697 = arith.addf %692, %696 : vector<10x38xf32>
    %698 = vector.extract_strided_slice %318 {offsets = [3, 2, 0], sizes = [1, 10, 38], strides = [1, 1, 1]} : vector<4x12x40xf32> to vector<1x10x38xf32>
    %699 = vector.shape_cast %698 : vector<1x10x38xf32> to vector<10x38xf32>
    %700 = vector.broadcast %109 : f32 to vector<10x38xf32>
    %701 = arith.mulf %700, %699 : vector<10x38xf32>
    %702 = arith.addf %697, %701 : vector<10x38xf32>
    %703 = vector.extract_strided_slice %318 {offsets = [3, 2, 1], sizes = [1, 10, 38], strides = [1, 1, 1]} : vector<4x12x40xf32> to vector<1x10x38xf32>
    %704 = vector.shape_cast %703 : vector<1x10x38xf32> to vector<10x38xf32>
    %705 = vector.broadcast %125 : f32 to vector<10x38xf32>
    %706 = arith.mulf %705, %704 : vector<10x38xf32>
    %707 = arith.addf %702, %706 : vector<10x38xf32>
    %708 = vector.extract_strided_slice %318 {offsets = [3, 2, 2], sizes = [1, 10, 38], strides = [1, 1, 1]} : vector<4x12x40xf32> to vector<1x10x38xf32>
    %709 = vector.shape_cast %708 : vector<1x10x38xf32> to vector<10x38xf32>
    %710 = vector.broadcast %141 : f32 to vector<10x38xf32>
    %711 = arith.mulf %710, %709 : vector<10x38xf32>
    %712 = arith.addf %707, %711 : vector<10x38xf32>
    %713 = vector.broadcast %145 : f32 to vector<10x38xf32>
    %714 = arith.addf %712, %713 : vector<10x38xf32>
    %cst_182 = arith.constant 0.000000e+00 : f32
    %715 = vector.broadcast %cst_182 : f32 to vector<10x38xf32>
    %716 = arith.maximumf %714, %715 : vector<10x38xf32>
    %cst_183 = arith.constant 0.000000e+00 : f32
    %717 = vector.broadcast %cst_183 : f32 to vector<10x38xf32>
    %718 = arith.select %344, %716, %717 : vector<10x38xi1>, vector<10x38xf32>
    %cst_184 = arith.constant 0.000000e+00 : f32
    %719 = vector.broadcast %cst_184 : f32 to vector<10x38xf32>
    %720 = vector.extract_strided_slice %318 {offsets = [0, 0, 0], sizes = [1, 10, 38], strides = [1, 1, 1]} : vector<4x12x40xf32> to vector<1x10x38xf32>
    %721 = vector.shape_cast %720 : vector<1x10x38xf32> to vector<10x38xf32>
    %722 = vector.broadcast %2 : f32 to vector<10x38xf32>
    %723 = arith.mulf %722, %721 : vector<10x38xf32>
    %724 = arith.addf %719, %723 : vector<10x38xf32>
    %725 = vector.extract_strided_slice %318 {offsets = [0, 0, 1], sizes = [1, 10, 38], strides = [1, 1, 1]} : vector<4x12x40xf32> to vector<1x10x38xf32>
    %726 = vector.shape_cast %725 : vector<1x10x38xf32> to vector<10x38xf32>
    %727 = vector.broadcast %18 : f32 to vector<10x38xf32>
    %728 = arith.mulf %727, %726 : vector<10x38xf32>
    %729 = arith.addf %724, %728 : vector<10x38xf32>
    %730 = vector.extract_strided_slice %318 {offsets = [0, 0, 2], sizes = [1, 10, 38], strides = [1, 1, 1]} : vector<4x12x40xf32> to vector<1x10x38xf32>
    %731 = vector.shape_cast %730 : vector<1x10x38xf32> to vector<10x38xf32>
    %732 = vector.broadcast %34 : f32 to vector<10x38xf32>
    %733 = arith.mulf %732, %731 : vector<10x38xf32>
    %734 = arith.addf %729, %733 : vector<10x38xf32>
    %735 = vector.extract_strided_slice %318 {offsets = [0, 1, 0], sizes = [1, 10, 38], strides = [1, 1, 1]} : vector<4x12x40xf32> to vector<1x10x38xf32>
    %736 = vector.shape_cast %735 : vector<1x10x38xf32> to vector<10x38xf32>
    %737 = vector.broadcast %50 : f32 to vector<10x38xf32>
    %738 = arith.mulf %737, %736 : vector<10x38xf32>
    %739 = arith.addf %734, %738 : vector<10x38xf32>
    %740 = vector.extract_strided_slice %318 {offsets = [0, 1, 1], sizes = [1, 10, 38], strides = [1, 1, 1]} : vector<4x12x40xf32> to vector<1x10x38xf32>
    %741 = vector.shape_cast %740 : vector<1x10x38xf32> to vector<10x38xf32>
    %742 = vector.broadcast %66 : f32 to vector<10x38xf32>
    %743 = arith.mulf %742, %741 : vector<10x38xf32>
    %744 = arith.addf %739, %743 : vector<10x38xf32>
    %745 = vector.extract_strided_slice %318 {offsets = [0, 1, 2], sizes = [1, 10, 38], strides = [1, 1, 1]} : vector<4x12x40xf32> to vector<1x10x38xf32>
    %746 = vector.shape_cast %745 : vector<1x10x38xf32> to vector<10x38xf32>
    %747 = vector.broadcast %82 : f32 to vector<10x38xf32>
    %748 = arith.mulf %747, %746 : vector<10x38xf32>
    %749 = arith.addf %744, %748 : vector<10x38xf32>
    %750 = vector.extract_strided_slice %318 {offsets = [0, 2, 0], sizes = [1, 10, 38], strides = [1, 1, 1]} : vector<4x12x40xf32> to vector<1x10x38xf32>
    %751 = vector.shape_cast %750 : vector<1x10x38xf32> to vector<10x38xf32>
    %752 = vector.broadcast %98 : f32 to vector<10x38xf32>
    %753 = arith.mulf %752, %751 : vector<10x38xf32>
    %754 = arith.addf %749, %753 : vector<10x38xf32>
    %755 = vector.extract_strided_slice %318 {offsets = [0, 2, 1], sizes = [1, 10, 38], strides = [1, 1, 1]} : vector<4x12x40xf32> to vector<1x10x38xf32>
    %756 = vector.shape_cast %755 : vector<1x10x38xf32> to vector<10x38xf32>
    %757 = vector.broadcast %114 : f32 to vector<10x38xf32>
    %758 = arith.mulf %757, %756 : vector<10x38xf32>
    %759 = arith.addf %754, %758 : vector<10x38xf32>
    %760 = vector.extract_strided_slice %318 {offsets = [0, 2, 2], sizes = [1, 10, 38], strides = [1, 1, 1]} : vector<4x12x40xf32> to vector<1x10x38xf32>
    %761 = vector.shape_cast %760 : vector<1x10x38xf32> to vector<10x38xf32>
    %762 = vector.broadcast %130 : f32 to vector<10x38xf32>
    %763 = arith.mulf %762, %761 : vector<10x38xf32>
    %764 = arith.addf %759, %763 : vector<10x38xf32>
    %765 = vector.extract_strided_slice %318 {offsets = [1, 0, 0], sizes = [1, 10, 38], strides = [1, 1, 1]} : vector<4x12x40xf32> to vector<1x10x38xf32>
    %766 = vector.shape_cast %765 : vector<1x10x38xf32> to vector<10x38xf32>
    %767 = vector.broadcast %6 : f32 to vector<10x38xf32>
    %768 = arith.mulf %767, %766 : vector<10x38xf32>
    %769 = arith.addf %764, %768 : vector<10x38xf32>
    %770 = vector.extract_strided_slice %318 {offsets = [1, 0, 1], sizes = [1, 10, 38], strides = [1, 1, 1]} : vector<4x12x40xf32> to vector<1x10x38xf32>
    %771 = vector.shape_cast %770 : vector<1x10x38xf32> to vector<10x38xf32>
    %772 = vector.broadcast %22 : f32 to vector<10x38xf32>
    %773 = arith.mulf %772, %771 : vector<10x38xf32>
    %774 = arith.addf %769, %773 : vector<10x38xf32>
    %775 = vector.extract_strided_slice %318 {offsets = [1, 0, 2], sizes = [1, 10, 38], strides = [1, 1, 1]} : vector<4x12x40xf32> to vector<1x10x38xf32>
    %776 = vector.shape_cast %775 : vector<1x10x38xf32> to vector<10x38xf32>
    %777 = vector.broadcast %38 : f32 to vector<10x38xf32>
    %778 = arith.mulf %777, %776 : vector<10x38xf32>
    %779 = arith.addf %774, %778 : vector<10x38xf32>
    %780 = vector.extract_strided_slice %318 {offsets = [1, 1, 0], sizes = [1, 10, 38], strides = [1, 1, 1]} : vector<4x12x40xf32> to vector<1x10x38xf32>
    %781 = vector.shape_cast %780 : vector<1x10x38xf32> to vector<10x38xf32>
    %782 = vector.broadcast %54 : f32 to vector<10x38xf32>
    %783 = arith.mulf %782, %781 : vector<10x38xf32>
    %784 = arith.addf %779, %783 : vector<10x38xf32>
    %785 = vector.extract_strided_slice %318 {offsets = [1, 1, 1], sizes = [1, 10, 38], strides = [1, 1, 1]} : vector<4x12x40xf32> to vector<1x10x38xf32>
    %786 = vector.shape_cast %785 : vector<1x10x38xf32> to vector<10x38xf32>
    %787 = vector.broadcast %70 : f32 to vector<10x38xf32>
    %788 = arith.mulf %787, %786 : vector<10x38xf32>
    %789 = arith.addf %784, %788 : vector<10x38xf32>
    %790 = vector.extract_strided_slice %318 {offsets = [1, 1, 2], sizes = [1, 10, 38], strides = [1, 1, 1]} : vector<4x12x40xf32> to vector<1x10x38xf32>
    %791 = vector.shape_cast %790 : vector<1x10x38xf32> to vector<10x38xf32>
    %792 = vector.broadcast %86 : f32 to vector<10x38xf32>
    %793 = arith.mulf %792, %791 : vector<10x38xf32>
    %794 = arith.addf %789, %793 : vector<10x38xf32>
    %795 = vector.extract_strided_slice %318 {offsets = [1, 2, 0], sizes = [1, 10, 38], strides = [1, 1, 1]} : vector<4x12x40xf32> to vector<1x10x38xf32>
    %796 = vector.shape_cast %795 : vector<1x10x38xf32> to vector<10x38xf32>
    %797 = vector.broadcast %102 : f32 to vector<10x38xf32>
    %798 = arith.mulf %797, %796 : vector<10x38xf32>
    %799 = arith.addf %794, %798 : vector<10x38xf32>
    %800 = vector.extract_strided_slice %318 {offsets = [1, 2, 1], sizes = [1, 10, 38], strides = [1, 1, 1]} : vector<4x12x40xf32> to vector<1x10x38xf32>
    %801 = vector.shape_cast %800 : vector<1x10x38xf32> to vector<10x38xf32>
    %802 = vector.broadcast %118 : f32 to vector<10x38xf32>
    %803 = arith.mulf %802, %801 : vector<10x38xf32>
    %804 = arith.addf %799, %803 : vector<10x38xf32>
    %805 = vector.extract_strided_slice %318 {offsets = [1, 2, 2], sizes = [1, 10, 38], strides = [1, 1, 1]} : vector<4x12x40xf32> to vector<1x10x38xf32>
    %806 = vector.shape_cast %805 : vector<1x10x38xf32> to vector<10x38xf32>
    %807 = vector.broadcast %134 : f32 to vector<10x38xf32>
    %808 = arith.mulf %807, %806 : vector<10x38xf32>
    %809 = arith.addf %804, %808 : vector<10x38xf32>
    %810 = vector.extract_strided_slice %318 {offsets = [2, 0, 0], sizes = [1, 10, 38], strides = [1, 1, 1]} : vector<4x12x40xf32> to vector<1x10x38xf32>
    %811 = vector.shape_cast %810 : vector<1x10x38xf32> to vector<10x38xf32>
    %812 = vector.broadcast %10 : f32 to vector<10x38xf32>
    %813 = arith.mulf %812, %811 : vector<10x38xf32>
    %814 = arith.addf %809, %813 : vector<10x38xf32>
    %815 = vector.extract_strided_slice %318 {offsets = [2, 0, 1], sizes = [1, 10, 38], strides = [1, 1, 1]} : vector<4x12x40xf32> to vector<1x10x38xf32>
    %816 = vector.shape_cast %815 : vector<1x10x38xf32> to vector<10x38xf32>
    %817 = vector.broadcast %26 : f32 to vector<10x38xf32>
    %818 = arith.mulf %817, %816 : vector<10x38xf32>
    %819 = arith.addf %814, %818 : vector<10x38xf32>
    %820 = vector.extract_strided_slice %318 {offsets = [2, 0, 2], sizes = [1, 10, 38], strides = [1, 1, 1]} : vector<4x12x40xf32> to vector<1x10x38xf32>
    %821 = vector.shape_cast %820 : vector<1x10x38xf32> to vector<10x38xf32>
    %822 = vector.broadcast %42 : f32 to vector<10x38xf32>
    %823 = arith.mulf %822, %821 : vector<10x38xf32>
    %824 = arith.addf %819, %823 : vector<10x38xf32>
    %825 = vector.extract_strided_slice %318 {offsets = [2, 1, 0], sizes = [1, 10, 38], strides = [1, 1, 1]} : vector<4x12x40xf32> to vector<1x10x38xf32>
    %826 = vector.shape_cast %825 : vector<1x10x38xf32> to vector<10x38xf32>
    %827 = vector.broadcast %58 : f32 to vector<10x38xf32>
    %828 = arith.mulf %827, %826 : vector<10x38xf32>
    %829 = arith.addf %824, %828 : vector<10x38xf32>
    %830 = vector.extract_strided_slice %318 {offsets = [2, 1, 1], sizes = [1, 10, 38], strides = [1, 1, 1]} : vector<4x12x40xf32> to vector<1x10x38xf32>
    %831 = vector.shape_cast %830 : vector<1x10x38xf32> to vector<10x38xf32>
    %832 = vector.broadcast %74 : f32 to vector<10x38xf32>
    %833 = arith.mulf %832, %831 : vector<10x38xf32>
    %834 = arith.addf %829, %833 : vector<10x38xf32>
    %835 = vector.extract_strided_slice %318 {offsets = [2, 1, 2], sizes = [1, 10, 38], strides = [1, 1, 1]} : vector<4x12x40xf32> to vector<1x10x38xf32>
    %836 = vector.shape_cast %835 : vector<1x10x38xf32> to vector<10x38xf32>
    %837 = vector.broadcast %90 : f32 to vector<10x38xf32>
    %838 = arith.mulf %837, %836 : vector<10x38xf32>
    %839 = arith.addf %834, %838 : vector<10x38xf32>
    %840 = vector.extract_strided_slice %318 {offsets = [2, 2, 0], sizes = [1, 10, 38], strides = [1, 1, 1]} : vector<4x12x40xf32> to vector<1x10x38xf32>
    %841 = vector.shape_cast %840 : vector<1x10x38xf32> to vector<10x38xf32>
    %842 = vector.broadcast %106 : f32 to vector<10x38xf32>
    %843 = arith.mulf %842, %841 : vector<10x38xf32>
    %844 = arith.addf %839, %843 : vector<10x38xf32>
    %845 = vector.extract_strided_slice %318 {offsets = [2, 2, 1], sizes = [1, 10, 38], strides = [1, 1, 1]} : vector<4x12x40xf32> to vector<1x10x38xf32>
    %846 = vector.shape_cast %845 : vector<1x10x38xf32> to vector<10x38xf32>
    %847 = vector.broadcast %122 : f32 to vector<10x38xf32>
    %848 = arith.mulf %847, %846 : vector<10x38xf32>
    %849 = arith.addf %844, %848 : vector<10x38xf32>
    %850 = vector.extract_strided_slice %318 {offsets = [2, 2, 2], sizes = [1, 10, 38], strides = [1, 1, 1]} : vector<4x12x40xf32> to vector<1x10x38xf32>
    %851 = vector.shape_cast %850 : vector<1x10x38xf32> to vector<10x38xf32>
    %852 = vector.broadcast %138 : f32 to vector<10x38xf32>
    %853 = arith.mulf %852, %851 : vector<10x38xf32>
    %854 = arith.addf %849, %853 : vector<10x38xf32>
    %855 = vector.extract_strided_slice %318 {offsets = [3, 0, 0], sizes = [1, 10, 38], strides = [1, 1, 1]} : vector<4x12x40xf32> to vector<1x10x38xf32>
    %856 = vector.shape_cast %855 : vector<1x10x38xf32> to vector<10x38xf32>
    %857 = vector.broadcast %14 : f32 to vector<10x38xf32>
    %858 = arith.mulf %857, %856 : vector<10x38xf32>
    %859 = arith.addf %854, %858 : vector<10x38xf32>
    %860 = vector.extract_strided_slice %318 {offsets = [3, 0, 1], sizes = [1, 10, 38], strides = [1, 1, 1]} : vector<4x12x40xf32> to vector<1x10x38xf32>
    %861 = vector.shape_cast %860 : vector<1x10x38xf32> to vector<10x38xf32>
    %862 = vector.broadcast %30 : f32 to vector<10x38xf32>
    %863 = arith.mulf %862, %861 : vector<10x38xf32>
    %864 = arith.addf %859, %863 : vector<10x38xf32>
    %865 = vector.extract_strided_slice %318 {offsets = [3, 0, 2], sizes = [1, 10, 38], strides = [1, 1, 1]} : vector<4x12x40xf32> to vector<1x10x38xf32>
    %866 = vector.shape_cast %865 : vector<1x10x38xf32> to vector<10x38xf32>
    %867 = vector.broadcast %46 : f32 to vector<10x38xf32>
    %868 = arith.mulf %867, %866 : vector<10x38xf32>
    %869 = arith.addf %864, %868 : vector<10x38xf32>
    %870 = vector.extract_strided_slice %318 {offsets = [3, 1, 0], sizes = [1, 10, 38], strides = [1, 1, 1]} : vector<4x12x40xf32> to vector<1x10x38xf32>
    %871 = vector.shape_cast %870 : vector<1x10x38xf32> to vector<10x38xf32>
    %872 = vector.broadcast %62 : f32 to vector<10x38xf32>
    %873 = arith.mulf %872, %871 : vector<10x38xf32>
    %874 = arith.addf %869, %873 : vector<10x38xf32>
    %875 = vector.extract_strided_slice %318 {offsets = [3, 1, 1], sizes = [1, 10, 38], strides = [1, 1, 1]} : vector<4x12x40xf32> to vector<1x10x38xf32>
    %876 = vector.shape_cast %875 : vector<1x10x38xf32> to vector<10x38xf32>
    %877 = vector.broadcast %78 : f32 to vector<10x38xf32>
    %878 = arith.mulf %877, %876 : vector<10x38xf32>
    %879 = arith.addf %874, %878 : vector<10x38xf32>
    %880 = vector.extract_strided_slice %318 {offsets = [3, 1, 2], sizes = [1, 10, 38], strides = [1, 1, 1]} : vector<4x12x40xf32> to vector<1x10x38xf32>
    %881 = vector.shape_cast %880 : vector<1x10x38xf32> to vector<10x38xf32>
    %882 = vector.broadcast %94 : f32 to vector<10x38xf32>
    %883 = arith.mulf %882, %881 : vector<10x38xf32>
    %884 = arith.addf %879, %883 : vector<10x38xf32>
    %885 = vector.extract_strided_slice %318 {offsets = [3, 2, 0], sizes = [1, 10, 38], strides = [1, 1, 1]} : vector<4x12x40xf32> to vector<1x10x38xf32>
    %886 = vector.shape_cast %885 : vector<1x10x38xf32> to vector<10x38xf32>
    %887 = vector.broadcast %110 : f32 to vector<10x38xf32>
    %888 = arith.mulf %887, %886 : vector<10x38xf32>
    %889 = arith.addf %884, %888 : vector<10x38xf32>
    %890 = vector.extract_strided_slice %318 {offsets = [3, 2, 1], sizes = [1, 10, 38], strides = [1, 1, 1]} : vector<4x12x40xf32> to vector<1x10x38xf32>
    %891 = vector.shape_cast %890 : vector<1x10x38xf32> to vector<10x38xf32>
    %892 = vector.broadcast %126 : f32 to vector<10x38xf32>
    %893 = arith.mulf %892, %891 : vector<10x38xf32>
    %894 = arith.addf %889, %893 : vector<10x38xf32>
    %895 = vector.extract_strided_slice %318 {offsets = [3, 2, 2], sizes = [1, 10, 38], strides = [1, 1, 1]} : vector<4x12x40xf32> to vector<1x10x38xf32>
    %896 = vector.shape_cast %895 : vector<1x10x38xf32> to vector<10x38xf32>
    %897 = vector.broadcast %142 : f32 to vector<10x38xf32>
    %898 = arith.mulf %897, %896 : vector<10x38xf32>
    %899 = arith.addf %894, %898 : vector<10x38xf32>
    %900 = vector.broadcast %146 : f32 to vector<10x38xf32>
    %901 = arith.addf %899, %900 : vector<10x38xf32>
    %cst_185 = arith.constant 0.000000e+00 : f32
    %902 = vector.broadcast %cst_185 : f32 to vector<10x38xf32>
    %903 = arith.maximumf %901, %902 : vector<10x38xf32>
    %cst_186 = arith.constant 0.000000e+00 : f32
    %904 = vector.broadcast %cst_186 : f32 to vector<10x38xf32>
    %905 = arith.select %344, %903, %904 : vector<10x38xi1>, vector<10x38xf32>
    %cst_187 = arith.constant 0.000000e+00 : f32
    %906 = vector.broadcast %cst_187 : f32 to vector<10x38xf32>
    %907 = vector.extract_strided_slice %318 {offsets = [0, 0, 0], sizes = [1, 10, 38], strides = [1, 1, 1]} : vector<4x12x40xf32> to vector<1x10x38xf32>
    %908 = vector.shape_cast %907 : vector<1x10x38xf32> to vector<10x38xf32>
    %909 = vector.broadcast %3 : f32 to vector<10x38xf32>
    %910 = arith.mulf %909, %908 : vector<10x38xf32>
    %911 = arith.addf %906, %910 : vector<10x38xf32>
    %912 = vector.extract_strided_slice %318 {offsets = [0, 0, 1], sizes = [1, 10, 38], strides = [1, 1, 1]} : vector<4x12x40xf32> to vector<1x10x38xf32>
    %913 = vector.shape_cast %912 : vector<1x10x38xf32> to vector<10x38xf32>
    %914 = vector.broadcast %19 : f32 to vector<10x38xf32>
    %915 = arith.mulf %914, %913 : vector<10x38xf32>
    %916 = arith.addf %911, %915 : vector<10x38xf32>
    %917 = vector.extract_strided_slice %318 {offsets = [0, 0, 2], sizes = [1, 10, 38], strides = [1, 1, 1]} : vector<4x12x40xf32> to vector<1x10x38xf32>
    %918 = vector.shape_cast %917 : vector<1x10x38xf32> to vector<10x38xf32>
    %919 = vector.broadcast %35 : f32 to vector<10x38xf32>
    %920 = arith.mulf %919, %918 : vector<10x38xf32>
    %921 = arith.addf %916, %920 : vector<10x38xf32>
    %922 = vector.extract_strided_slice %318 {offsets = [0, 1, 0], sizes = [1, 10, 38], strides = [1, 1, 1]} : vector<4x12x40xf32> to vector<1x10x38xf32>
    %923 = vector.shape_cast %922 : vector<1x10x38xf32> to vector<10x38xf32>
    %924 = vector.broadcast %51 : f32 to vector<10x38xf32>
    %925 = arith.mulf %924, %923 : vector<10x38xf32>
    %926 = arith.addf %921, %925 : vector<10x38xf32>
    %927 = vector.extract_strided_slice %318 {offsets = [0, 1, 1], sizes = [1, 10, 38], strides = [1, 1, 1]} : vector<4x12x40xf32> to vector<1x10x38xf32>
    %928 = vector.shape_cast %927 : vector<1x10x38xf32> to vector<10x38xf32>
    %929 = vector.broadcast %67 : f32 to vector<10x38xf32>
    %930 = arith.mulf %929, %928 : vector<10x38xf32>
    %931 = arith.addf %926, %930 : vector<10x38xf32>
    %932 = vector.extract_strided_slice %318 {offsets = [0, 1, 2], sizes = [1, 10, 38], strides = [1, 1, 1]} : vector<4x12x40xf32> to vector<1x10x38xf32>
    %933 = vector.shape_cast %932 : vector<1x10x38xf32> to vector<10x38xf32>
    %934 = vector.broadcast %83 : f32 to vector<10x38xf32>
    %935 = arith.mulf %934, %933 : vector<10x38xf32>
    %936 = arith.addf %931, %935 : vector<10x38xf32>
    %937 = vector.extract_strided_slice %318 {offsets = [0, 2, 0], sizes = [1, 10, 38], strides = [1, 1, 1]} : vector<4x12x40xf32> to vector<1x10x38xf32>
    %938 = vector.shape_cast %937 : vector<1x10x38xf32> to vector<10x38xf32>
    %939 = vector.broadcast %99 : f32 to vector<10x38xf32>
    %940 = arith.mulf %939, %938 : vector<10x38xf32>
    %941 = arith.addf %936, %940 : vector<10x38xf32>
    %942 = vector.extract_strided_slice %318 {offsets = [0, 2, 1], sizes = [1, 10, 38], strides = [1, 1, 1]} : vector<4x12x40xf32> to vector<1x10x38xf32>
    %943 = vector.shape_cast %942 : vector<1x10x38xf32> to vector<10x38xf32>
    %944 = vector.broadcast %115 : f32 to vector<10x38xf32>
    %945 = arith.mulf %944, %943 : vector<10x38xf32>
    %946 = arith.addf %941, %945 : vector<10x38xf32>
    %947 = vector.extract_strided_slice %318 {offsets = [0, 2, 2], sizes = [1, 10, 38], strides = [1, 1, 1]} : vector<4x12x40xf32> to vector<1x10x38xf32>
    %948 = vector.shape_cast %947 : vector<1x10x38xf32> to vector<10x38xf32>
    %949 = vector.broadcast %131 : f32 to vector<10x38xf32>
    %950 = arith.mulf %949, %948 : vector<10x38xf32>
    %951 = arith.addf %946, %950 : vector<10x38xf32>
    %952 = vector.extract_strided_slice %318 {offsets = [1, 0, 0], sizes = [1, 10, 38], strides = [1, 1, 1]} : vector<4x12x40xf32> to vector<1x10x38xf32>
    %953 = vector.shape_cast %952 : vector<1x10x38xf32> to vector<10x38xf32>
    %954 = vector.broadcast %7 : f32 to vector<10x38xf32>
    %955 = arith.mulf %954, %953 : vector<10x38xf32>
    %956 = arith.addf %951, %955 : vector<10x38xf32>
    %957 = vector.extract_strided_slice %318 {offsets = [1, 0, 1], sizes = [1, 10, 38], strides = [1, 1, 1]} : vector<4x12x40xf32> to vector<1x10x38xf32>
    %958 = vector.shape_cast %957 : vector<1x10x38xf32> to vector<10x38xf32>
    %959 = vector.broadcast %23 : f32 to vector<10x38xf32>
    %960 = arith.mulf %959, %958 : vector<10x38xf32>
    %961 = arith.addf %956, %960 : vector<10x38xf32>
    %962 = vector.extract_strided_slice %318 {offsets = [1, 0, 2], sizes = [1, 10, 38], strides = [1, 1, 1]} : vector<4x12x40xf32> to vector<1x10x38xf32>
    %963 = vector.shape_cast %962 : vector<1x10x38xf32> to vector<10x38xf32>
    %964 = vector.broadcast %39 : f32 to vector<10x38xf32>
    %965 = arith.mulf %964, %963 : vector<10x38xf32>
    %966 = arith.addf %961, %965 : vector<10x38xf32>
    %967 = vector.extract_strided_slice %318 {offsets = [1, 1, 0], sizes = [1, 10, 38], strides = [1, 1, 1]} : vector<4x12x40xf32> to vector<1x10x38xf32>
    %968 = vector.shape_cast %967 : vector<1x10x38xf32> to vector<10x38xf32>
    %969 = vector.broadcast %55 : f32 to vector<10x38xf32>
    %970 = arith.mulf %969, %968 : vector<10x38xf32>
    %971 = arith.addf %966, %970 : vector<10x38xf32>
    %972 = vector.extract_strided_slice %318 {offsets = [1, 1, 1], sizes = [1, 10, 38], strides = [1, 1, 1]} : vector<4x12x40xf32> to vector<1x10x38xf32>
    %973 = vector.shape_cast %972 : vector<1x10x38xf32> to vector<10x38xf32>
    %974 = vector.broadcast %71 : f32 to vector<10x38xf32>
    %975 = arith.mulf %974, %973 : vector<10x38xf32>
    %976 = arith.addf %971, %975 : vector<10x38xf32>
    %977 = vector.extract_strided_slice %318 {offsets = [1, 1, 2], sizes = [1, 10, 38], strides = [1, 1, 1]} : vector<4x12x40xf32> to vector<1x10x38xf32>
    %978 = vector.shape_cast %977 : vector<1x10x38xf32> to vector<10x38xf32>
    %979 = vector.broadcast %87 : f32 to vector<10x38xf32>
    %980 = arith.mulf %979, %978 : vector<10x38xf32>
    %981 = arith.addf %976, %980 : vector<10x38xf32>
    %982 = vector.extract_strided_slice %318 {offsets = [1, 2, 0], sizes = [1, 10, 38], strides = [1, 1, 1]} : vector<4x12x40xf32> to vector<1x10x38xf32>
    %983 = vector.shape_cast %982 : vector<1x10x38xf32> to vector<10x38xf32>
    %984 = vector.broadcast %103 : f32 to vector<10x38xf32>
    %985 = arith.mulf %984, %983 : vector<10x38xf32>
    %986 = arith.addf %981, %985 : vector<10x38xf32>
    %987 = vector.extract_strided_slice %318 {offsets = [1, 2, 1], sizes = [1, 10, 38], strides = [1, 1, 1]} : vector<4x12x40xf32> to vector<1x10x38xf32>
    %988 = vector.shape_cast %987 : vector<1x10x38xf32> to vector<10x38xf32>
    %989 = vector.broadcast %119 : f32 to vector<10x38xf32>
    %990 = arith.mulf %989, %988 : vector<10x38xf32>
    %991 = arith.addf %986, %990 : vector<10x38xf32>
    %992 = vector.extract_strided_slice %318 {offsets = [1, 2, 2], sizes = [1, 10, 38], strides = [1, 1, 1]} : vector<4x12x40xf32> to vector<1x10x38xf32>
    %993 = vector.shape_cast %992 : vector<1x10x38xf32> to vector<10x38xf32>
    %994 = vector.broadcast %135 : f32 to vector<10x38xf32>
    %995 = arith.mulf %994, %993 : vector<10x38xf32>
    %996 = arith.addf %991, %995 : vector<10x38xf32>
    %997 = vector.extract_strided_slice %318 {offsets = [2, 0, 0], sizes = [1, 10, 38], strides = [1, 1, 1]} : vector<4x12x40xf32> to vector<1x10x38xf32>
    %998 = vector.shape_cast %997 : vector<1x10x38xf32> to vector<10x38xf32>
    %999 = vector.broadcast %11 : f32 to vector<10x38xf32>
    %1000 = arith.mulf %999, %998 : vector<10x38xf32>
    %1001 = arith.addf %996, %1000 : vector<10x38xf32>
    %1002 = vector.extract_strided_slice %318 {offsets = [2, 0, 1], sizes = [1, 10, 38], strides = [1, 1, 1]} : vector<4x12x40xf32> to vector<1x10x38xf32>
    %1003 = vector.shape_cast %1002 : vector<1x10x38xf32> to vector<10x38xf32>
    %1004 = vector.broadcast %27 : f32 to vector<10x38xf32>
    %1005 = arith.mulf %1004, %1003 : vector<10x38xf32>
    %1006 = arith.addf %1001, %1005 : vector<10x38xf32>
    %1007 = vector.extract_strided_slice %318 {offsets = [2, 0, 2], sizes = [1, 10, 38], strides = [1, 1, 1]} : vector<4x12x40xf32> to vector<1x10x38xf32>
    %1008 = vector.shape_cast %1007 : vector<1x10x38xf32> to vector<10x38xf32>
    %1009 = vector.broadcast %43 : f32 to vector<10x38xf32>
    %1010 = arith.mulf %1009, %1008 : vector<10x38xf32>
    %1011 = arith.addf %1006, %1010 : vector<10x38xf32>
    %1012 = vector.extract_strided_slice %318 {offsets = [2, 1, 0], sizes = [1, 10, 38], strides = [1, 1, 1]} : vector<4x12x40xf32> to vector<1x10x38xf32>
    %1013 = vector.shape_cast %1012 : vector<1x10x38xf32> to vector<10x38xf32>
    %1014 = vector.broadcast %59 : f32 to vector<10x38xf32>
    %1015 = arith.mulf %1014, %1013 : vector<10x38xf32>
    %1016 = arith.addf %1011, %1015 : vector<10x38xf32>
    %1017 = vector.extract_strided_slice %318 {offsets = [2, 1, 1], sizes = [1, 10, 38], strides = [1, 1, 1]} : vector<4x12x40xf32> to vector<1x10x38xf32>
    %1018 = vector.shape_cast %1017 : vector<1x10x38xf32> to vector<10x38xf32>
    %1019 = vector.broadcast %75 : f32 to vector<10x38xf32>
    %1020 = arith.mulf %1019, %1018 : vector<10x38xf32>
    %1021 = arith.addf %1016, %1020 : vector<10x38xf32>
    %1022 = vector.extract_strided_slice %318 {offsets = [2, 1, 2], sizes = [1, 10, 38], strides = [1, 1, 1]} : vector<4x12x40xf32> to vector<1x10x38xf32>
    %1023 = vector.shape_cast %1022 : vector<1x10x38xf32> to vector<10x38xf32>
    %1024 = vector.broadcast %91 : f32 to vector<10x38xf32>
    %1025 = arith.mulf %1024, %1023 : vector<10x38xf32>
    %1026 = arith.addf %1021, %1025 : vector<10x38xf32>
    %1027 = vector.extract_strided_slice %318 {offsets = [2, 2, 0], sizes = [1, 10, 38], strides = [1, 1, 1]} : vector<4x12x40xf32> to vector<1x10x38xf32>
    %1028 = vector.shape_cast %1027 : vector<1x10x38xf32> to vector<10x38xf32>
    %1029 = vector.broadcast %107 : f32 to vector<10x38xf32>
    %1030 = arith.mulf %1029, %1028 : vector<10x38xf32>
    %1031 = arith.addf %1026, %1030 : vector<10x38xf32>
    %1032 = vector.extract_strided_slice %318 {offsets = [2, 2, 1], sizes = [1, 10, 38], strides = [1, 1, 1]} : vector<4x12x40xf32> to vector<1x10x38xf32>
    %1033 = vector.shape_cast %1032 : vector<1x10x38xf32> to vector<10x38xf32>
    %1034 = vector.broadcast %123 : f32 to vector<10x38xf32>
    %1035 = arith.mulf %1034, %1033 : vector<10x38xf32>
    %1036 = arith.addf %1031, %1035 : vector<10x38xf32>
    %1037 = vector.extract_strided_slice %318 {offsets = [2, 2, 2], sizes = [1, 10, 38], strides = [1, 1, 1]} : vector<4x12x40xf32> to vector<1x10x38xf32>
    %1038 = vector.shape_cast %1037 : vector<1x10x38xf32> to vector<10x38xf32>
    %1039 = vector.broadcast %139 : f32 to vector<10x38xf32>
    %1040 = arith.mulf %1039, %1038 : vector<10x38xf32>
    %1041 = arith.addf %1036, %1040 : vector<10x38xf32>
    %1042 = vector.extract_strided_slice %318 {offsets = [3, 0, 0], sizes = [1, 10, 38], strides = [1, 1, 1]} : vector<4x12x40xf32> to vector<1x10x38xf32>
    %1043 = vector.shape_cast %1042 : vector<1x10x38xf32> to vector<10x38xf32>
    %1044 = vector.broadcast %15 : f32 to vector<10x38xf32>
    %1045 = arith.mulf %1044, %1043 : vector<10x38xf32>
    %1046 = arith.addf %1041, %1045 : vector<10x38xf32>
    %1047 = vector.extract_strided_slice %318 {offsets = [3, 0, 1], sizes = [1, 10, 38], strides = [1, 1, 1]} : vector<4x12x40xf32> to vector<1x10x38xf32>
    %1048 = vector.shape_cast %1047 : vector<1x10x38xf32> to vector<10x38xf32>
    %1049 = vector.broadcast %31 : f32 to vector<10x38xf32>
    %1050 = arith.mulf %1049, %1048 : vector<10x38xf32>
    %1051 = arith.addf %1046, %1050 : vector<10x38xf32>
    %1052 = vector.extract_strided_slice %318 {offsets = [3, 0, 2], sizes = [1, 10, 38], strides = [1, 1, 1]} : vector<4x12x40xf32> to vector<1x10x38xf32>
    %1053 = vector.shape_cast %1052 : vector<1x10x38xf32> to vector<10x38xf32>
    %1054 = vector.broadcast %47 : f32 to vector<10x38xf32>
    %1055 = arith.mulf %1054, %1053 : vector<10x38xf32>
    %1056 = arith.addf %1051, %1055 : vector<10x38xf32>
    %1057 = vector.extract_strided_slice %318 {offsets = [3, 1, 0], sizes = [1, 10, 38], strides = [1, 1, 1]} : vector<4x12x40xf32> to vector<1x10x38xf32>
    %1058 = vector.shape_cast %1057 : vector<1x10x38xf32> to vector<10x38xf32>
    %1059 = vector.broadcast %63 : f32 to vector<10x38xf32>
    %1060 = arith.mulf %1059, %1058 : vector<10x38xf32>
    %1061 = arith.addf %1056, %1060 : vector<10x38xf32>
    %1062 = vector.extract_strided_slice %318 {offsets = [3, 1, 1], sizes = [1, 10, 38], strides = [1, 1, 1]} : vector<4x12x40xf32> to vector<1x10x38xf32>
    %1063 = vector.shape_cast %1062 : vector<1x10x38xf32> to vector<10x38xf32>
    %1064 = vector.broadcast %79 : f32 to vector<10x38xf32>
    %1065 = arith.mulf %1064, %1063 : vector<10x38xf32>
    %1066 = arith.addf %1061, %1065 : vector<10x38xf32>
    %1067 = vector.extract_strided_slice %318 {offsets = [3, 1, 2], sizes = [1, 10, 38], strides = [1, 1, 1]} : vector<4x12x40xf32> to vector<1x10x38xf32>
    %1068 = vector.shape_cast %1067 : vector<1x10x38xf32> to vector<10x38xf32>
    %1069 = vector.broadcast %95 : f32 to vector<10x38xf32>
    %1070 = arith.mulf %1069, %1068 : vector<10x38xf32>
    %1071 = arith.addf %1066, %1070 : vector<10x38xf32>
    %1072 = vector.extract_strided_slice %318 {offsets = [3, 2, 0], sizes = [1, 10, 38], strides = [1, 1, 1]} : vector<4x12x40xf32> to vector<1x10x38xf32>
    %1073 = vector.shape_cast %1072 : vector<1x10x38xf32> to vector<10x38xf32>
    %1074 = vector.broadcast %111 : f32 to vector<10x38xf32>
    %1075 = arith.mulf %1074, %1073 : vector<10x38xf32>
    %1076 = arith.addf %1071, %1075 : vector<10x38xf32>
    %1077 = vector.extract_strided_slice %318 {offsets = [3, 2, 1], sizes = [1, 10, 38], strides = [1, 1, 1]} : vector<4x12x40xf32> to vector<1x10x38xf32>
    %1078 = vector.shape_cast %1077 : vector<1x10x38xf32> to vector<10x38xf32>
    %1079 = vector.broadcast %127 : f32 to vector<10x38xf32>
    %1080 = arith.mulf %1079, %1078 : vector<10x38xf32>
    %1081 = arith.addf %1076, %1080 : vector<10x38xf32>
    %1082 = vector.extract_strided_slice %318 {offsets = [3, 2, 2], sizes = [1, 10, 38], strides = [1, 1, 1]} : vector<4x12x40xf32> to vector<1x10x38xf32>
    %1083 = vector.shape_cast %1082 : vector<1x10x38xf32> to vector<10x38xf32>
    %1084 = vector.broadcast %143 : f32 to vector<10x38xf32>
    %1085 = arith.mulf %1084, %1083 : vector<10x38xf32>
    %1086 = arith.addf %1081, %1085 : vector<10x38xf32>
    %1087 = vector.broadcast %147 : f32 to vector<10x38xf32>
    %1088 = arith.addf %1086, %1087 : vector<10x38xf32>
    %cst_188 = arith.constant 0.000000e+00 : f32
    %1089 = vector.broadcast %cst_188 : f32 to vector<10x38xf32>
    %1090 = arith.maximumf %1088, %1089 : vector<10x38xf32>
    %cst_189 = arith.constant 0.000000e+00 : f32
    %1091 = vector.broadcast %cst_189 : f32 to vector<10x38xf32>
    %1092 = arith.select %344, %1090, %1091 : vector<10x38xi1>, vector<10x38xf32>
    %cst_190 = arith.constant 0.000000e+00 : f32
    %1093 = vector.broadcast %cst_190 : f32 to vector<8x36xf32>
    %1094 = vector.extract_strided_slice %531 {offsets = [0, 0], sizes = [8, 36], strides = [1, 1]} : vector<10x38xf32> to vector<8x36xf32>
    %1095 = vector.broadcast %148 : f32 to vector<8x36xf32>
    %1096 = arith.mulf %1095, %1094 : vector<8x36xf32>
    %1097 = arith.addf %1093, %1096 : vector<8x36xf32>
    %1098 = vector.extract_strided_slice %531 {offsets = [0, 1], sizes = [8, 36], strides = [1, 1]} : vector<10x38xf32> to vector<8x36xf32>
    %1099 = vector.broadcast %164 : f32 to vector<8x36xf32>
    %1100 = arith.mulf %1099, %1098 : vector<8x36xf32>
    %1101 = arith.addf %1097, %1100 : vector<8x36xf32>
    %1102 = vector.extract_strided_slice %531 {offsets = [0, 2], sizes = [8, 36], strides = [1, 1]} : vector<10x38xf32> to vector<8x36xf32>
    %1103 = vector.broadcast %180 : f32 to vector<8x36xf32>
    %1104 = arith.mulf %1103, %1102 : vector<8x36xf32>
    %1105 = arith.addf %1101, %1104 : vector<8x36xf32>
    %1106 = vector.extract_strided_slice %531 {offsets = [1, 0], sizes = [8, 36], strides = [1, 1]} : vector<10x38xf32> to vector<8x36xf32>
    %1107 = vector.broadcast %196 : f32 to vector<8x36xf32>
    %1108 = arith.mulf %1107, %1106 : vector<8x36xf32>
    %1109 = arith.addf %1105, %1108 : vector<8x36xf32>
    %1110 = vector.extract_strided_slice %531 {offsets = [1, 1], sizes = [8, 36], strides = [1, 1]} : vector<10x38xf32> to vector<8x36xf32>
    %1111 = vector.broadcast %212 : f32 to vector<8x36xf32>
    %1112 = arith.mulf %1111, %1110 : vector<8x36xf32>
    %1113 = arith.addf %1109, %1112 : vector<8x36xf32>
    %1114 = vector.extract_strided_slice %531 {offsets = [1, 2], sizes = [8, 36], strides = [1, 1]} : vector<10x38xf32> to vector<8x36xf32>
    %1115 = vector.broadcast %228 : f32 to vector<8x36xf32>
    %1116 = arith.mulf %1115, %1114 : vector<8x36xf32>
    %1117 = arith.addf %1113, %1116 : vector<8x36xf32>
    %1118 = vector.extract_strided_slice %531 {offsets = [2, 0], sizes = [8, 36], strides = [1, 1]} : vector<10x38xf32> to vector<8x36xf32>
    %1119 = vector.broadcast %244 : f32 to vector<8x36xf32>
    %1120 = arith.mulf %1119, %1118 : vector<8x36xf32>
    %1121 = arith.addf %1117, %1120 : vector<8x36xf32>
    %1122 = vector.extract_strided_slice %531 {offsets = [2, 1], sizes = [8, 36], strides = [1, 1]} : vector<10x38xf32> to vector<8x36xf32>
    %1123 = vector.broadcast %260 : f32 to vector<8x36xf32>
    %1124 = arith.mulf %1123, %1122 : vector<8x36xf32>
    %1125 = arith.addf %1121, %1124 : vector<8x36xf32>
    %1126 = vector.extract_strided_slice %531 {offsets = [2, 2], sizes = [8, 36], strides = [1, 1]} : vector<10x38xf32> to vector<8x36xf32>
    %1127 = vector.broadcast %276 : f32 to vector<8x36xf32>
    %1128 = arith.mulf %1127, %1126 : vector<8x36xf32>
    %1129 = arith.addf %1125, %1128 : vector<8x36xf32>
    %1130 = vector.extract_strided_slice %718 {offsets = [0, 0], sizes = [8, 36], strides = [1, 1]} : vector<10x38xf32> to vector<8x36xf32>
    %1131 = vector.broadcast %152 : f32 to vector<8x36xf32>
    %1132 = arith.mulf %1131, %1130 : vector<8x36xf32>
    %1133 = arith.addf %1129, %1132 : vector<8x36xf32>
    %1134 = vector.extract_strided_slice %718 {offsets = [0, 1], sizes = [8, 36], strides = [1, 1]} : vector<10x38xf32> to vector<8x36xf32>
    %1135 = vector.broadcast %168 : f32 to vector<8x36xf32>
    %1136 = arith.mulf %1135, %1134 : vector<8x36xf32>
    %1137 = arith.addf %1133, %1136 : vector<8x36xf32>
    %1138 = vector.extract_strided_slice %718 {offsets = [0, 2], sizes = [8, 36], strides = [1, 1]} : vector<10x38xf32> to vector<8x36xf32>
    %1139 = vector.broadcast %184 : f32 to vector<8x36xf32>
    %1140 = arith.mulf %1139, %1138 : vector<8x36xf32>
    %1141 = arith.addf %1137, %1140 : vector<8x36xf32>
    %1142 = vector.extract_strided_slice %718 {offsets = [1, 0], sizes = [8, 36], strides = [1, 1]} : vector<10x38xf32> to vector<8x36xf32>
    %1143 = vector.broadcast %200 : f32 to vector<8x36xf32>
    %1144 = arith.mulf %1143, %1142 : vector<8x36xf32>
    %1145 = arith.addf %1141, %1144 : vector<8x36xf32>
    %1146 = vector.extract_strided_slice %718 {offsets = [1, 1], sizes = [8, 36], strides = [1, 1]} : vector<10x38xf32> to vector<8x36xf32>
    %1147 = vector.broadcast %216 : f32 to vector<8x36xf32>
    %1148 = arith.mulf %1147, %1146 : vector<8x36xf32>
    %1149 = arith.addf %1145, %1148 : vector<8x36xf32>
    %1150 = vector.extract_strided_slice %718 {offsets = [1, 2], sizes = [8, 36], strides = [1, 1]} : vector<10x38xf32> to vector<8x36xf32>
    %1151 = vector.broadcast %232 : f32 to vector<8x36xf32>
    %1152 = arith.mulf %1151, %1150 : vector<8x36xf32>
    %1153 = arith.addf %1149, %1152 : vector<8x36xf32>
    %1154 = vector.extract_strided_slice %718 {offsets = [2, 0], sizes = [8, 36], strides = [1, 1]} : vector<10x38xf32> to vector<8x36xf32>
    %1155 = vector.broadcast %248 : f32 to vector<8x36xf32>
    %1156 = arith.mulf %1155, %1154 : vector<8x36xf32>
    %1157 = arith.addf %1153, %1156 : vector<8x36xf32>
    %1158 = vector.extract_strided_slice %718 {offsets = [2, 1], sizes = [8, 36], strides = [1, 1]} : vector<10x38xf32> to vector<8x36xf32>
    %1159 = vector.broadcast %264 : f32 to vector<8x36xf32>
    %1160 = arith.mulf %1159, %1158 : vector<8x36xf32>
    %1161 = arith.addf %1157, %1160 : vector<8x36xf32>
    %1162 = vector.extract_strided_slice %718 {offsets = [2, 2], sizes = [8, 36], strides = [1, 1]} : vector<10x38xf32> to vector<8x36xf32>
    %1163 = vector.broadcast %280 : f32 to vector<8x36xf32>
    %1164 = arith.mulf %1163, %1162 : vector<8x36xf32>
    %1165 = arith.addf %1161, %1164 : vector<8x36xf32>
    %1166 = vector.extract_strided_slice %905 {offsets = [0, 0], sizes = [8, 36], strides = [1, 1]} : vector<10x38xf32> to vector<8x36xf32>
    %1167 = vector.broadcast %156 : f32 to vector<8x36xf32>
    %1168 = arith.mulf %1167, %1166 : vector<8x36xf32>
    %1169 = arith.addf %1165, %1168 : vector<8x36xf32>
    %1170 = vector.extract_strided_slice %905 {offsets = [0, 1], sizes = [8, 36], strides = [1, 1]} : vector<10x38xf32> to vector<8x36xf32>
    %1171 = vector.broadcast %172 : f32 to vector<8x36xf32>
    %1172 = arith.mulf %1171, %1170 : vector<8x36xf32>
    %1173 = arith.addf %1169, %1172 : vector<8x36xf32>
    %1174 = vector.extract_strided_slice %905 {offsets = [0, 2], sizes = [8, 36], strides = [1, 1]} : vector<10x38xf32> to vector<8x36xf32>
    %1175 = vector.broadcast %188 : f32 to vector<8x36xf32>
    %1176 = arith.mulf %1175, %1174 : vector<8x36xf32>
    %1177 = arith.addf %1173, %1176 : vector<8x36xf32>
    %1178 = vector.extract_strided_slice %905 {offsets = [1, 0], sizes = [8, 36], strides = [1, 1]} : vector<10x38xf32> to vector<8x36xf32>
    %1179 = vector.broadcast %204 : f32 to vector<8x36xf32>
    %1180 = arith.mulf %1179, %1178 : vector<8x36xf32>
    %1181 = arith.addf %1177, %1180 : vector<8x36xf32>
    %1182 = vector.extract_strided_slice %905 {offsets = [1, 1], sizes = [8, 36], strides = [1, 1]} : vector<10x38xf32> to vector<8x36xf32>
    %1183 = vector.broadcast %220 : f32 to vector<8x36xf32>
    %1184 = arith.mulf %1183, %1182 : vector<8x36xf32>
    %1185 = arith.addf %1181, %1184 : vector<8x36xf32>
    %1186 = vector.extract_strided_slice %905 {offsets = [1, 2], sizes = [8, 36], strides = [1, 1]} : vector<10x38xf32> to vector<8x36xf32>
    %1187 = vector.broadcast %236 : f32 to vector<8x36xf32>
    %1188 = arith.mulf %1187, %1186 : vector<8x36xf32>
    %1189 = arith.addf %1185, %1188 : vector<8x36xf32>
    %1190 = vector.extract_strided_slice %905 {offsets = [2, 0], sizes = [8, 36], strides = [1, 1]} : vector<10x38xf32> to vector<8x36xf32>
    %1191 = vector.broadcast %252 : f32 to vector<8x36xf32>
    %1192 = arith.mulf %1191, %1190 : vector<8x36xf32>
    %1193 = arith.addf %1189, %1192 : vector<8x36xf32>
    %1194 = vector.extract_strided_slice %905 {offsets = [2, 1], sizes = [8, 36], strides = [1, 1]} : vector<10x38xf32> to vector<8x36xf32>
    %1195 = vector.broadcast %268 : f32 to vector<8x36xf32>
    %1196 = arith.mulf %1195, %1194 : vector<8x36xf32>
    %1197 = arith.addf %1193, %1196 : vector<8x36xf32>
    %1198 = vector.extract_strided_slice %905 {offsets = [2, 2], sizes = [8, 36], strides = [1, 1]} : vector<10x38xf32> to vector<8x36xf32>
    %1199 = vector.broadcast %284 : f32 to vector<8x36xf32>
    %1200 = arith.mulf %1199, %1198 : vector<8x36xf32>
    %1201 = arith.addf %1197, %1200 : vector<8x36xf32>
    %1202 = vector.extract_strided_slice %1092 {offsets = [0, 0], sizes = [8, 36], strides = [1, 1]} : vector<10x38xf32> to vector<8x36xf32>
    %1203 = vector.broadcast %160 : f32 to vector<8x36xf32>
    %1204 = arith.mulf %1203, %1202 : vector<8x36xf32>
    %1205 = arith.addf %1201, %1204 : vector<8x36xf32>
    %1206 = vector.extract_strided_slice %1092 {offsets = [0, 1], sizes = [8, 36], strides = [1, 1]} : vector<10x38xf32> to vector<8x36xf32>
    %1207 = vector.broadcast %176 : f32 to vector<8x36xf32>
    %1208 = arith.mulf %1207, %1206 : vector<8x36xf32>
    %1209 = arith.addf %1205, %1208 : vector<8x36xf32>
    %1210 = vector.extract_strided_slice %1092 {offsets = [0, 2], sizes = [8, 36], strides = [1, 1]} : vector<10x38xf32> to vector<8x36xf32>
    %1211 = vector.broadcast %192 : f32 to vector<8x36xf32>
    %1212 = arith.mulf %1211, %1210 : vector<8x36xf32>
    %1213 = arith.addf %1209, %1212 : vector<8x36xf32>
    %1214 = vector.extract_strided_slice %1092 {offsets = [1, 0], sizes = [8, 36], strides = [1, 1]} : vector<10x38xf32> to vector<8x36xf32>
    %1215 = vector.broadcast %208 : f32 to vector<8x36xf32>
    %1216 = arith.mulf %1215, %1214 : vector<8x36xf32>
    %1217 = arith.addf %1213, %1216 : vector<8x36xf32>
    %1218 = vector.extract_strided_slice %1092 {offsets = [1, 1], sizes = [8, 36], strides = [1, 1]} : vector<10x38xf32> to vector<8x36xf32>
    %1219 = vector.broadcast %224 : f32 to vector<8x36xf32>
    %1220 = arith.mulf %1219, %1218 : vector<8x36xf32>
    %1221 = arith.addf %1217, %1220 : vector<8x36xf32>
    %1222 = vector.extract_strided_slice %1092 {offsets = [1, 2], sizes = [8, 36], strides = [1, 1]} : vector<10x38xf32> to vector<8x36xf32>
    %1223 = vector.broadcast %240 : f32 to vector<8x36xf32>
    %1224 = arith.mulf %1223, %1222 : vector<8x36xf32>
    %1225 = arith.addf %1221, %1224 : vector<8x36xf32>
    %1226 = vector.extract_strided_slice %1092 {offsets = [2, 0], sizes = [8, 36], strides = [1, 1]} : vector<10x38xf32> to vector<8x36xf32>
    %1227 = vector.broadcast %256 : f32 to vector<8x36xf32>
    %1228 = arith.mulf %1227, %1226 : vector<8x36xf32>
    %1229 = arith.addf %1225, %1228 : vector<8x36xf32>
    %1230 = vector.extract_strided_slice %1092 {offsets = [2, 1], sizes = [8, 36], strides = [1, 1]} : vector<10x38xf32> to vector<8x36xf32>
    %1231 = vector.broadcast %272 : f32 to vector<8x36xf32>
    %1232 = arith.mulf %1231, %1230 : vector<8x36xf32>
    %1233 = arith.addf %1229, %1232 : vector<8x36xf32>
    %1234 = vector.extract_strided_slice %1092 {offsets = [2, 2], sizes = [8, 36], strides = [1, 1]} : vector<10x38xf32> to vector<8x36xf32>
    %1235 = vector.broadcast %288 : f32 to vector<8x36xf32>
    %1236 = arith.mulf %1235, %1234 : vector<8x36xf32>
    %1237 = arith.addf %1233, %1236 : vector<8x36xf32>
    %1238 = vector.broadcast %292 : f32 to vector<8x36xf32>
    %1239 = arith.addf %1237, %1238 : vector<8x36xf32>
    %cst_191 = arith.constant 0.000000e+00 : f32
    %1240 = vector.broadcast %cst_191 : f32 to vector<8x36xf32>
    %1241 = arith.maximumf %1239, %1240 : vector<8x36xf32>
    %cst_192 = arith.constant 0.000000e+00 : f32
    %1242 = vector.broadcast %cst_192 : f32 to vector<8x36xf32>
    %1243 = vector.extract_strided_slice %531 {offsets = [0, 0], sizes = [8, 36], strides = [1, 1]} : vector<10x38xf32> to vector<8x36xf32>
    %1244 = vector.broadcast %149 : f32 to vector<8x36xf32>
    %1245 = arith.mulf %1244, %1243 : vector<8x36xf32>
    %1246 = arith.addf %1242, %1245 : vector<8x36xf32>
    %1247 = vector.extract_strided_slice %531 {offsets = [0, 1], sizes = [8, 36], strides = [1, 1]} : vector<10x38xf32> to vector<8x36xf32>
    %1248 = vector.broadcast %165 : f32 to vector<8x36xf32>
    %1249 = arith.mulf %1248, %1247 : vector<8x36xf32>
    %1250 = arith.addf %1246, %1249 : vector<8x36xf32>
    %1251 = vector.extract_strided_slice %531 {offsets = [0, 2], sizes = [8, 36], strides = [1, 1]} : vector<10x38xf32> to vector<8x36xf32>
    %1252 = vector.broadcast %181 : f32 to vector<8x36xf32>
    %1253 = arith.mulf %1252, %1251 : vector<8x36xf32>
    %1254 = arith.addf %1250, %1253 : vector<8x36xf32>
    %1255 = vector.extract_strided_slice %531 {offsets = [1, 0], sizes = [8, 36], strides = [1, 1]} : vector<10x38xf32> to vector<8x36xf32>
    %1256 = vector.broadcast %197 : f32 to vector<8x36xf32>
    %1257 = arith.mulf %1256, %1255 : vector<8x36xf32>
    %1258 = arith.addf %1254, %1257 : vector<8x36xf32>
    %1259 = vector.extract_strided_slice %531 {offsets = [1, 1], sizes = [8, 36], strides = [1, 1]} : vector<10x38xf32> to vector<8x36xf32>
    %1260 = vector.broadcast %213 : f32 to vector<8x36xf32>
    %1261 = arith.mulf %1260, %1259 : vector<8x36xf32>
    %1262 = arith.addf %1258, %1261 : vector<8x36xf32>
    %1263 = vector.extract_strided_slice %531 {offsets = [1, 2], sizes = [8, 36], strides = [1, 1]} : vector<10x38xf32> to vector<8x36xf32>
    %1264 = vector.broadcast %229 : f32 to vector<8x36xf32>
    %1265 = arith.mulf %1264, %1263 : vector<8x36xf32>
    %1266 = arith.addf %1262, %1265 : vector<8x36xf32>
    %1267 = vector.extract_strided_slice %531 {offsets = [2, 0], sizes = [8, 36], strides = [1, 1]} : vector<10x38xf32> to vector<8x36xf32>
    %1268 = vector.broadcast %245 : f32 to vector<8x36xf32>
    %1269 = arith.mulf %1268, %1267 : vector<8x36xf32>
    %1270 = arith.addf %1266, %1269 : vector<8x36xf32>
    %1271 = vector.extract_strided_slice %531 {offsets = [2, 1], sizes = [8, 36], strides = [1, 1]} : vector<10x38xf32> to vector<8x36xf32>
    %1272 = vector.broadcast %261 : f32 to vector<8x36xf32>
    %1273 = arith.mulf %1272, %1271 : vector<8x36xf32>
    %1274 = arith.addf %1270, %1273 : vector<8x36xf32>
    %1275 = vector.extract_strided_slice %531 {offsets = [2, 2], sizes = [8, 36], strides = [1, 1]} : vector<10x38xf32> to vector<8x36xf32>
    %1276 = vector.broadcast %277 : f32 to vector<8x36xf32>
    %1277 = arith.mulf %1276, %1275 : vector<8x36xf32>
    %1278 = arith.addf %1274, %1277 : vector<8x36xf32>
    %1279 = vector.extract_strided_slice %718 {offsets = [0, 0], sizes = [8, 36], strides = [1, 1]} : vector<10x38xf32> to vector<8x36xf32>
    %1280 = vector.broadcast %153 : f32 to vector<8x36xf32>
    %1281 = arith.mulf %1280, %1279 : vector<8x36xf32>
    %1282 = arith.addf %1278, %1281 : vector<8x36xf32>
    %1283 = vector.extract_strided_slice %718 {offsets = [0, 1], sizes = [8, 36], strides = [1, 1]} : vector<10x38xf32> to vector<8x36xf32>
    %1284 = vector.broadcast %169 : f32 to vector<8x36xf32>
    %1285 = arith.mulf %1284, %1283 : vector<8x36xf32>
    %1286 = arith.addf %1282, %1285 : vector<8x36xf32>
    %1287 = vector.extract_strided_slice %718 {offsets = [0, 2], sizes = [8, 36], strides = [1, 1]} : vector<10x38xf32> to vector<8x36xf32>
    %1288 = vector.broadcast %185 : f32 to vector<8x36xf32>
    %1289 = arith.mulf %1288, %1287 : vector<8x36xf32>
    %1290 = arith.addf %1286, %1289 : vector<8x36xf32>
    %1291 = vector.extract_strided_slice %718 {offsets = [1, 0], sizes = [8, 36], strides = [1, 1]} : vector<10x38xf32> to vector<8x36xf32>
    %1292 = vector.broadcast %201 : f32 to vector<8x36xf32>
    %1293 = arith.mulf %1292, %1291 : vector<8x36xf32>
    %1294 = arith.addf %1290, %1293 : vector<8x36xf32>
    %1295 = vector.extract_strided_slice %718 {offsets = [1, 1], sizes = [8, 36], strides = [1, 1]} : vector<10x38xf32> to vector<8x36xf32>
    %1296 = vector.broadcast %217 : f32 to vector<8x36xf32>
    %1297 = arith.mulf %1296, %1295 : vector<8x36xf32>
    %1298 = arith.addf %1294, %1297 : vector<8x36xf32>
    %1299 = vector.extract_strided_slice %718 {offsets = [1, 2], sizes = [8, 36], strides = [1, 1]} : vector<10x38xf32> to vector<8x36xf32>
    %1300 = vector.broadcast %233 : f32 to vector<8x36xf32>
    %1301 = arith.mulf %1300, %1299 : vector<8x36xf32>
    %1302 = arith.addf %1298, %1301 : vector<8x36xf32>
    %1303 = vector.extract_strided_slice %718 {offsets = [2, 0], sizes = [8, 36], strides = [1, 1]} : vector<10x38xf32> to vector<8x36xf32>
    %1304 = vector.broadcast %249 : f32 to vector<8x36xf32>
    %1305 = arith.mulf %1304, %1303 : vector<8x36xf32>
    %1306 = arith.addf %1302, %1305 : vector<8x36xf32>
    %1307 = vector.extract_strided_slice %718 {offsets = [2, 1], sizes = [8, 36], strides = [1, 1]} : vector<10x38xf32> to vector<8x36xf32>
    %1308 = vector.broadcast %265 : f32 to vector<8x36xf32>
    %1309 = arith.mulf %1308, %1307 : vector<8x36xf32>
    %1310 = arith.addf %1306, %1309 : vector<8x36xf32>
    %1311 = vector.extract_strided_slice %718 {offsets = [2, 2], sizes = [8, 36], strides = [1, 1]} : vector<10x38xf32> to vector<8x36xf32>
    %1312 = vector.broadcast %281 : f32 to vector<8x36xf32>
    %1313 = arith.mulf %1312, %1311 : vector<8x36xf32>
    %1314 = arith.addf %1310, %1313 : vector<8x36xf32>
    %1315 = vector.extract_strided_slice %905 {offsets = [0, 0], sizes = [8, 36], strides = [1, 1]} : vector<10x38xf32> to vector<8x36xf32>
    %1316 = vector.broadcast %157 : f32 to vector<8x36xf32>
    %1317 = arith.mulf %1316, %1315 : vector<8x36xf32>
    %1318 = arith.addf %1314, %1317 : vector<8x36xf32>
    %1319 = vector.extract_strided_slice %905 {offsets = [0, 1], sizes = [8, 36], strides = [1, 1]} : vector<10x38xf32> to vector<8x36xf32>
    %1320 = vector.broadcast %173 : f32 to vector<8x36xf32>
    %1321 = arith.mulf %1320, %1319 : vector<8x36xf32>
    %1322 = arith.addf %1318, %1321 : vector<8x36xf32>
    %1323 = vector.extract_strided_slice %905 {offsets = [0, 2], sizes = [8, 36], strides = [1, 1]} : vector<10x38xf32> to vector<8x36xf32>
    %1324 = vector.broadcast %189 : f32 to vector<8x36xf32>
    %1325 = arith.mulf %1324, %1323 : vector<8x36xf32>
    %1326 = arith.addf %1322, %1325 : vector<8x36xf32>
    %1327 = vector.extract_strided_slice %905 {offsets = [1, 0], sizes = [8, 36], strides = [1, 1]} : vector<10x38xf32> to vector<8x36xf32>
    %1328 = vector.broadcast %205 : f32 to vector<8x36xf32>
    %1329 = arith.mulf %1328, %1327 : vector<8x36xf32>
    %1330 = arith.addf %1326, %1329 : vector<8x36xf32>
    %1331 = vector.extract_strided_slice %905 {offsets = [1, 1], sizes = [8, 36], strides = [1, 1]} : vector<10x38xf32> to vector<8x36xf32>
    %1332 = vector.broadcast %221 : f32 to vector<8x36xf32>
    %1333 = arith.mulf %1332, %1331 : vector<8x36xf32>
    %1334 = arith.addf %1330, %1333 : vector<8x36xf32>
    %1335 = vector.extract_strided_slice %905 {offsets = [1, 2], sizes = [8, 36], strides = [1, 1]} : vector<10x38xf32> to vector<8x36xf32>
    %1336 = vector.broadcast %237 : f32 to vector<8x36xf32>
    %1337 = arith.mulf %1336, %1335 : vector<8x36xf32>
    %1338 = arith.addf %1334, %1337 : vector<8x36xf32>
    %1339 = vector.extract_strided_slice %905 {offsets = [2, 0], sizes = [8, 36], strides = [1, 1]} : vector<10x38xf32> to vector<8x36xf32>
    %1340 = vector.broadcast %253 : f32 to vector<8x36xf32>
    %1341 = arith.mulf %1340, %1339 : vector<8x36xf32>
    %1342 = arith.addf %1338, %1341 : vector<8x36xf32>
    %1343 = vector.extract_strided_slice %905 {offsets = [2, 1], sizes = [8, 36], strides = [1, 1]} : vector<10x38xf32> to vector<8x36xf32>
    %1344 = vector.broadcast %269 : f32 to vector<8x36xf32>
    %1345 = arith.mulf %1344, %1343 : vector<8x36xf32>
    %1346 = arith.addf %1342, %1345 : vector<8x36xf32>
    %1347 = vector.extract_strided_slice %905 {offsets = [2, 2], sizes = [8, 36], strides = [1, 1]} : vector<10x38xf32> to vector<8x36xf32>
    %1348 = vector.broadcast %285 : f32 to vector<8x36xf32>
    %1349 = arith.mulf %1348, %1347 : vector<8x36xf32>
    %1350 = arith.addf %1346, %1349 : vector<8x36xf32>
    %1351 = vector.extract_strided_slice %1092 {offsets = [0, 0], sizes = [8, 36], strides = [1, 1]} : vector<10x38xf32> to vector<8x36xf32>
    %1352 = vector.broadcast %161 : f32 to vector<8x36xf32>
    %1353 = arith.mulf %1352, %1351 : vector<8x36xf32>
    %1354 = arith.addf %1350, %1353 : vector<8x36xf32>
    %1355 = vector.extract_strided_slice %1092 {offsets = [0, 1], sizes = [8, 36], strides = [1, 1]} : vector<10x38xf32> to vector<8x36xf32>
    %1356 = vector.broadcast %177 : f32 to vector<8x36xf32>
    %1357 = arith.mulf %1356, %1355 : vector<8x36xf32>
    %1358 = arith.addf %1354, %1357 : vector<8x36xf32>
    %1359 = vector.extract_strided_slice %1092 {offsets = [0, 2], sizes = [8, 36], strides = [1, 1]} : vector<10x38xf32> to vector<8x36xf32>
    %1360 = vector.broadcast %193 : f32 to vector<8x36xf32>
    %1361 = arith.mulf %1360, %1359 : vector<8x36xf32>
    %1362 = arith.addf %1358, %1361 : vector<8x36xf32>
    %1363 = vector.extract_strided_slice %1092 {offsets = [1, 0], sizes = [8, 36], strides = [1, 1]} : vector<10x38xf32> to vector<8x36xf32>
    %1364 = vector.broadcast %209 : f32 to vector<8x36xf32>
    %1365 = arith.mulf %1364, %1363 : vector<8x36xf32>
    %1366 = arith.addf %1362, %1365 : vector<8x36xf32>
    %1367 = vector.extract_strided_slice %1092 {offsets = [1, 1], sizes = [8, 36], strides = [1, 1]} : vector<10x38xf32> to vector<8x36xf32>
    %1368 = vector.broadcast %225 : f32 to vector<8x36xf32>
    %1369 = arith.mulf %1368, %1367 : vector<8x36xf32>
    %1370 = arith.addf %1366, %1369 : vector<8x36xf32>
    %1371 = vector.extract_strided_slice %1092 {offsets = [1, 2], sizes = [8, 36], strides = [1, 1]} : vector<10x38xf32> to vector<8x36xf32>
    %1372 = vector.broadcast %241 : f32 to vector<8x36xf32>
    %1373 = arith.mulf %1372, %1371 : vector<8x36xf32>
    %1374 = arith.addf %1370, %1373 : vector<8x36xf32>
    %1375 = vector.extract_strided_slice %1092 {offsets = [2, 0], sizes = [8, 36], strides = [1, 1]} : vector<10x38xf32> to vector<8x36xf32>
    %1376 = vector.broadcast %257 : f32 to vector<8x36xf32>
    %1377 = arith.mulf %1376, %1375 : vector<8x36xf32>
    %1378 = arith.addf %1374, %1377 : vector<8x36xf32>
    %1379 = vector.extract_strided_slice %1092 {offsets = [2, 1], sizes = [8, 36], strides = [1, 1]} : vector<10x38xf32> to vector<8x36xf32>
    %1380 = vector.broadcast %273 : f32 to vector<8x36xf32>
    %1381 = arith.mulf %1380, %1379 : vector<8x36xf32>
    %1382 = arith.addf %1378, %1381 : vector<8x36xf32>
    %1383 = vector.extract_strided_slice %1092 {offsets = [2, 2], sizes = [8, 36], strides = [1, 1]} : vector<10x38xf32> to vector<8x36xf32>
    %1384 = vector.broadcast %289 : f32 to vector<8x36xf32>
    %1385 = arith.mulf %1384, %1383 : vector<8x36xf32>
    %1386 = arith.addf %1382, %1385 : vector<8x36xf32>
    %1387 = vector.broadcast %293 : f32 to vector<8x36xf32>
    %1388 = arith.addf %1386, %1387 : vector<8x36xf32>
    %cst_193 = arith.constant 0.000000e+00 : f32
    %1389 = vector.broadcast %cst_193 : f32 to vector<8x36xf32>
    %1390 = arith.maximumf %1388, %1389 : vector<8x36xf32>
    %cst_194 = arith.constant 0.000000e+00 : f32
    %1391 = vector.broadcast %cst_194 : f32 to vector<8x36xf32>
    %1392 = vector.extract_strided_slice %531 {offsets = [0, 0], sizes = [8, 36], strides = [1, 1]} : vector<10x38xf32> to vector<8x36xf32>
    %1393 = vector.broadcast %150 : f32 to vector<8x36xf32>
    %1394 = arith.mulf %1393, %1392 : vector<8x36xf32>
    %1395 = arith.addf %1391, %1394 : vector<8x36xf32>
    %1396 = vector.extract_strided_slice %531 {offsets = [0, 1], sizes = [8, 36], strides = [1, 1]} : vector<10x38xf32> to vector<8x36xf32>
    %1397 = vector.broadcast %166 : f32 to vector<8x36xf32>
    %1398 = arith.mulf %1397, %1396 : vector<8x36xf32>
    %1399 = arith.addf %1395, %1398 : vector<8x36xf32>
    %1400 = vector.extract_strided_slice %531 {offsets = [0, 2], sizes = [8, 36], strides = [1, 1]} : vector<10x38xf32> to vector<8x36xf32>
    %1401 = vector.broadcast %182 : f32 to vector<8x36xf32>
    %1402 = arith.mulf %1401, %1400 : vector<8x36xf32>
    %1403 = arith.addf %1399, %1402 : vector<8x36xf32>
    %1404 = vector.extract_strided_slice %531 {offsets = [1, 0], sizes = [8, 36], strides = [1, 1]} : vector<10x38xf32> to vector<8x36xf32>
    %1405 = vector.broadcast %198 : f32 to vector<8x36xf32>
    %1406 = arith.mulf %1405, %1404 : vector<8x36xf32>
    %1407 = arith.addf %1403, %1406 : vector<8x36xf32>
    %1408 = vector.extract_strided_slice %531 {offsets = [1, 1], sizes = [8, 36], strides = [1, 1]} : vector<10x38xf32> to vector<8x36xf32>
    %1409 = vector.broadcast %214 : f32 to vector<8x36xf32>
    %1410 = arith.mulf %1409, %1408 : vector<8x36xf32>
    %1411 = arith.addf %1407, %1410 : vector<8x36xf32>
    %1412 = vector.extract_strided_slice %531 {offsets = [1, 2], sizes = [8, 36], strides = [1, 1]} : vector<10x38xf32> to vector<8x36xf32>
    %1413 = vector.broadcast %230 : f32 to vector<8x36xf32>
    %1414 = arith.mulf %1413, %1412 : vector<8x36xf32>
    %1415 = arith.addf %1411, %1414 : vector<8x36xf32>
    %1416 = vector.extract_strided_slice %531 {offsets = [2, 0], sizes = [8, 36], strides = [1, 1]} : vector<10x38xf32> to vector<8x36xf32>
    %1417 = vector.broadcast %246 : f32 to vector<8x36xf32>
    %1418 = arith.mulf %1417, %1416 : vector<8x36xf32>
    %1419 = arith.addf %1415, %1418 : vector<8x36xf32>
    %1420 = vector.extract_strided_slice %531 {offsets = [2, 1], sizes = [8, 36], strides = [1, 1]} : vector<10x38xf32> to vector<8x36xf32>
    %1421 = vector.broadcast %262 : f32 to vector<8x36xf32>
    %1422 = arith.mulf %1421, %1420 : vector<8x36xf32>
    %1423 = arith.addf %1419, %1422 : vector<8x36xf32>
    %1424 = vector.extract_strided_slice %531 {offsets = [2, 2], sizes = [8, 36], strides = [1, 1]} : vector<10x38xf32> to vector<8x36xf32>
    %1425 = vector.broadcast %278 : f32 to vector<8x36xf32>
    %1426 = arith.mulf %1425, %1424 : vector<8x36xf32>
    %1427 = arith.addf %1423, %1426 : vector<8x36xf32>
    %1428 = vector.extract_strided_slice %718 {offsets = [0, 0], sizes = [8, 36], strides = [1, 1]} : vector<10x38xf32> to vector<8x36xf32>
    %1429 = vector.broadcast %154 : f32 to vector<8x36xf32>
    %1430 = arith.mulf %1429, %1428 : vector<8x36xf32>
    %1431 = arith.addf %1427, %1430 : vector<8x36xf32>
    %1432 = vector.extract_strided_slice %718 {offsets = [0, 1], sizes = [8, 36], strides = [1, 1]} : vector<10x38xf32> to vector<8x36xf32>
    %1433 = vector.broadcast %170 : f32 to vector<8x36xf32>
    %1434 = arith.mulf %1433, %1432 : vector<8x36xf32>
    %1435 = arith.addf %1431, %1434 : vector<8x36xf32>
    %1436 = vector.extract_strided_slice %718 {offsets = [0, 2], sizes = [8, 36], strides = [1, 1]} : vector<10x38xf32> to vector<8x36xf32>
    %1437 = vector.broadcast %186 : f32 to vector<8x36xf32>
    %1438 = arith.mulf %1437, %1436 : vector<8x36xf32>
    %1439 = arith.addf %1435, %1438 : vector<8x36xf32>
    %1440 = vector.extract_strided_slice %718 {offsets = [1, 0], sizes = [8, 36], strides = [1, 1]} : vector<10x38xf32> to vector<8x36xf32>
    %1441 = vector.broadcast %202 : f32 to vector<8x36xf32>
    %1442 = arith.mulf %1441, %1440 : vector<8x36xf32>
    %1443 = arith.addf %1439, %1442 : vector<8x36xf32>
    %1444 = vector.extract_strided_slice %718 {offsets = [1, 1], sizes = [8, 36], strides = [1, 1]} : vector<10x38xf32> to vector<8x36xf32>
    %1445 = vector.broadcast %218 : f32 to vector<8x36xf32>
    %1446 = arith.mulf %1445, %1444 : vector<8x36xf32>
    %1447 = arith.addf %1443, %1446 : vector<8x36xf32>
    %1448 = vector.extract_strided_slice %718 {offsets = [1, 2], sizes = [8, 36], strides = [1, 1]} : vector<10x38xf32> to vector<8x36xf32>
    %1449 = vector.broadcast %234 : f32 to vector<8x36xf32>
    %1450 = arith.mulf %1449, %1448 : vector<8x36xf32>
    %1451 = arith.addf %1447, %1450 : vector<8x36xf32>
    %1452 = vector.extract_strided_slice %718 {offsets = [2, 0], sizes = [8, 36], strides = [1, 1]} : vector<10x38xf32> to vector<8x36xf32>
    %1453 = vector.broadcast %250 : f32 to vector<8x36xf32>
    %1454 = arith.mulf %1453, %1452 : vector<8x36xf32>
    %1455 = arith.addf %1451, %1454 : vector<8x36xf32>
    %1456 = vector.extract_strided_slice %718 {offsets = [2, 1], sizes = [8, 36], strides = [1, 1]} : vector<10x38xf32> to vector<8x36xf32>
    %1457 = vector.broadcast %266 : f32 to vector<8x36xf32>
    %1458 = arith.mulf %1457, %1456 : vector<8x36xf32>
    %1459 = arith.addf %1455, %1458 : vector<8x36xf32>
    %1460 = vector.extract_strided_slice %718 {offsets = [2, 2], sizes = [8, 36], strides = [1, 1]} : vector<10x38xf32> to vector<8x36xf32>
    %1461 = vector.broadcast %282 : f32 to vector<8x36xf32>
    %1462 = arith.mulf %1461, %1460 : vector<8x36xf32>
    %1463 = arith.addf %1459, %1462 : vector<8x36xf32>
    %1464 = vector.extract_strided_slice %905 {offsets = [0, 0], sizes = [8, 36], strides = [1, 1]} : vector<10x38xf32> to vector<8x36xf32>
    %1465 = vector.broadcast %158 : f32 to vector<8x36xf32>
    %1466 = arith.mulf %1465, %1464 : vector<8x36xf32>
    %1467 = arith.addf %1463, %1466 : vector<8x36xf32>
    %1468 = vector.extract_strided_slice %905 {offsets = [0, 1], sizes = [8, 36], strides = [1, 1]} : vector<10x38xf32> to vector<8x36xf32>
    %1469 = vector.broadcast %174 : f32 to vector<8x36xf32>
    %1470 = arith.mulf %1469, %1468 : vector<8x36xf32>
    %1471 = arith.addf %1467, %1470 : vector<8x36xf32>
    %1472 = vector.extract_strided_slice %905 {offsets = [0, 2], sizes = [8, 36], strides = [1, 1]} : vector<10x38xf32> to vector<8x36xf32>
    %1473 = vector.broadcast %190 : f32 to vector<8x36xf32>
    %1474 = arith.mulf %1473, %1472 : vector<8x36xf32>
    %1475 = arith.addf %1471, %1474 : vector<8x36xf32>
    %1476 = vector.extract_strided_slice %905 {offsets = [1, 0], sizes = [8, 36], strides = [1, 1]} : vector<10x38xf32> to vector<8x36xf32>
    %1477 = vector.broadcast %206 : f32 to vector<8x36xf32>
    %1478 = arith.mulf %1477, %1476 : vector<8x36xf32>
    %1479 = arith.addf %1475, %1478 : vector<8x36xf32>
    %1480 = vector.extract_strided_slice %905 {offsets = [1, 1], sizes = [8, 36], strides = [1, 1]} : vector<10x38xf32> to vector<8x36xf32>
    %1481 = vector.broadcast %222 : f32 to vector<8x36xf32>
    %1482 = arith.mulf %1481, %1480 : vector<8x36xf32>
    %1483 = arith.addf %1479, %1482 : vector<8x36xf32>
    %1484 = vector.extract_strided_slice %905 {offsets = [1, 2], sizes = [8, 36], strides = [1, 1]} : vector<10x38xf32> to vector<8x36xf32>
    %1485 = vector.broadcast %238 : f32 to vector<8x36xf32>
    %1486 = arith.mulf %1485, %1484 : vector<8x36xf32>
    %1487 = arith.addf %1483, %1486 : vector<8x36xf32>
    %1488 = vector.extract_strided_slice %905 {offsets = [2, 0], sizes = [8, 36], strides = [1, 1]} : vector<10x38xf32> to vector<8x36xf32>
    %1489 = vector.broadcast %254 : f32 to vector<8x36xf32>
    %1490 = arith.mulf %1489, %1488 : vector<8x36xf32>
    %1491 = arith.addf %1487, %1490 : vector<8x36xf32>
    %1492 = vector.extract_strided_slice %905 {offsets = [2, 1], sizes = [8, 36], strides = [1, 1]} : vector<10x38xf32> to vector<8x36xf32>
    %1493 = vector.broadcast %270 : f32 to vector<8x36xf32>
    %1494 = arith.mulf %1493, %1492 : vector<8x36xf32>
    %1495 = arith.addf %1491, %1494 : vector<8x36xf32>
    %1496 = vector.extract_strided_slice %905 {offsets = [2, 2], sizes = [8, 36], strides = [1, 1]} : vector<10x38xf32> to vector<8x36xf32>
    %1497 = vector.broadcast %286 : f32 to vector<8x36xf32>
    %1498 = arith.mulf %1497, %1496 : vector<8x36xf32>
    %1499 = arith.addf %1495, %1498 : vector<8x36xf32>
    %1500 = vector.extract_strided_slice %1092 {offsets = [0, 0], sizes = [8, 36], strides = [1, 1]} : vector<10x38xf32> to vector<8x36xf32>
    %1501 = vector.broadcast %162 : f32 to vector<8x36xf32>
    %1502 = arith.mulf %1501, %1500 : vector<8x36xf32>
    %1503 = arith.addf %1499, %1502 : vector<8x36xf32>
    %1504 = vector.extract_strided_slice %1092 {offsets = [0, 1], sizes = [8, 36], strides = [1, 1]} : vector<10x38xf32> to vector<8x36xf32>
    %1505 = vector.broadcast %178 : f32 to vector<8x36xf32>
    %1506 = arith.mulf %1505, %1504 : vector<8x36xf32>
    %1507 = arith.addf %1503, %1506 : vector<8x36xf32>
    %1508 = vector.extract_strided_slice %1092 {offsets = [0, 2], sizes = [8, 36], strides = [1, 1]} : vector<10x38xf32> to vector<8x36xf32>
    %1509 = vector.broadcast %194 : f32 to vector<8x36xf32>
    %1510 = arith.mulf %1509, %1508 : vector<8x36xf32>
    %1511 = arith.addf %1507, %1510 : vector<8x36xf32>
    %1512 = vector.extract_strided_slice %1092 {offsets = [1, 0], sizes = [8, 36], strides = [1, 1]} : vector<10x38xf32> to vector<8x36xf32>
    %1513 = vector.broadcast %210 : f32 to vector<8x36xf32>
    %1514 = arith.mulf %1513, %1512 : vector<8x36xf32>
    %1515 = arith.addf %1511, %1514 : vector<8x36xf32>
    %1516 = vector.extract_strided_slice %1092 {offsets = [1, 1], sizes = [8, 36], strides = [1, 1]} : vector<10x38xf32> to vector<8x36xf32>
    %1517 = vector.broadcast %226 : f32 to vector<8x36xf32>
    %1518 = arith.mulf %1517, %1516 : vector<8x36xf32>
    %1519 = arith.addf %1515, %1518 : vector<8x36xf32>
    %1520 = vector.extract_strided_slice %1092 {offsets = [1, 2], sizes = [8, 36], strides = [1, 1]} : vector<10x38xf32> to vector<8x36xf32>
    %1521 = vector.broadcast %242 : f32 to vector<8x36xf32>
    %1522 = arith.mulf %1521, %1520 : vector<8x36xf32>
    %1523 = arith.addf %1519, %1522 : vector<8x36xf32>
    %1524 = vector.extract_strided_slice %1092 {offsets = [2, 0], sizes = [8, 36], strides = [1, 1]} : vector<10x38xf32> to vector<8x36xf32>
    %1525 = vector.broadcast %258 : f32 to vector<8x36xf32>
    %1526 = arith.mulf %1525, %1524 : vector<8x36xf32>
    %1527 = arith.addf %1523, %1526 : vector<8x36xf32>
    %1528 = vector.extract_strided_slice %1092 {offsets = [2, 1], sizes = [8, 36], strides = [1, 1]} : vector<10x38xf32> to vector<8x36xf32>
    %1529 = vector.broadcast %274 : f32 to vector<8x36xf32>
    %1530 = arith.mulf %1529, %1528 : vector<8x36xf32>
    %1531 = arith.addf %1527, %1530 : vector<8x36xf32>
    %1532 = vector.extract_strided_slice %1092 {offsets = [2, 2], sizes = [8, 36], strides = [1, 1]} : vector<10x38xf32> to vector<8x36xf32>
    %1533 = vector.broadcast %290 : f32 to vector<8x36xf32>
    %1534 = arith.mulf %1533, %1532 : vector<8x36xf32>
    %1535 = arith.addf %1531, %1534 : vector<8x36xf32>
    %1536 = vector.broadcast %294 : f32 to vector<8x36xf32>
    %1537 = arith.addf %1535, %1536 : vector<8x36xf32>
    %cst_195 = arith.constant 0.000000e+00 : f32
    %1538 = vector.broadcast %cst_195 : f32 to vector<8x36xf32>
    %1539 = arith.maximumf %1537, %1538 : vector<8x36xf32>
    %cst_196 = arith.constant 0.000000e+00 : f32
    %1540 = vector.broadcast %cst_196 : f32 to vector<8x36xf32>
    %1541 = vector.extract_strided_slice %531 {offsets = [0, 0], sizes = [8, 36], strides = [1, 1]} : vector<10x38xf32> to vector<8x36xf32>
    %1542 = vector.broadcast %151 : f32 to vector<8x36xf32>
    %1543 = arith.mulf %1542, %1541 : vector<8x36xf32>
    %1544 = arith.addf %1540, %1543 : vector<8x36xf32>
    %1545 = vector.extract_strided_slice %531 {offsets = [0, 1], sizes = [8, 36], strides = [1, 1]} : vector<10x38xf32> to vector<8x36xf32>
    %1546 = vector.broadcast %167 : f32 to vector<8x36xf32>
    %1547 = arith.mulf %1546, %1545 : vector<8x36xf32>
    %1548 = arith.addf %1544, %1547 : vector<8x36xf32>
    %1549 = vector.extract_strided_slice %531 {offsets = [0, 2], sizes = [8, 36], strides = [1, 1]} : vector<10x38xf32> to vector<8x36xf32>
    %1550 = vector.broadcast %183 : f32 to vector<8x36xf32>
    %1551 = arith.mulf %1550, %1549 : vector<8x36xf32>
    %1552 = arith.addf %1548, %1551 : vector<8x36xf32>
    %1553 = vector.extract_strided_slice %531 {offsets = [1, 0], sizes = [8, 36], strides = [1, 1]} : vector<10x38xf32> to vector<8x36xf32>
    %1554 = vector.broadcast %199 : f32 to vector<8x36xf32>
    %1555 = arith.mulf %1554, %1553 : vector<8x36xf32>
    %1556 = arith.addf %1552, %1555 : vector<8x36xf32>
    %1557 = vector.extract_strided_slice %531 {offsets = [1, 1], sizes = [8, 36], strides = [1, 1]} : vector<10x38xf32> to vector<8x36xf32>
    %1558 = vector.broadcast %215 : f32 to vector<8x36xf32>
    %1559 = arith.mulf %1558, %1557 : vector<8x36xf32>
    %1560 = arith.addf %1556, %1559 : vector<8x36xf32>
    %1561 = vector.extract_strided_slice %531 {offsets = [1, 2], sizes = [8, 36], strides = [1, 1]} : vector<10x38xf32> to vector<8x36xf32>
    %1562 = vector.broadcast %231 : f32 to vector<8x36xf32>
    %1563 = arith.mulf %1562, %1561 : vector<8x36xf32>
    %1564 = arith.addf %1560, %1563 : vector<8x36xf32>
    %1565 = vector.extract_strided_slice %531 {offsets = [2, 0], sizes = [8, 36], strides = [1, 1]} : vector<10x38xf32> to vector<8x36xf32>
    %1566 = vector.broadcast %247 : f32 to vector<8x36xf32>
    %1567 = arith.mulf %1566, %1565 : vector<8x36xf32>
    %1568 = arith.addf %1564, %1567 : vector<8x36xf32>
    %1569 = vector.extract_strided_slice %531 {offsets = [2, 1], sizes = [8, 36], strides = [1, 1]} : vector<10x38xf32> to vector<8x36xf32>
    %1570 = vector.broadcast %263 : f32 to vector<8x36xf32>
    %1571 = arith.mulf %1570, %1569 : vector<8x36xf32>
    %1572 = arith.addf %1568, %1571 : vector<8x36xf32>
    %1573 = vector.extract_strided_slice %531 {offsets = [2, 2], sizes = [8, 36], strides = [1, 1]} : vector<10x38xf32> to vector<8x36xf32>
    %1574 = vector.broadcast %279 : f32 to vector<8x36xf32>
    %1575 = arith.mulf %1574, %1573 : vector<8x36xf32>
    %1576 = arith.addf %1572, %1575 : vector<8x36xf32>
    %1577 = vector.extract_strided_slice %718 {offsets = [0, 0], sizes = [8, 36], strides = [1, 1]} : vector<10x38xf32> to vector<8x36xf32>
    %1578 = vector.broadcast %155 : f32 to vector<8x36xf32>
    %1579 = arith.mulf %1578, %1577 : vector<8x36xf32>
    %1580 = arith.addf %1576, %1579 : vector<8x36xf32>
    %1581 = vector.extract_strided_slice %718 {offsets = [0, 1], sizes = [8, 36], strides = [1, 1]} : vector<10x38xf32> to vector<8x36xf32>
    %1582 = vector.broadcast %171 : f32 to vector<8x36xf32>
    %1583 = arith.mulf %1582, %1581 : vector<8x36xf32>
    %1584 = arith.addf %1580, %1583 : vector<8x36xf32>
    %1585 = vector.extract_strided_slice %718 {offsets = [0, 2], sizes = [8, 36], strides = [1, 1]} : vector<10x38xf32> to vector<8x36xf32>
    %1586 = vector.broadcast %187 : f32 to vector<8x36xf32>
    %1587 = arith.mulf %1586, %1585 : vector<8x36xf32>
    %1588 = arith.addf %1584, %1587 : vector<8x36xf32>
    %1589 = vector.extract_strided_slice %718 {offsets = [1, 0], sizes = [8, 36], strides = [1, 1]} : vector<10x38xf32> to vector<8x36xf32>
    %1590 = vector.broadcast %203 : f32 to vector<8x36xf32>
    %1591 = arith.mulf %1590, %1589 : vector<8x36xf32>
    %1592 = arith.addf %1588, %1591 : vector<8x36xf32>
    %1593 = vector.extract_strided_slice %718 {offsets = [1, 1], sizes = [8, 36], strides = [1, 1]} : vector<10x38xf32> to vector<8x36xf32>
    %1594 = vector.broadcast %219 : f32 to vector<8x36xf32>
    %1595 = arith.mulf %1594, %1593 : vector<8x36xf32>
    %1596 = arith.addf %1592, %1595 : vector<8x36xf32>
    %1597 = vector.extract_strided_slice %718 {offsets = [1, 2], sizes = [8, 36], strides = [1, 1]} : vector<10x38xf32> to vector<8x36xf32>
    %1598 = vector.broadcast %235 : f32 to vector<8x36xf32>
    %1599 = arith.mulf %1598, %1597 : vector<8x36xf32>
    %1600 = arith.addf %1596, %1599 : vector<8x36xf32>
    %1601 = vector.extract_strided_slice %718 {offsets = [2, 0], sizes = [8, 36], strides = [1, 1]} : vector<10x38xf32> to vector<8x36xf32>
    %1602 = vector.broadcast %251 : f32 to vector<8x36xf32>
    %1603 = arith.mulf %1602, %1601 : vector<8x36xf32>
    %1604 = arith.addf %1600, %1603 : vector<8x36xf32>
    %1605 = vector.extract_strided_slice %718 {offsets = [2, 1], sizes = [8, 36], strides = [1, 1]} : vector<10x38xf32> to vector<8x36xf32>
    %1606 = vector.broadcast %267 : f32 to vector<8x36xf32>
    %1607 = arith.mulf %1606, %1605 : vector<8x36xf32>
    %1608 = arith.addf %1604, %1607 : vector<8x36xf32>
    %1609 = vector.extract_strided_slice %718 {offsets = [2, 2], sizes = [8, 36], strides = [1, 1]} : vector<10x38xf32> to vector<8x36xf32>
    %1610 = vector.broadcast %283 : f32 to vector<8x36xf32>
    %1611 = arith.mulf %1610, %1609 : vector<8x36xf32>
    %1612 = arith.addf %1608, %1611 : vector<8x36xf32>
    %1613 = vector.extract_strided_slice %905 {offsets = [0, 0], sizes = [8, 36], strides = [1, 1]} : vector<10x38xf32> to vector<8x36xf32>
    %1614 = vector.broadcast %159 : f32 to vector<8x36xf32>
    %1615 = arith.mulf %1614, %1613 : vector<8x36xf32>
    %1616 = arith.addf %1612, %1615 : vector<8x36xf32>
    %1617 = vector.extract_strided_slice %905 {offsets = [0, 1], sizes = [8, 36], strides = [1, 1]} : vector<10x38xf32> to vector<8x36xf32>
    %1618 = vector.broadcast %175 : f32 to vector<8x36xf32>
    %1619 = arith.mulf %1618, %1617 : vector<8x36xf32>
    %1620 = arith.addf %1616, %1619 : vector<8x36xf32>
    %1621 = vector.extract_strided_slice %905 {offsets = [0, 2], sizes = [8, 36], strides = [1, 1]} : vector<10x38xf32> to vector<8x36xf32>
    %1622 = vector.broadcast %191 : f32 to vector<8x36xf32>
    %1623 = arith.mulf %1622, %1621 : vector<8x36xf32>
    %1624 = arith.addf %1620, %1623 : vector<8x36xf32>
    %1625 = vector.extract_strided_slice %905 {offsets = [1, 0], sizes = [8, 36], strides = [1, 1]} : vector<10x38xf32> to vector<8x36xf32>
    %1626 = vector.broadcast %207 : f32 to vector<8x36xf32>
    %1627 = arith.mulf %1626, %1625 : vector<8x36xf32>
    %1628 = arith.addf %1624, %1627 : vector<8x36xf32>
    %1629 = vector.extract_strided_slice %905 {offsets = [1, 1], sizes = [8, 36], strides = [1, 1]} : vector<10x38xf32> to vector<8x36xf32>
    %1630 = vector.broadcast %223 : f32 to vector<8x36xf32>
    %1631 = arith.mulf %1630, %1629 : vector<8x36xf32>
    %1632 = arith.addf %1628, %1631 : vector<8x36xf32>
    %1633 = vector.extract_strided_slice %905 {offsets = [1, 2], sizes = [8, 36], strides = [1, 1]} : vector<10x38xf32> to vector<8x36xf32>
    %1634 = vector.broadcast %239 : f32 to vector<8x36xf32>
    %1635 = arith.mulf %1634, %1633 : vector<8x36xf32>
    %1636 = arith.addf %1632, %1635 : vector<8x36xf32>
    %1637 = vector.extract_strided_slice %905 {offsets = [2, 0], sizes = [8, 36], strides = [1, 1]} : vector<10x38xf32> to vector<8x36xf32>
    %1638 = vector.broadcast %255 : f32 to vector<8x36xf32>
    %1639 = arith.mulf %1638, %1637 : vector<8x36xf32>
    %1640 = arith.addf %1636, %1639 : vector<8x36xf32>
    %1641 = vector.extract_strided_slice %905 {offsets = [2, 1], sizes = [8, 36], strides = [1, 1]} : vector<10x38xf32> to vector<8x36xf32>
    %1642 = vector.broadcast %271 : f32 to vector<8x36xf32>
    %1643 = arith.mulf %1642, %1641 : vector<8x36xf32>
    %1644 = arith.addf %1640, %1643 : vector<8x36xf32>
    %1645 = vector.extract_strided_slice %905 {offsets = [2, 2], sizes = [8, 36], strides = [1, 1]} : vector<10x38xf32> to vector<8x36xf32>
    %1646 = vector.broadcast %287 : f32 to vector<8x36xf32>
    %1647 = arith.mulf %1646, %1645 : vector<8x36xf32>
    %1648 = arith.addf %1644, %1647 : vector<8x36xf32>
    %1649 = vector.extract_strided_slice %1092 {offsets = [0, 0], sizes = [8, 36], strides = [1, 1]} : vector<10x38xf32> to vector<8x36xf32>
    %1650 = vector.broadcast %163 : f32 to vector<8x36xf32>
    %1651 = arith.mulf %1650, %1649 : vector<8x36xf32>
    %1652 = arith.addf %1648, %1651 : vector<8x36xf32>
    %1653 = vector.extract_strided_slice %1092 {offsets = [0, 1], sizes = [8, 36], strides = [1, 1]} : vector<10x38xf32> to vector<8x36xf32>
    %1654 = vector.broadcast %179 : f32 to vector<8x36xf32>
    %1655 = arith.mulf %1654, %1653 : vector<8x36xf32>
    %1656 = arith.addf %1652, %1655 : vector<8x36xf32>
    %1657 = vector.extract_strided_slice %1092 {offsets = [0, 2], sizes = [8, 36], strides = [1, 1]} : vector<10x38xf32> to vector<8x36xf32>
    %1658 = vector.broadcast %195 : f32 to vector<8x36xf32>
    %1659 = arith.mulf %1658, %1657 : vector<8x36xf32>
    %1660 = arith.addf %1656, %1659 : vector<8x36xf32>
    %1661 = vector.extract_strided_slice %1092 {offsets = [1, 0], sizes = [8, 36], strides = [1, 1]} : vector<10x38xf32> to vector<8x36xf32>
    %1662 = vector.broadcast %211 : f32 to vector<8x36xf32>
    %1663 = arith.mulf %1662, %1661 : vector<8x36xf32>
    %1664 = arith.addf %1660, %1663 : vector<8x36xf32>
    %1665 = vector.extract_strided_slice %1092 {offsets = [1, 1], sizes = [8, 36], strides = [1, 1]} : vector<10x38xf32> to vector<8x36xf32>
    %1666 = vector.broadcast %227 : f32 to vector<8x36xf32>
    %1667 = arith.mulf %1666, %1665 : vector<8x36xf32>
    %1668 = arith.addf %1664, %1667 : vector<8x36xf32>
    %1669 = vector.extract_strided_slice %1092 {offsets = [1, 2], sizes = [8, 36], strides = [1, 1]} : vector<10x38xf32> to vector<8x36xf32>
    %1670 = vector.broadcast %243 : f32 to vector<8x36xf32>
    %1671 = arith.mulf %1670, %1669 : vector<8x36xf32>
    %1672 = arith.addf %1668, %1671 : vector<8x36xf32>
    %1673 = vector.extract_strided_slice %1092 {offsets = [2, 0], sizes = [8, 36], strides = [1, 1]} : vector<10x38xf32> to vector<8x36xf32>
    %1674 = vector.broadcast %259 : f32 to vector<8x36xf32>
    %1675 = arith.mulf %1674, %1673 : vector<8x36xf32>
    %1676 = arith.addf %1672, %1675 : vector<8x36xf32>
    %1677 = vector.extract_strided_slice %1092 {offsets = [2, 1], sizes = [8, 36], strides = [1, 1]} : vector<10x38xf32> to vector<8x36xf32>
    %1678 = vector.broadcast %275 : f32 to vector<8x36xf32>
    %1679 = arith.mulf %1678, %1677 : vector<8x36xf32>
    %1680 = arith.addf %1676, %1679 : vector<8x36xf32>
    %1681 = vector.extract_strided_slice %1092 {offsets = [2, 2], sizes = [8, 36], strides = [1, 1]} : vector<10x38xf32> to vector<8x36xf32>
    %1682 = vector.broadcast %291 : f32 to vector<8x36xf32>
    %1683 = arith.mulf %1682, %1681 : vector<8x36xf32>
    %1684 = arith.addf %1680, %1683 : vector<8x36xf32>
    %1685 = vector.broadcast %295 : f32 to vector<8x36xf32>
    %1686 = arith.addf %1684, %1685 : vector<8x36xf32>
    %cst_197 = arith.constant 0.000000e+00 : f32
    %1687 = vector.broadcast %cst_197 : f32 to vector<8x36xf32>
    %1688 = arith.maximumf %1686, %1687 : vector<8x36xf32>
    %cst_198 = arith.constant 0.000000e+00 : f32
    %1689 = vector.broadcast %cst_198 : f32 to vector<8x36xf32>
    %1690 = vector.broadcast %296 : f32 to vector<8x36xf32>
    %1691 = arith.mulf %1690, %1241 : vector<8x36xf32>
    %1692 = arith.addf %1689, %1691 : vector<8x36xf32>
    %1693 = vector.broadcast %300 : f32 to vector<8x36xf32>
    %1694 = arith.mulf %1693, %1390 : vector<8x36xf32>
    %1695 = arith.addf %1692, %1694 : vector<8x36xf32>
    %1696 = vector.broadcast %304 : f32 to vector<8x36xf32>
    %1697 = arith.mulf %1696, %1539 : vector<8x36xf32>
    %1698 = arith.addf %1695, %1697 : vector<8x36xf32>
    %1699 = vector.broadcast %308 : f32 to vector<8x36xf32>
    %1700 = arith.mulf %1699, %1688 : vector<8x36xf32>
    %1701 = arith.addf %1698, %1700 : vector<8x36xf32>
    %1702 = vector.broadcast %312 : f32 to vector<8x36xf32>
    %1703 = arith.addf %1701, %1702 : vector<8x36xf32>
    %1704 = vector.extract_strided_slice %318 {offsets = [0, 2, 2], sizes = [1, 8, 36], strides = [1, 1, 1]} : vector<4x12x40xf32> to vector<1x8x36xf32>
    %1705 = vector.shape_cast %1704 : vector<1x8x36xf32> to vector<8x36xf32>
    %1706 = arith.addf %1703, %1705 : vector<8x36xf32>
    %cst_199 = arith.constant 0.000000e+00 : f32
    %1707 = vector.broadcast %cst_199 : f32 to vector<8x36xf32>
    %1708 = arith.maximumf %1706, %1707 : vector<8x36xf32>
    %1709 = vector.extract_strided_slice %1708 {offsets = [0, 0], sizes = [8, 16], strides = [1, 1]} : vector<8x36xf32> to vector<8x16xf32>
    %1710 = vector.extract_strided_slice %1708 {offsets = [0, 20], sizes = [8, 16], strides = [1, 1]} : vector<8x36xf32> to vector<8x16xf32>
    %1711 = tpu.concatenate %1709, %1710 in 1 : vector<8x16xf32>, vector<8x16xf32> -> vector<8x32xf32>
    %c0_200 = arith.constant 0 : index
    %c0_201 = arith.constant 0 : index
    %c0_202 = arith.constant 0 : index
    %c0_203 = arith.constant 0 : index
    %1712 = vector.load %arg9[%c0_200, %c0_201, %c0_202, %c0_203] : memref<1x4x8x32xf32, #tpu.memory_space<vmem>>, vector<1x1x8x32xf32>
    %1713 = vector.shape_cast %1712 : vector<1x1x8x32xf32> to vector<8x32xf32>
    %1714 = vector.shape_cast %1711 : vector<8x32xf32> to vector<1x1x8x32xf32>
    tpu.vector_store %arg9[%c0_200, %c0_201, %c0_202, %c0_203], %1714 {strides = array<i32>} : memref<1x4x8x32xf32, #tpu.memory_space<vmem>>, vector<1x1x8x32xf32>,
    %cst_204 = arith.constant 0.000000e+00 : f32
    %1715 = vector.broadcast %cst_204 : f32 to vector<8x36xf32>
    %1716 = vector.broadcast %297 : f32 to vector<8x36xf32>
    %1717 = arith.mulf %1716, %1241 : vector<8x36xf32>
    %1718 = arith.addf %1715, %1717 : vector<8x36xf32>
    %1719 = vector.broadcast %301 : f32 to vector<8x36xf32>
    %1720 = arith.mulf %1719, %1390 : vector<8x36xf32>
    %1721 = arith.addf %1718, %1720 : vector<8x36xf32>
    %1722 = vector.broadcast %305 : f32 to vector<8x36xf32>
    %1723 = arith.mulf %1722, %1539 : vector<8x36xf32>
    %1724 = arith.addf %1721, %1723 : vector<8x36xf32>
    %1725 = vector.broadcast %309 : f32 to vector<8x36xf32>
    %1726 = arith.mulf %1725, %1688 : vector<8x36xf32>
    %1727 = arith.addf %1724, %1726 : vector<8x36xf32>
    %1728 = vector.broadcast %313 : f32 to vector<8x36xf32>
    %1729 = arith.addf %1727, %1728 : vector<8x36xf32>
    %1730 = vector.extract_strided_slice %318 {offsets = [1, 2, 2], sizes = [1, 8, 36], strides = [1, 1, 1]} : vector<4x12x40xf32> to vector<1x8x36xf32>
    %1731 = vector.shape_cast %1730 : vector<1x8x36xf32> to vector<8x36xf32>
    %1732 = arith.addf %1729, %1731 : vector<8x36xf32>
    %cst_205 = arith.constant 0.000000e+00 : f32
    %1733 = vector.broadcast %cst_205 : f32 to vector<8x36xf32>
    %1734 = arith.maximumf %1732, %1733 : vector<8x36xf32>
    %1735 = vector.extract_strided_slice %1734 {offsets = [0, 0], sizes = [8, 16], strides = [1, 1]} : vector<8x36xf32> to vector<8x16xf32>
    %1736 = vector.extract_strided_slice %1734 {offsets = [0, 20], sizes = [8, 16], strides = [1, 1]} : vector<8x36xf32> to vector<8x16xf32>
    %1737 = tpu.concatenate %1735, %1736 in 1 : vector<8x16xf32>, vector<8x16xf32> -> vector<8x32xf32>
    %c0_206 = arith.constant 0 : index
    %c1_207 = arith.constant 1 : index
    %c0_208 = arith.constant 0 : index
    %c0_209 = arith.constant 0 : index
    %1738 = vector.load %arg9[%c0_206, %c1_207, %c0_208, %c0_209] : memref<1x4x8x32xf32, #tpu.memory_space<vmem>>, vector<1x1x8x32xf32>
    %1739 = vector.shape_cast %1738 : vector<1x1x8x32xf32> to vector<8x32xf32>
    %1740 = vector.shape_cast %1737 : vector<8x32xf32> to vector<1x1x8x32xf32>
    tpu.vector_store %arg9[%c0_206, %c1_207, %c0_208, %c0_209], %1740 {strides = array<i32>} : memref<1x4x8x32xf32, #tpu.memory_space<vmem>>, vector<1x1x8x32xf32>,
    %cst_210 = arith.constant 0.000000e+00 : f32
    %1741 = vector.broadcast %cst_210 : f32 to vector<8x36xf32>
    %1742 = vector.broadcast %298 : f32 to vector<8x36xf32>
    %1743 = arith.mulf %1742, %1241 : vector<8x36xf32>
    %1744 = arith.addf %1741, %1743 : vector<8x36xf32>
    %1745 = vector.broadcast %302 : f32 to vector<8x36xf32>
    %1746 = arith.mulf %1745, %1390 : vector<8x36xf32>
    %1747 = arith.addf %1744, %1746 : vector<8x36xf32>
    %1748 = vector.broadcast %306 : f32 to vector<8x36xf32>
    %1749 = arith.mulf %1748, %1539 : vector<8x36xf32>
    %1750 = arith.addf %1747, %1749 : vector<8x36xf32>
    %1751 = vector.broadcast %310 : f32 to vector<8x36xf32>
    %1752 = arith.mulf %1751, %1688 : vector<8x36xf32>
    %1753 = arith.addf %1750, %1752 : vector<8x36xf32>
    %1754 = vector.broadcast %314 : f32 to vector<8x36xf32>
    %1755 = arith.addf %1753, %1754 : vector<8x36xf32>
    %1756 = vector.extract_strided_slice %318 {offsets = [2, 2, 2], sizes = [1, 8, 36], strides = [1, 1, 1]} : vector<4x12x40xf32> to vector<1x8x36xf32>
    %1757 = vector.shape_cast %1756 : vector<1x8x36xf32> to vector<8x36xf32>
    %1758 = arith.addf %1755, %1757 : vector<8x36xf32>
    %cst_211 = arith.constant 0.000000e+00 : f32
    %1759 = vector.broadcast %cst_211 : f32 to vector<8x36xf32>
    %1760 = arith.maximumf %1758, %1759 : vector<8x36xf32>
    %1761 = vector.extract_strided_slice %1760 {offsets = [0, 0], sizes = [8, 16], strides = [1, 1]} : vector<8x36xf32> to vector<8x16xf32>
    %1762 = vector.extract_strided_slice %1760 {offsets = [0, 20], sizes = [8, 16], strides = [1, 1]} : vector<8x36xf32> to vector<8x16xf32>
    %1763 = tpu.concatenate %1761, %1762 in 1 : vector<8x16xf32>, vector<8x16xf32> -> vector<8x32xf32>
    %c0_212 = arith.constant 0 : index
    %c2_213 = arith.constant 2 : index
    %c0_214 = arith.constant 0 : index
    %c0_215 = arith.constant 0 : index
    %1764 = vector.load %arg9[%c0_212, %c2_213, %c0_214, %c0_215] : memref<1x4x8x32xf32, #tpu.memory_space<vmem>>, vector<1x1x8x32xf32>
    %1765 = vector.shape_cast %1764 : vector<1x1x8x32xf32> to vector<8x32xf32>
    %1766 = vector.shape_cast %1763 : vector<8x32xf32> to vector<1x1x8x32xf32>
    tpu.vector_store %arg9[%c0_212, %c2_213, %c0_214, %c0_215], %1766 {strides = array<i32>} : memref<1x4x8x32xf32, #tpu.memory_space<vmem>>, vector<1x1x8x32xf32>,
    %cst_216 = arith.constant 0.000000e+00 : f32
    %1767 = vector.broadcast %cst_216 : f32 to vector<8x36xf32>
    %1768 = vector.broadcast %299 : f32 to vector<8x36xf32>
    %1769 = arith.mulf %1768, %1241 : vector<8x36xf32>
    %1770 = arith.addf %1767, %1769 : vector<8x36xf32>
    %1771 = vector.broadcast %303 : f32 to vector<8x36xf32>
    %1772 = arith.mulf %1771, %1390 : vector<8x36xf32>
    %1773 = arith.addf %1770, %1772 : vector<8x36xf32>
    %1774 = vector.broadcast %307 : f32 to vector<8x36xf32>
    %1775 = arith.mulf %1774, %1539 : vector<8x36xf32>
    %1776 = arith.addf %1773, %1775 : vector<8x36xf32>
    %1777 = vector.broadcast %311 : f32 to vector<8x36xf32>
    %1778 = arith.mulf %1777, %1688 : vector<8x36xf32>
    %1779 = arith.addf %1776, %1778 : vector<8x36xf32>
    %1780 = vector.broadcast %315 : f32 to vector<8x36xf32>
    %1781 = arith.addf %1779, %1780 : vector<8x36xf32>
    %1782 = vector.extract_strided_slice %318 {offsets = [3, 2, 2], sizes = [1, 8, 36], strides = [1, 1, 1]} : vector<4x12x40xf32> to vector<1x8x36xf32>
    %1783 = vector.shape_cast %1782 : vector<1x8x36xf32> to vector<8x36xf32>
    %1784 = arith.addf %1781, %1783 : vector<8x36xf32>
    %cst_217 = arith.constant 0.000000e+00 : f32
    %1785 = vector.broadcast %cst_217 : f32 to vector<8x36xf32>
    %1786 = arith.maximumf %1784, %1785 : vector<8x36xf32>
    %1787 = vector.extract_strided_slice %1786 {offsets = [0, 0], sizes = [8, 16], strides = [1, 1]} : vector<8x36xf32> to vector<8x16xf32>
    %1788 = vector.extract_strided_slice %1786 {offsets = [0, 20], sizes = [8, 16], strides = [1, 1]} : vector<8x36xf32> to vector<8x16xf32>
    %1789 = tpu.concatenate %1787, %1788 in 1 : vector<8x16xf32>, vector<8x16xf32> -> vector<8x32xf32>
    %c0_218 = arith.constant 0 : index
    %c3_219 = arith.constant 3 : index
    %c0_220 = arith.constant 0 : index
    %c0_221 = arith.constant 0 : index
    %1790 = vector.load %arg9[%c0_218, %c3_219, %c0_220, %c0_221] : memref<1x4x8x32xf32, #tpu.memory_space<vmem>>, vector<1x1x8x32xf32>
    %1791 = vector.shape_cast %1790 : vector<1x1x8x32xf32> to vector<8x32xf32>
    %1792 = vector.shape_cast %1789 : vector<8x32xf32> to vector<1x1x8x32xf32>
    tpu.vector_store %arg9[%c0_218, %c3_219, %c0_220, %c0_221], %1792 {strides = array<i32>} : memref<1x4x8x32xf32, #tpu.memory_space<vmem>>, vector<1x1x8x32xf32>,
    return
  }
  func.func @transform_0(%arg0: i32, %arg1: i32) -> (i32, i32, i32, i32, i32) {
    %c0_i32 = arith.constant 0 : i32
    %c0_i32_0 = arith.constant 0 : i32
    %c0_i32_1 = arith.constant 0 : i32
    %c0_i32_2 = arith.constant 0 : i32
    return %arg0, %arg1, %c0_i32, %c0_i32_0, %c0_i32_1 : i32, i32, i32, i32, i32
  }
  func.func @transform_1(%arg0: i32, %arg1: i32) -> i32 {
    %c0_i32 = arith.constant 0 : i32
    %c0_i32_0 = arith.constant 0 : i32
    return %c0_i32 : i32
  }
  func.func @transform_2(%arg0: i32, %arg1: i32) -> i32 {
    %c0_i32 = arith.constant 0 : i32
    %c0_i32_0 = arith.constant 0 : i32
    return %c0_i32 : i32
  }
  func.func @transform_3(%arg0: i32, %arg1: i32) -> i32 {
    %c0_i32 = arith.constant 0 : i32
    %c0_i32_0 = arith.constant 0 : i32
    return %c0_i32 : i32
  }
  func.func @transform_4(%arg0: i32, %arg1: i32) -> i32 {
    %c0_i32 = arith.constant 0 : i32
    %c0_i32_0 = arith.constant 0 : i32
    return %c0_i32 : i32
  }
  func.func @transform_5(%arg0: i32, %arg1: i32) -> i32 {
    %c0_i32 = arith.constant 0 : i32
    %c0_i32_0 = arith.constant 0 : i32
    return %c0_i32 : i32
  }
  func.func @transform_6(%arg0: i32, %arg1: i32) -> i32 {
    %c0_i32 = arith.constant 0 : i32
    %c0_i32_0 = arith.constant 0 : i32
    return %c0_i32 : i32
  }
  func.func @transform_7(%arg0: i32, %arg1: i32) -> (i32, i32, i32, i32) {
    %c0_i32 = arith.constant 0 : i32
    %c0_i32_0 = arith.constant 0 : i32
    %c0_i32_1 = arith.constant 0 : i32
    return %arg0, %c0_i32, %arg1, %c0_i32_0 : i32, i32, i32, i32
  }
}

</mosaic_0001>

<bundles_post_ra>
// kernel: tpu_custom_call.1
= control target key start
LH: loop header
LB: loop body
LE: loop exit
PB: predicated region body
PF: predicated region fallthrough
CT: control target
= control target key end

     0   :  { %s7937_s0 = inlined_call_operand.vmem [shape: bf16[1,2,4,12,40], index: 0, kind: input, shape index: {}]   ;;  %s7938_s1 = inlined_call_operand.vmem [shape: f32[144], index: 1, kind: input, shape index: {}]   ;;  %s7939_s2 = inlined_call_operand.vmem [shape: f32[4], index: 2, kind: input, shape index: {}]   ;;  %s7940_s3 = inlined_call_operand.vmem [shape: f32[144], index: 3, kind: input, shape index: {}]   ;;  %s7941_s4 = inlined_call_operand.vmem [shape: f32[4], index: 4, kind: input, shape index: {}]   ;;  %s7942_s5 = inlined_call_operand.vmem [shape: f32[16], index: 5, kind: input, shape index: {}]   ;;  %s7943_s6 = inlined_call_operand.vmem [shape: f32[4], index: 6, kind: input, shape index: {}]   ;;  %s7944_s7 = inlined_call_operand.hbm [shape: f32[1,4,16,32], index: 7, kind: output, shape index: {}]  }
   0x1   :  { %7954 = sst [smem:[#allocation70_spill]] %s7937_s0 }
   0x2   :  { %7955 = sst [smem:[#allocation71_spill]] %s7938_s1 }
   0x3   :  { %7956 = sst [smem:[#allocation72_spill]] %s7939_s2 }
   0x4   :  { %7957 = sst [smem:[#allocation73_spill]] %s7941_s4 }
   0x5   :  { %12 = vsyncpa [#allocation4], 0 }
   0x6   :  { %13 = vsyncpa [#allocation6], 0 }
   0x7   :  { %14 = vsyncpa [#allocation9], 0 }
   0x8   :  { %15 = vsyncpa [#allocation12], 0 }
   0x9   :  { %16 = vsyncpa [#allocation3], 0 }
   0xa   :  { %18 = vsyncpa [#allocation3 + $0x1], 0  ;;  %s5040_s24 = smov 0   ;;  %s5042_s25 = smov 0  }
   0xb   :  { %s5044_s26 = smov 0   ;;  %s5046_s27 = smov 0  }
   0xc   :  { %s5048_s28 = smov 0   ;;  %s5050_s29 = smov 0  }
   0xd LB: > { %s4330_s30 = sadd.s32 4294967295, %s4986_s29   ;;  %s4331_s8 = sadd.s32 4294967294, %s4986_s29   ;;  %s4986_s29 = sphi %s5050_s29, %s24_s29   ;;  %s4982_s28 = sphi %s5048_s28, %s8123_s28   ;;  %s4978_s27 = sphi %s5046_s27, %s8122_s27   ;;  %s4974_s26 = sphi %s5044_s26, %s8121_s26   ;;  %s4970_s25 = sphi %s5042_s25, %s8120_s25   ;;  %s4966_s24 = sphi %s5040_s24, %s8119_s24  }
   0xe   : > { %s33_s9 = sadd.s32 1, %s4982_s28  ;;  %s199_s10 = sadd.s32 1, %s4974_s26 }
   0xf   : > { %p34_p0 = scmp.ge.s32.totalorder %s33_s9, 2  ;;  %p209_p1 = scmp.ne.s32.totalorder %s4974_s26, %s4970_s25 }
  0x10   : > { %p210_p2 = scmp.eq.s32.totalorder %s4330_s30, 1  ;;  %p215_p3 = scmp.ne.s32.totalorder %s4970_s25, %s4966_s24 }
  0x11   : > { %s8125_s9 = smov (%p34_p0, %s33_s9), 0  ;;  %p216_p5 = scmp.eq.s32.totalorder %s4331_s8, 1 }
  0x12   : > { %p5080_p4 = por %p210_p2, %p209_p1  ;;  %s195_s12 = ssub.s32 %s4982_s28, %s8125_s9 }
  0x13   : > { %p4332_p6 = scmp.ge.s32.totalorder %s4986_s29, 1  ;;  %p197_p7 = scmp.eq.s32.totalorder %s195_s12, 0 }
  0x14   : > { %p5087_p8 = por %p216_p5, %p215_p3  ;;  %p223_p9 = scmp.lt.s32.totalorder %s4986_s29, 3 }
  0x15   : > { %s5093_s14 = scalar_select %p197_p7, %s4974_s26, %s199_s10  }
  0x16   : > { %p5095_p10 = pnand %p4332_p6, %p223_p9  ;;  %p5099_p11 = scmp.eq.s32.totalorder %s4330_s30, 0 }
  0x17   : > { %s7962_s2 = sld [smem:[#allocation72_spill]]  ;;  %s4988_s12 = smov [#allocation5]  }
  0x18   : > { %p4696_p12 = pneg %p5095_p10  ;;  %s7963_s4 = sld [smem:[#allocation73_spill]] }
  0x19   : > { %s7965_s1 = sld [smem:[#allocation71_spill]]  ;;  %s4989_s17 = smov [#allocation8]  }
  0x1a   : > { %p5113_p13 = pnand %p5099_p11, %p4696_p12  ;;  %s4990_s18 = smov [#allocation2]  }
  0x1b   : > { %s275_s8 = sshll.u32 %s7942_s5, 4  ;;  %s276_s8 = int_to_ptr.vmem [resolvable:$true] %s275_s8 }
  0x1d   : > { %s245_s19 = sshll.u32 %s7962_s2, 4  ;;  %s255_s2 = sshll.u32 %s7940_s3, 4  ;;  %s246_s19 = int_to_ptr.vmem [resolvable:$true] %s245_s19  ;;  %s256_s2 = int_to_ptr.vmem [resolvable:$true] %s255_s2 }
  0x1e   : > { %s265_s22 = sshll.u32 %s7963_s4, 4  ;;  %s266_s22 = int_to_ptr.vmem [resolvable:$true] %s265_s22 }
  0x1f   : > { %s235_s10 = sshll.u32 %s7965_s1, 4  ;;  %s4991_s1 = smov [#allocation7]   ;;  %s236_s10 = int_to_ptr.vmem [resolvable:$true] %s235_s10 }
  0x20   : > { %4702 = dma.vmem_to_smem (!%p5113_p13), %s246_s19, 16, %s4988_s12, [#allocation6]  }
  0x21   : > { %4708 = dma.vmem_to_smem (!%p5113_p13), %s266_s22, 16, %s4989_s17, [#allocation9]  }
  0x22   : > { %4699 = dma.vmem_to_smem (!%p5113_p13), %s236_s10, 32, %s4990_s18, [#allocation4]  }
  0x23   : > { %4705 = dma.vmem_to_smem (!%p5113_p13), %s256_s2, 32, %s4991_s1, [#allocation6]  }
  0x24   : > { %s4992_s19 = smov [#allocation10]   ;;  %s285_s10 = sshll.u32 %s7943_s6, 4  ;;  %s286_s10 = int_to_ptr.vmem [resolvable:$true] %s285_s10 }
  0x25   : > { %4711 = dma.vmem_to_smem (!%p5113_p13), %s276_s8, 16, %s4992_s19, [#allocation9]  }
  0x26   : > { %s4993_s17 = smov [#allocation11]   ;;  %310 = sbr.rel (%p5095_p10) target bundleno = 1153 (0x481), region = 48 }
  0x27   : > { %4714 = dma.vmem_to_smem (!%p5113_p13), %s286_s10, 16, %s4993_s17, [#allocation12]  }
  0x2b   : > { %4945 = dma.done.wait (%p5099_p11), [#allocation4], 32  }
  0x2c   : > { %4947 = vsyncadd (%p5099_p11), [#allocation4], 4294967264 }
  0x2d   : > { %4949 = dma.done.wait (%p5099_p11), [#allocation6], 48  }
  0x2e   : > { %4951 = vsyncadd (%p5099_p11), [#allocation6], 4294967248 }
  0x2f   : > { %4953 = dma.done.wait (%p5099_p11), [#allocation9], 32  }
  0x30   : > { %4955 = vsyncadd (%p5099_p11), [#allocation9], 4294967264 }
  0x31   : > { %4957 = dma.done.wait (%p5099_p11), [#allocation12], 16  }
  0x32   : > { %4959 = vsyncadd (%p5099_p11), [#allocation12], 4294967280 }
  0x33   : > { %342 = sfence }
  0x34   : > { %p375_p0 = scmp.lt.s32.totalorder %s4978_s27, 1  ;;  %s4381_s1 = sld [smem:[#allocation2 + $0x20]]  ;;  %vm777_vm0 = vcmask 1046528   ;;  %vm822_vm1 = vcmask 1045504  }
  0x35   : > { %s4365_s2 = sld [smem:[#allocation2 + $0x10]]  ;;  %s7952_s8 = smov 126  }
  0x36   : > { %s376_s4 = scalar_select %p375_p0, %s4978_s27, 1 }
  0x37   : > { %s4413_s15 = sld [smem:[#allocation2 + $0x40]]  ;;  %s7950_s19 = smov 127  }
  0x38   : > { %s4669_s23 = sshll.u32 %s376_s4, 5  ;;  %s7966_s0 = sld [smem:[#allocation70_spill]] }
  0x39   : > { %s4429_s30 = sld [smem:[#allocation2 + $0x50]] }
  0x3a   : > { %v759_v2 = vstv %s4381_s1  ;;  %s4461_s16 = sld [smem:[#allocation2 + $0x70]] }
  0x3b   : > { %v746_v5 = vstv %s4365_s2  ;;  %s4477_s22 = sld [smem:[#allocation2 + $0x80]] }
  0x3c   : > { %s4369_s12 = sld [smem:[#allocation2 + $0x14]] }
  0x3d   : > { %v785_v8 = vstv %s4413_s15  ;;  %s4417_s10 = sld [smem:[#allocation2 + $0x44]] }
  0x3e   : > { %s5164_s21 = scalar_lea.vmem %s7966_s0, %s4669_s23  ;;  %s4385_s17 = sld [smem:[#allocation2 + $0x24]] }
  0x3f   : > { %v698_v0 = vld [vmem:[%s5164_s21] sm:$0xf]  ;;  %v699_v1 = vld [vmem:[%s5164_s21 + $0x4] sm:$0x3]  ;;  %v801_v12 = vstv %s4429_s30  ;;  %v701_v34 = vld [vmem:[%s5164_s21 + $0xc] sm:$0x3] }
  0x40   : > { %v5168_v3 = vunpack.c.l.bf16 %v698_v0  ;;  %v5170_v4 = vunpack.c.l.bf16 %v699_v1  ;;  %v830_v18 = vstv %s4461_s16  ;;  %v700_v35 = vld [vmem:[%s5164_s21 + $0x8] sm:$0xf]  ;;  %v5201_v36 = vunpack.c.l.bf16 %v701_v34  ;;  %s4433_s1 = sld [smem:[#allocation2 + $0x54]] }
  0x41   : > { %v846_v24 = vstv %s4477_s22  ;;  %v5203_v37 = vunpack.c.l.bf16 %v700_v35  ;;  %s4465_s2 = sld [smem:[#allocation2 + $0x74]] }
  0x42   : > { %7967 = vst [vmem:[#allocation19_spill] sm:$0xff] %v5168_v3  ;;  %v760_v6 = vmul.f32 %v759_v2, %v5168_v3  ;;  %v747_v7 = vmul.f32 %v746_v5, %v5168_v3  ;;  %v787_v9 = vmul.f32 %v785_v8, %v5170_v4  ;;  %v786_v10 = vmul.f32 %v785_v8, %v5168_v3  ;;  %s4481_s4 = sld [smem:[#allocation2 + $0x84]] }
  0x43   : > { %7968 = vst [vmem:[#allocation20_spill] sm:$0xff] %v5170_v4  ;;  %v761_v13 = vmul.f32 %v759_v2, %v5170_v4  ;;  %v748_v14 = vmul.f32 %v746_v5, %v5170_v4  ;;  %v802_v16 = vmul.f32 %v801_v12, %v5168_v3  ;;  %v803_v17 = vmul.f32 %v801_v12, %v5170_v4  ;;  %s4373_s15 = sld [smem:[#allocation2 + $0x18]] }
  0x44   : > { %764 = vrot.lane.b32.xlu1 %v760_v6, %s7952_s8  ;;  %751 = vrot.lane.b32.xlu0 %v747_v7, %s7950_s19  ;;  %v791_v11 = vrot.slane %v787_v9, 1  ;;  %v790_v15 = vrot.slane %v786_v10, 1  ;;  %v831_v19 = vmul.f32 %v830_v18, %v5168_v3  ;;  %v832_v20 = vmul.f32 %v830_v18, %v5170_v4  ;;  %s4421_s23 = sld [smem:[#allocation2 + $0x48]]  ;;  %v703_v6 = vld [vmem:[%s5164_s21 + $0x14] sm:$0x3] }
  0x45   : > { %v807_v22 = vrot.slane %v803_v17, 1  ;;  %v806_v23 = vrot.slane %v802_v16, 1  ;;  %v847_v25 = vmul.f32 %v846_v24, %v5168_v3  ;;  %v848_v29 = vmul.f32 %v846_v24, %v5170_v4  ;;  %v702_v7 = vld [vmem:[%s5164_s21 + $0x10] sm:$0xf]  ;;  %s4389_s18 = sld [smem:[#allocation2 + $0x28]] }
  0x46   : > { %795 = vrot.lane.b32.xlu2 %v791_v11, %s7950_s19  ;;  %v792_v21 = vsel %vm777_vm0, %v790_v15, %v791_v11  ;;  %v835_v27 = vrot.slane %v831_v19, 2  ;;  %v836_v28 = vrot.slane %v832_v20, 2  ;;  %v867_v38 = vstv %s4369_s12  ;;  %s4437_s20 = sld [smem:[#allocation2 + $0x58]] }
  0x47   : > { %v808_v26 = vsel %vm777_vm0, %v806_v23, %v807_v22  ;;  %v851_v31 = vrot.slane %v847_v25, 2  ;;  %v852_v32 = vrot.slane %v848_v29, 2  ;;  %v905_v39 = vstv %s4417_s10  ;;  %s4469_s30 = sld [smem:[#allocation2 + $0x78]] }
  0x48   : > { %v837_v30 = vsel %vm822_vm1, %v835_v27, %v836_v28  ;;  %v869_v40 = vmul.f32 %v867_v38, %v5201_v36  ;;  %v868_v41 = vmul.f32 %v867_v38, %v5203_v37  ;;  %v880_v42 = vstv %s4385_s17  ;;  %s4485_s16 = sld [smem:[#allocation2 + $0x88]] }
  0x49   : > { %v853_v33 = vsel %vm822_vm1, %v851_v31, %v852_v32  ;;  %v906_v43 = vmul.f32 %v905_v39, %v5203_v37  ;;  %v907_v44 = vmul.f32 %v905_v39, %v5201_v36  ;;  %v881_v45 = vmul.f32 %v880_v42, %v5203_v37  ;;  %s4377_s22 = sld [smem:[#allocation2 + $0x1c]] }
  0x4a   : > { %v921_v48 = vstv %s4433_s1  ;;  %v882_v49 = vmul.f32 %v880_v42, %v5201_v36  ;;  %v949_v53 = vstv %s4465_s2  ;;  %v965_v58 = vstv %s4481_s4  ;;  %s4425_s12 = sld [smem:[#allocation2 + $0x4c]]  ;;  %v705_v42 = vld [vmem:[%s5164_s21 + $0x1c] sm:$0x3] }
  0x4b   : > { %v910_v46 = vrot.slane %v906_v43, 1  ;;  %v911_v47 = vrot.slane %v907_v44, 1  ;;  %v922_v50 = vmul.f32 %v921_v48, %v5203_v37  ;;  %v923_v51 = vmul.f32 %v921_v48, %v5201_v36  ;;  %v704_v43 = vld [vmem:[%s5164_s21 + $0x18] sm:$0xf]  ;;  %s4393_s10 = sld [smem:[#allocation2 + $0x2c]] }
  0x4c   : > { %766 = vrot.lane.b32.xlu1 %v761_v13, %s7952_s8  ;;  %753 = vrot.lane.b32.xlu0 %v748_v14, %s7950_s19  ;;  %v950_v56 = vmul.f32 %v949_v53, %v5203_v37  ;;  %v951_v57 = vmul.f32 %v949_v53, %v5201_v36  ;;  %v966_v62 = vmul.f32 %v965_v58, %v5203_v37  ;;  %v5235_v8 = vunpack.c.l.bf16 %v703_v6  ;;  %s4441_s17 = sld [smem:[#allocation2 + $0x5c]] }
  0x4d   : > { %v912_v52 = vsel %vm777_vm0, %v910_v46, %v911_v47  ;;  %v927_v54 = vrot.slane %v923_v51, 1  ;;  %v926_v55 = vrot.slane %v922_v50, 1  ;;  %v967_v63 = vmul.f32 %v965_v58, %v5201_v36  ;;  %s4473_s21 = sld [smem:[#allocation2 + $0x7c]] }
  0x4e   : > { %793 = vrot.lane.b32.xlu2 %v792_v21, %s7950_s19  ;;  %v954_v60 = vrot.slane %v950_v56, 2  ;;  %v955_v61 = vrot.slane %v951_v57, 2  ;;  %v970_v1 = vrot.slane %v966_v62, 2  ;;  %v5237_v9 = vunpack.c.l.bf16 %v702_v7  ;;  %s4489_s1 = sld [smem:[#allocation2 + $0x8c]] }
  0x4f   : > { %v928_v59 = vsel %vm777_vm0, %v926_v55, %v927_v54  ;;  %v971_v2 = vrot.slane %v967_v63, 2  ;;  %v986_v10 = vstv %s4373_s15  ;;  %v1024_v11 = vstv %s4421_s23  ;;  %s4366_s2 = sld [smem:[#allocation2 + $0x11]] }
  0x50   : > { %v956_v0 = vsel %vm822_vm1, %v954_v60, %v955_v61  ;;  %v988_v12 = vmul.f32 %v986_v10, %v5235_v8  ;;  %v987_v13 = vmul.f32 %v986_v10, %v5237_v9  ;;  %v999_v14 = vstv %s4389_s18  ;;  %s4414_s4 = sld [smem:[#allocation2 + $0x41]] }
  0x51   : > { %v972_v5 = vsel %vm822_vm1, %v970_v1, %v971_v2  ;;  %v1025_v15 = vmul.f32 %v1024_v11, %v5237_v9  ;;  %v1026_v16 = vmul.f32 %v1024_v11, %v5235_v8  ;;  %v1000_v17 = vmul.f32 %v999_v14, %v5237_v9  ;;  %s4382_s15 = sld [smem:[#allocation2 + $0x21]] }
  0x52   : > { %v1040_v20 = vstv %s4437_s20  ;;  %v1001_v21 = vmul.f32 %v999_v14, %v5235_v8  ;;  %v1068_v25 = vstv %s4469_s30  ;;  %v5269_v44 = vunpack.c.l.bf16 %v705_v42  ;;  %s4430_s23 = sld [smem:[#allocation2 + $0x51]] }
  0x53   : > { %v1029_v18 = vrot.slane %v1025_v15, 1  ;;  %v1030_v19 = vrot.slane %v1026_v16, 1  ;;  %v1042_v23 = vmul.f32 %v1040_v20, %v5235_v8  ;;  %v1070_v29 = vmul.f32 %v1068_v25, %v5235_v8  ;;  %s4462_s18 = sld [smem:[#allocation2 + $0x71]] }
  0x54   : > { %811 = vrot.lane.b32.xlu1 %v807_v22, %s7952_s8  ;;  %809 = vrot.lane.b32.xlu0 %v808_v26, %s7952_s8  ;;  %v1041_v22 = vmul.f32 %v1040_v20, %v5237_v9  ;;  %v1105_v46 = vstv %s4377_s22  ;;  %v1118_v50 = vstv %s4393_s10  ;;  %s4478_s20 = sld [smem:[#allocation2 + $0x81]] }
  0x55   : > { %v1031_v24 = vsel %vm777_vm0, %v1029_v18, %v1030_v19  ;;  %v1046_v26 = vrot.slane %v1042_v23, 1  ;;  %v1107_v48 = vmul.f32 %v1105_v46, %v5269_v44  ;;  %v1159_v57 = vstv %s4441_s17  ;;  %s4370_s30 = sld [smem:[#allocation2 + $0x15]] }
  0x56   : > { %838 = vrot.lane.b32.xlu2 %v837_v30, %s7950_s19  ;;  %v1045_v27 = vrot.slane %v1041_v22, 1  ;;  %v1084_v30 = vstv %s4485_s16  ;;  %v1120_v58 = vmul.f32 %v1118_v50, %v5269_v44  ;;  %v1161_v60 = vmul.f32 %v1159_v57, %v5269_v44  ;;  %s4418_s16 = sld [smem:[#allocation2 + $0x45]] }
  0x57   : > { %v1085_v34 = vmul.f32 %v1084_v30, %v5237_v9  ;;  %v1086_v35 = vmul.f32 %v1084_v30, %v5235_v8  ;;  %v1187_v63 = vstv %s4473_s21  ;;  %v1203_v6 = vstv %s4489_s1  ;;  %s4386_s22 = sld [smem:[#allocation2 + $0x25]] }
  0x58   : > { %v1047_v31 = vsel %vm777_vm0, %v1045_v27, %v1046_v26  ;;  %v1231_v22 = vstv %s4366_s2  ;;  %s4466_s10 = sld [smem:[#allocation2 + $0x75]] }
  0x59   : > { %v1089_v39 = vrot.slane %v1085_v34, 2  ;;  %v1232_v27 = vmul.f32 %v1231_v22, %v5168_v3  ;;  %s4482_s17 = sld [smem:[#allocation2 + $0x85]] }
  0x5a   : > { %s4374_s21 = sld [smem:[#allocation2 + $0x19]] }
  0x5b   : > { %s4422_s1 = sld [smem:[#allocation2 + $0x49]] }
  0x5c   : > { %854 = vrot.lane.b32.xlu1 %v853_v33, %s7952_s8  ;;  %840 = vrot.lane.b32.xlu0 %v836_v28, %s7950_s19  ;;  %v1069_v28 = vmul.f32 %v1068_v25, %v5237_v9  ;;  %v1074_v33 = vrot.slane %v1070_v29, 2  ;;  %v1269_v25 = vstv %s4414_s4  ;;  %s4390_s2 = sld [smem:[#allocation2 + $0x29]] }
  0x5d   : > { %v1270_v29 = vmul.f32 %v1269_v25, %v5168_v3  ;;  %v1271_v30 = vmul.f32 %v1269_v25, %v5170_v4  ;;  %s4438_s4 = sld [smem:[#allocation2 + $0x59]] }
  0x5e   : > { %856 = vrot.lane.b32.xlu2 %v852_v32, %s7952_s8  ;;  %v1073_v32 = vrot.slane %v1069_v28, 2  ;;  %v1244_v28 = vstv %s4382_s15  ;;  %s4470_s15 = sld [smem:[#allocation2 + $0x79]] }
  0x5f   : > { %v1275_v34 = vrot.slane %v1271_v30, 1  ;;  %s7158_s0 = sld [smem:[#allocation7 + $0x8d]] }
  0x60   : > { %v1075_v38 = vsel %vm822_vm1, %v1073_v32, %v1074_v33  ;;  %v1245_v32 = vmul.f32 %v1244_v28, %v5168_v3 }
  0x64   : > { %874 = vrot.lane.b32.xlu1 %v869_v40, %s7950_s19  ;;  %872 = vrot.lane.b32.xlu0 %v868_v41, %s7950_s19  ;;  %v1090_v40 = vrot.slane %v1086_v35, 2  ;;  %v1285_v35 = vstv %s4430_s23  ;;  %s4486_s23 = sld [smem:[#allocation2 + $0x89]] }
  0x65   : > { %v1287_v42 = vmul.f32 %v1285_v35, %v5170_v4 }
  0x66   : > { %885 = vrot.lane.b32.xlu2 %v881_v45, %s7952_s8  ;;  %v1091_v41 = vsel %vm822_vm1, %v1089_v39, %v1090_v40  ;;  %v5271_v45 = vunpack.c.l.bf16 %v704_v43 }
  0x6c   : > { %913 = vrot.lane.b32.xlu1 %v912_v52, %s7950_s19  ;;  %887 = vrot.lane.b32.xlu0 %v882_v49, %s7952_s8  ;;  %v1106_v49 = vmul.f32 %v1105_v46, %v5271_v45 }
  0x6e   : > { %915 = vrot.lane.b32.xlu2 %v911_v47, %s7950_s19  ;;  %v1143_v47 = vstv %s4425_s12  ;;  %s4434_s12 = sld [smem:[#allocation2 + $0x55]] }
  0x6f   : > { %v1144_v51 = vmul.f32 %v1143_v47, %v5271_v45  ;;  %v1145_v52 = vmul.f32 %v1143_v47, %v5269_v44  ;;  %v1313_v47 = vstv %s4462_s18  ;;  %s4378_s18 = sld [smem:[#allocation2 + $0x1d]] }
  0x71   : > { %v1148_v55 = vrot.slane %v1144_v51, 1  ;;  %v1149_v56 = vrot.slane %v1145_v52, 1  ;;  %v1315_v51 = vmul.f32 %v1313_v47, %v5170_v4 }
  0x74   : > { %931 = vrot.lane.b32.xlu1 %v927_v54, %s7952_s8  ;;  %929 = vrot.lane.b32.xlu0 %v928_v59, %s7952_s8  ;;  %v1119_v54 = vmul.f32 %v1118_v50, %v5271_v45  ;;  %v1160_v59 = vmul.f32 %v1159_v57, %v5271_v45  ;;  %v1314_v50 = vmul.f32 %v1313_v47, %v5168_v3 }
  0x76   : > { %957 = vrot.lane.b32.xlu2 %v956_v0, %s7950_s19  ;;  %v1165_v0 = vrot.slane %v1161_v60, 1  ;;  %v1164_v1 = vrot.slane %v1160_v59, 1  ;;  %v1318_v57 = vrot.slane %v1314_v50, 2 }
  0x78   : > { %v1166_v7 = vsel %vm777_vm0, %v1164_v1, %v1165_v0 }
  0x7c   : > { %973 = vrot.lane.b32.xlu1 %v972_v5, %s7952_s8  ;;  %959 = vrot.lane.b32.xlu0 %v955_v61, %s7950_s19  ;;  %v1150_v61 = vsel %vm777_vm0, %v1148_v55, %v1149_v56  ;;  %v1189_v5 = vmul.f32 %v1187_v63, %v5269_v44  ;;  %v1329_v55 = vstv %s4478_s20  ;;  %s4426_s20 = sld [smem:[#allocation2 + $0x4d]] }
  0x7d   : > { %v1330_v59 = vmul.f32 %v1329_v55, %v5168_v3  ;;  %v1331_v60 = vmul.f32 %v1329_v55, %v5170_v4  ;;  %v1448_v55 = vstv %s4482_s17  ;;  %s4415_s17 = sld [smem:[#allocation2 + $0x42]] }
  0x7e   : > { %975 = vrot.lane.b32.xlu2 %v971_v2, %s7952_s8  ;;  %v1188_v2 = vmul.f32 %v1187_v63, %v5271_v45  ;;  %v1193_v11 = vrot.slane %v1189_v5, 2 }
  0x7f   : > { %v1335_v1 = vrot.slane %v1331_v60, 2  ;;  %v1450_v60 = vmul.f32 %v1448_v55, %v5201_v36 }
  0x80   : > { %v1192_v10 = vrot.slane %v1188_v2, 2 }
  0x82   : > { %v1194_v15 = vsel %vm822_vm1, %v1192_v10, %v1193_v11  ;;  %v1350_v10 = vstv %s4370_s30  ;;  %s4394_s30 = sld [smem:[#allocation2 + $0x2d]] }
  0x84   : > { %993 = vrot.lane.b32.xlu1 %v988_v12, %s7950_s19  ;;  %991 = vrot.lane.b32.xlu0 %v987_v13, %s7950_s19  ;;  %v1204_v12 = vmul.f32 %v1203_v6, %v5271_v45  ;;  %v1205_v13 = vmul.f32 %v1203_v6, %v5269_v44 }
  0x86   : > { %1004 = vrot.lane.b32.xlu2 %v1000_v17, %s7952_s8  ;;  %v1208_v16 = vrot.slane %v1204_v12, 2  ;;  %v1209_v17 = vrot.slane %v1205_v13, 2  ;;  %v1388_v13 = vstv %s4418_s16  ;;  %s4442_s16 = sld [smem:[#allocation2 + $0x5d]] }
  0x88   : > { %v1210_v20 = vsel %vm822_vm1, %v1208_v16, %v1209_v17  ;;  %v1351_v16 = vmul.f32 %v1350_v10, %v5203_v37 }
  0x8c   : > { %1032 = vrot.lane.b32.xlu1 %v1031_v24, %s7950_s19  ;;  %1006 = vrot.lane.b32.xlu0 %v1001_v21, %s7952_s8 }
  0x8e   : > { %1034 = vrot.lane.b32.xlu2 %v1030_v19, %s7950_s19 }
  0x94   : > { %1050 = vrot.lane.b32.xlu1 %v1046_v26, %s7952_s8  ;;  %1048 = vrot.lane.b32.xlu0 %v1047_v31, %s7952_s8  ;;  %v1233_v26 = vmul.f32 %v1231_v22, %v5170_v4  ;;  %v1390_v22 = vmul.f32 %v1388_v13, %v5201_v36 }
  0x96   : > { %1076 = vrot.lane.b32.xlu2 %v1075_v38, %s7950_s19 }
  0x9c   : > { %1092 = vrot.lane.b32.xlu1 %v1091_v41, %s7952_s8  ;;  %1078 = vrot.lane.b32.xlu0 %v1074_v33, %s7950_s19  ;;  %v1274_v33 = vrot.slane %v1270_v29, 1  ;;  %v1286_v41 = vmul.f32 %v1285_v35, %v5168_v3  ;;  %v1404_v29 = vstv %s4434_s12  ;;  %s4490_s12 = sld [smem:[#allocation2 + $0x8d]] }
  0x9d   : > { %v1406_v35 = vmul.f32 %v1404_v29, %v5201_v36 }
  0x9e   : > { %1094 = vrot.lane.b32.xlu2 %v1090_v40, %s7952_s8  ;;  %v1246_v40 = vmul.f32 %v1244_v28, %v5170_v4  ;;  %v1276_v43 = vsel %vm777_vm0, %v1274_v33, %v1275_v34  ;;  %v1394_v28 = vrot.slane %v1390_v22, 1 }
  0xa0   : > { %v5278_v53 = vpop.permute.xlu2 %795 }
  0xa4   : > { %1112 = vrot.lane.b32.xlu1 %v1107_v48, %s7950_s19  ;;  %1110 = vrot.lane.b32.xlu0 %v1106_v49, %s7950_s19  ;;  %v1291_v48 = vrot.slane %v1287_v42, 1  ;;  %v1290_v49 = vrot.slane %v1286_v41, 1  ;;  %v1432_v42 = vstv %s4466_s10  ;;  %s4367_s10 = sld [smem:[#allocation2 + $0x12]] }
  0xa6   : > { %1123 = vrot.lane.b32.xlu2 %v1119_v54, %s7952_s8 }
  0xa8   : > { %v5288_v62 = vpop.permute.xlu2 %793 }
  0xac   : > { %1151 = vrot.lane.b32.xlu1 %v1150_v61, %s7950_s19  ;;  %1125 = vrot.lane.b32.xlu0 %v1120_v58, %s7952_s8  ;;  %v1319_v58 = vrot.slane %v1315_v51, 2 }
  0xae   : > { %1153 = vrot.lane.b32.xlu2 %v1149_v56, %s7950_s19  ;;  %v1292_v56 = vsel %vm777_vm0, %v1290_v49, %v1291_v48  ;;  %v1320_v63 = vsel %vm822_vm1, %v1318_v57, %v1319_v58  ;;  %v1434_v49 = vmul.f32 %v1432_v42, %v5201_v36 }
  0xb0   : > { %v5298_v14 = vpop.permute.xlu2 %838 }
  0xb4   : > { %1169 = vrot.lane.b32.xlu1 %v1165_v0, %s7952_s8  ;;  %1167 = vrot.lane.b32.xlu0 %v1166_v7, %s7952_s8  ;;  %v1334_v0 = vrot.slane %v1330_v59, 2  ;;  %v1449_v59 = vmul.f32 %v1448_v55, %v5203_v37 }
  0xb6   : > { %v5303_v18 = vpop.permute.xlu1 %764  ;;  %v5305_v19 = vpop.permute.xlu0 %751  ;;  %1195 = vrot.lane.b32.xlu2 %v1194_v15, %s7950_s19  ;;  %v1336_v6 = vsel %vm822_vm1, %v1334_v0, %v1335_v1  ;;  %v1352_v15 = vmul.f32 %v1350_v10, %v5201_v36 }
  0xb8   : > { %v5309_v21 = vpop.permute.xlu2 %856 }
  0xbc   : > { %1211 = vrot.lane.b32.xlu1 %v1210_v20, %s7952_s8  ;;  %1197 = vrot.lane.b32.xlu0 %v1193_v11, %s7950_s19  ;;  %v1389_v20 = vmul.f32 %v1388_v13, %v5203_v37 }
  0xbe   : > { %v5313_v23 = vpop.permute.xlu1 %766  ;;  %v5315_v24 = vpop.permute.xlu0 %753  ;;  %1213 = vrot.lane.b32.xlu2 %v1209_v17, %s7952_s8  ;;  %v1363_v17 = vstv %s4386_s22  ;;  %s4474_s22 = sld [smem:[#allocation2 + $0x7d]] }
  0xbf   : > { %v1365_v33 = vmul.f32 %v1363_v17, %v5201_v36 }
  0xc0   : > { %v5322_v31 = vpop.permute.xlu2 %885 }
  0xc4   : > { %1238 = vrot.lane.b32.xlu1 %v1233_v26, %s7950_s19  ;;  %1236 = vrot.lane.b32.xlu0 %v1232_v27, %s7950_s19  ;;  %v1364_v26 = vmul.f32 %v1363_v17, %v5203_v37  ;;  %v1393_v27 = vrot.slane %v1389_v20, 1  ;;  %v1469_v17 = vstv %s4374_s21  ;;  %s4383_s21 = sld [smem:[#allocation2 + $0x22]] }
  0xc6   : > { %v5327_v38 = vpop.permute.xlu1 %811  ;;  %v5329_v39 = vpop.permute.xlu0 %809  ;;  %1249 = vrot.lane.b32.xlu2 %v1245_v32, %s7952_s8 }
  0xc8   : > { %v5336_v46 = vpop.permute.xlu2 %915 }
  0xcc   : > { %1277 = vrot.lane.b32.xlu1 %v1276_v43, %s7950_s19  ;;  %1251 = vrot.lane.b32.xlu0 %v1246_v40, %s7952_s8  ;;  %v1395_v40 = vsel %vm777_vm0, %v1393_v27, %v1394_v28  ;;  %v1410_v43 = vrot.slane %v1406_v35, 1  ;;  %v1471_v27 = vmul.f32 %v1469_v17, %v5235_v8 }
  0xce   : > { %v5342_v52 = vpop.permute.xlu1 %854  ;;  %v5344_v54 = vpop.permute.xlu0 %840  ;;  %1279 = vrot.lane.b32.xlu2 %v1275_v34, %s7950_s19  ;;  %v1405_v34 = vmul.f32 %v1404_v29, %v5203_v37  ;;  %v1482_v29 = vstv %s4390_s2  ;;  %s4463_s2 = sld [smem:[#allocation2 + $0x72]] }
  0xcf   : > { %v1484_v55 = vmul.f32 %v1482_v29, %v5235_v8 }
  0xd0   : > { %v5350_v61 = vpop.permute.xlu2 %957  ;;  %v1409_v47 = vrot.slane %v1405_v34, 1 }
  0xd4   : > { %1295 = vrot.lane.b32.xlu1 %v1291_v48, %s7952_s8  ;;  %1293 = vrot.lane.b32.xlu0 %v1292_v56, %s7952_s8  ;;  %v1433_v48 = vmul.f32 %v1432_v42, %v5203_v37  ;;  %v1411_v56 = vsel %vm777_vm0, %v1409_v47, %v1410_v43  ;;  %v1523_v47 = vstv %s4438_s4  ;;  %s4479_s4 = sld [smem:[#allocation2 + $0x82]] }
  0xd6   : > { %v5355_v2 = vpop.permute.xlu1 %874  ;;  %v5357_v5 = vpop.permute.xlu0 %872  ;;  %1321 = vrot.lane.b32.xlu2 %v1320_v63, %s7950_s19  ;;  %v1437_v57 = vrot.slane %v1433_v48, 2 }
  0xd8   : > { %v5361_v7 = vpop.permute.xlu2 %975 }
  0xdc   : > { %1337 = vrot.lane.b32.xlu1 %v1336_v6, %s7952_s8  ;;  %1323 = vrot.lane.b32.xlu0 %v1319_v58, %s7950_s19  ;;  %v1438_v58 = vrot.slane %v1434_v49, 2  ;;  %v1454_v6 = vrot.slane %v1450_v60, 2  ;;  %v1551_v60 = vstv %s4470_s15  ;;  %s4371_s15 = sld [smem:[#allocation2 + $0x16]] }
  0xde   : > { %v5365_v11 = vpop.permute.xlu1 %913  ;;  %v5367_v12 = vpop.permute.xlu0 %887  ;;  %1339 = vrot.lane.b32.xlu2 %v1335_v1, %s7952_s8  ;;  %v1439_v0 = vsel %vm822_vm1, %v1437_v57, %v1438_v58  ;;  %v1453_v1 = vrot.slane %v1449_v59, 2  ;;  %v1525_v57 = vmul.f32 %v1523_v47, %v5235_v8 }
  0xe0   : > { %v5374_v25 = vpop.permute.xlu2 %1004 }
  0xe4   : > { %1357 = vrot.lane.b32.xlu1 %v1352_v15, %s7950_s19  ;;  %1355 = vrot.lane.b32.xlu0 %v1351_v16, %s7950_s19  ;;  %v1455_v15 = vsel %vm822_vm1, %v1453_v1, %v1454_v6 }
  0xe6   : > { %v5379_v30 = vpop.permute.xlu1 %931  ;;  %v5381_v32 = vpop.permute.xlu0 %929  ;;  %1368 = vrot.lane.b32.xlu2 %v1364_v26, %s7952_s8  ;;  %v1507_v26 = vstv %s4422_s1  ;;  %s4431_s1 = sld [smem:[#allocation2 + $0x52]] }
  0xe7   : > { %v1509_v34 = vmul.f32 %v1507_v26, %v5235_v8 }
  0xe8   : > { %v5388_v41 = vpop.permute.xlu2 %1034 }
  0xe9   : > { %7969 = vst [vmem:[#allocation21_spill] sm:$0xff] %v5388_v41 }
  0xec   : > { %1396 = vrot.lane.b32.xlu1 %v1395_v40, %s7950_s19  ;;  %1370 = vrot.lane.b32.xlu0 %v1365_v33, %s7952_s8  ;;  %v1508_v33 = vmul.f32 %v1507_v26, %v5237_v9  ;;  %v1483_v40 = vmul.f32 %v1482_v29, %v5237_v9 }
  0xee   : > { %v5394_v50 = vpop.permute.xlu1 %973  ;;  %v5396_v51 = vpop.permute.xlu0 %959  ;;  %1398 = vrot.lane.b32.xlu2 %v1394_v28, %s7950_s19  ;;  %v1470_v28 = vmul.f32 %v1469_v17, %v5237_v9  ;;  %v1512_v42 = vrot.slane %v1508_v33, 1 }
  0xf0   : > { %v5402_v63 = vpop.permute.xlu2 %1076 }
  0xf1   : > { %7970 = vst [vmem:[#allocation22_spill] sm:$0xff] %v5402_v63 }
  0xf4   : > { %1414 = vrot.lane.b32.xlu1 %v1410_v43, %s7952_s8  ;;  %1412 = vrot.lane.b32.xlu0 %v1411_v56, %s7952_s8  ;;  %v1513_v43 = vrot.slane %v1509_v34, 1  ;;  %v1524_v56 = vmul.f32 %v1523_v47, %v5237_v9 }
  0xf6   : > { %v5407_v10 = vpop.permute.xlu1 %993  ;;  %v5409_v13 = vpop.permute.xlu0 %991  ;;  %1440 = vrot.lane.b32.xlu2 %v1439_v0, %s7950_s19  ;;  %v1529_v0 = vrot.slane %v1525_v57, 1  ;;  %v1528_v1 = vrot.slane %v1524_v56, 1 }
  0xf7   : > { %7971 = vst [vmem:[#allocation23_spill] sm:$0xff] %v5407_v10 }
  0xf8   : > { %v5413_v16 = vpop.permute.xlu2 %1094 }
  0xf9   : > { %7972 = vst [vmem:[#allocation24_spill] sm:$0xff] %v5413_v16 }
  0xfc   : > { %1456 = vrot.lane.b32.xlu1 %v1455_v15, %s7952_s8  ;;  %1442 = vrot.lane.b32.xlu0 %v1438_v58, %s7950_s19  ;;  %v1514_v58 = vsel %vm777_vm0, %v1512_v42, %v1513_v43  ;;  %v1553_v15 = vmul.f32 %v1551_v60, %v5235_v8 }
  0xfe   : > { %v5417_v20 = vpop.permute.xlu1 %1032  ;;  %v5419_v22 = vpop.permute.xlu0 %1006  ;;  %1458 = vrot.lane.b32.xlu2 %v1454_v6, %s7952_s8  ;;  %v1552_v6 = vmul.f32 %v1551_v60, %v5237_v9  ;;  %v1557_v33 = vrot.slane %v1553_v15, 2  ;;  %v1626_v15 = vstv %s4426_s20  ;;  %s4435_s20 = sld [smem:[#allocation2 + $0x56]] }
  0xff   : > { %7973 = vst [vmem:[#allocation25_spill] sm:$0xff] %v5417_v20 }
 0x100   : > { %7974 = vst [vmem:[#allocation26_spill] sm:$0xff] %v5419_v22  ;;  %v5426_v35 = vpop.permute.xlu2 %1123  ;;  %v1556_v29 = vrot.slane %v1552_v6, 2 }
 0x101   : > { %7975 = vst [vmem:[#allocation27_spill] sm:$0xff] %v5426_v35 }
 0x102   : > { %v1558_v47 = vsel %vm822_vm1, %v1556_v29, %v1557_v33  ;;  %v1601_v29 = vstv %s4394_s30  ;;  %s4467_s30 = sld [smem:[#allocation2 + $0x76]] }
 0x104   : > { %1476 = vrot.lane.b32.xlu1 %v1471_v27, %s7950_s19  ;;  %1474 = vrot.lane.b32.xlu0 %v1470_v28, %s7950_s19  ;;  %v1567_v27 = vstv %s4486_s23  ;;  %v1530_v28 = vsel %vm777_vm0, %v1528_v1, %v1529_v0  ;;  %s4419_s23 = sld [smem:[#allocation2 + $0x46]] }
 0x105   : > { %v1568_v34 = vmul.f32 %v1567_v27, %v5237_v9 }
 0x106   : > { %v5431_v48 = vpop.permute.xlu1 %1050  ;;  %v5433_v49 = vpop.permute.xlu0 %1048  ;;  %1487 = vrot.lane.b32.xlu2 %v1483_v40, %s7952_s8  ;;  %v1569_v40 = vmul.f32 %v1567_v27, %v5235_v8 }
 0x107   : > { %7976 = vst [vmem:[#allocation28_spill] sm:$0xff] %v5431_v48 }
 0x108   : > { %7977 = vst [vmem:[#allocation29_spill] sm:$0xff] %v5433_v49  ;;  %v5440_v59 = vpop.permute.xlu2 %1153  ;;  %v1573_v56 = vrot.slane %v1569_v40, 2  ;;  %v1628_v40 = vmul.f32 %v1626_v15, %v5269_v44 }
 0x109   : > { %7978 = vst [vmem:[#allocation30_spill] sm:$0xff] %v5440_v59 }
 0x10c   : > { %1515 = vrot.lane.b32.xlu1 %v1514_v58, %s7950_s19  ;;  %1489 = vrot.lane.b32.xlu0 %v1484_v55, %s7952_s8  ;;  %v1572_v55 = vrot.slane %v1568_v34, 2  ;;  %v1627_v34 = vmul.f32 %v1626_v15, %v5271_v45  ;;  %v1603_v15 = vmul.f32 %v1601_v29, %v5269_v44 }
 0x10e   : > { %v5446_v17 = vpop.permute.xlu1 %1092  ;;  %v5448_v26 = vpop.permute.xlu0 %1078  ;;  %1517 = vrot.lane.b32.xlu2 %v1513_v43, %s7950_s19  ;;  %v1574_v58 = vsel %vm822_vm1, %v1572_v55, %v1573_v56  ;;  %v1631_v55 = vrot.slane %v1627_v34, 1  ;;  %v1670_v34 = vstv %s4474_s22  ;;  %s382_s22 = sld [smem:[#allocation2]] }
 0x10f   : > { %7979 = vst [vmem:[#allocation31_spill] sm:$0xff] %v5446_v17 }
 0x110   : > { %7980 = vst [vmem:[#allocation32_spill] sm:$0xff] %v5448_v26  ;;  %v5454_v42 = vpop.permute.xlu2 %1195 }
 0x111   : > { %7981 = vst [vmem:[#allocation33_spill] sm:$0xff] %v5454_v42 }
 0x114   : > { %1533 = vrot.lane.b32.xlu1 %v1529_v0, %s7952_s8  ;;  %1531 = vrot.lane.b32.xlu0 %v1530_v28, %s7952_s8  ;;  %v1588_v0 = vstv %s4378_s18  ;;  %s4387_s18 = sld [smem:[#allocation2 + $0x26]] }
 0x115   : > { %v1590_v27 = vmul.f32 %v1588_v0, %v5269_v44  ;;  %v1589_v28 = vmul.f32 %v1588_v0, %v5271_v45 }
 0x116   : > { %v5459_v43 = vpop.permute.xlu1 %1112  ;;  %v5461_v57 = vpop.permute.xlu0 %1110  ;;  %1559 = vrot.lane.b32.xlu2 %v1558_v47, %s7950_s19 }
 0x117   : > { %7982 = vst [vmem:[#allocation34_spill] sm:$0xff] %v5459_v43 }
 0x118   : > { %7983 = vst [vmem:[#allocation35_spill] sm:$0xff] %v5461_v57  ;;  %v5465_v60 = vpop.permute.xlu2 %1213  ;;  %v1768_v57 = vstv %s4431_s1  ;;  %s5627_s1 = sld [smem:[#allocation2 + $0x5a]] }
 0x119   : > { %7984 = vst [vmem:[#allocation36_spill] sm:$0xff] %v5465_v60  ;;  %v1769_v26 = vmul.f32 %v1768_v57, %v5168_v3 }
 0x11b   : > { %v1773_v63 = vrot.slane %v1769_v26, 1 }
 0x11c   : > { %1575 = vrot.lane.b32.xlu1 %v1574_v58, %s7952_s8  ;;  %1561 = vrot.lane.b32.xlu0 %v1557_v33, %s7950_s19  ;;  %v1602_v33 = vmul.f32 %v1601_v29, %v5271_v45  ;;  %v1642_v58 = vstv %s4442_s16  ;;  %s4483_s16 = sld [smem:[#allocation2 + $0x86]] }
 0x11d   : > { %v1643_v42 = vmul.f32 %v1642_v58, %v5271_v45 }
 0x11e   : > { %v5469_v1 = vpop.permute.xlu1 %1151  ;;  %v5471_v6 = vpop.permute.xlu0 %1125  ;;  %1577 = vrot.lane.b32.xlu2 %v1573_v56, %s7952_s8  ;;  %v1632_v56 = vrot.slane %v1628_v40, 1  ;;  %v2006_v10 = vstv %s5627_s1  ;;  %s5765_s1 = sld [smem:[#allocation2 + $0x8e]] }
 0x11f   : > { %7985 = vst [vmem:[#allocation37_spill] sm:$0xff] %v5469_v1 }
 0x120   : > { %7986 = vst [vmem:[#allocation38_spill] sm:$0xff] %v5471_v6  ;;  %v5478_v47 = vpop.permute.xlu2 %1249 }
 0x124   : > { %1595 = vrot.lane.b32.xlu1 %v1590_v27, %s7950_s19  ;;  %1593 = vrot.lane.b32.xlu0 %v1589_v28, %s7950_s19  ;;  %v1644_v27 = vmul.f32 %v1642_v58, %v5269_v44  ;;  %v1633_v28 = vsel %vm777_vm0, %v1631_v55, %v1632_v56  ;;  %v1686_v58 = vstv %s4490_s12  ;;  %s4397_s12 = sld [smem:[#allocation2 + $0x30]] }
 0x126   : > { %v5483_v60 = vpop.permute.xlu1 %1169  ;;  %v5485_v0 = vpop.permute.xlu0 %1167  ;;  %1606 = vrot.lane.b32.xlu2 %v1602_v33, %s7952_s8  ;;  %v1648_v40 = vrot.slane %v1644_v27, 1  ;;  %v1672_v33 = vmul.f32 %v1670_v34, %v5269_v44 }
 0x127   : > { %7987 = vst [vmem:[#allocation39_spill] sm:$0xff] %v5483_v60  ;;  %v1671_v60 = vmul.f32 %v1670_v34, %v5271_v45 }
 0x128   : > { %7988 = vst [vmem:[#allocation40_spill] sm:$0xff] %v5485_v0  ;;  %v5492_v59 = vpop.permute.xlu2 %1279  ;;  %v1647_v0 = vrot.slane %v1643_v42, 1  ;;  %v1676_v35 = vrot.slane %v1672_v33, 2 }
 0x129   : > { %v1675_v6 = vrot.slane %v1671_v60, 2 }
 0x12a   : > { %v1649_v55 = vsel %vm777_vm0, %v1647_v0, %v1648_v40 }
 0x12b   : > { %v1677_v27 = vsel %vm822_vm1, %v1675_v6, %v1676_v35  ;;  %v1714_v6 = vstv %s4367_s10  ;;  %s4375_s10 = sld [smem:[#allocation2 + $0x1a]] }
 0x12c   : > { %1634 = vrot.lane.b32.xlu1 %v1633_v28, %s7950_s19  ;;  %1608 = vrot.lane.b32.xlu0 %v1603_v15, %s7952_s8  ;;  %v1687_v28 = vmul.f32 %v1686_v58, %v5271_v45  ;;  %v1688_v15 = vmul.f32 %v1686_v58, %v5269_v44 }
 0x12e   : > { %v5498_v29 = vpop.permute.xlu1 %1211  ;;  %v5500_v1 = vpop.permute.xlu0 %1197  ;;  %1636 = vrot.lane.b32.xlu2 %v1632_v56, %s7950_s19  ;;  %v1691_v34 = vrot.slane %v1687_v28, 2  ;;  %v1716_v28 = vmul.f32 %v1714_v6, %v5170_v4 }
 0x12f   : > { %7989 = vst [vmem:[#allocation41_spill] sm:$0xff] %v5498_v29  ;;  %v1692_v29 = vrot.slane %v1688_v15, 2  ;;  %v1715_v15 = vmul.f32 %v1714_v6, %v5168_v3 }
 0x130   : > { %7990 = vst [vmem:[#allocation42_spill] sm:$0xff] %v5500_v1  ;;  %v5506_v42 = vpop.permute.xlu2 %1321 }
 0x131   : > { %v1693_v60 = vsel %vm822_vm1, %v1691_v34, %v1692_v29 }
 0x134   : > { %1652 = vrot.lane.b32.xlu1 %v1648_v40, %s7952_s8  ;;  %1650 = vrot.lane.b32.xlu0 %v1649_v55, %s7952_s8  ;;  %v1752_v55 = vstv %s4415_s17  ;;  %s4423_s17 = sld [smem:[#allocation2 + $0x4a]] }
 0x135   : > { %v1753_v34 = vmul.f32 %v1752_v55, %v5168_v3 }
 0x136   : > { %v5511_v56 = vpop.permute.xlu1 %1238  ;;  %v5513_v0 = vpop.permute.xlu0 %1236  ;;  %1678 = vrot.lane.b32.xlu2 %v1677_v27, %s7950_s19  ;;  %v1727_v27 = vstv %s4383_s21  ;;  %s5621_s21 = sld [smem:[#allocation2 + $0x2a]] }
 0x137   : > { %v1757_v43 = vrot.slane %v1753_v34, 1  ;;  %v1796_v34 = vstv %s4463_s2  ;;  %s5634_s2 = sld [smem:[#allocation2 + $0x60]] }
 0x138   : > { %v5517_v33 = vpop.permute.xlu2 %1339  ;;  %v1797_v48 = vmul.f32 %v1796_v34, %v5168_v3 }
 0x139   : > { %7991 = vst [vmem:[#allocation43_spill] sm:$0xff] %v5517_v33 }
 0x13c   : > { %1694 = vrot.lane.b32.xlu1 %v1693_v60, %s7952_s8  ;;  %1680 = vrot.lane.b32.xlu0 %v1676_v35, %s7950_s19  ;;  %v1754_v60 = vmul.f32 %v1752_v55, %v5170_v4  ;;  %v1728_v35 = vmul.f32 %v1727_v27, %v5168_v3  ;;  %v1729_v55 = vmul.f32 %v1727_v27, %v5170_v4 }
 0x13e   : > { %v5521_v40 = vpop.permute.xlu1 %1277  ;;  %v5523_v58 = vpop.permute.xlu0 %1251  ;;  %1696 = vrot.lane.b32.xlu2 %v1692_v29, %s7952_s8  ;;  %v1758_v29 = vrot.slane %v1754_v60, 1 }
 0x140   : > { %v5530_v1 = vpop.permute.xlu2 %1368 }
 0x141   : > { %7992 = vst [vmem:[#allocation44_spill] sm:$0xff] %v5530_v1 }
 0x144   : > { %1721 = vrot.lane.b32.xlu1 %v1716_v28, %s7950_s19  ;;  %1719 = vrot.lane.b32.xlu0 %v1715_v15, %s7950_s19  ;;  %v1770_v28 = vmul.f32 %v1768_v57, %v5170_v4  ;;  %v1759_v15 = vsel %vm777_vm0, %v1757_v43, %v1758_v29  ;;  %v1812_v57 = vstv %s4479_s4  ;;  %s5647_s4 = sld [smem:[#allocation2 + $0x7a]] }
 0x146   : > { %v5535_v16 = vpop.permute.xlu1 %1295  ;;  %v5537_v6 = vpop.permute.xlu0 %1293  ;;  %1732 = vrot.lane.b32.xlu2 %v1728_v35, %s7952_s8  ;;  %v1774_v60 = vrot.slane %v1770_v28, 1  ;;  %v1798_v35 = vmul.f32 %v1796_v34, %v5170_v4 }
 0x148   : > { %v5544_v17 = vpop.permute.xlu2 %1398  ;;  %v1775_v43 = vsel %vm777_vm0, %v1773_v63, %v1774_v60  ;;  %v1802_v41 = vrot.slane %v1798_v35, 2 }
 0x149   : > { %7993 = vst [vmem:[#allocation45_spill] sm:$0xff] %v5544_v17  ;;  %v1801_v17 = vrot.slane %v1797_v48, 2 }
 0x14b   : > { %v1803_v28 = vsel %vm822_vm1, %v1801_v17, %v1802_v41  ;;  %v1833_v17 = vstv %s4371_s15  ;;  %s5659_s15 = sld [smem:[#allocation2 + $0x8a]] }
 0x14c   : > { %1760 = vrot.lane.b32.xlu1 %v1759_v15, %s7950_s19  ;;  %1734 = vrot.lane.b32.xlu0 %v1729_v55, %s7952_s8  ;;  %v1813_v15 = vmul.f32 %v1812_v57, %v5168_v3  ;;  %v1814_v55 = vmul.f32 %v1812_v57, %v5170_v4 }
 0x14e   : > { %v5550_v27 = vpop.permute.xlu1 %1337  ;;  %v5552_v49 = vpop.permute.xlu0 %1323  ;;  %1762 = vrot.lane.b32.xlu2 %v1758_v29, %s7950_s19  ;;  %v1817_v34 = vrot.slane %v1813_v15, 2  ;;  %v1818_v1 = vrot.slane %v1814_v55, 2  ;;  %v1835_v15 = vmul.f32 %v1833_v17, %v5201_v36  ;;  %v1834_v55 = vmul.f32 %v1833_v17, %v5203_v37 }
 0x150   : > { %v5558_v26 = vpop.permute.xlu2 %1440  ;;  %v1819_v48 = vsel %vm822_vm1, %v1817_v34, %v1818_v1 }
 0x151   : > { %7994 = vst [vmem:[#allocation46_spill] sm:$0xff] %v5558_v26 }
 0x154   : > { %1778 = vrot.lane.b32.xlu1 %v1774_v60, %s7952_s8  ;;  %1776 = vrot.lane.b32.xlu0 %v1775_v43, %s7952_s8  ;;  %v1871_v43 = vstv %s4419_s23  ;;  %s5690_s23 = sld [smem:[#allocation2 + $0x4]] }
 0x155   : > { %v1872_v34 = vmul.f32 %v1871_v43, %v5203_v37 }
 0x156   : > { %v5563_v29 = vpop.permute.xlu1 %1357  ;;  %v5565_v63 = vpop.permute.xlu0 %1355  ;;  %1804 = vrot.lane.b32.xlu2 %v1803_v28, %s7950_s19  ;;  %v1846_v28 = vstv %s4387_s18  ;;  %s4401_s18 = sld [smem:[#allocation2 + $0x34]] }
 0x157   : > { %7995 = vst [vmem:[#allocation47_spill] sm:$0xff] %v5563_v29  ;;  %v1876_v26 = vrot.slane %v1872_v34, 1  ;;  %v1915_v34 = vstv %s4467_s30  ;;  %s5706_s30 = sld [smem:[#allocation2 + $0x4e]] }
 0x158   : > { %7996 = vst [vmem:[#allocation48_spill] sm:$0xff] %v5565_v63  ;;  %v5569_v35 = vpop.permute.xlu2 %1458 }
 0x159   : > { %7997 = vst [vmem:[#allocation49_spill] sm:$0xff] %v5569_v35 }
 0x15c   : > { %1820 = vrot.lane.b32.xlu1 %v1819_v48, %s7952_s8  ;;  %1806 = vrot.lane.b32.xlu0 %v1802_v41, %s7950_s19  ;;  %v1873_v48 = vmul.f32 %v1871_v43, %v5201_v36  ;;  %v1847_v41 = vmul.f32 %v1846_v28, %v5203_v37  ;;  %v1848_v43 = vmul.f32 %v1846_v28, %v5201_v36 }
 0x15e   : > { %v5573_v60 = vpop.permute.xlu1 %1396  ;;  %v5575_v57 = vpop.permute.xlu0 %1370  ;;  %1822 = vrot.lane.b32.xlu2 %v1818_v1, %s7952_s8  ;;  %v1877_v1 = vrot.slane %v1873_v48, 1 }
 0x15f   : > { %7998 = vst [vmem:[#allocation50_spill] sm:$0xff] %v5573_v60  ;;  %v1887_v60 = vstv %s4435_s20  ;;  %s5700_s20 = sld [smem:[#allocation2 + $0x1e]] }
 0x160   : > { %7999 = vst [vmem:[#allocation51_spill] sm:$0xff] %v5575_v57  ;;  %v5582_v35 = vpop.permute.xlu2 %1487 }
 0x161   : > { %8000 = vst [vmem:[#allocation52_spill] sm:$0xff] %v5582_v35  ;;  %v1888_v35 = vmul.f32 %v1887_v60, %v5203_v37 }
 0x164   : > { %1840 = vrot.lane.b32.xlu1 %v1835_v15, %s7950_s19  ;;  %1838 = vrot.lane.b32.xlu0 %v1834_v55, %s7950_s19  ;;  %v1889_v15 = vmul.f32 %v1887_v60, %v5201_v36  ;;  %v1878_v55 = vsel %vm777_vm0, %v1876_v26, %v1877_v1  ;;  %v1931_v60 = vstv %s4483_s16  ;;  %s5710_s16 = sld [smem:[#allocation2 + $0x2e]] }
 0x166   : > { %v5587_v57 = vpop.permute.xlu1 %1414  ;;  %v5589_v17 = vpop.permute.xlu0 %1412  ;;  %1851 = vrot.lane.b32.xlu2 %v1847_v41, %s7952_s8  ;;  %v1893_v48 = vrot.slane %v1889_v15, 1  ;;  %v1917_v41 = vmul.f32 %v1915_v34, %v5201_v36 }
 0x167   : > { %8001 = vst [vmem:[#allocation53_spill] sm:$0xff] %v5587_v57  ;;  %v1916_v57 = vmul.f32 %v1915_v34, %v5203_v37 }
 0x168   : > { %8002 = vst [vmem:[#allocation54_spill] sm:$0xff] %v5589_v17  ;;  %v5596_v20 = vpop.permute.xlu2 %1517  ;;  %v1892_v17 = vrot.slane %v1888_v35, 1  ;;  %v1921_v29 = vrot.slane %v1917_v41, 2 }
 0x169   : > { %8003 = vst [vmem:[#allocation55_spill] sm:$0xff] %v5596_v20  ;;  %v1920_v20 = vrot.slane %v1916_v57, 2 }
 0x16a   : > { %v1894_v26 = vsel %vm777_vm0, %v1892_v17, %v1893_v48 }
 0x16b   : > { %v1922_v15 = vsel %vm822_vm1, %v1920_v20, %v1921_v29  ;;  %v772_v20 = vstv %s4397_s12  ;;  %s5724_s12 = sld [smem:[#allocation2 + $0x5e]] }
 0x16c   : > { %1879 = vrot.lane.b32.xlu1 %v1878_v55, %s7950_s19  ;;  %1853 = vrot.lane.b32.xlu0 %v1848_v43, %s7952_s8  ;;  %v1932_v55 = vmul.f32 %v1931_v60, %v5203_v37  ;;  %v1933_v43 = vmul.f32 %v1931_v60, %v5201_v36 }
 0x16e   : > { %v5602_v28 = vpop.permute.xlu1 %1456  ;;  %v5604_v63 = vpop.permute.xlu0 %1442  ;;  %1881 = vrot.lane.b32.xlu2 %v1877_v1, %s7950_s19  ;;  %v1936_v34 = vrot.slane %v1932_v55, 2  ;;  %v1937_v1 = vrot.slane %v1933_v43, 2 }
 0x16f   : > { %8004 = vst [vmem:[#allocation56_spill] sm:$0xff] %v5602_v28 }
 0x170   : > { %8005 = vst [vmem:[#allocation57_spill] sm:$0xff] %v5604_v63  ;;  %v5610_v35 = vpop.permute.xlu2 %1559  ;;  %v1938_v41 = vsel %vm822_vm1, %v1936_v34, %v1937_v1 }
 0x171   : > { %8006 = vst [vmem:[#allocation58_spill] sm:$0xff] %v5610_v35 }
 0x174   : > { %1897 = vrot.lane.b32.xlu1 %v1893_v48, %s7952_s8  ;;  %1895 = vrot.lane.b32.xlu0 %v1894_v26, %s7952_s8  ;;  %v741_v48 = vstv %s382_s22  ;;  %v1952_v26 = vstv %s4375_s10  ;;  %s5717_s22 = sld [smem:[#allocation2 + $0x64]] }
 0x175   : > { %v742_v34 = vmul.f32 %v741_v48, %v5168_v3  ;;  %v1953_v35 = vmul.f32 %v1952_v26, %v5237_v9  ;;  %s5728_s10 = sld [smem:[#allocation2 + $0x1]] }
 0x176   : > { %v5615_v17 = vpop.permute.xlu1 %1476  ;;  %v5617_v57 = vpop.permute.xlu0 %1474  ;;  %1923 = vrot.lane.b32.xlu2 %v1922_v15, %s7950_s19  ;;  %v1990_v15 = vstv %s4423_s17  ;;  %s5737_s17 = sld [smem:[#allocation2 + $0x31]] }
 0x177   : > { %8007 = vst [vmem:[#allocation59_spill] sm:$0xff] %v5615_v17  ;;  %v1992_v17 = vmul.f32 %v1990_v15, %v5235_v8 }
 0x178   : > { %8008 = vst [vmem:[#allocation60_spill] sm:$0xff] %v5617_v57  ;;  %v5623_v60 = vpop.permute.xlu2 %1577  ;;  %v1965_v57 = vstv %s5621_s21  ;;  %s5747_s21 = sld [smem:[#allocation2 + $0x7e]] }
 0x179   : > { %8009 = vst [vmem:[#allocation61_spill] sm:$0xff] %v5623_v60  ;;  %v743_v60 = vmul.f32 %v741_v48, %v5170_v4  ;;  %v757_v48 = vadd.f32 %v5305_v19, %v742_v34 }
 0x17b   : > { %v770_v19 = vadd.f32 %v5303_v18, %v757_v48 }
 0x17c   : > { %1939 = vrot.lane.b32.xlu1 %v1938_v41, %s7952_s8  ;;  %1925 = vrot.lane.b32.xlu0 %v1921_v29, %s7950_s19  ;;  %v773_v41 = vmul.f32 %v772_v20, %v5168_v3  ;;  %v1954_v29 = vmul.f32 %v1952_v26, %v5235_v8 }
 0x17e   : > { %v5629_v55 = vpop.permute.xlu1 %1515  ;;  %v5631_v43 = vpop.permute.xlu0 %1489  ;;  %1941 = vrot.lane.b32.xlu2 %v1937_v1, %s7952_s8  ;;  %v758_v1 = vadd.f32 %v5315_v24, %v743_v60  ;;  %v778_v63 = vrot.slane %v773_v41, 1  ;;  %v817_v24 = vstv %s5634_s2  ;;  %s5772_s2 = sld [smem:[#allocation2 + $0x61]] }
 0x17f   : > { %8010 = vst [vmem:[#allocation62_spill] sm:$0xff] %v5629_v55  ;;  %v774_v55 = vmul.f32 %v772_v20, %v5170_v4  ;;  %v1966_v20 = vmul.f32 %v1965_v57, %v5237_v9  ;;  %v818_v18 = vmul.f32 %v817_v24, %v5168_v3 }
 0x180   : > { %8011 = vst [vmem:[#allocation63_spill] sm:$0xff] %v5631_v43  ;;  %v1991_v43 = vmul.f32 %v1990_v15, %v5237_v9  ;;  %v5645_v28 = vpop.permute.xlu2 %1606  ;;  %v1996_v15 = vrot.slane %v1992_v17, 1  ;;  %v771_v60 = vadd.f32 %v5313_v23, %v758_v1  ;;  %v2008_v17 = vmul.f32 %v2006_v10, %v5235_v8 }
 0x181   : > { %8012 = vst [vmem:[#allocation64_spill] sm:$0xff] %v5645_v28  ;;  %v779_v26 = vrot.slane %v774_v55, 1  ;;  %v2007_v55 = vmul.f32 %v2006_v10, %v5237_v9  ;;  %v819_v23 = vmul.f32 %v817_v24, %v5170_v4 }
 0x182   : > { %v1995_v22 = vrot.slane %v1991_v43, 1 }
 0x183   : > { %v780_v43 = vsel %vm777_vm0, %v778_v63, %v779_v26  ;;  %v784_v48 = vadd.f32 %v779_v26, %v771_v60  ;;  %v2011_v10 = vrot.slane %v2007_v55, 1  ;;  %v824_v26 = vrot.slane %v819_v23, 2 }
 0x184   : > { %1959 = vrot.lane.b32.xlu1 %v1954_v29, %s7950_s19  ;;  %1957 = vrot.lane.b32.xlu0 %v1953_v35, %s7950_s19  ;;  %v1967_v35 = vmul.f32 %v1965_v57, %v5235_v8  ;;  %v1997_v34 = vsel %vm777_vm0, %v1995_v22, %v1996_v15  ;;  %v2034_v29 = vstv %s5647_s4  ;;  %v783_v1 = vadd.f32 %v780_v43, %v770_v19  ;;  %s5794_s4 = sld [smem:[#allocation2 + $0x8]] }
 0x185   : > { %v2012_v57 = vrot.slane %v2008_v17, 1  ;;  %v2035_v63 = vmul.f32 %v2034_v29, %v5237_v9  ;;  %v800_v24 = vadd.f32 %v5278_v53, %v784_v48 }
 0x186   : > { %v5655_v28 = vpop.permute.xlu1 %1533  ;;  %v5657_v33 = vpop.permute.xlu0 %1531  ;;  %1970 = vrot.lane.b32.xlu2 %v1966_v20, %s7952_s8  ;;  %v2036_v20 = vmul.f32 %v2034_v29, %v5235_v8  ;;  %v799_v19 = vadd.f32 %v5288_v62, %v783_v1 }
 0x187   : > { %8013 = vst [vmem:[#allocation65_spill] sm:$0xff] %v5655_v28  ;;  %v2050_v28 = vstv %s5659_s15  ;;  %v2013_v60 = vsel %vm777_vm0, %v2011_v10, %v2012_v57  ;;  %v816_v62 = vadd.f32 %v5327_v38, %v800_v24  ;;  %v862_v38 = vstv %s5690_s23  ;;  %s5804_s15 = sld [smem:[#allocation2 + $0x38]] }
 0x188   : > { %8014 = vst [vmem:[#allocation66_spill] sm:$0xff] %v5657_v33  ;;  %v5670_v41 = vpop.permute.xlu2 %1636  ;;  %v823_v33 = vrot.slane %v818_v18, 2  ;;  %v2040_v55 = vrot.slane %v2036_v20, 2  ;;  %v2051_v17 = vmul.f32 %v2050_v28, %v5237_v9  ;;  %v2052_v43 = vmul.f32 %v2050_v28, %v5235_v8  ;;  %s5819_s23 = sld [smem:[#allocation2 + $0x68]] }
 0x189   : > { %8015 = vst [vmem:[#allocation67_spill] sm:$0xff] %v5670_v41  ;;  %v815_v29 = vadd.f32 %v5329_v39, %v799_v19  ;;  %v893_v20 = vstv %s4401_s18  ;;  %v2071_v19 = vstv %s5700_s20  ;;  %s5826_s18 = sld [smem:[#allocation2 + $0x13]] }
 0x18a   : > { %v825_v53 = vsel %vm822_vm1, %v823_v33, %v824_v26  ;;  %v2055_v18 = vrot.slane %v2051_v17, 2  ;;  %v2056_v28 = vrot.slane %v2052_v43, 2  ;;  %v829_v33 = vadd.f32 %v824_v26, %v816_v62  ;;  %s5832_s20 = sld [smem:[#allocation2 + $0x43]] }
 0x18b   : > { %v828_v39 = vadd.f32 %v825_v53, %v815_v29  ;;  %v863_v26 = vmul.f32 %v862_v38, %v5203_v37  ;;  %v2109_v17 = vstv %s5706_s30  ;;  %v2073_v43 = vmul.f32 %v2071_v19, %v5269_v44  ;;  %s5836_s30 = sld [smem:[#allocation2 + $0x32]] }
 0x18c   : > { %1998 = vrot.lane.b32.xlu1 %v1997_v34, %s7950_s19  ;;  %1972 = vrot.lane.b32.xlu0 %v1967_v35, %s7952_s8  ;;  %v2039_v35 = vrot.slane %v2035_v63, 2  ;;  %v2057_v1 = vsel %vm822_vm1, %v2055_v18, %v2056_v28  ;;  %v845_v63 = vadd.f32 %v5344_v54, %v829_v33  ;;  %v2072_v29 = vmul.f32 %v2071_v19, %v5271_v45 }
 0x18d   : > { %v844_v10 = vadd.f32 %v5298_v14, %v828_v39  ;;  %v895_v14 = vmul.f32 %v893_v20, %v5201_v36  ;;  %v2084_v62 = vstv %s5710_s16  ;;  %v2111_v18 = vmul.f32 %v2109_v17, %v5269_v44  ;;  %s5839_s16 = sld [smem:[#allocation2 + $0x2]] }
 0x18e   : > { %v5679_v22 = vpop.permute.xlu1 %1575  ;;  %v5681_v41 = vpop.permute.xlu0 %1561  ;;  %2000 = vrot.lane.b32.xlu2 %v1996_v15, %s7950_s19  ;;  %v2041_v15 = vsel %vm822_vm1, %v2039_v35, %v2040_v55 }
 0x18f   : > { %v860_v24 = vadd.f32 %v5342_v52, %v844_v10  ;;  %v864_v52 = vmul.f32 %v862_v38, %v5201_v36  ;;  %v937_v38 = vstv %s5717_s22  ;;  %v2085_v10 = vmul.f32 %v2084_v62, %v5271_v45  ;;  %s5844_s22 = sld [smem:[#allocation2 + $0x23]] }
 0x190   : > { %v5692_v34 = vpop.permute.xlu2 %1678 }
 0x191   : > { %8016 = vst [vmem:[#allocation68_spill] sm:$0xff] %v5692_v34  ;;  %v865_v53 = vadd.f32 %v863_v26, %v860_v24  ;;  %v2115_v24 = vrot.slane %v2111_v18, 1  ;;  %v2125_v26 = vstv %s5724_s12  ;;  %s5858_s12 = sld [smem:[#allocation2 + $0x5]] }
 0x192   : > { %v2127_v18 = vmul.f32 %v2125_v26, %v5269_v44 }
 0x194   : > { %2016 = vrot.lane.b32.xlu1 %v2012_v57, %s7952_s8  ;;  %2014 = vrot.lane.b32.xlu0 %v2013_v60, %s7952_s8  ;;  %v894_v60 = vmul.f32 %v893_v20, %v5203_v37 }
 0x196   : > { %v5702_v23 = vpop.permute.xlu1 %1595  ;;  %v5704_v48 = vpop.permute.xlu0 %1593  ;;  %2042 = vrot.lane.b32.xlu2 %v2041_v15, %s7950_s19  ;;  %v2110_v15 = vmul.f32 %v2109_v17, %v5271_v45  ;;  %v898_v39 = vrot.slane %v894_v60, 1  ;;  %v938_v60 = vmul.f32 %v937_v38, %v5203_v37 }
 0x198   : > { %v5713_v57 = vpop.permute.xlu2 %1696  ;;  %v2114_v20 = vrot.slane %v2110_v15, 1  ;;  %v2126_v15 = vmul.f32 %v2125_v26, %v5271_v45 }
 0x199   : > { %8017 = vst [vmem:[#allocation69_spill] sm:$0xff] %v5713_v57  ;;  %v942_v57 = vrot.slane %v938_v60, 2 }
 0x19a   : > { %v2130_v26 = vrot.slane %v2126_v15, 1 }
 0x19c   : > { %2058 = vrot.lane.b32.xlu1 %v2057_v1, %s7952_s8  ;;  %2044 = vrot.lane.b32.xlu0 %v2040_v55, %s7950_s19  ;;  %v861_v55 = vadd.f32 %v5309_v21, %v845_v63  ;;  %v899_v21 = vrot.slane %v895_v14, 1 }
 0x19e   : > { %v5730_v54 = vpop.permute.xlu1 %1634  ;;  %v5732_v35 = vpop.permute.xlu0 %1608  ;;  %2060 = vrot.lane.b32.xlu2 %v2056_v28, %s7952_s8  ;;  %v866_v1 = vadd.f32 %v864_v52, %v861_v55  ;;  %v878_v28 = vadd.f32 %v5357_v5, %v865_v53  ;;  %v900_v19 = vsel %vm777_vm0, %v898_v39, %v899_v21  ;;  %v5759_v5 = vmul.f32 %v937_v38, %v5201_v36 }
 0x19f   : > { %v1226_v52 = vstv %s5728_s10  ;;  %v2086_v53 = vmul.f32 %v2084_v62, %v5269_v44  ;;  %v2116_v39 = vsel %vm777_vm0, %v2114_v20, %v2115_v24  ;;  %v2131_v20 = vrot.slane %v2127_v18, 1  ;;  %s5866_s10 = sld [smem:[#allocation2 + $0x53]] }
 0x1a0   : > { %v5745_v33 = vpop.permute.xlu2 %1732  ;;  %v879_v63 = vadd.f32 %v5355_v2, %v866_v1  ;;  %v891_v55 = vadd.f32 %v5322_v31, %v878_v28  ;;  %v2153_v28 = vstv %s5747_s21  ;;  %v1228_v62 = vmul.f32 %v1226_v52, %v5170_v4  ;;  %s5885_s21 = sld [smem:[#allocation2 + $0x62]] }
 0x1a1   : > { %v1301_v18 = vstv %s5772_s2  ;;  %s5926_s2 = sld [smem:[#allocation2 + $0x83]] }
 0x1a2   : > { %v892_v2 = vadd.f32 %v5367_v12, %v879_v63  ;;  %v903_v38 = vadd.f32 %v900_v19, %v891_v55  ;;  %v2154_v19 = vmul.f32 %v2153_v28, %v5271_v45 }
 0x1a4   : > { %2078 = vrot.lane.b32.xlu1 %v2073_v43, %s7950_s19  ;;  %2076 = vrot.lane.b32.xlu0 %v2072_v29, %s7950_s19  ;;  %v1257_v43 = vstv %s5737_s17  ;;  %v1227_v29 = vmul.f32 %v1226_v52, %v5168_v3  ;;  %v904_v63 = vadd.f32 %v899_v21, %v892_v2  ;;  %v5792_v21 = vmul.f32 %v2153_v28, %v5269_v44  ;;  %s5878_s17 = sld [smem:[#allocation2 + $0x35]] }
 0x1a5   : > { %v1258_v31 = vmul.f32 %v1257_v43, %v5168_v3  ;;  %v1259_v12 = vmul.f32 %v1257_v43, %v5170_v4  ;;  %v919_v43 = vadd.f32 %v5365_v11, %v903_v38  ;;  %v2169_v2 = vstv %s5765_s1  ;;  %s5893_s1 = sld [smem:[#allocation2 + $0x73]] }
 0x1a6   : > { %v5761_v14 = vpop.permute.xlu1 %1652  ;;  %v5763_v17 = vpop.permute.xlu0 %1650  ;;  %2089 = vrot.lane.b32.xlu2 %v2085_v10, %s7952_s8  ;;  %v943_v10 = vrot.slane %v5759_v5, 2  ;;  %v1242_v34 = vadd.f32 %v5513_v0, %v1227_v29  ;;  %v920_v52 = vadd.f32 %v5336_v46, %v904_v63  ;;  %v2170_v46 = vmul.f32 %v2169_v2, %v5271_v45 }
 0x1a7   : > { %v1262_v60 = vrot.slane %v1258_v31, 1  ;;  %v1263_v5 = vrot.slane %v1259_v12, 1  ;;  %v935_v11 = vadd.f32 %v5381_v32, %v919_v43  ;;  %v2158_v31 = vrot.slane %v2154_v19, 2 }
 0x1a8   : > { %v5781_v1 = vpop.permute.xlu2 %1762  ;;  %v944_v29 = vsel %vm822_vm1, %v942_v57, %v943_v10  ;;  %v1255_v15 = vadd.f32 %v5478_v47, %v1242_v34  ;;  %v2159_v12 = vrot.slane %v5792_v21, 2  ;;  %v2171_v57 = vmul.f32 %v2169_v2, %v5269_v44 }
 0x1a9   : > { %v1264_v32 = vsel %vm777_vm0, %v1262_v60, %v1263_v5  ;;  %v936_v47 = vadd.f32 %v5379_v30, %v920_v52  ;;  %v1302_v34 = vmul.f32 %v1301_v18, %v5168_v3  ;;  %v981_v21 = vstv %s5794_s4  ;;  %s5932_s4 = sld [smem:[#allocation2 + $0x65]] }
 0x1aa   : > { %v1267_v63 = vadd.f32 %v1264_v32, %v1255_v15  ;;  %v1012_v60 = vstv %s5804_s15  ;;  %s5944_s15 = sld [smem:[#allocation2 + $0xc]] }
 0x1ab   : > { %v1013_v15 = vmul.f32 %v1012_v60, %v5237_v9 }
 0x1ac   : > { %2117 = vrot.lane.b32.xlu1 %v2116_v39, %s7950_s19  ;;  %2091 = vrot.lane.b32.xlu0 %v2086_v53, %s7952_s8  ;;  %v1243_v53 = vadd.f32 %v5511_v56, %v1228_v62  ;;  %v2132_v39 = vsel %vm777_vm0, %v2130_v26, %v2131_v20  ;;  %v947_v56 = vadd.f32 %v944_v29, %v935_v11  ;;  %v2174_v62 = vrot.slane %v2170_v46, 2 }
 0x1ad   : > { %v2175_v26 = vrot.slane %v2171_v57, 2  ;;  %v1283_v29 = vadd.f32 %v5521_v40, %v1267_v63  ;;  %v1740_v63 = vstv %s5836_s30  ;;  %s6009_s30 = sld [smem:[#allocation2 + $0x36]] }
 0x1ae   : > { %v5796_v55 = vpop.permute.xlu1 %1694  ;;  %v5798_v0 = vpop.permute.xlu0 %1680  ;;  %2119 = vrot.lane.b32.xlu2 %v2115_v24, %s7950_s19  ;;  %v1256_v28 = vadd.f32 %v5523_v58, %v1243_v53  ;;  %v1303_v24 = vmul.f32 %v1301_v18, %v5170_v4  ;;  %v2160_v58 = vsel %vm822_vm1, %v2158_v31, %v2159_v12  ;;  %v963_v52 = vadd.f32 %v5350_v61, %v947_v56 }
 0x1af   : > { %v2176_v11 = vsel %vm822_vm1, %v2174_v62, %v2175_v26  ;;  %v982_v53 = vmul.f32 %v981_v21, %v5237_v9  ;;  %v5849_v18 = vmul.f32 %v1012_v60, %v5235_v8  ;;  %v1299_v46 = vadd.f32 %v5537_v6, %v1283_v29 }
 0x1b0   : > { %v5816_v38 = vpop.permute.xlu2 %1804  ;;  %v1268_v30 = vadd.f32 %v1263_v5, %v1256_v28  ;;  %v1307_v2 = vrot.slane %v1303_v24, 2  ;;  %v948_v5 = vadd.f32 %v943_v10, %v936_v47  ;;  %v979_v61 = vadd.f32 %v5394_v50, %v963_v52 }
 0x1b1   : > { %v1056_v10 = vstv %s5819_s23  ;;  %v983_v50 = vmul.f32 %v981_v21, %v5235_v8  ;;  %v1018_v6 = vrot.slane %v5849_v18, 1  ;;  %v2235_v56 = vstv %s5832_s20  ;;  %s5956_s23 = sld [smem:[#allocation2 + $0x3c]]  ;;  %v8025_v18 = vld [vmem:[#allocation44_spill] sm:$0xff] }
 0x1b2   : > { %v964_v40 = vadd.f32 %v5396_v51, %v948_v5  ;;  %v1017_v51 = vrot.slane %v1013_v15, 1  ;;  %v5870_v28 = vmul.f32 %v1056_v10, %v5237_v9  ;;  %v1709_v62 = vstv %s5839_s16  ;;  %s5997_s20 = sld [smem:[#allocation2 + $0x9]] }
 0x1b3   : > { %v1710_v60 = vmul.f32 %v1709_v62, %v5168_v3  ;;  %v5891_v52 = vmul.f32 %v2235_v56, %v5170_v4  ;;  %v1741_v5 = vmul.f32 %v1740_v63, %v5168_v3  ;;  %v5901_v29 = vmul.f32 %v1740_v63, %v5170_v4  ;;  %s6014_s16 = sld [smem:[#allocation2 + $0x17]] }
 0x1b4   : > { %2135 = vrot.lane.b32.xlu1 %v2131_v20, %s7952_s8  ;;  %2133 = vrot.lane.b32.xlu0 %v2132_v39, %s7952_s8  ;;  %v1306_v20 = vrot.slane %v1302_v34, 2  ;;  %v1284_v39 = vadd.f32 %v5492_v59, %v1268_v30  ;;  %v2197_v59 = vstv %s5826_s18  ;;  %v984_v34 = vadd.f32 %v982_v53, %v979_v61  ;;  %s5993_s18 = sld [smem:[#allocation2 + $0x6]] }
 0x1b5   : > { %v2199_v30 = vmul.f32 %v2197_v59, %v5170_v4  ;;  %v2198_v21 = vmul.f32 %v2197_v59, %v5168_v3  ;;  %v5906_v15 = vmul.f32 %v1056_v10, %v5235_v8  ;;  %v1345_v61 = vstv %s5858_s12  ;;  %s6040_s12 = sld [smem:[#allocation2 + $0x27]] }
 0x1b6   : > { %v5828_v43 = vpop.permute.xlu1 %1721  ;;  %v5830_v19 = vpop.permute.xlu0 %1719  ;;  %2161 = vrot.lane.b32.xlu2 %v2160_v58, %s7950_s19  ;;  %v1300_v57 = vadd.f32 %v5535_v16, %v1284_v39  ;;  %v1308_v32 = vsel %vm822_vm1, %v1306_v20, %v1307_v2  ;;  %v2210_v20 = vstv %s5844_s22  ;;  %s6022_s22 = sld [smem:[#allocation2 + $0x47]] }
 0x1b7   : > { %v1311_v24 = vadd.f32 %v1308_v32, %v1299_v46  ;;  %v1711_v46 = vmul.f32 %v1709_v62, %v5170_v4  ;;  %v1725_v32 = vadd.f32 %v5830_v19, %v1710_v60  ;;  %v1376_v62 = vstv %s5878_s17  ;;  %s6064_s17 = sld [smem:[#allocation2 + $0x57]] }
 0x1b8   : > { %v5852_v31 = vpop.permute.xlu2 %1822  ;;  %v1312_v58 = vadd.f32 %v1307_v2, %v1300_v57  ;;  %v997_v2 = vadd.f32 %v5409_v13, %v984_v34  ;;  %v2211_v57 = vmul.f32 %v2210_v20, %v5168_v3  ;;  %v8022_v13 = vld [vmem:[#allocation48_spill] sm:$0xff] }
 0x1ba   : > { %v1328_v39 = vadd.f32 %v5552_v49, %v1312_v58  ;;  %v2251_v49 = vstv %s5866_s10  ;;  %v1010_v59 = vadd.f32 %v5374_v25, %v997_v2  ;;  %v1347_v58 = vmul.f32 %v1345_v61, %v5201_v36  ;;  %s6058_s10 = sld [smem:[#allocation2 + $0x66]] }
 0x1bb   : > { %v2212_v25 = vmul.f32 %v2210_v20, %v5170_v4  ;;  %v2252_v60 = vmul.f32 %v2251_v49, %v5168_v3  ;;  %v2279_v2 = vstv %s5893_s1  ;;  %v1377_v20 = vmul.f32 %v1376_v62, %v5203_v37  ;;  %s6079_s1 = sld [smem:[#allocation2 + $0x6c]] }
 0x1bc   : > { %2177 = vrot.lane.b32.xlu1 %v2176_v11, %s7952_s8  ;;  %2163 = vrot.lane.b32.xlu0 %v2159_v12, %s7950_s19  ;;  %v980_v12 = vadd.f32 %v5361_v7, %v964_v40  ;;  %v2236_v7 = vmul.f32 %v2235_v56, %v5168_v3  ;;  %v1327_v40 = vadd.f32 %v5506_v42, %v1311_v24  ;;  %v1746_v56 = vrot.slane %v5901_v29, 1  ;;  %v8018_v24 = vld [vmem:[#allocation43_spill] sm:$0xff] }
 0x1bd   : > { %v1346_v42 = vmul.f32 %v1345_v61, %v5203_v37  ;;  %v1344_v63 = vadd.f32 %v8018_v24, %v1328_v39  ;;  %v5948_v29 = vmul.f32 %v1376_v62, %v5201_v36  ;;  %v8020_v24 = vld [vmem:[#allocation26_spill] sm:$0xff] }
 0x1be   : > { %v5872_v16 = vpop.permute.xlu1 %1760  ;;  %v5874_v47 = vpop.permute.xlu0 %1734  ;;  %2179 = vrot.lane.b32.xlu2 %v2175_v26, %s7952_s8  ;;  %v1019_v26 = vsel %vm777_vm0, %v1017_v51, %v1018_v6  ;;  %v985_v53 = vadd.f32 %v983_v50, %v980_v12  ;;  %v2240_v10 = vrot.slane %v2236_v7, 1  ;;  %v2241_v50 = vrot.slane %v5891_v52, 1 }
 0x1bf   : > { %v1745_v51 = vrot.slane %v1741_v5, 1  ;;  %v1343_v19 = vadd.f32 %v5550_v27, %v1327_v40  ;;  %v1726_v7 = vadd.f32 %v5828_v43, %v1711_v46  ;;  %v1738_v27 = vadd.f32 %v5745_v33, %v1725_v32  ;;  %v8019_v40 = vld [vmem:[#allocation23_spill] sm:$0xff] }
 0x1c0   : > { %v5903_v11 = vpop.permute.xlu2 %1851  ;;  %v2242_v52 = vsel %vm777_vm0, %v2240_v10, %v2241_v50  ;;  %v1062_v5 = vrot.slane %v5906_v15, 2  ;;  %v998_v43 = vadd.f32 %v8019_v40, %v985_v53  ;;  %v1022_v46 = vadd.f32 %v1019_v26, %v1010_v59 }
 0x1c1   : > { %v1747_v39 = vsel %vm777_vm0, %v1745_v51, %v1746_v56  ;;  %v1739_v33 = vadd.f32 %v5874_v47, %v1726_v7  ;;  %v2280_v53 = vmul.f32 %v2279_v2, %v5168_v3  ;;  %v1349_v26 = vadd.f32 %v1347_v58, %v1344_v63 }
 0x1c2   : > { %v1348_v59 = vadd.f32 %v1346_v42, %v1343_v19  ;;  %v1750_v47 = vadd.f32 %v1747_v39, %v1738_v27  ;;  %v5965_v51 = vmul.f32 %v2279_v2, %v5170_v4  ;;  %v1011_v62 = vadd.f32 %v8020_v24, %v998_v43 }
 0x1c3   : > { %v1381_v7 = vrot.slane %v1377_v20, 1  ;;  %v1420_v42 = vstv %s5932_s4  ;;  %v1751_v19 = vadd.f32 %v1746_v56, %v1739_v33  ;;  %v2284_v20 = vrot.slane %v2280_v53, 2  ;;  %s6115_s4 = sld [smem:[#allocation2 + $0x87]] }
 0x1c4   : > { %2204 = vrot.lane.b32.xlu1 %v2199_v30, %s7950_s19  ;;  %2202 = vrot.lane.b32.xlu0 %v2198_v21, %s7950_s19  ;;  %v1784_v30 = vstv %s5885_s21  ;;  %v2253_v21 = vmul.f32 %v2251_v49, %v5170_v4  ;;  %v2256_v49 = vrot.slane %v2252_v60, 1  ;;  %v1361_v63 = vadd.f32 %v8022_v13, %v1348_v59  ;;  %v8023_v13 = vld [vmem:[#allocation25_spill] sm:$0xff]  ;;  %s6070_s21 = sld [smem:[#allocation2 + $0x39]] }
 0x1c5   : > { %v5959_v32 = vmul.f32 %v1784_v30, %v5170_v4  ;;  %v2285_v39 = vrot.slane %v5965_v51, 2  ;;  %v1038_v56 = vadd.f32 %v8023_v13, %v1022_v46  ;;  %v1023_v33 = vadd.f32 %v1018_v6, %v1011_v62 }
 0x1c6   : > { %v5922_v12 = vpop.permute.xlu1 %1778  ;;  %v5924_v34 = vpop.permute.xlu0 %1776  ;;  %2215 = vrot.lane.b32.xlu2 %v2211_v57, %s7952_s8  ;;  %v1785_v57 = vmul.f32 %v1784_v30, %v5168_v3  ;;  %v2257_v10 = vrot.slane %v2253_v21, 1  ;;  %v1382_v30 = vrot.slane %v5948_v29, 1  ;;  %v8021_v21 = vld [vmem:[#allocation47_spill] sm:$0xff]  ;;  %v1766_v29 = vadd.f32 %v5872_v16, %v1750_v47 }
 0x1c7   : > { %v1362_v60 = vadd.f32 %v8021_v21, %v1349_v26  ;;  %v1790_v27 = vrot.slane %v5959_v32, 2  ;;  %v1421_v53 = vmul.f32 %v1420_v42, %v5203_v37  ;;  %v1767_v59 = vadd.f32 %v5781_v1, %v1751_v19 }
 0x1c8   : > { %v5951_v61 = vpop.permute.xlu2 %1881  ;;  %v1789_v58 = vrot.slane %v1785_v57, 2  ;;  %v2258_v2 = vsel %vm777_vm0, %v2256_v49, %v2257_v10  ;;  %v1100_v57 = vstv %s5944_s15  ;;  %v1383_v16 = vsel %vm777_vm0, %v1381_v7, %v1382_v30  ;;  %s6117_s15 = sld [smem:[#allocation2 + $0x69]] }
 0x1c9   : > { %v1782_v46 = vadd.f32 %v5924_v34, %v1766_v29  ;;  %v1131_v47 = vstv %s5956_s23  ;;  %v1374_v6 = vadd.f32 %v8025_v18, %v1361_v63  ;;  %v6004_v51 = vmul.f32 %v1420_v42, %v5201_v36  ;;  %v8029_v29 = vld [vmem:[#allocation28_spill] sm:$0xff]  ;;  %v8031_v18 = vld [vmem:[#allocation45_spill] sm:$0xff]  ;;  %s6150_s23 = sld [smem:[#allocation2 + $0xa]] }
 0x1ca   : > { %v1791_v24 = vsel %vm822_vm1, %v1789_v58, %v1790_v27  ;;  %v1783_v62 = vadd.f32 %v5922_v12, %v1767_v59  ;;  %v2286_v1 = vsel %vm822_vm1, %v2284_v20, %v2285_v39  ;;  %v8028_v12 = vrot.slane %v5870_v28, 2  ;;  %v8030_v59 = vld [vmem:[#allocation50_spill] sm:$0xff] }
 0x1cb   : > { %v1794_v20 = vadd.f32 %v1791_v24, %v1782_v46  ;;  %v1386_v13 = vadd.f32 %v1383_v16, %v1374_v6  ;;  %v1426_v28 = vrot.slane %v6004_v51, 2  ;;  %v6048_v16 = vmul.f32 %v1100_v57, %v5269_v44 }
 0x1cc   : > { %2243 = vrot.lane.b32.xlu1 %v2242_v52, %s7950_s19  ;;  %2217 = vrot.lane.b32.xlu0 %v2212_v25, %s7952_s8  ;;  %v2295_v25 = vstv %s5926_s2  ;;  %v1063_v58 = vsel %vm822_vm1, %v8028_v12, %v1062_v5  ;;  %s6089_s2 = sld [smem:[#allocation2 + $0x77]] }
 0x1cd   : > { %v2296_v43 = vmul.f32 %v2295_v25, %v5168_v3  ;;  %v5984_v26 = vmul.f32 %v2295_v25, %v5170_v4  ;;  %v8026_v25 = vld [vmem:[#allocation21_spill] sm:$0xff]  ;;  %v1402_v46 = vadd.f32 %v8030_v59, %v1386_v13  ;;  %v2329_v59 = vstv %s6040_s12  ;;  %s6194_s12 = sld [smem:[#allocation2 + $0x1b]] }
 0x1ce   : > { %v5969_v40 = vpop.permute.xlu1 %1820  ;;  %v5971_v52 = vpop.permute.xlu0 %1806  ;;  %2245 = vrot.lane.b32.xlu2 %v2241_v50, %s7950_s19  ;;  %v8024_v50 = vld [vmem:[#allocation51_spill] sm:$0xff]  ;;  %v1039_v21 = vadd.f32 %v8026_v25, %v1023_v33  ;;  %v1795_v33 = vadd.f32 %v1790_v27, %v1783_v62  ;;  %v1828_v25 = vstv %s5993_s18  ;;  %v1810_v27 = vadd.f32 %v5816_v38, %v1794_v20  ;;  %v8032_v62 = vld [vmem:[#allocation53_spill] sm:$0xff]  ;;  %s6159_s18 = sld [smem:[#allocation2 + $0x3a]] }
 0x1cf   : > { %v1375_v32 = vadd.f32 %v8024_v50, %v1362_v60  ;;  %v2300_v7 = vrot.slane %v2296_v43, 2  ;;  %v2301_v34 = vrot.slane %v5984_v26, 2  ;;  %v8027_v60 = vld [vmem:[#allocation29_spill] sm:$0xff]  ;;  %v6035_v26 = vmul.f32 %v1131_v47, %v5269_v44 }
 0x1d0   : > { %v5991_v49 = vpop.permute.xlu2 %1923  ;;  %v1054_v63 = vadd.f32 %v8027_v60, %v1038_v56  ;;  %v1055_v43 = vadd.f32 %v8029_v29, %v1039_v21  ;;  %v1425_v56 = vrot.slane %v1421_v53, 2  ;;  %v1811_v6 = vadd.f32 %v5971_v52, %v1795_v33 }
 0x1d1   : > { %v1387_v42 = vadd.f32 %v1382_v30, %v1375_v32  ;;  %v6032_v30 = vmul.f32 %v1100_v57, %v5271_v45  ;;  %v2302_v50 = vsel %vm822_vm1, %v2300_v7, %v2301_v34  ;;  %v1137_v51 = vrot.slane %v6035_v26, 1  ;;  %v8033_v7 = vld [vmem:[#allocation54_spill] sm:$0xff] }
 0x1d2   : > { %v1066_v32 = vadd.f32 %v1063_v58, %v1054_v63  ;;  %v1418_v21 = vadd.f32 %v8033_v7, %v1402_v46  ;;  %v1859_v60 = vstv %s6009_s30  ;;  %v1427_v57 = vsel %vm822_vm1, %v1425_v56, %v1426_v28  ;;  %s6179_s30 = sld [smem:[#allocation5]] }
 0x1d3   : > { %v1403_v24 = vadd.f32 %v8031_v18, %v1387_v42  ;;  %v1826_v38 = vadd.f32 %v5969_v40, %v1810_v27  ;;  %v1829_v52 = vmul.f32 %v1828_v25, %v5203_v37  ;;  %v2316_v63 = vstv %s6014_s16  ;;  %v8034_v42 = vld [vmem:[#allocation22_spill] sm:$0xff]  ;;  %v8035_v18 = vld [vmem:[#allocation31_spill] sm:$0xff]  ;;  %v8037_v27 = vld [vmem:[#allocation57_spill] sm:$0xff]  ;;  %s6184_s16 = sld [smem:[#allocation2 + $0xd]] }
 0x1d4   : > { %2261 = vrot.lane.b32.xlu1 %v2257_v10, %s7952_s8  ;;  %2259 = vrot.lane.b32.xlu0 %v2258_v2, %s7952_s8  ;;  %v1132_v2 = vmul.f32 %v1131_v47, %v5271_v45  ;;  %v1082_v12 = vadd.f32 %v8034_v42, %v1066_v32  ;;  %v1067_v58 = vadd.f32 %v1062_v5, %v1055_v43  ;;  %v2354_v29 = vstv %s6022_s22 }
 0x1d5   : > { %v1827_v40 = vadd.f32 %v5852_v31, %v1811_v6  ;;  %v1830_v13 = vmul.f32 %v1828_v25, %v5201_v36  ;;  %v1860_v56 = vmul.f32 %v1859_v60, %v5203_v37  ;;  %v1861_v33 = vmul.f32 %v1859_v60, %v5201_v36  ;;  %v8036_v25 = vld [vmem:[#allocation32_spill] sm:$0xff] }
 0x1d6   : > { %v6018_v19 = vpop.permute.xlu1 %1840  ;;  %v6020_v10 = vpop.permute.xlu0 %1838  ;;  %2287 = vrot.lane.b32.xlu2 %v2286_v1, %s7950_s19  ;;  %v1136_v53 = vrot.slane %v1132_v2, 1  ;;  %v1419_v1 = vadd.f32 %v8032_v62, %v1403_v24  ;;  %v1464_v2 = vstv %s5997_s20  ;;  %v1430_v15 = vadd.f32 %v1427_v57, %v1418_v21  ;;  %v8038_v57 = vld [vmem:[#allocation46_spill] sm:$0xff]  ;;  %s7949_s20 = sshll.u32 %s4978_s27, 3 }
 0x1d7   : > { %v2318_v43 = vmul.f32 %v2316_v63, %v5201_v36  ;;  %v1831_v32 = vadd.f32 %v1829_v52, %v1826_v38  ;;  %v2355_v31 = vmul.f32 %v2354_v29, %v5203_v37  ;;  %v6087_v46 = vmul.f32 %v2354_v29, %v5201_v36  ;;  %v8039_v29 = vld [vmem:[#allocation56_spill] sm:$0xff]  ;;  %s6190_s22 = sadd.s32 4294967295, %s7949_s20  ;;  %s7082_s20 = sld [smem:[#allocation7 + $0x15]] }
 0x1d8   : > { %v6045_v47 = vpop.permute.xlu2 %1941  ;;  %v1431_v5 = vadd.f32 %v1426_v28, %v1419_v1  ;;  %v1098_v24 = vadd.f32 %v8035_v18, %v1082_v12  ;;  %v1083_v28 = vadd.f32 %v8036_v25, %v1067_v58  ;;  %v1832_v1 = vadd.f32 %v1830_v13, %v1827_v40  ;;  %v8040_v13 = vld [vmem:[#allocation49_spill] sm:$0xff] }
 0x1d9   : > { %v1844_v7 = vadd.f32 %v6020_v10, %v1831_v32  ;;  %v1864_v21 = vrot.slane %v1860_v56, 1  ;;  %v1865_v60 = vrot.slane %v1861_v33, 1  ;;  %v1446_v38 = vadd.f32 %v8038_v57, %v1430_v15 }
 0x1da   : > { %v1447_v6 = vadd.f32 %v8037_v27, %v1431_v5  ;;  %v1465_v52 = vmul.f32 %v1464_v2, %v5237_v9  ;;  %v1845_v42 = vadd.f32 %v6018_v19, %v1832_v1  ;;  %v2359_v12 = vrot.slane %v2355_v31, 1  ;;  %v8041_v27 = vld [vmem:[#allocation24_spill] sm:$0xff] }
 0x1db   : > { %v2360_v58 = vrot.slane %v6087_v46, 1  ;;  %v2370_v10 = vstv %s6064_s17  ;;  %v1462_v40 = vadd.f32 %v8039_v29, %v1446_v38  ;;  %v1466_v33 = vmul.f32 %v1464_v2, %v5235_v8  ;;  %s6206_s17 = sld [smem:[#allocation2 + $0x6a]] }
 0x1dc   : > { %2303 = vrot.lane.b32.xlu1 %v2302_v50, %s7952_s8  ;;  %2289 = vrot.lane.b32.xlu0 %v2285_v39, %s7950_s19  ;;  %v2317_v50 = vmul.f32 %v2316_v63, %v5203_v37  ;;  %v1903_v63 = vstv %s6058_s10  ;;  %v1463_v56 = vadd.f32 %v8040_v13, %v1447_v6  ;;  %v1495_v15 = vstv %s6070_s21  ;;  %s6198_s10 = sld [smem:[#allocation2 + $0x4b]] }
 0x1dd   : > { %v1857_v19 = vadd.f32 %v5903_v11, %v1844_v7  ;;  %v1904_v31 = vmul.f32 %v1903_v63, %v5203_v37  ;;  %v6124_v2 = vmul.f32 %v1903_v63, %v5201_v36  ;;  %v2331_v46 = vmul.f32 %v2329_v59, %v5201_v36  ;;  %s6211_s21 = sld [smem:[#allocation2 + $0x2b]] }
 0x1de   : > { %v6072_v39 = vpop.permute.xlu1 %1879  ;;  %v1854_v20 = vpop.permute.xlu0 %1853  ;;  %2305 = vrot.lane.b32.xlu2 %v2301_v34, %s7952_s8  ;;  %v6096_v34 = vsel %vm777_vm0, %v1136_v53, %v1137_v51  ;;  %v2330_v53 = vmul.f32 %v2329_v59, %v5203_v37  ;;  %v2372_v18 = vmul.f32 %v2370_v10, %v5201_v36  ;;  %v2371_v25 = vmul.f32 %v2370_v10, %v5203_v37 }
 0x1df   : > { %v1858_v32 = vadd.f32 %v1854_v20, %v1845_v42  ;;  %v1099_v6 = vadd.f32 %v8041_v27, %v1083_v28  ;;  %v1175_v1 = vstv %s6079_s1  ;;  %v2361_v11 = vsel %vm777_vm0, %v2359_v12, %v2360_v58  ;;  %v8042_v12 = vld [vmem:[#allocation35_spill] sm:$0xff]  ;;  %s6218_s1 = sld [smem:[#allocation2 + $0x3d]] }
 0x1e0   : > { %v6099_v62 = vpop.permute.xlu2 %1970  ;;  %v2398_v7 = vstv %s6089_s2  ;;  %v1103_v20 = vadd.f32 %v6032_v30, %v1098_v24  ;;  %v1496_v57 = vmul.f32 %v1495_v15, %v5237_v9  ;;  %v1497_v38 = vmul.f32 %v1495_v15, %v5235_v8  ;;  %v8044_v15 = vld [vmem:[#allocation60_spill] sm:$0xff]  ;;  %s6243_s2 = sld [smem:[#allocation2 + $0x5b]] }
 0x1e1   : > { %v1468_v59 = vadd.f32 %v1466_v33, %v1463_v56  ;;  %v1870_v42 = vadd.f32 %v1865_v60, %v1858_v32  ;;  %v1908_v29 = vrot.slane %v1904_v31, 2  ;;  %v1909_v10 = vrot.slane %v6124_v2, 2  ;;  %v8043_v56 = vld [vmem:[#allocation59_spill] sm:$0xff] }
 0x1e2   : > { %v2376_v30 = vrot.slane %v2372_v18, 1  ;;  %v2375_v24 = vrot.slane %v2371_v25, 1  ;;  %v2399_v28 = vmul.f32 %v2398_v7, %v5203_v37  ;;  %v2414_v2 = vstv %s6115_s4  ;;  %s6257_s4 = sld [smem:[#allocation2 + $0x7b]] }
 0x1e3   : > { %v1481_v33 = vadd.f32 %v8043_v56, %v1468_v59  ;;  %v1886_v18 = vadd.f32 %v5951_v61, %v1870_v42  ;;  %v8046_v61 = vld [vmem:[#allocation34_spill] sm:$0xff]  ;;  %v8047_v59 = vld [vmem:[#allocation52_spill] sm:$0xff] }
 0x1e4   : > { %2323 = vrot.lane.b32.xlu1 %v2318_v43, %s7950_s19  ;;  %2321 = vrot.lane.b32.xlu0 %v2317_v50, %s7950_s19  ;;  %v1866_v50 = vsel %vm777_vm0, %v1864_v21, %v1865_v60  ;;  %v1467_v21 = vadd.f32 %v1465_v52, %v1462_v40  ;;  %v1104_v52 = vadd.f32 %v6048_v16, %v1099_v6  ;;  %v1539_v16 = vstv %s6117_s15  ;;  %s6284_s15 = sld [smem:[#allocation2 + $0x8b]] }
 0x1e5   : > { %v1869_v63 = vadd.f32 %v1866_v50, %v1857_v19  ;;  %v1116_v40 = vadd.f32 %v8042_v12, %v1103_v20  ;;  %v6146_v60 = vmul.f32 %v2398_v7, %v5201_v36  ;;  %v1500_v50 = vrot.slane %v1496_v57, 1  ;;  %v8048_v12 = vld [vmem:[#allocation27_spill] sm:$0xff] }
 0x1e6   : > { %v1898_v5 = vpop.permute.xlu1 %1897  ;;  %v1896_v43 = vpop.permute.xlu0 %1895  ;;  %2334 = vrot.lane.b32.xlu2 %v2330_v53, %s7952_s8  ;;  %v1480_v19 = vadd.f32 %v8044_v15, %v1467_v21  ;;  %v1910_v6 = vsel %vm822_vm1, %v1908_v29, %v1909_v10  ;;  %v2403_v7 = vrot.slane %v2399_v28, 2  ;;  %v2415_v57 = vmul.f32 %v2414_v2, %v5203_v37 }
 0x1e7   : > { %v1885_v13 = vadd.f32 %v6072_v39, %v1869_v63  ;;  %v8045_v39 = vld [vmem:[#allocation63_spill] sm:$0xff]  ;;  %v1902_v20 = vadd.f32 %v1898_v5, %v1886_v18  ;;  %v2404_v21 = vrot.slane %v6146_v60, 2  ;;  %v6171_v42 = vmul.f32 %v1539_v16, %v5235_v8  ;;  %v8049_v60 = vld [vmem:[#allocation38_spill] sm:$0xff] }
 0x1e8   : > { %v6136_v53 = vpop.permute.xlu2 %2000  ;;  %v1494_v27 = vadd.f32 %v8045_v39, %v1481_v33  ;;  %v1493_v63 = vadd.f32 %v8047_v59, %v1480_v19  ;;  %v1176_v5 = vmul.f32 %v1175_v1, %v5271_v45  ;;  %v714_v33 = vlaneseq }
 0x1e9   : > { %v1901_v25 = vadd.f32 %v1896_v43, %v1885_v13  ;;  %v1117_v43 = vadd.f32 %v8046_v61, %v1104_v52  ;;  %v1129_v13 = vadd.f32 %v8048_v12, %v1116_v40  ;;  %v2405_v19 = vsel %vm822_vm1, %v2403_v7, %v2404_v21  ;;  %v8051_v61 = vld [vmem:[#allocation55_spill] sm:$0xff] }
 0x1ea   : > { %v1180_v39 = vrot.slane %v1176_v5, 2  ;;  %v721_v7 = vstv %s6190_s22  ;;  %v8052_v5 = vld [vmem:[#allocation66_spill] sm:$0xff]  ;;  %s6336_s22 = sld [smem:[#allocation7 + $0x10]] }
 0x1eb   : > { %v1913_v52 = vadd.f32 %v1910_v6, %v1901_v25  ;;  %v1130_v56 = vadd.f32 %v8049_v60, %v1117_v43 }
 0x1ec   : > { %2362 = vrot.lane.b32.xlu1 %v2361_v11, %s7950_s19  ;;  %2336 = vrot.lane.b32.xlu0 %v2331_v46, %s7952_s8  ;;  %v1501_v46 = vrot.slane %v1497_v38, 1  ;;  %v2377_v11 = vsel %vm777_vm0, %v2375_v24, %v2376_v30  ;;  %v6164_v38 = vmul.f32 %v2414_v2, %v5201_v36  ;;  %v6177_v24 = vmul.f32 %v1175_v1, %v5269_v44 }
 0x1ed   : > { %v1914_v1 = vadd.f32 %v1909_v10, %v1902_v20  ;;  %v8050_v20 = vld [vmem:[#allocation62_spill] sm:$0xff] }
 0x1ee   : > { %v1940_v32 = vpop.permute.xlu1 %1939  ;;  %v1926_v31 = vpop.permute.xlu0 %1925  ;;  %2364 = vrot.lane.b32.xlu2 %v2360_v58, %s7950_s19  ;;  %v1540_v58 = vmul.f32 %v1539_v16, %v5237_v9  ;;  %v1502_v28 = vsel %vm777_vm0, %v1500_v50, %v1501_v46  ;;  %v1506_v15 = vadd.f32 %v1501_v46, %v1494_v27  ;;  %v2419_v50 = vrot.slane %v2415_v57, 2 }
 0x1ef   : > { %v2420_v40 = vrot.slane %v6164_v38, 2  ;;  %v1505_v2 = vadd.f32 %v1502_v28, %v1493_v63  ;;  %v1545_v16 = vrot.slane %v6171_v42, 2  ;;  %v1181_v10 = vrot.slane %v6177_v24, 2 }
 0x1f0   : > { %v6173_v29 = vpop.permute.xlu2 %2042  ;;  %v1544_v46 = vrot.slane %v1540_v58, 2  ;;  %v1929_v27 = vadd.f32 %v5991_v49, %v1913_v52  ;;  %v1930_v6 = vadd.f32 %v1926_v31, %v1914_v1  ;;  %v1978_v38 = vstv %s6159_s18  ;;  %v8053_v52 = vld [vmem:[#allocation65_spill] sm:$0xff]  ;;  %s6296_s18 = sld [smem:[#allocation2 + $0xe]] }
 0x1f1   : > { %v1521_v57 = vadd.f32 %v8050_v20, %v1505_v2  ;;  %v1522_v43 = vadd.f32 %v8051_v61, %v1506_v15  ;;  %v2421_v58 = vsel %vm822_vm1, %v2419_v50, %v2420_v40  ;;  %v1141_v49 = vadd.f32 %v6096_v34, %v1129_v13  ;;  %v8054_v15 = vld [vmem:[#allocation37_spill] sm:$0xff] }
 0x1f2   : > { %v1945_v59 = vadd.f32 %v1940_v32, %v1929_v27  ;;  %v1142_v31 = vadd.f32 %v1137_v51, %v1130_v56  ;;  %v1546_v42 = vsel %vm822_vm1, %v1544_v46, %v1545_v16  ;;  %v1946_v60 = vadd.f32 %v6045_v47, %v1930_v6  ;;  %v8055_v46 = vld [vmem:[#allocation30_spill] sm:$0xff] }
 0x1f3   : > { %v1537_v28 = vadd.f32 %v8052_v5, %v1521_v57  ;;  %v1538_v12 = vadd.f32 %v8053_v52, %v1522_v43  ;;  %v1979_v26 = vmul.f32 %v1978_v38, %v5237_v9  ;;  %v6229_v51 = vsel %vm822_vm1, %v1180_v39, %v1181_v10 }
 0x1f4   : > { %2380 = vrot.lane.b32.xlu1 %v2376_v30, %s7952_s8  ;;  %2378 = vrot.lane.b32.xlu0 %v2377_v11, %s7952_s8  ;;  %v1947_v30 = vstv %s6150_s23  ;;  %v715_v11 = vshrl.u32 %v714_v33, 7  ;;  %v6231_v13 = vand.u32 127, %v714_v33  ;;  %v1219_v56 = vstv %s6179_s30  ;;  %s6287_s23 = sld [smem:[#allocation2 + $0x6d]] }
 0x1f5   : > { %v1948_v63 = vmul.f32 %v1947_v30, %v5237_v9  ;;  %v1949_v34 = vmul.f32 %v1947_v30, %v5235_v8  ;;  %v1980_v47 = vmul.f32 %v1978_v38, %v5235_v8  ;;  %v1157_v1 = vadd.f32 %v8054_v15, %v1141_v49  ;;  %s6432_s30 = sld [smem:[#allocation2 + $0x2f]] }
 0x1f6   : > { %v1960_v18 = vpop.permute.xlu1 %1959  ;;  %v1958_v25 = vpop.permute.xlu0 %1957  ;;  %2406 = vrot.lane.b32.xlu2 %v2405_v19, %s7950_s19  ;;  %v6240_v19 = vadd.s32 %v721_v7, %v715_v11  ;;  %v2435_v2 = vstv %s6194_s12  ;;  %v1158_v33 = vadd.f32 %v8055_v46, %v1142_v31  ;;  %v1549_v30 = vadd.f32 %v1546_v42, %v1537_v28  ;;  %v8057_v28 = vld [vmem:[#allocation58_spill] sm:$0xff]  ;;  %s6331_s12 = sld [smem:[#allocation7 + $0x20]] }
 0x1f7   : > { %v1950_v50 = vadd.f32 %v1948_v63, %v1945_v59  ;;  %v1583_v39 = vstv %s6184_s16  ;;  %v1550_v20 = vadd.f32 %v1545_v16, %v1538_v12  ;;  %v1951_v57 = vadd.f32 %v1949_v34, %v1946_v60  ;;  %v8056_v16 = vld [vmem:[#allocation39_spill] sm:$0xff]  ;;  %s6317_s16 = sld [smem:[#allocation2 + $0x3e]] }
 0x1f8   : > { %v6220_v32 = vpop.permute.xlu2 %2060  ;;  %v1983_v61 = vrot.slane %v1979_v26, 1  ;;  %v1984_v43 = vrot.slane %v1980_v47, 1  ;;  %v2437_v59 = vmul.f32 %v2435_v2, %v5235_v8  ;;  %v2436_v63 = vmul.f32 %v2435_v2, %v5237_v9 }
 0x1f9   : > { %v1963_v38 = vadd.f32 %v1958_v25, %v1950_v50  ;;  %v1964_v49 = vadd.f32 %v1960_v18, %v1951_v57  ;;  %v2448_v31 = vstv %s6211_s21  ;;  %v1174_v25 = vadd.f32 %v8056_v16, %v1158_v33  ;;  %s6359_s21 = sld [smem:[#allocation7 + $0x50]] }
 0x1fa   : > { %v1565_v52 = vadd.f32 %v8057_v28, %v1549_v30  ;;  %v1614_v12 = vstv %s6218_s1  ;;  %v1566_v18 = vadd.f32 %v5681_v41, %v1550_v20  ;;  %v716_v15 = vadd.s32 8, %v715_v11  ;;  %s6364_s1 = sld [smem:[#allocation2 + $0x6e]] }
 0x1fb   : > { %v1976_v34 = vadd.f32 %v6099_v62, %v1963_v38  ;;  %v1985_v50 = vsel %vm777_vm0, %v1983_v61, %v1984_v43  ;;  %v2449_v2 = vmul.f32 %v2448_v31, %v5237_v9  ;;  %v2489_v30 = vstv %s6243_s2  ;;  %s6378_s2 = sld [smem:[#allocation7 + $0x80]] }
 0x1fc   : > { %2422 = vrot.lane.b32.xlu1 %v2421_v58, %s7952_s8  ;;  %2408 = vrot.lane.b32.xlu0 %v2404_v21, %s7950_s19  ;;  %v2473_v21 = vstv %s6198_s10  ;;  %v2022_v58 = vstv %s6206_s17  ;;  %v1581_v33 = vadd.f32 %v5679_v22, %v1565_v52  ;;  %v1585_v11 = vmul.f32 %v1583_v39, %v5269_v44  ;;  %s6342_s10 = sld [smem:[#allocation7 + $0x40]] }
 0x1fd   : > { %v2474_v42 = vmul.f32 %v2473_v21, %v5237_v9  ;;  %v6255_v5 = vmul.f32 %v2473_v21, %v5235_v8  ;;  %v2023_v47 = vmul.f32 %v2022_v58, %v5237_v9  ;;  %v6273_v46 = vmul.f32 %v2022_v58, %v5235_v8  ;;  %s6349_s17 = sld [smem:[#allocation7 + $0x70]] }
 0x1fe   : > { %v1999_v27 = vpop.permute.xlu1 %1998  ;;  %v1973_v6 = vpop.permute.xlu0 %1972  ;;  %2424 = vrot.lane.b32.xlu2 %v2420_v40, %s7952_s8  ;;  %v1584_v40 = vmul.f32 %v1583_v39, %v5271_v45  ;;  %v1615_v20 = vmul.f32 %v1614_v12, %v5271_v45  ;;  %v6282_v57 = vmul.f32 %v1614_v12, %v5269_v44  ;;  %v1988_v22 = vadd.f32 %v1985_v50, %v1976_v34 }
 0x1ff   : > { %v1977_v26 = vadd.f32 %v1973_v6, %v1964_v49  ;;  %v2478_v41 = vrot.slane %v2474_v42, 1  ;;  %v2479_v62 = vrot.slane %v6255_v5, 1  ;;  %v8058_v6 = vld [vmem:[#allocation40_spill] sm:$0xff]  ;;  %v2027_v49 = vrot.slane %v2023_v47, 2 }
 0x200   : > { %v6263_v60 = vpop.permute.xlu2 %2089  ;;  %v1173_v21 = vadd.f32 %v8058_v6, %v1157_v1  ;;  %v2028_v1 = vrot.slane %v6273_v46, 2  ;;  %v2450_v39 = vmul.f32 %v2448_v31, %v5235_v8  ;;  %v6293_v42 = vmul.f32 %v2489_v30, %v5235_v8  ;;  %v8060_v46 = vld [vmem:[#allocation33_spill] sm:$0xff] }
 0x201   : > { %v1989_v58 = vadd.f32 %v1984_v43, %v1977_v26  ;;  %v2490_v5 = vmul.f32 %v2489_v30, %v5237_v9  ;;  %vm731_vm2 = vcmp.ge.s32.totalorder %v6231_v13, 1  ;;  %vm732_vm3 = vcmp.le.s32.totalorder %v6231_v13, 16 }
 0x202   : > { %v1586_v16 = vadd.f32 %v1584_v40, %v1581_v33  ;;  %v2004_v43 = vadd.f32 %v1999_v27, %v1988_v22  ;;  %v2480_v28 = vsel %vm777_vm0, %v2478_v41, %v2479_v62  ;;  %v2517_v52 = vstv %s6257_s4  ;;  %v8061_v41 = vld [vmem:[#allocation42_spill] sm:$0xff]  ;;  %vm6370_vm9 = vmand %vm731_vm2, %vm732_vm3  ;;  %s6392_s4 = sld [smem:[#allocation2 + $0x1f]] }
 0x203   : > { %v1185_v12 = vadd.f32 %v6229_v51, %v1173_v21  ;;  %vm735_vm4 = vcmp.ge.s32.totalorder %v6231_v13, 21  ;;  %vm736_vm5 = vcmp.le.s32.totalorder %v6231_v13, 36  ;;  %v1186_v31 = vadd.f32 %v1181_v10, %v1174_v25 }
 0x204   : > { %2442 = vrot.lane.b32.xlu1 %v2437_v59, %s7950_s19  ;;  %2440 = vrot.lane.b32.xlu0 %v2436_v63, %s7950_s19  ;;  %v8059_v59 = vld [vmem:[#allocation61_spill] sm:$0xff]  ;;  %v1620_v34 = vrot.slane %v6282_v57, 1  ;;  %v1599_v27 = vadd.f32 %v5704_v48, %v1586_v16  ;;  %v2005_v47 = vadd.f32 %v6136_v53, %v1989_v58  ;;  %v2029_v51 = vsel %vm822_vm1, %v2027_v49, %v2028_v1  ;;  %v8062_v57 = vld [vmem:[#allocation64_spill] sm:$0xff]  ;;  %vm6384_vm10 = vmand %vm735_vm4, %vm736_vm5 }
 0x205   : > { %v1582_v63 = vadd.f32 %v8059_v59, %v1566_v18  ;;  %v1619_v18 = vrot.slane %v1615_v20, 1  ;;  %v2495_v24 = vrot.slane %v6293_v42, 1  ;;  %v2494_v10 = vrot.slane %v2490_v5, 1  ;;  %vm738_vm13 = vmor %vm6370_vm9, %vm6384_vm10 }
 0x206   : > { %v2017_v38 = vpop.permute.xlu1 %2016  ;;  %v2015_v61 = vpop.permute.xlu0 %2014  ;;  %2453 = vrot.lane.b32.xlu2 %v2449_v2, %s7952_s8  ;;  %v2518_v25 = vmul.f32 %v2517_v52, %v5237_v9  ;;  %vm724_vm6 = vcmp.ge.s32.totalorder %v6240_v19, 0  ;;  %v6322_v48 = vadd.s32 %v721_v7, %v716_v15  ;;  %v6325_v2 = vmul.f32 %v2517_v52, %v5235_v8 }
 0x207   : > { %v1587_v40 = vadd.f32 %v1585_v11, %v1582_v63  ;;  %v2020_v50 = vadd.f32 %v2015_v61, %v2004_v43  ;;  %v2021_v53 = vadd.f32 %v2017_v38, %v2005_v47  ;;  %v1201_v33 = vadd.f32 %v8060_v46, %v1185_v12  ;;  %v8064_v43 = vld [vmem:[#allocation36_spill] sm:$0xff] }
 0x208   : > { %v6308_v26 = vpop.permute.xlu2 %2119  ;;  %v1202_v30 = vadd.f32 %v8061_v41, %v1186_v31  ;;  %v2533_v20 = vstv %s6284_s15  ;;  %v1612_v61 = vadd.f32 %v8062_v57, %v1599_v27  ;;  %v1621_v7 = vsel %vm777_vm0, %v1619_v18, %v1620_v34  ;;  %s6398_s15 = sld [smem:[#allocation2 + $0x4f]] }
 0x209   : > { %v1600_v6 = vadd.f32 %v5702_v23, %v1587_v40  ;;  %v1658_v15 = vstv %s6287_s23  ;;  %v2032_v38 = vadd.f32 %v2029_v51, %v2020_v50  ;;  %v2496_v63 = vsel %vm777_vm0, %v2494_v10, %v2495_v24  ;;  %s6463_s23 = sld [smem:[#allocation5 + $0x1]] }
 0x20a   : > { %v2522_v23 = vrot.slane %v2518_v25, 2  ;;  %v2066_v22 = vstv %s6296_s18  ;;  %v2033_v58 = vadd.f32 %v2028_v1, %v2021_v53  ;;  %v2523_v49 = vrot.slane %v6325_v2, 2  ;;  %s6472_s18 = sld [smem:[#allocation2 + $0x5f]] }
 0x20b   : > { %v1613_v59 = vadd.f32 %v5732_v35, %v1600_v6  ;;  %v6347_v42 = vmul.f32 %v2533_v20, %v5235_v8  ;;  %vm726_vm7 = vcmp.le.s32.totalorder %v6240_v19, 15  ;;  %v8063_v35 = vld [vmem:[#allocation41_spill] sm:$0xff]  ;;  %v1659_v5 = vmul.f32 %v1658_v15, %v5271_v45 }
 0x20c   : > { %2481 = vrot.lane.b32.xlu1 %v2480_v28, %s7950_s19  ;;  %2455 = vrot.lane.b32.xlu0 %v2450_v39, %s7952_s8  ;;  %v2534_v39 = vmul.f32 %v2533_v20, %v5237_v9  ;;  %v6355_v16 = vmul.f32 %v1658_v15, %v5269_v44  ;;  %vm725_vm8 = vcmp.ge.s32.totalorder %v6322_v48, 0  ;;  %v1218_v28 = vadd.f32 %v8064_v43, %v1202_v30  ;;  %vm6404_vm12 = vmand %vm724_vm6, %vm726_vm7 }
 0x20d   : > { %v2048_v52 = vadd.f32 %v6173_v29, %v2032_v38  ;;  %v1624_v18 = vadd.f32 %v1621_v7, %v1612_v61  ;;  %v1625_v40 = vadd.f32 %v1620_v34, %v1613_v59  ;;  %v2067_v29 = vmul.f32 %v2066_v22, %v5271_v45  ;;  %vm6447_vm15 = vmand %vm6404_vm12, %vm738_vm13 }
 0x20e   : > { %v2059_v21 = vpop.permute.xlu1 %2058  ;;  %v2045_v11 = vpop.permute.xlu0 %2044  ;;  %2483 = vrot.lane.b32.xlu2 %v2479_v62, %s7950_s19  ;;  %v1217_v62 = vadd.f32 %v8063_v35, %v1201_v33  ;;  %v2097_v27 = vstv %s6317_s16  ;;  %v2524_v34 = vsel %vm822_vm1, %v2522_v23, %v2523_v49  ;;  %v2538_v51 = vrot.slane %v2534_v39, 2  ;;  %s6500_s16 = sld [smem:[#allocation2 + $0x7f]] }
 0x20f   : > { %v2049_v12 = vadd.f32 %v2045_v11, %v2033_v58  ;;  %v2064_v50 = vadd.f32 %v2059_v21, %v2048_v52  ;;  %vm727_vm11 = vcmp.le.s32.totalorder %v6322_v48, 15  ;;  %v1663_v13 = vrot.slane %v1659_v5, 2  ;;  %v8071_v11 = vld [vmem:[#allocation67_spill] sm:$0xff] }
 0x210   : > { %v6357_v1 = vpop.permute.xlu2 %2161  ;;  %v1220_v10 = vadd.f32 %v1219_v56, %v1217_v62  ;;  %v1664_v25 = vrot.slane %v6355_v16, 2  ;;  %v1221_v41 = vadd.f32 %v1219_v56, %v1218_v28  ;;  %v1640_v30 = vadd.f32 %v5730_v54, %v1624_v18  ;;  %vm6426_vm14 = vmand %vm725_vm8, %vm727_vm11 }
 0x211   : > { %v2065_v6 = vadd.f32 %v6220_v32, %v2049_v12  ;;  %v2068_v21 = vmul.f32 %v2066_v22, %v5269_v44  ;;  %v1641_v19 = vadd.f32 %v8071_v11, %v1625_v40  ;;  %v2098_v20 = vmul.f32 %v2097_v27, %v5271_v45  ;;  %vm6459_vm2 = vmand %vm6426_vm14, %vm738_vm13 }
 0x212   : > { %v2099_v56 = vmul.f32 %v2097_v27, %v5269_v44  ;;  %v2685_v57 = vstv %s6331_s12  ;;  %v1656_v32 = vadd.f32 %v5763_v17, %v1640_v30  ;;  %v2069_v61 = vadd.f32 %v2067_v29, %v2064_v50  ;;  %s6519_s12 = sld [smem:[#allocation7 + $0x44]] }
 0x213   : > { %v2678_v15 = vstv %s6336_s22  ;;  %v1222_v38 = vmax.f32 %v1220_v10, 0.0  ;;  %v1657_v59 = vadd.f32 %v5761_v14, %v1641_v19  ;;  %v1665_v48 = vsel %vm822_vm1, %v1663_v13, %v1664_v25  ;;  %s6564_s22 = sld [smem:[#allocation7 + $0x54]] }
 0x214   : > { %2499 = vrot.lane.b32.xlu1 %v2495_v24, %s7952_s8  ;;  %2497 = vrot.lane.b32.xlu0 %v2496_v63, %s7952_s8  ;;  %v2539_v24 = vrot.slane %v6347_v42, 2  ;;  %v2702_v23 = vstv %s6342_s10  ;;  %v1223_v22 = vmax.f32 %v1221_v41, 0.0  ;;  %v2070_v14 = vadd.f32 %v2068_v21, %v2065_v6  ;;  %s6522_s10 = sld [smem:[#allocation2 + $0x8f]] }
 0x215   : > { %v2141_v39 = vstv %s6364_s1  ;;  %v2102_v35 = vrot.slane %v2098_v20, 1  ;;  %v2103_v62 = vrot.slane %v2099_v56, 1  ;;  %v2736_v5 = vstv %s6349_s17  ;;  %s6526_s17 = sld [smem:[#allocation5 + $0x2]] }
 0x216   : > { %v2079_v53 = vpop.permute.xlu1 %2078  ;;  %v2077_v46 = vpop.permute.xlu0 %2076  ;;  %2525 = vrot.lane.b32.xlu2 %v2524_v34, %s7950_s19  ;;  %v2540_v7 = vsel %vm822_vm1, %v2538_v51, %v2539_v24  ;;  %v2714_v16 = vstv %s6359_s21  ;;  %v1668_v43 = vadd.f32 %v1665_v48, %v1656_v32  ;;  %v2554_v52 = vstv %s6392_s4  ;;  %v8079_v32 = vld [vmem:[#allocation69_spill] sm:$0xff]  ;;  %s6535_s1 = sld [smem:[#allocation7 + $0x24]] }
 0x217   : > { %v2082_v58 = vadd.f32 %v2077_v46, %v2069_v61  ;;  %v2083_v28 = vadd.f32 %v2079_v53, %v2070_v14  ;;  %v2748_v12 = vstv %s6378_s2  ;;  %v1669_v31 = vadd.f32 %v1664_v25, %v1657_v59  ;;  %v8078_v53 = vld [vmem:[#allocation68_spill] sm:$0xff]  ;;  %s6539_s4 = sld [smem:[#allocation7 + $0x14]] }
 0x218   : > { %v6437_v63 = vpop.permute.xlu2 %2179  ;;  %v2142_v29 = vmul.f32 %v2141_v39, %v5271_v45  ;;  %v6477_v2 = vmul.f32 %v2141_v39, %v5269_v44  ;;  %v6482_v27 = vsel %vm6447_vm15, %v1222_v38, 0.0  ;;  %v6486_v47 = vsel %vm6459_vm2, %v1223_v22, 0.0  ;;  %s6569_s21 = sld [smem:[#allocation2 + $0x33]] }
 0x219   : > { %v2095_v50 = vadd.f32 %v6263_v60, %v2082_v58  ;;  %v1685_v51 = vadd.f32 %v5798_v0, %v1669_v31  ;;  %v2104_v10 = vsel %vm777_vm0, %v2102_v35, %v2103_v62  ;;  %v2556_v13 = vmul.f32 %v2554_v52, %v5269_v44  ;;  %s6580_s2 = sld [smem:[#allocation7 + $0x84]] }
 0x21a   : > { %v2555_v25 = vmul.f32 %v2554_v52, %v5271_v45  ;;  %v1684_v46 = vadd.f32 %v8078_v53, %v1668_v43  ;;  %v2567_v33 = vstv %s6432_s30  ;;  %v2146_v60 = vrot.slane %v2142_v29, 2  ;;  %s6596_s30 = sld [smem:[#allocation2 + $0x3]] }
 0x21b   : > { %v2703_v6 = vmul.f32 %v2702_v23, %v6482_v27  ;;  %v2704_v21 = vmul.f32 %v2702_v23, %v6486_v47  ;;  %v2107_v19 = vadd.f32 %v2104_v10, %v2095_v50  ;;  %v6509_v56 = vmul.f32 %v2685_v57, %v6482_v27 }
 0x21c   : > { %2541 = vrot.lane.b32.xlu1 %v2540_v7, %s7952_s8  ;;  %2527 = vrot.lane.b32.xlu0 %v2523_v49, %s7950_s19  ;;  %v2592_v49 = vstv %s6398_s15  ;;  %v1700_v11 = vadd.f32 %v5796_v55, %v1684_v46  ;;  %v1702_v54 = vstv %s6463_s23  ;;  %v1701_v61 = vadd.f32 %v8079_v32, %v1685_v51  ;;  %s6556_s15 = sld [smem:[#allocation7 + $0x74]] }
 0x21d   : > { %v2593_v41 = vmul.f32 %v2592_v49, %v5271_v45  ;;  %v6498_v30 = vmul.f32 %v2592_v49, %v5269_v44  ;;  %v2568_v7 = vmul.f32 %v2567_v33, %v5271_v45  ;;  %v2737_v38 = vmul.f32 %v2736_v5, %v6482_v27  ;;  %s6608_s23 = sld [smem:[#allocation7 + $0x38]] }
 0x21e   : > { %v2118_v18 = vpop.permute.xlu1 %2117  ;;  %v2092_v40 = vpop.permute.xlu0 %2091  ;;  %2543 = vrot.lane.b32.xlu2 %v2539_v24, %s7952_s8  ;;  %v2147_v24 = vrot.slane %v6477_v2, 2  ;;  %v2608_v23 = vstv %s6472_s18  ;;  %v2707_v58 = vrot.slane %v2703_v6, 1  ;;  %v2708_v39 = vrot.slane %v2704_v21, 1  ;;  %s6613_s18 = sld [smem:[#allocation7 + $0x68]] }
 0x21f   : > { %v2096_v34 = vadd.f32 %v2092_v40, %v2083_v28  ;;  %v2123_v59 = vadd.f32 %v2118_v18, %v2107_v19  ;;  %v2597_v48 = vrot.slane %v2593_v41, 1  ;;  %v2598_v55 = vrot.slane %v6498_v30, 1 }
 0x220   : > { %v6502_v0 = vpop.permute.xlu2 %2215  ;;  %v2148_v22 = vsel %vm822_vm1, %v2146_v60, %v2147_v24  ;;  %v2738_v35 = vmul.f32 %v2736_v5, %v6486_v47  ;;  %v2715_v52 = vmul.f32 %v2714_v16, %v6482_v27  ;;  %v1704_v31 = vadd.f32 %v1702_v54, %v1701_v61 }
 0x221   : > { %v2108_v20 = vadd.f32 %v2103_v62, %v2096_v34  ;;  %v1703_v62 = vadd.f32 %v1702_v54, %v1700_v11  ;;  %v2569_v18 = vmul.f32 %v2567_v33, %v5269_v44  ;;  %v2610_v40 = vmul.f32 %v2608_v23, %v5269_v44 }
 0x222   : > { %v2609_v5 = vmul.f32 %v2608_v23, %v5271_v45  ;;  %v2599_v2 = vsel %vm777_vm0, %v2597_v48, %v2598_v55  ;;  %v2636_v49 = vstv %s6500_s16  ;;  %v6546_v34 = vmul.f32 %v2678_v15, %v6482_v27  ;;  %s6618_s16 = sld [smem:[#allocation2 + $0x63]] }
 0x223   : > { %v2124_v43 = vadd.f32 %v6308_v26, %v2108_v20  ;;  %v2742_v51 = vrot.slane %v2738_v35, 2  ;;  %v2716_v10 = vmul.f32 %v2714_v16, %v6486_v47  ;;  %v6559_v53 = vsel %vm777_vm0, %v2707_v58, %v2708_v39 }
 0x224   : > { %2561 = vrot.lane.b32.xlu1 %v2556_v13, %s7950_s19  ;;  %2559 = vrot.lane.b32.xlu0 %v2555_v25, %s7950_s19  ;;  %v6554_v13 = vmul.f32 %v2748_v12, %v6482_v27  ;;  %v1705_v25 = vmax.f32 %v1703_v62, 0.0  ;;  %v2741_v46 = vrot.slane %v2737_v38, 2  ;;  %v2750_v15 = vmul.f32 %v2748_v12, %v6486_v47 }
 0x225   : > { %v1706_v33 = vmax.f32 %v1704_v31, 0.0  ;;  %v2614_v16 = vrot.slane %v2610_v40, 1  ;;  %v2613_v41 = vrot.slane %v2609_v5, 1  ;;  %v2637_v30 = vmul.f32 %v2636_v49, %v5271_v45 }
 0x226   : > { %v2136_v57 = vpop.permute.xlu1 %2135  ;;  %v2134_v14 = vpop.permute.xlu0 %2133  ;;  %2572 = vrot.lane.b32.xlu2 %v2568_v7, %s7952_s8  ;;  %v6573_v12 = vmul.f32 %v2636_v49, %v5269_v44  ;;  %v2719_v21 = vrot.slane %v2715_v52, 1  ;;  %v2652_v20 = vstv %s6522_s10  ;;  %v6577_v54 = vsel %vm822_vm1, %v2741_v46, %v2742_v51  ;;  %s6637_s10 = sld [smem:[#allocation7 + $0x79]] }
 0x227   : > { %v2139_v28 = vadd.f32 %v2134_v14, %v2123_v59  ;;  %v2140_v26 = vadd.f32 %v2136_v57, %v2124_v43  ;;  %v2720_v32 = vrot.slane %v2716_v10, 1  ;;  %v2753_v61 = vrot.slane %v6554_v13, 2 }
 0x228   : > { %v6541_v50 = vpop.permute.xlu2 %2245  ;;  %v2185_v7 = vstv %s6526_s17  ;;  %v6590_v48 = vsel %vm6459_vm2, %v1706_v33, 0.0  ;;  %v2615_v23 = vsel %vm777_vm0, %v2613_v41, %v2614_v16  ;;  %v2641_v57 = vrot.slane %v2637_v30, 2  ;;  %s6646_s17 = sld [smem:[#allocation7 + $0x59]] }
 0x229   : > { %v2151_v29 = vadd.f32 %v2148_v22, %v2139_v28  ;;  %v2152_v6 = vadd.f32 %v2147_v24, %v2140_v26  ;;  %v6586_v24 = vsel %vm6447_vm15, %v1705_v25, 0.0  ;;  %v2642_v14 = vrot.slane %v6573_v12, 2 }
 0x22a   : > { %v2653_v58 = vmul.f32 %v2652_v20, %v5271_v45  ;;  %v6600_v39 = vmul.f32 %v2652_v20, %v5269_v44  ;;  %v2754_v43 = vrot.slane %v2750_v15, 2  ;;  %v2821_v28 = vstv %s6556_s15  ;;  %s6703_s15 = sld [smem:[#allocation7 + $0x78]] }
 0x22b   : > { %v2167_v60 = vadd.f32 %v6357_v1, %v2151_v29  ;;  %v2787_v1 = vstv %s6519_s12  ;;  %v2770_v52 = vstv %s6535_s1  ;;  %v2763_v31 = vstv %s6539_s4  ;;  %s6626_s12 = sld [smem:[#allocation7 + $0x49]] }
 0x22c   : > { %2600 = vrot.lane.b32.xlu1 %v2599_v2, %s7950_s19  ;;  %2574 = vrot.lane.b32.xlu0 %v2569_v18, %s7952_s8  ;;  %v2799_v18 = vstv %s6564_s22  ;;  %v2223_v40 = vstv %s6569_s21  ;;  %v2788_v5 = vmul.f32 %v2787_v1, %v6586_v24  ;;  %v2789_v26 = vmul.f32 %v2787_v1, %v6590_v48  ;;  %s6659_s1 = sld [smem:[#allocation7 + $0x89]] }
 0x22d   : > { %v2823_v29 = vmul.f32 %v2821_v28, %v6590_v48  ;;  %v2643_v2 = vsel %vm822_vm1, %v2641_v57, %v2642_v14  ;;  %v2657_v49 = vrot.slane %v2653_v58, 2  ;;  %v2658_v51 = vrot.slane %v6600_v39, 2  ;;  %s6695_s4 = sld [smem:[#allocation7 + $0x48]] }
 0x22e   : > { %v2178_v11 = vpop.permute.xlu1 %2177  ;;  %v2164_v19 = vpop.permute.xlu0 %2163  ;;  %2602 = vrot.lane.b32.xlu2 %v2598_v55, %s7950_s19  ;;  %v6605_v55 = vsel %vm777_vm0, %v2719_v21, %v2720_v32  ;;  %v2822_v10 = vmul.f32 %v2821_v28, %v6586_v24  ;;  %v6631_v15 = vsel %vm822_vm1, %v2753_v61, %v2754_v43  ;;  %v6634_v33 = vmul.f32 %v2770_v52, %v6586_v24  ;;  %s6709_s22 = sld [smem:[#allocation7 + $0x28]] }
 0x22f   : > { %v2183_v38 = vadd.f32 %v2178_v11, %v2167_v60  ;;  %v2168_v59 = vadd.f32 %v2164_v19, %v2152_v6  ;;  %v2224_v30 = vmul.f32 %v2223_v40, %v5168_v3  ;;  %v6641_v60 = vmul.f32 %v2223_v40, %v5170_v4  ;;  %s6715_s21 = sld [smem:[#allocation7 + $0x18]] }
 0x230   : > { %v6602_v62 = vpop.permute.xlu2 %2287  ;;  %v6644_v6 = vmul.f32 %v2763_v31, %v6586_v24  ;;  %v2793_v12 = vrot.slane %v2789_v26, 1  ;;  %v2827_v21 = vrot.slane %v2823_v29, 2  ;;  %v6650_v11 = vmul.f32 %v2799_v18, %v6586_v24 }
 0x231   : > { %v2184_v22 = vadd.f32 %v6437_v63, %v2168_v59  ;;  %v2186_v35 = vadd.f32 %v2185_v7, %v2183_v38  ;;  %v6653_v19 = vmul.f32 %v2799_v18, %v6590_v48  ;;  %v2659_v20 = vsel %vm822_vm1, %v2657_v49, %v2658_v51 }
 0x232   : > { %v2792_v32 = vrot.slane %v2788_v5, 1  ;;  %v2826_v61 = vrot.slane %v2822_v10, 2  ;;  %v2192_v59 = vstv %s6596_s30  ;;  %v2862_v57 = vstv %s6608_s23  ;;  %s6731_s30 = sld [smem:[#allocation7 + $0x58]] }
 0x233   : > { %v2187_v63 = vadd.f32 %v2185_v7, %v2184_v22  ;;  %v2188_v13 = vmax.f32 %v2186_v35, 0.0  ;;  %v2228_v58 = vrot.slane %v2224_v30, 1  ;;  %v7945_v39 = vrot.slane %v6641_v60, 1  ;;  %s6740_s23 = sld [smem:[#allocation7 + $0x88]] }
 0x234   : > { %2618 = vrot.lane.b32.xlu1 %v2614_v16, %s7952_s8  ;;  %2616 = vrot.lane.b32.xlu0 %v2615_v23, %s7952_s8  ;;  %v2833_v16 = vstv %s6580_s2  ;;  %v2896_v35 = vstv %s6613_s18  ;;  %v6681_v43 = vsel %vm777_vm0, %v2792_v32, %v2793_v12  ;;  %v6684_v28 = vsel %vm822_vm1, %v2826_v61, %v2827_v21  ;;  %s6720_s2 = sld [smem:[#allocation2 + $0x7]] }
 0x235   : > { %v2189_v41 = vmax.f32 %v2187_v63, 0.0  ;;  %v6657_v7 = vmul.f32 %v2833_v16, %v6590_v48  ;;  %v6663_v38 = vsel %vm6447_vm15, %v2188_v13, 0.0  ;;  %v6669_v23 = vmul.f32 %v2833_v16, %v6586_v24  ;;  %s6746_s18 = sld [smem:[#allocation7 + $0x4a]] }
 0x236   : > { %v6628_v25 = vpop.permute.xlu1 %2204  ;;  %v2203_v46 = vpop.permute.xlu0 %2202  ;;  %2644 = vrot.lane.b32.xlu2 %v2643_v2, %s7950_s19  ;;  %v2194_v31 = vmul.f32 %v2192_v59, %v5170_v4  ;;  %v2193_v18 = vmul.f32 %v2192_v59, %v5168_v3  ;;  %v2267_v29 = vstv %s6618_s16  ;;  %v2897_v49 = vmul.f32 %v2896_v35, %v6663_v38  ;;  %s6756_s16 = sld [smem:[#allocation7 + $0x5a]] }
 0x237   : > { %v6674_v22 = vsel %vm6459_vm2, %v2189_v41, 0.0  ;;  %v2230_v13 = vsel %vm777_vm0, %v2228_v58, %v7945_v39  ;;  %v3215_v16 = vstv %s6626_s12  ;;  %v3249_v41 = vstv %s6637_s10  ;;  %s6764_s12 = sld [smem:[#allocation7 + $0x5b]] }
 0x238   : > { %v6666_v1 = vpop.permute.xlu2 %2305  ;;  %v2864_v2 = vmul.f32 %v2862_v57, %v6674_v22  ;;  %v2898_v10 = vmul.f32 %v2896_v35, %v6674_v22  ;;  %v3227_v30 = vstv %s6646_s17  ;;  %v2208_v61 = vadd.f32 %v2203_v46, %v2193_v18  ;;  %s6769_s10 = sld [smem:[#allocation7 + $0x4b]] }
 0x239   : > { %v2268_v59 = vmul.f32 %v2267_v29, %v5168_v3  ;;  %v3261_v58 = vstv %s6659_s1  ;;  %v3216_v46 = vmul.f32 %v3215_v16, %v6663_v38  ;;  %v3217_v18 = vmul.f32 %v3215_v16, %v6674_v22  ;;  %s6812_s17 = sld [smem:[#allocation7 + $0x7a]] }
 0x23a   : > { %v2868_v21 = vrot.slane %v2864_v2, 1  ;;  %v2902_v32 = vrot.slane %v2898_v10, 2  ;;  %v3250_v2 = vmul.f32 %v3249_v41, %v6663_v38  ;;  %v3228_v10 = vmul.f32 %v3227_v30, %v6663_v38  ;;  %s6822_s1 = sld [smem:[#allocation7 + $0x7b]] }
 0x23b   : > { %v3221_v16 = vrot.slane %v3217_v18, 1  ;;  %v2272_v63 = vrot.slane %v2268_v59, 2  ;;  %v2872_v52 = vstv %s6695_s4  ;;  %v2906_v39 = vstv %s6703_s15  ;;  %s6832_s4 = sld [smem:[#allocation2 + $0x37]] }
 0x23c   : > { %2660 = vrot.lane.b32.xlu1 %v2659_v20, %s7952_s8  ;;  %2646 = vrot.lane.b32.xlu0 %v2642_v14, %s7950_s19  ;;  %v2863_v14 = vmul.f32 %v2862_v57, %v6663_v38  ;;  %v2901_v20 = vrot.slane %v2897_v49, 2  ;;  %v6713_v57 = vmul.f32 %v2267_v29, %v5170_v4  ;;  %v2209_v29 = vadd.f32 %v6628_v25, %v2194_v31  ;;  %s6848_s15 = sld [smem:[#allocation7 + $0x8a]] }
 0x23d   : > { %v3251_v49 = vmul.f32 %v3249_v41, %v6674_v22  ;;  %v3229_v25 = vmul.f32 %v3227_v30, %v6674_v22  ;;  %v3262_v31 = vmul.f32 %v3261_v58, %v6663_v38  ;;  %v2221_v41 = vadd.f32 %v6502_v0, %v2208_v61 }
 0x23e   : > { %v6692_v5 = vpop.permute.xlu1 %2243  ;;  %v2218_v26 = vpop.permute.xlu0 %2217  ;;  %2662 = vrot.lane.b32.xlu2 %v2658_v51, %s7952_s8  ;;  %v2867_v12 = vrot.slane %v2863_v14, 1  ;;  %v6726_v14 = vsel %vm822_vm1, %v2901_v20, %v2902_v32  ;;  %v3263_v32 = vmul.f32 %v3261_v58, %v6674_v22  ;;  %v3232_v18 = vrot.slane %v3228_v10, 1 }
 0x23f   : > { %v3255_v20 = vrot.slane %v3251_v49, 2  ;;  %v3233_v30 = vrot.slane %v3229_v25, 1  ;;  %v3266_v58 = vrot.slane %v3262_v31, 2  ;;  %v2233_v59 = vadd.f32 %v2230_v13, %v2221_v41 }
 0x240   : > { %v6718_v35 = vpop.permute.xlu2 %2334  ;;  %v6723_v51 = vsel %vm777_vm0, %v2867_v12, %v2868_v21  ;;  %v3220_v12 = vrot.slane %v3216_v46, 1  ;;  %v3254_v21 = vrot.slane %v3250_v2, 2  ;;  %v2838_v2 = vrot.slane %v6669_v23, 2 }
 0x241   : > { %v6762_v61 = vsel %vm777_vm0, %v3232_v18, %v3233_v30  ;;  %v2855_v49 = vstv %s6709_s22  ;;  %v2848_v10 = vstv %s6715_s21  ;;  %v2311_v25 = vstv %s6720_s2  ;;  %s6856_s22 = sld [smem:[#allocation7 + $0x39]] }
 0x242   : > { %v6749_v46 = vsel %vm777_vm0, %v3220_v12, %v3221_v16  ;;  %v6754_v0 = vsel %vm822_vm1, %v3254_v21, %v3255_v20  ;;  %v8080_v12 = vrot.slane %v6641_v60, 1  ;;  %v6777_v31 = vmul.f32 %v2872_v52, %v6663_v38  ;;  %s6873_s21 = sld [smem:[#allocation7 + $0x69]] }
 0x243   : > { %v8081_v23 = vrot.slane %v6653_v19, 1  ;;  %v8082_v13 = vrot.slane %v6650_v11, 1  ;;  %v8083_v60 = vrot.slane %v6657_v7, 2  ;;  %v6806_v11 = vmul.f32 %v2311_v25, %v5201_v36  ;;  %s6897_s2 = sld [smem:[#allocation7 + $0x8b]] }
 0x244   : > { %2688 = vrot.lane.b32.xlu1 %v6509_v56, %s7952_s8  ;;  %2681 = vrot.lane.b32.xlu0 %v6546_v34, %s7950_s19  ;;  %v2222_v56 = vadd.f32 %v2218_v26, %v2209_v29  ;;  %v2273_v26 = vrot.slane %v6713_v57, 2  ;;  %v3267_v29 = vrot.slane %v3263_v32, 2  ;;  %v6795_v32 = vmul.f32 %v2906_v39, %v6663_v38 }
 0x245   : > { %v6787_v41 = vsel %vm777_vm0, %v8082_v13, %v8081_v23  ;;  %v6792_v20 = vsel %vm822_vm1, %v2838_v2, %v8083_v60  ;;  %v6809_v19 = vmul.f32 %v2855_v49, %v6663_v38  ;;  %v7946_v7 = vstv %s6740_s23 }
 0x246   : > { %v2262_v34 = vpop.permute.xlu1 %2261  ;;  %v2260_v40 = vpop.permute.xlu0 %2259  ;;  %2710 = vrot.lane.b32.xlu2 %v6559_v53, %s7950_s19  ;;  %v2234_v16 = vadd.f32 %v8080_v12, %v2222_v56  ;;  %v6780_v21 = vsel %vm822_vm1, %v3266_v58, %v3267_v29  ;;  %v2884_v56 = vstv %s6731_s30  ;;  %v2274_v18 = vsel %vm822_vm1, %v2272_v63, %v2273_v26  ;;  %s6909_s30 = sld [smem:[#allocation7 + $0x3a]] }
 0x247   : > { %v2249_v30 = vadd.f32 %v6692_v5, %v2233_v59  ;;  %v6816_v58 = vmul.f32 %v2311_v25, %v5203_v37  ;;  %v6819_v63 = vmul.f32 %v2848_v10, %v6663_v38  ;;  %v6828_v49 = vmul.f32 %v2872_v52, %v6674_v22 }
 0x248   : > { %v6773_v53 = vpop.permute.xlu2 %2364  ;;  %v6835_v12 = vmul.f32 %v2906_v39, %v6674_v22  ;;  %v6842_v52 = vmul.f32 %v2884_v56, %v6663_v38  ;;  %v3570_v23 = vstv %s6756_s16  ;;  %v3913_v13 = vstv %s6764_s12  ;;  %s6943_s16 = sld [smem:[#allocation7 + $0x6b]] }
 0x249   : > { %v2265_v10 = vadd.f32 %v2260_v40, %v2249_v30  ;;  %v3571_v30 = vmul.f32 %v3570_v23, %v6663_v38  ;;  %v3901_v39 = vstv %s6769_s10  ;;  %v6851_v25 = vmul.f32 %v2884_v56, %v6674_v22  ;;  %s6962_s12 = sld [smem:[#allocation7 + $0x6a]] }
 0x24a   : > { %s4360_s10 = sld [smem:[#allocation2 + $0xb]] }
 0x24b   : > { %v3575_v5 = vrot.slane %v3571_v30, 1  ;;  %v3935_v30 = vstv %s6822_s1  ;;  %s4456_s1 = sld [smem:[#allocation2 + $0x6b]] }
 0x24c   : > { %2744 = vrot.lane.b32.xlu1 %v6577_v54, %s7950_s19  ;;  %2722 = vrot.lane.b32.xlu0 %v6605_v55, %s7952_s8  ;;  %v3558_v54 = vstv %s6746_s18  ;;  %v2250_v55 = vadd.f32 %v6541_v50, %v2234_v16  ;;  %s6937_s18 = sld [smem:[#allocation7 + $0x3b]] }
 0x24d   : > { %v3559_v59 = vmul.f32 %v3558_v54, %v6663_v38  ;;  %v3560_v50 = vmul.f32 %v3558_v54, %v6674_v22  ;;  %v3915_v54 = vmul.f32 %v3913_v13, %v6674_v22 }
 0x24e   : > { %v6825_v29 = vpop.permute.xlu1 %2303  ;;  %v2290_v2 = vpop.permute.xlu0 %2289  ;;  %v2266_v16 = vadd.f32 %v2262_v34, %v2250_v55  ;;  %2756 = vrot.lane.b32.xlu2 %v6631_v15, %s7952_s8  ;;  %v3572_v34 = vmul.f32 %v3570_v23, %v6674_v22  ;;  %v3914_v15 = vmul.f32 %v3913_v13, %v6663_v38  ;;  %v2277_v55 = vadd.f32 %v2274_v18, %v2265_v10 }
 0x24f   : > { %v3563_v40 = vrot.slane %v3559_v59, 1  ;;  %v3564_v60 = vrot.slane %v3560_v50, 1  ;;  %v6863_v50 = vmul.f32 %v7946_v7, %v6663_v38  ;;  %v3919_v18 = vrot.slane %v3915_v54, 1 }
 0x250   : > { %v6858_v59 = vpop.permute.xlu2 %2406  ;;  %v3576_v23 = vrot.slane %v3572_v34, 1  ;;  %v3918_v13 = vrot.slane %v3914_v15, 1  ;;  %v3902_v10 = vmul.f32 %v3901_v39, %v6663_v38  ;;  %v2278_v7 = vadd.f32 %v2273_v26, %v2266_v16 }
 0x251   : > { %v6866_v56 = vsel %vm777_vm0, %v3563_v40, %v3564_v60  ;;  %v3903_v40 = vmul.f32 %v3901_v39, %v6674_v22  ;;  %v3592_v60 = vstv %s6812_s17  ;;  %v2342_v26 = vstv %s6832_s4  ;;  %s4408_s17 = sld [smem:[#allocation2 + $0x3b]] }
 0x252   : > { %v6885_v15 = vsel %vm777_vm0, %v3575_v5, %v3576_v23  ;;  %v6888_v54 = vsel %vm777_vm0, %v3918_v13, %v3919_v18  ;;  %v2294_v57 = vadd.f32 %v2290_v2, %v2278_v7  ;;  %v3906_v16 = vrot.slane %v3902_v10, 1  ;;  %s4364_s4 = sld [smem:[#allocation2 + $0xf]] }
 0x253   : > { %v3907_v39 = vrot.slane %v3903_v40, 1  ;;  %v3593_v3 = vmul.f32 %v3592_v60, %v6663_v38  ;;  %v3936_v34 = vmul.f32 %v3935_v30, %v6663_v38  ;;  %v3937_v5 = vmul.f32 %v3935_v30, %v6674_v22 }
 0x254   : > { %2773 = vrot.lane.b32.xlu1 %v6634_v33, %s7952_s8  ;;  %2766 = vrot.lane.b32.xlu0 %v6644_v6, %s7950_s19  ;;  %v3594_v6 = vmul.f32 %v3592_v60, %v6674_v22  ;;  %v2293_v23 = vadd.f32 %v6602_v62, %v2277_v55  ;;  %v8084_v7 = vstv %s6740_s23  ;;  %v6912_v18 = vmul.f32 %v2342_v26, %v5203_v37  ;;  %s6917_s23 = sld [smem:[#allocation2 + $0x67]] }
 0x255   : > { %v6903_v2 = vmul.f32 %v8084_v7, %v6674_v22  ;;  %v6906_v13 = vsel %vm777_vm0, %v3906_v16, %v3907_v39  ;;  %v3597_v10 = vrot.slane %v3593_v3, 2  ;;  %v3205_v60 = vstv %s6856_s22  ;;  %s4460_s22 = sld [smem:[#allocation2 + $0x6f]] }
 0x256   : > { %v6880_v4 = vpop.permute.xlu1 %2323  ;;  %v2322_v33 = vpop.permute.xlu0 %2321  ;;  %2795 = vrot.lane.b32.xlu2 %v6681_v43, %s7950_s19  ;;  %8085 = vst [vmem:[#allocation43_spill] sm:$0xff] %v6906_v13  ;;  %v3604_v43 = vstv %s6848_s15  ;;  %v3598_v40 = vrot.slane %v3594_v6, 2  ;;  %v2309_v30 = vadd.f32 %v6825_v29, %v2293_v23  ;;  %v2310_v62 = vadd.f32 %v6666_v1, %v2294_v57  ;;  %s4412_s15 = sld [smem:[#allocation2 + $0x3f]] }
 0x257   : > { %v3940_v55 = vrot.slane %v3936_v34, 2  ;;  %v3941_v7 = vrot.slane %v3937_v5, 2  ;;  %v3605_v3 = vmul.f32 %v3604_v43, %v6663_v38  ;;  %v3606_v6 = vmul.f32 %v3604_v43, %v6674_v22 }
 0x258   : > { %v6924_v16 = vsel %vm822_vm1, %v3597_v10, %v3598_v40  ;;  %v3239_v29 = vstv %s6873_s21  ;;  %v6929_v39 = vpop.permute.xlu2 %2424  ;;  %v3207_v10 = vmul.f32 %v3205_v60, %v6674_v22  ;;  %v2344_v1 = vmul.f32 %v2342_v26, %v5201_v36  ;;  %s7045_s21 = sld [smem:[#allocation7]] }
 0x259   : > { %8086 = vst [vmem:[#allocation23_spill] sm:$0xff] %v6924_v16  ;;  %v6934_v57 = vsel %vm822_vm1, %v3940_v55, %v3941_v7  ;;  %v3609_v23 = vrot.slane %v3605_v3, 2  ;;  %v3610_v43 = vrot.slane %v3606_v6, 2  ;;  %v3240_v40 = vmul.f32 %v3239_v29, %v6663_v38 }
 0x25a   : > { %8087 = vst [vmem:[#allocation26_spill] sm:$0xff] %v6934_v57  ;;  %v2315_v55 = vadd.f32 %v6806_v11, %v2310_v62  ;;  %v2314_v7 = vadd.f32 %v6816_v58, %v2309_v30  ;;  %v2347_v34 = vrot.slane %v6912_v18, 1  ;;  %v3211_v6 = vrot.slane %v3207_v10, 1 }
 0x25b   : > { %v6952_v3 = vsel %vm822_vm1, %v3609_v23, %v3610_v43  ;;  %v3241_v57 = vmul.f32 %v3239_v29, %v6674_v22  ;;  %v3244_v13 = vrot.slane %v3240_v40, 2  ;;  %v3947_v11 = vstv %s6897_s2  ;;  %s7047_s2 = sld [smem:[#allocation7 + $0x30]] }
 0x25c   : > { %2829 = vrot.lane.b32.xlu1 %v6684_v28, %s7950_s19  ;;  %2807 = vrot.lane.b32.xlu0 %v6787_v41, %s7952_s8  ;;  %v3206_v28 = vmul.f32 %v3205_v60, %v6663_v38  ;;  %v2327_v16 = vadd.f32 %v2322_v33, %v2314_v7  ;;  %v3548_v62 = vstv %s6909_s30  ;;  %v3948_v18 = vmul.f32 %v3947_v11, %v6663_v38  ;;  %s7049_s30 = sld [smem:[#allocation7 + $0x60]] }
 0x25d   : > { %v3245_v26 = vrot.slane %v3241_v57, 2  ;;  %v2348_v30 = vrot.slane %v2344_v1, 1  ;;  %v3549_v23 = vmul.f32 %v3548_v62, %v6663_v38  ;;  %v3550_v33 = vmul.f32 %v3548_v62, %v6674_v22 }
 0x25e   : > { %v6939_v41 = vpop.permute.xlu1 %2362  ;;  %v2337_v5 = vpop.permute.xlu0 %2336  ;;  %2841 = vrot.lane.b32.xlu2 %v6792_v20, %s7952_s8  ;;  %v3210_v60 = vrot.slane %v3206_v28, 1  ;;  %v3949_v20 = vmul.f32 %v3947_v11, %v6674_v22  ;;  %v2386_v28 = vstv %s6917_s23  ;;  %v2328_v29 = vadd.f32 %v6880_v4, %v2315_v55  ;;  %s7051_s23 = sld [smem:[#allocation7 + $0x21]] }
 0x25f   : > { %v6973_v57 = vsel %vm822_vm1, %v3244_v13, %v3245_v26  ;;  %v3952_v43 = vrot.slane %v3948_v18, 2  ;;  %v2340_v1 = vadd.f32 %v6718_v35, %v2327_v16  ;;  %v3553_v40 = vrot.slane %v3549_v23, 1 }
 0x260   : > { %v6958_v58 = vsel %vm777_vm0, %v3210_v60, %v3211_v6  ;;  %v3953_v10 = vrot.slane %v3949_v20, 2  ;;  %v3554_v7 = vrot.slane %v3550_v33, 1  ;;  %v3891_v60 = vstv %s6937_s18  ;;  %v6984_v26 = vpop.permute.xlu2 %2453  ;;  %s7053_s18 = sld [smem:[#allocation7 + $0x11]] }
 0x261   : > { %v3893_v55 = vmul.f32 %v3891_v60, %v6674_v22  ;;  %v2349_v13 = vsel %vm777_vm0, %v2347_v34, %v2348_v30  ;;  %v2341_v62 = vadd.f32 %v2337_v5, %v2328_v29  ;;  %v8088_v35 = vrot.slane %v6828_v49, 1 }
 0x262   : > { %v6978_v4 = vsel %vm822_vm1, %v3952_v43, %v3953_v10  ;;  %v8089_v16 = vrot.slane %v6777_v31, 1  ;;  %v6992_v20 = vsel %vm777_vm0, %v3553_v40, %v3554_v7  ;;  %v2387_v23 = vmul.f32 %v2386_v28, %v5203_v37 }
 0x263   : > { %v2388_v33 = vmul.f32 %v2386_v28, %v5201_v36  ;;  %v3897_v5 = vrot.slane %v3893_v55, 1  ;;  %v8090_v29 = vrot.slane %v6835_v12, 2  ;;  %v8091_v43 = vrot.slane %v6795_v32, 2 }
 0x264   : > { %2858 = vrot.lane.b32.xlu1 %v6809_v19, %s7952_s8  ;;  %2851 = vrot.lane.b32.xlu0 %v6819_v63, %s7950_s19  ;;  %v3892_v19 = vmul.f32 %v3891_v60, %v6663_v38  ;;  %v3925_v63 = vstv %s6943_s16  ;;  %v2879_v18 = vsel %vm777_vm0, %v8089_v16, %v8088_v35  ;;  %v2924_v31 = vrot.slane %v6903_v2, 2  ;;  %s7055_s16 = sld [smem:[#allocation7 + $0x41]] }
 0x265   : > { %v2913_v49 = vsel %vm822_vm1, %v8091_v43, %v8090_v29  ;;  %v3926_v10 = vmul.f32 %v3925_v63, %v6663_v38  ;;  %v3927_v40 = vmul.f32 %v3925_v63, %v6674_v22  ;;  %v2352_v7 = vadd.f32 %v2349_v13, %v2340_v1 }
 0x266   : > { %v2381_v6 = vpop.permute.xlu1 %2380  ;;  %v2379_v11 = vpop.permute.xlu0 %2378  ;;  %2880 = vrot.lane.b32.xlu2 %v2879_v18, %s7950_s19  ;;  %v3896_v34 = vrot.slane %v3892_v19, 1  ;;  %v8092_v60 = vrot.slane %v6851_v25, 1  ;;  %v8093_v28 = vrot.slane %v6842_v52, 1  ;;  %v3582_v12 = vstv %s6962_s12  ;;  %s7061_s12 = sld [smem:[#allocation7 + $0x71]] }
 0x267   : > { %v2353_v32 = vadd.f32 %v2348_v30, %v2341_v62  ;;  %v3930_v35 = vrot.slane %v3926_v10, 2  ;;  %v3931_v16 = vrot.slane %v3927_v40, 2  ;;  %v3583_v2 = vmul.f32 %v3582_v12, %v6663_v38 }
 0x268   : > { %v2891_v19 = vsel %vm777_vm0, %v8093_v28, %v8092_v60  ;;  %v7011_v55 = vsel %vm777_vm0, %v3896_v34, %v3897_v5  ;;  %v2391_v18 = vrot.slane %v2387_v23, 2  ;;  %v2392_v29 = vrot.slane %v2388_v33, 2 }
 0x269   : > { %v3584_v25 = vmul.f32 %v3582_v12, %v6674_v22  ;;  %v2368_v52 = vadd.f32 %v6939_v41, %v2352_v7  ;;  %v2923_v1 = vrot.slane %v6863_v50, 2  ;;  %v7021_v63 = vsel %vm822_vm1, %v3930_v35, %v3931_v16  ;;  %v2484_v41 = vpop.permute.xlu2 %2483 }
 0x26a   : > { %8094 = vst [vmem:[#allocation47_spill] sm:$0xff] %v7021_v63  ;;  %v3587_v62 = vrot.slane %v3583_v2, 2  ;;  %v2369_v23 = vadd.f32 %v6773_v53, %v2353_v32  ;;  %v2393_v43 = vsel %vm822_vm1, %v2391_v18, %v2392_v29  ;;  %v2430_v40 = vstv %s4360_s10  ;;  %s7063_s10 = sld [smem:[#allocation7 + $0x51]] }
 0x26b   : > { %v3588_v34 = vrot.slane %v3584_v25, 2  ;;  %v2384_v33 = vadd.f32 %v2379_v11, %v2368_v52  ;;  %v2925_v5 = vsel %vm822_vm1, %v2923_v1, %v2924_v31  ;;  %v2431_v31 = vmul.f32 %v2430_v40, %v5237_v9 }
 0x26c   : > { %2914 = vrot.lane.b32.xlu1 %v2913_v49, %s7950_s19  ;;  %2892 = vrot.lane.b32.xlu0 %v2891_v19, %s7952_s8  ;;  %v2385_v50 = vadd.f32 %v2381_v6, %v2369_v23  ;;  %v2461_v19 = vstv %s4408_s17  ;;  %v2432_v6 = vmul.f32 %v2430_v40, %v5235_v8  ;;  %s7066_s17 = sld [smem:[#allocation7 + $0x81]] }
 0x26d   : > { %v7028_v22 = vsel %vm822_vm1, %v3587_v62, %v3588_v34  ;;  %v2396_v49 = vadd.f32 %v2393_v43, %v2384_v33  ;;  %v2462_v35 = vmul.f32 %v2461_v19, %v5237_v9  ;;  %v2463_v16 = vmul.f32 %v2461_v19, %v5235_v8  ;;  %s7085_s19 = sld [smem:[#allocation5 + $0x3]] }
 0x26e   : > { %v2423_v30 = vpop.permute.xlu1 %2422  ;;  %v2409_v13 = vpop.permute.xlu0 %2408  ;;  %2926 = vrot.lane.b32.xlu2 %v2925_v5, %s7952_s8  ;;  %8095 = vst [vmem:[#allocation48_spill] sm:$0xff] %v7028_v22  ;;  %v2397_v10 = vadd.f32 %v2392_v29, %v2385_v50  ;;  %s7152_s8 = sld [smem:[#allocation7 + $0x5d]] }
 0x26f   : > { %v2412_v53 = vadd.f32 %v6858_v59, %v2396_v49  ;;  %v2466_v52 = vrot.slane %v2462_v35, 1  ;;  %v2467_v1 = vrot.slane %v2463_v16, 1  ;;  %v2549_v16 = vstv %s4364_s4  ;;  %s7071_s4 = sld [smem:[#allocation7 + $0x34]] }
 0x270   : > { %v2413_v11 = vadd.f32 %v2409_v13, %v2397_v10  ;;  %v2505_v13 = vstv %s4456_s1  ;;  %s7068_s1 = sld [smem:[#allocation7 + $0x4]] }
 0x271   : > { %v2428_v28 = vadd.f32 %v2423_v30, %v2412_v53  ;;  %v2526_v32 = vpop.permute.xlu2 %2525  ;;  %v2506_v23 = vmul.f32 %v2505_v13, %v5237_v9  ;;  %v2507_v33 = vmul.f32 %v2505_v13, %v5235_v8 }
 0x272   : > { %v2429_v12 = vadd.f32 %v6929_v39, %v2413_v11  ;;  %v2468_v39 = vsel %vm777_vm0, %v2466_v52, %v2467_v1 }
 0x273   : > { %v2433_v2 = vadd.f32 %v2431_v31, %v2428_v28  ;;  %v2510_v40 = vrot.slane %v2506_v23, 2 }
 0x274   : > { %v2434_v25 = vadd.f32 %v2432_v6, %v2429_v12 }
 0x276   : > { %v2443_v7 = vpop.permute.xlu1 %2442  ;;  %v2441_v60 = vpop.permute.xlu0 %2440 }
 0x277   : > { %v2446_v59 = vadd.f32 %v2441_v60, %v2433_v2  ;;  %v2447_v30 = vadd.f32 %v2443_v7, %v2434_v25  ;;  %v2511_v60 = vrot.slane %v2507_v33, 2  ;;  %v2624_v33 = vstv %s4460_s22  ;;  %s7077_s22 = sld [smem:[#allocation7 + $0x25]] }
 0x279   : > { %v2459_v62 = vadd.f32 %v6984_v26, %v2446_v59  ;;  %v2544_v5 = vpop.permute.xlu2 %2543  ;;  %v2512_v26 = vsel %vm822_vm1, %v2510_v40, %v2511_v60  ;;  %v2550_v59 = vmul.f32 %v2549_v16, %v5271_v45  ;;  %v2625_v40 = vmul.f32 %v2624_v33, %v5271_v45 }
 0x27b   : > { %v2471_v49 = vadd.f32 %v2468_v39, %v2459_v62 }
 0x27e   : > { %v2482_v18 = vpop.permute.xlu1 %2481  ;;  %v2456_v29 = vpop.permute.xlu0 %2455 }
 0x27f   : > { %v2460_v34 = vadd.f32 %v2456_v29, %v2447_v30  ;;  %v2487_v53 = vadd.f32 %v2482_v18, %v2471_v49  ;;  %v2580_v18 = vstv %s4412_s15  ;;  %v2551_v30 = vmul.f32 %v2549_v16, %v5269_v44  ;;  %s7074_s15 = sld [smem:[#allocation7 + $0x64]] }
 0x280   : > { %v2581_v13 = vmul.f32 %v2580_v18, %v5271_v45  ;;  %v2582_v62 = vmul.f32 %v2580_v18, %v5269_v44 }
 0x281   : > { %v2472_v10 = vadd.f32 %v2467_v1, %v2460_v34  ;;  %v2573_v12 = vpop.permute.xlu2 %2572 }
 0x283   : > { %v2488_v7 = vadd.f32 %v2484_v41, %v2472_v10 }
 0x286   : > { %v2500_v43 = vpop.permute.xlu1 %2499  ;;  %v2498_v50 = vpop.permute.xlu0 %2497 }
 0x287   : > { %v2503_v11 = vadd.f32 %v2498_v50, %v2487_v53  ;;  %v2504_v28 = vadd.f32 %v2500_v43, %v2488_v7  ;;  %v2586_v43 = vrot.slane %v2582_v62, 1 }
 0x289   : > { %v2515_v6 = vadd.f32 %v2512_v26, %v2503_v11  ;;  %v2516_v35 = vadd.f32 %v2511_v60, %v2504_v28  ;;  %v2603_v34 = vpop.permute.xlu2 %2602  ;;  %v7059_v60 = vmul.f32 %v2624_v33, %v5269_v44  ;;  %v2629_v26 = vrot.slane %v2625_v40, 2 }
 0x28b   : > { %v2531_v2 = vadd.f32 %v2526_v32, %v2515_v6  ;;  %v2630_v28 = vrot.slane %v7059_v60, 2  ;;  %v2692_v6 = vstv %s7047_s2  ;;  %s7098_s2 = sld [smem:[#allocation7 + $0x75]] }
 0x28d   : > { %v2631_v18 = vsel %vm822_vm1, %v2629_v26, %v2630_v28 }
 0x28e   : > { %v2542_v31 = vpop.permute.xlu1 %2541  ;;  %v2528_v19 = vpop.permute.xlu0 %2527 }
 0x28f   : > { %v2532_v29 = vadd.f32 %v2528_v19, %v2516_v35  ;;  %v2547_v25 = vadd.f32 %v2542_v31, %v2531_v2  ;;  %v2726_v35 = vstv %s7049_s30  ;;  %v2675_v2 = vstv %s7045_s21  ;;  %s7092_s21 = sld [smem:[#allocation7 + $0x45]] }
 0x290   : > { %s7100_s30 = sld [smem:[#allocation7 + $0x2c]]  ;;  %v7105_v40 = vmul.f32 %v2675_v2, %v6482_v27 }
 0x291   : > { %v2548_v1 = vadd.f32 %v2544_v5, %v2532_v29  ;;  %v2552_v39 = vadd.f32 %v2550_v59, %v2547_v25  ;;  %v2585_v5 = vrot.slane %v2581_v13, 1  ;;  %v2645_v31 = vpop.permute.xlu2 %2644  ;;  %v3028_v29 = vstv %s7051_s23  ;;  %s7107_s23 = sld [smem:[#allocation7 + $0x1c]] }
 0x292   : > { %v3045_v25 = vstv %s7055_s16  ;;  %s7114_s16 = sld [smem:[#allocation7 + $0x7c]] }
 0x293   : > { %v2553_v32 = vadd.f32 %v2551_v30, %v2548_v1  ;;  %v2587_v11 = vsel %vm777_vm0, %v2585_v5, %v2586_v43  ;;  %v2694_v1 = vmul.f32 %v2692_v6, %v6486_v47  ;;  %v3079_v30 = vstv %s7061_s12  ;;  %s7122_s12 = sld [smem:[#allocation7 + $0x5c]] }
 0x294   : > { %v3047_v33 = vmul.f32 %v3045_v25, %v6486_v47  ;;  %v3081_v5 = vmul.f32 %v3079_v30, %v6486_v47 }
 0x295   : > { %v2698_v60 = vrot.slane %v2694_v1, 1  ;;  %v2668_v1 = vstv %s7085_s19  ;;  %s7146_s19 = sld [smem:[#allocation7 + $0x7d]] }
 0x296   : > { %v2562_v52 = vpop.permute.xlu1 %2561  ;;  %v2560_v41 = vpop.permute.xlu0 %2559 }
 0x297   : > { %v2565_v23 = vadd.f32 %v2560_v41, %v2552_v39  ;;  %v2566_v50 = vadd.f32 %v2562_v52, %v2553_v32  ;;  %v2693_v41 = vmul.f32 %v2692_v6, %v6482_v27  ;;  %v2727_v39 = vmul.f32 %v2726_v35, %v6482_v27 }
 0x298   : > { %v2728_v32 = vmul.f32 %v2726_v35, %v6486_v47  ;;  %v7117_v6 = vmul.f32 %v3028_v29, %v6482_v27  ;;  %v3051_v35 = vrot.slane %v3047_v33, 1 }
 0x299   : > { %v2578_v53 = vadd.f32 %v2573_v12, %v2565_v23  ;;  %v3021_v23 = vstv %s7053_s18  ;;  %s7111_s18 = sld [smem:[#allocation7 + $0x4c]]  ;;  %v2731_v26 = vrot.slane %v2727_v39, 2 }
 0x29b   : > { %v2590_v19 = vadd.f32 %v2587_v11, %v2578_v53  ;;  %v3046_v53 = vmul.f32 %v3045_v25, %v6482_v27  ;;  %v2697_v11 = vrot.slane %v2693_v41, 1  ;;  %v2663_v25 = vpop.permute.xlu2 %2662 }
 0x29d   : > { %v2699_v29 = vsel %vm777_vm0, %v2697_v11, %v2698_v60 }
 0x29e   : > { %v2601_v49 = vpop.permute.xlu1 %2600  ;;  %v2575_v10 = vpop.permute.xlu0 %2574 }
 0x29f   : > { %v2579_v7 = vadd.f32 %v2575_v10, %v2566_v50  ;;  %v2606_v16 = vadd.f32 %v2601_v49, %v2590_v19  ;;  %v3091_v10 = vstv %s7066_s17  ;;  %v2732_v19 = vrot.slane %v2728_v32, 2  ;;  %s7134_s17 = sld [smem:[#allocation7 + $0x4d]] }
 0x2a0   : > { %v7120_v2 = vmul.f32 %v3091_v10, %v6482_v27  ;;  %v7125_v41 = vmul.f32 %v3091_v10, %v6486_v47 }
 0x2a1   : > { %v2591_v12 = vadd.f32 %v2586_v43, %v2579_v7  ;;  %v3057_v43 = vstv %s7063_s10  ;;  %v3080_v7 = vmul.f32 %v3079_v30, %v6482_v27  ;;  %s7129_s10 = sld [smem:[#allocation7 + $0x8c]] }
 0x2a3   : > { %v2607_v13 = vadd.f32 %v2603_v34, %v2591_v12  ;;  %v3059_v34 = vmul.f32 %v3057_v43, %v6486_v47  ;;  %v3058_v12 = vmul.f32 %v3057_v43, %v6482_v27  ;;  %v3084_v39 = vrot.slane %v3080_v7, 2 }
 0x2a5   : > { %v3062_v33 = vrot.slane %v3058_v12, 1 }
 0x2a6   : > { %v2619_v59 = vpop.permute.xlu1 %2618  ;;  %v2617_v52 = vpop.permute.xlu0 %2616 }
 0x2a7   : > { %v2622_v62 = vadd.f32 %v2617_v52, %v2606_v16  ;;  %v2623_v50 = vadd.f32 %v2619_v59, %v2607_v13  ;;  %v3085_v16 = vrot.slane %v3081_v5, 2  ;;  %v3063_v52 = vrot.slane %v3059_v34, 1 }
 0x2a8   : > { %v7137_v5 = vsel %vm822_vm1, %v2731_v26, %v2732_v19  ;;  %v3346_v26 = vstv %s7158_s0  ;;  %s7206_s0 = sld [smem:[#allocation7 + $0x85]] }
 0x2a9   : > { %v2634_v49 = vadd.f32 %v2631_v18, %v2622_v62  ;;  %v2635_v18 = vadd.f32 %v2630_v28, %v2623_v50  ;;  %v3050_v62 = vrot.slane %v3046_v53, 1  ;;  %v7132_v28 = vmul.f32 %v3021_v23, %v6482_v27 }
 0x2aa   : > { %v7143_v50 = vsel %vm822_vm1, %v3084_v39, %v3085_v16  ;;  %v7149_v10 = vsel %vm777_vm0, %v3062_v33, %v3063_v52  ;;  %v2940_v53 = vstv %s7100_s30  ;;  %v2957_v16 = vstv %s7111_s18  ;;  %s8096_s30 = smov 126   ;;  %s7191_s18 = sld [smem:[#allocation7 + $0x55]] }
 0x2ab   : > { %v2650_v59 = vadd.f32 %v2645_v31, %v2634_v49  ;;  %v7140_v43 = vsel %vm777_vm0, %v3050_v62, %v3051_v35  ;;  %v2933_v35 = vstv %s7107_s23  ;;  %v2969_v62 = vstv %s7122_s12  ;;  %s8097_s23 = smov 127   ;;  %s7201_s12 = sld [smem:[#allocation7 + $0x6c]] }
 0x2ac   : > { %v3334_v49 = vstv %s7146_s19  ;;  %s7348_s19 = sld [smem:[#allocation7 + $0x8e]] }
 0x2ae   : > { %v2661_v30 = vpop.permute.xlu1 %2660  ;;  %v2647_v13 = vpop.permute.xlu0 %2646 }
 0x2af   : > { %v2666_v32 = vadd.f32 %v2661_v30, %v2650_v59  ;;  %v2651_v31 = vadd.f32 %v2647_v13, %v2635_v18  ;;  %v2711_v59 = vpop.permute.xlu2 %2710 }
 0x2b1   : > { %v2669_v23 = vadd.f32 %v2668_v1, %v2666_v32  ;;  %v2667_v34 = vadd.f32 %v2663_v25, %v2651_v31  ;;  %v2991_v25 = vstv %s7114_s16  ;;  %s7196_s16 = sld [smem:[#allocation7 + $0x3c]] }
 0x2b3   : > { %v2671_v19 = vmax.f32 %v2669_v23, 0.0  ;;  %v2670_v12 = vadd.f32 %v2668_v1, %v2667_v34  ;;  %v3003_v34 = vstv %s7129_s10  ;;  %s7283_s10 = sld [smem:[#allocation7 + $0x3d]] }
 0x2b5   : > { %v7168_v30 = vsel %vm6447_vm15, %v2671_v19, 0.0  ;;  %v2672_v13 = vmax.f32 %v2670_v12, 0.0  ;;  %v3300_v12 = vstv %s7134_s17  ;;  %s7344_s17 = sld [smem:[#allocation7 + $0x7f]] }
 0x2b6   : > { %v2689_v32 = vpop.permute.xlu1 %2688  ;;  %v2682_v31 = vpop.permute.xlu0 %2681  ;;  %v2941_v1 = vmul.f32 %v2940_v53, %v7168_v30  ;;  %v2934_v33 = vmul.f32 %v2933_v35, %v7168_v30  ;;  %v2958_v23 = vmul.f32 %v2957_v16, %v7168_v30  ;;  %v2992_v19 = vmul.f32 %v2991_v25, %v7168_v30 }
 0x2b7   : > { %v7178_v18 = vsel %vm6459_vm2, %v2672_v13, 0.0  ;;  %v2684_v17 = vadd.f32 %v2682_v31, %v7105_v40  ;;  %v2970_v42 = vmul.f32 %v2969_v62, %v7168_v30  ;;  %v3312_v31 = vstv %s7152_s8  ;;  %s7251_s8 = sld [smem:[#allocation7 + $0x8]] }
 0x2b8   : > { %2943 = vrot.lane.b32.xlu1 %v2941_v1, %s8096_s30  ;;  %2936 = vrot.lane.b32.xlu0 %v2934_v33, %s8097_s23  ;;  %v2959_v53 = vmul.f32 %v2957_v16, %v7178_v18  ;;  %v2993_v35 = vmul.f32 %v2991_v25, %v7178_v18  ;;  %v2971_v60 = vmul.f32 %v2969_v62, %v7178_v18  ;;  %v2962_v39 = vrot.slane %v2958_v23, 1 }
 0x2b9   : > { %v2691_v13 = vadd.f32 %v2689_v32, %v2684_v17  ;;  %v3005_v40 = vmul.f32 %v3003_v34, %v7178_v18  ;;  %v2996_v7 = vrot.slane %v2992_v19, 2  ;;  %v3004_v25 = vmul.f32 %v3003_v34, %v7168_v30 }
 0x2ba   : > { %v2963_v52 = vrot.slane %v2959_v53, 1  ;;  %v2997_v1 = vrot.slane %v2993_v35, 2  ;;  %v2975_v16 = vrot.slane %v2971_v60, 1  ;;  %v2974_v17 = vrot.slane %v2970_v42, 1 }
 0x2bb   : > { %v2701_v33 = vadd.f32 %v2699_v29, %v2691_v13  ;;  %v3301_v62 = vmul.f32 %v3300_v12, %v7168_v30  ;;  %v3302_v11 = vmul.f32 %v3300_v12, %v7178_v18  ;;  %v3009_v19 = vrot.slane %v3005_v40, 2 }
 0x2bc   : > { %v2964_v32 = vsel %vm777_vm0, %v2962_v39, %v2963_v52  ;;  %v2998_v29 = vsel %vm822_vm1, %v2996_v7, %v2997_v1  ;;  %v3335_v60 = vmul.f32 %v3334_v49, %v7168_v30  ;;  %v3336_v35 = vmul.f32 %v3334_v49, %v7178_v18 }
 0x2bd   : > { %2965 = vrot.lane.b32.xlu2 %v2964_v32, %s8097_s23  ;;  %v2713_v23 = vadd.f32 %v2711_v59, %v2701_v33  ;;  %v3305_v52 = vrot.slane %v3301_v62, 1  ;;  %v3306_v39 = vrot.slane %v3302_v11, 1  ;;  %v3313_v12 = vmul.f32 %v3312_v31, %v7168_v30 }
 0x2be   : > { %v2745_v34 = vpop.permute.xlu1 %2744  ;;  %v2723_v53 = vpop.permute.xlu0 %2722  ;;  %v2976_v13 = vsel %vm777_vm0, %v2974_v17, %v2975_v16  ;;  %v3314_v59 = vmul.f32 %v3312_v31, %v7178_v18  ;;  %v3347_v7 = vmul.f32 %v3346_v26, %v7168_v30  ;;  %v3339_v11 = vrot.slane %v3335_v60, 2 }
 0x2bf   : > { %v2725_v42 = vadd.f32 %v2723_v53, %v2713_v23  ;;  %v7216_v40 = vsel %vm777_vm0, %v3305_v52, %v3306_v39  ;;  %v3340_v49 = vrot.slane %v3336_v35, 2  ;;  %v3348_v1 = vmul.f32 %v3346_v26, %v7178_v18  ;;  %v2757_v17 = vpop.permute.xlu2 %2756 }
 0x2c0   : > { %2999 = vrot.lane.b32.xlu1 %v2998_v29, %s8097_s23  ;;  %2977 = vrot.lane.b32.xlu0 %v2976_v13, %s8096_s30  ;;  %v3142_v16 = vstv %s7191_s18  ;;  %v3317_v31 = vrot.slane %v3313_v12, 1  ;;  %v3318_v32 = vrot.slane %v3314_v59, 1  ;;  %v3008_v62 = vrot.slane %v3004_v25, 2  ;;  %s7354_s18 = sld [smem:[#allocation7 + $0x8f]] }
 0x2c1   : > { %v2735_v33 = vadd.f32 %v7137_v5, %v2725_v42  ;;  %v7222_v23 = vsel %vm822_vm1, %v3339_v11, %v3340_v49  ;;  %v3351_v29 = vrot.slane %v3347_v7, 2  ;;  %v3352_v53 = vrot.slane %v3348_v1, 2 }
 0x2c2   : > { %v8098_v26 = vstv %s7071_s4  ;;  %v7228_v5 = vsel %vm777_vm0, %v3317_v31, %v3318_v32  ;;  %v2947_v39 = vstv %s7196_s16  ;;  %v3010_v35 = vsel %vm822_vm1, %v3008_v62, %v3009_v19  ;;  %s7269_s4 = sld [smem:[#allocation7 + $0x4e]] }
 0x2c3   : > { %v2747_v60 = vadd.f32 %v2745_v34, %v2735_v33  ;;  %v2779_v52 = vmul.f32 %v8098_v26, %v6590_v48  ;;  %v7233_v12 = vsel %vm822_vm1, %v3351_v29, %v3352_v53  ;;  %v2948_v25 = vmul.f32 %v2947_v39, %v7168_v30  ;;  %s7363_s16 = sld [smem:[#allocation7 + $0x19]] }
 0x2c4   : > { %v2981_v42 = vstv %s7201_s12  ;;  %v8099_v34 = vstv %s7068_s1  ;;  %v8100_v7 = vmov %v8098_v26  ;;  %v8101_v1 = vstv %s7074_s15  ;;  %s7263_s1 = sld [smem:[#allocation7 + $0x29]] }
 0x2c5   : > { %3011 = vrot.lane.b32.xlu2 %v3010_v35, %s8096_s30  ;;  %v2761_v13 = vmul.f32 %v8099_v34, %v6586_v24  ;;  %v2759_v59 = vadd.f32 %v2757_v17, %v2747_v60  ;;  %v2778_v11 = vmul.f32 %v8100_v7, %v6586_v24  ;;  %v2982_v49 = vmul.f32 %v2981_v42, %v7168_v30  ;;  %s7287_s15 = sld [smem:[#allocation7 + $0x6d]] }
 0x2c6   : > { %v2767_v19 = vpop.permute.xlu0 %2766  ;;  %v2813_v33 = vmul.f32 %v8101_v1, %v6590_v48  ;;  %v3176_v31 = vstv %s7206_s0  ;;  %v2949_v32 = vmul.f32 %v2947_v39, %v7178_v18  ;;  %v2983_v62 = vmul.f32 %v2981_v42, %v7178_v18  ;;  %v2774_v34 = vpop.permute.xlu1 %2773  ;;  %s7372_s12 = sld [smem:[#allocation7 + $0x3e]] }
 0x2c7   : > { %v2762_v29 = vadd.f32 %v2761_v13, %v2759_v59  ;;  %v2783_v53 = vrot.slane %v2779_v52, 1  ;;  %v8102_v17 = vstv %s7092_s21  ;;  %v8103_v26 = vstv %s7098_s2  ;;  %s7385_s0 = sld [smem:[#allocation7 + $0x3f]] }
 0x2c8   : > { %v3132_v60 = vmul.f32 %v8102_v17, %v6590_v48  ;;  %v3166_v35 = vmul.f32 %v8103_v26, %v6590_v48  ;;  %3031 = vrot.lane.b32.xlu1 %v7117_v6, %s8096_s30  ;;  %3024 = vrot.lane.b32.xlu0 %v7132_v28, %s8097_s23  ;;  %v2952_v52 = vrot.slane %v2948_v25, 1  ;;  %v2953_v39 = vrot.slane %v2949_v32, 1 }
 0x2c9   : > { %v2986_v42 = vrot.slane %v2982_v49, 2  ;;  %v2987_v13 = vrot.slane %v2983_v62, 2  ;;  %v2769_v59 = vadd.f32 %v2767_v19, %v2762_v29  ;;  %v2782_v7 = vrot.slane %v2778_v11, 1  ;;  %v2796_v29 = vpop.permute.xlu2 %2795 }
 0x2ca   : > { %v2812_v17 = vmul.f32 %v8101_v1, %v6586_v24  ;;  %v3144_v26 = vmul.f32 %v3142_v16, %v6590_v48  ;;  %v8104_v6 = vstv %s7092_s21  ;;  %v8105_v28 = vstv %s7098_s2  ;;  %s7302_s21 = sld [smem:[#allocation7 + $0x5e]] }
 0x2cb   : > { %v3131_v63 = vmul.f32 %v8104_v6, %v6586_v24  ;;  %v3165_v22 = vmul.f32 %v8105_v28, %v6586_v24  ;;  %v7278_v25 = vsel %vm777_vm0, %v2952_v52, %v2953_v39  ;;  %v7281_v49 = vsel %vm822_vm1, %v2986_v42, %v2987_v13  ;;  %s7312_s2 = sld [smem:[#allocation7 + $0x5f]] }
 0x2cc   : > { %v2776_v11 = vadd.f32 %v2774_v34, %v2769_v59  ;;  %v2784_v19 = vsel %vm777_vm0, %v2782_v7, %v2783_v53  ;;  %v2817_v32 = vrot.slane %v2813_v33, 2  ;;  %v3143_v62 = vmul.f32 %v3142_v16, %v6586_v24 }
 0x2cd   : > { %v3136_v1 = vrot.slane %v3132_v60, 1  ;;  %v3170_v6 = vrot.slane %v3166_v35, 2  ;;  %v7290_v52 = vmul.f32 %v3176_v31, %v6586_v24  ;;  %v7293_v39 = vmul.f32 %v3176_v31, %v6590_v48  ;;  %3053 = vrot.lane.b32.xlu2 %v7140_v43, %s8097_s23 }
 0x2ce   : > { %v2816_v53 = vrot.slane %v2812_v17, 2  ;;  %v2786_v33 = vadd.f32 %v2784_v19, %v2776_v11  ;;  %v8106_v34 = vrot.slane %v7125_v41, 2  ;;  %v8107_v16 = vrot.slane %v7120_v2, 2  ;;  %v2808_v35 = vpop.permute.xlu0 %2807 }
 0x2cf   : > { %v3148_v60 = vrot.slane %v3144_v26, 1  ;;  %v8108_v13 = vstv %s7077_s22  ;;  %v8109_v31 = vstv %s7082_s20  ;;  %v3135_v28 = vrot.slane %v3131_v63, 1  ;;  %s7326_s20 = sld [smem:[#allocation7 + $0x4f]] }
 0x2d0   : > { %v3098_v42 = vsel %vm822_vm1, %v8107_v16, %v8106_v34  ;;  %v3114_v59 = vmul.f32 %v8108_v13, %v6586_v24  ;;  %v3107_v7 = vmul.f32 %v8109_v31, %v6586_v24  ;;  %v3169_v43 = vrot.slane %v3165_v22, 2  ;;  %3087 = vrot.lane.b32.xlu1 %v7143_v50, %s8097_s23  ;;  %3065 = vrot.lane.b32.xlu0 %v7149_v10, %s8096_s30  ;;  %s7333_s22 = sld [smem:[#allocation7 + $0x7e]]  ;;  %v2830_v10 = vpop.permute.xlu1 %2829 }
 0x2d1   : > { %v2818_v41 = vsel %vm822_vm1, %v2816_v53, %v2817_v32  ;;  %v2798_v17 = vadd.f32 %v2796_v29, %v2786_v33  ;;  %v2845_v2 = vstv %s7251_s8  ;;  %v3147_v11 = vrot.slane %v3143_v62, 1  ;;  %s7390_s8 = sld [smem:[#allocation7 + $0x6f]] }
 0x2d2   : > { %v7319_v26 = vsel %vm777_vm0, %v3135_v28, %v3136_v1  ;;  %v7322_v63 = vsel %vm822_vm1, %v3169_v43, %v3170_v6  ;;  %v3181_v22 = vrot.slane %v7290_v52, 2  ;;  %v3182_v19 = vrot.slane %v7293_v39, 2 }
 0x2d3   : > { %v2810_v32 = vadd.f32 %v2808_v35, %v2798_v17  ;;  %v7329_v50 = vsel %vm777_vm0, %v3147_v11, %v3148_v60  ;;  %v3643_v29 = vstv %s7269_s4  ;;  %v2846_v1 = vmul.f32 %v2845_v2, %v6663_v38  ;;  %s7398_s4 = sld [smem:[#allocation7 + $0x6e]] }
 0x2d4   : > { %v3644_v6 = vmul.f32 %v3643_v29, %v7168_v30  ;;  %v3645_v53 = vmul.f32 %v3643_v29, %v7178_v18  ;;  %v3290_v33 = vstv %s7283_s10  ;;  %v3324_v60 = vstv %s7287_s15  ;;  %s4524_s10 = sld [smem:[#allocation7 + $0x1d]] }
 0x2d5   : > { %v2820_v34 = vadd.f32 %v2818_v41, %v2810_v32  ;;  %v3291_v16 = vmul.f32 %v3290_v33, %v7168_v30  ;;  %v3292_v35 = vmul.f32 %v3290_v33, %v7178_v18  ;;  %v3325_v28 = vmul.f32 %v3324_v60, %v7168_v30  ;;  %3099 = vrot.lane.b32.xlu2 %v3098_v42, %s8096_s30  ;;  %v2842_v32 = vpop.permute.xlu2 %2841  ;;  %s4507_s15 = sld [smem:[#allocation7 + $0xc]] }
 0x2d6   : > { %v3648_v13 = vrot.slane %v3644_v6, 1  ;;  %v3649_v31 = vrot.slane %v3645_v53, 1  ;;  %v3326_v43 = vmul.f32 %v3324_v60, %v7178_v18  ;;  %v3655_v41 = vstv %s7302_s21  ;;  %s4529_s21 = sld [smem:[#allocation7 + $0x22]] }
 0x2d7   : > { %v2832_v17 = vadd.f32 %v2830_v10, %v2820_v34  ;;  %v3295_v2 = vrot.slane %v3291_v16, 1  ;;  %v3296_v11 = vrot.slane %v3292_v35, 1  ;;  %v3329_v6 = vrot.slane %v3325_v28, 2  ;;  %v2852_v35 = vpop.permute.xlu0 %2851 }
 0x2d8   : > { %v7351_v29 = vsel %vm777_vm0, %v3648_v13, %v3649_v31  ;;  %v3330_v53 = vrot.slane %v3326_v43, 2  ;;  %v3656_v33 = vmul.f32 %v3655_v41, %v7168_v30  ;;  %v3657_v34 = vmul.f32 %v3655_v41, %v7178_v18  ;;  %3116 = vrot.lane.b32.xlu1 %v3114_v59, %s8096_s30  ;;  %3109 = vrot.lane.b32.xlu0 %v3107_v7, %s8097_s23 }
 0x2d9   : > { %v2844_v10 = vadd.f32 %v2842_v32, %v2832_v17  ;;  %v7357_v42 = vsel %vm777_vm0, %v3295_v2, %v3296_v11  ;;  %v3998_v16 = vstv %s7312_s2  ;;  %v3986_v2 = vstv %s7326_s20  ;;  %s4513_s2 = sld [smem:[#allocation7 + $0x12]] }
 0x2da   : > { %v7366_v60 = vsel %vm822_vm1, %v3329_v6, %v3330_v53  ;;  %v3660_v13 = vrot.slane %v3656_v33, 1  ;;  %v3999_v31 = vmul.f32 %v3998_v16, %v7168_v30  ;;  %v4000_v28 = vmul.f32 %v3998_v16, %v7178_v18  ;;  %s4561_s20 = sld [smem:[#allocation7 + $0x42]] }
 0x2db   : > { %v2847_v43 = vadd.f32 %v2846_v1, %v2844_v10  ;;  %v3661_v17 = vrot.slane %v3657_v34, 1  ;;  %v3677_v11 = vstv %s7333_s22  ;;  %v3987_v7 = vmul.f32 %v3986_v2, %v7168_v30  ;;  %v2859_v10 = vpop.permute.xlu1 %2858  ;;  %s4514_s22 = sld [smem:[#allocation7 + $0x13]] }
 0x2dc   : > { %v4003_v59 = vrot.slane %v3999_v31, 1  ;;  %v4004_v41 = vrot.slane %v4000_v28, 1  ;;  %v3988_v32 = vmul.f32 %v3986_v2, %v7178_v18  ;;  %v3678_v33 = vmul.f32 %v3677_v11, %v7168_v30 }
 0x2dd   : > { %v2854_v6 = vadd.f32 %v2852_v35, %v2847_v43  ;;  %v7377_v53 = vsel %vm777_vm0, %v3660_v13, %v3661_v17  ;;  %v3679_v1 = vmul.f32 %v3677_v11, %v7178_v18  ;;  %v3991_v16 = vrot.slane %v3987_v7, 1  ;;  %3138 = vrot.lane.b32.xlu2 %v7319_v26, %s8097_s23 }
 0x2de   : > { %v7382_v34 = vsel %vm777_vm0, %v4003_v59, %v4004_v41  ;;  %v3992_v31 = vrot.slane %v3988_v32, 1  ;;  %v4020_v28 = vstv %s7344_s17  ;;  %v3682_v35 = vrot.slane %v3678_v33, 2  ;;  %v2881_v33 = vpop.permute.xlu2 %2880  ;;  %s4530_s17 = sld [smem:[#allocation7 + $0x23]] }
 0x2df   : > { %v2861_v2 = vadd.f32 %v2859_v10, %v2854_v6  ;;  %v3683_v13 = vrot.slane %v3679_v1, 2  ;;  %v4021_v43 = vmul.f32 %v4020_v28, %v7168_v30  ;;  %v4022_v11 = vmul.f32 %v4020_v28, %v7178_v18 }
 0x2e0   : > { %v7393_v17 = vsel %vm777_vm0, %v3991_v16, %v3992_v31  ;;  %v3689_v59 = vstv %s7348_s19  ;;  %v4032_v41 = vstv %s7354_s18  ;;  %3172 = vrot.lane.b32.xlu1 %v7322_v63, %s8097_s23  ;;  %3150 = vrot.lane.b32.xlu0 %v7329_v50, %s8096_s30  ;;  %s4577_s19 = sld [smem:[#allocation7 + $0x52]] }
 0x2e1   : > { %v2871_v7 = vadd.f32 %v6723_v51, %v2861_v2  ;;  %v7402_v26 = vsel %vm822_vm1, %v3682_v35, %v3683_v13  ;;  %v4025_v32 = vrot.slane %v4021_v43, 2  ;;  %v3690_v6 = vmul.f32 %v3689_v59, %v7168_v30  ;;  %v2893_v13 = vpop.permute.xlu0 %2892  ;;  %s4578_s18 = sld [smem:[#allocation7 + $0x53]] }
 0x2e2   : > { %v4026_v1 = vrot.slane %v4022_v11, 2  ;;  %v3691_v10 = vmul.f32 %v3689_v59, %v7178_v18  ;;  %v4033_v16 = vmul.f32 %v4032_v41, %v7168_v30  ;;  %v4034_v51 = vmul.f32 %v4032_v41, %v7178_v18 }
 0x2e3   : > { %v2883_v31 = vadd.f32 %v2881_v33, %v2871_v7  ;;  %v3191_v28 = vstv %s7363_s16  ;;  %v3694_v2 = vrot.slane %v3690_v6, 2  ;;  %v3633_v35 = vstv %s7372_s12  ;;  %s4562_s16 = sld [smem:[#allocation7 + $0x43]] }
 0x2e4   : > { %v7415_v43 = vsel %vm822_vm1, %v4025_v32, %v4026_v1  ;;  %v3695_v63 = vrot.slane %v3691_v10, 2  ;;  %v4037_v62 = vrot.slane %v4033_v16, 2  ;;  %v4038_v50 = vrot.slane %v4034_v51, 2  ;;  %s4609_s12 = sld [smem:[#allocation7 + $0x72]] }
 0x2e5   : > { %v2895_v11 = vadd.f32 %v2893_v13, %v2883_v31  ;;  %v3183_v59 = vsel %vm822_vm1, %v3181_v22, %v3182_v19  ;;  %v3634_v41 = vmul.f32 %v3633_v35, %v7168_v30  ;;  %v3635_v7 = vmul.f32 %v3633_v35, %v7178_v18 }
 0x2e6   : > { %v8110_v6 = vstv %s7263_s1  ;;  %v7428_v33 = vsel %vm822_vm1, %v3694_v2, %v3695_v63  ;;  %v7431_v1 = vsel %vm822_vm1, %v4037_v62, %v4038_v50  ;;  %v3976_v10 = vstv %s7385_s0  ;;  %3184 = vrot.lane.b32.xlu2 %v3183_v59, %s8096_s30  ;;  %s4540_s1 = sld [smem:[#allocation7 + $0x2d]] }
 0x2e7   : > { %v3199_v32 = vmul.f32 %v8110_v6, %v6663_v38  ;;  %v2905_v39 = vadd.f32 %v6726_v14, %v2895_v11  ;;  %v3192_v52 = vmul.f32 %v3191_v28, %v6663_v38  ;;  %v3638_v22 = vrot.slane %v3634_v41, 1  ;;  %s7491_s0 = sld [smem:[#allocation7 + $0x73]] }
 0x2e8   : > { %v3639_v19 = vrot.slane %v3635_v7, 1  ;;  %v3977_v16 = vmul.f32 %v3976_v10, %v7168_v30  ;;  %v3978_v51 = vmul.f32 %v3976_v10, %v7178_v18  ;;  %v4010_v31 = vstv %s7390_s8  ;;  %s7495_s8 = sld [smem:[#allocation7 + $0x82]] }
 0x2e9   : > { %v3667_v35 = vstv %s7398_s4  ;;  %v4011_v62 = vmul.f32 %v4010_v31, %v7168_v30  ;;  %v4012_v13 = vmul.f32 %v4010_v31, %v7178_v18  ;;  %3201 = vrot.lane.b32.xlu1 %v3199_v32, %s8096_s30  ;;  %3194 = vrot.lane.b32.xlu0 %v3192_v52, %s8097_s23  ;;  %s4626_s4 = sld [smem:[#allocation7 + $0x83]] }
 0x2ea   : > { %v7442_v2 = vsel %vm777_vm0, %v3638_v22, %v3639_v19  ;;  %v3981_v14 = vrot.slane %v3977_v16, 1  ;;  %v3982_v28 = vrot.slane %v3978_v51, 1  ;;  %v3668_v63 = vmul.f32 %v3667_v35, %v7168_v30  ;;  %v2927_v51 = vpop.permute.xlu2 %2926 }
 0x2eb   : > { %v3669_v50 = vmul.f32 %v3667_v35, %v7178_v18  ;;  %v4015_v11 = vrot.slane %v4011_v62, 2  ;;  %v4016_v59 = vrot.slane %v4012_v13, 2  ;;  %v2915_v18 = vpop.permute.xlu1 %2914  ;;  %v3276_v19 = vstv %s4524_s10  ;;  %s4517_s10 = sld [smem:[#allocation7 + $0x16]] }
 0x2ec   : > { %v7451_v41 = vsel %vm777_vm0, %v3981_v14, %v3982_v28  ;;  %v3672_v7 = vrot.slane %v3668_v63, 2  ;;  %v2917_v52 = vadd.f32 %v2915_v18, %v2905_v39  ;;  %v3283_v22 = vstv %s4540_s1  ;;  %s4533_s1 = sld [smem:[#allocation7 + $0x26]] }
 0x2ed   : > { %v3673_v6 = vrot.slane %v3669_v50, 2  ;;  %v7454_v10 = vsel %vm822_vm1, %v4015_v11, %v4016_v59  ;;  %v2930_v16 = vstv %s4507_s15  ;;  %v3284_v31 = vmul.f32 %v3283_v22, %v7168_v30  ;;  %s4565_s15 = sld [smem:[#allocation7 + $0x46]] }
 0x2ee   : > { %3223 = vrot.lane.b32.xlu2 %v6749_v46, %s8097_s23  ;;  %v3277_v35 = vmul.f32 %v3276_v19, %v7168_v30  ;;  %v2931_v46 = vmul.f32 %v2930_v16, %v7168_v30  ;;  %v2929_v62 = vadd.f32 %v2927_v51, %v2917_v52  ;;  %v3388_v13 = vstv %s4561_s20  ;;  %s7532_s20 = sld [smem:[#allocation7 + $0x56]] }
 0x2ef   : > { %v7457_v32 = vsel %vm822_vm1, %v3672_v7, %v3673_v6  ;;  %v3389_v14 = vmul.f32 %v3388_v13, %v6482_v27  ;;  %v3400_v50 = vstv %s4577_s19  ;;  %v3743_v18 = vstv %s4578_s18  ;;  %s7549_s19 = sld [smem:[#allocation7 + $0x1]] }
 0x2f0   : > { %v3402_v11 = vmul.f32 %v3400_v50, %v6486_v47  ;;  %v3401_v6 = vmul.f32 %v3400_v50, %v6482_v27  ;;  %v3731_v52 = vstv %s4562_s16  ;;  %v3745_v19 = vmul.f32 %v3743_v18, %v6486_v47  ;;  %s7554_s18 = sld [smem:[#allocation7 + $0x76]] }
 0x2f1   : > { %3257 = vrot.lane.b32.xlu1 %v6754_v0, %s8097_s23  ;;  %3235 = vrot.lane.b32.xlu0 %v6762_v61, %s8096_s30  ;;  %v7472_v0 = vadd.f32 %v2931_v46, %v2929_v62  ;;  %v3371_v61 = vstv %s4529_s21  ;;  %v3393_v59 = vrot.slane %v3389_v14, 1  ;;  %v3733_v16 = vmul.f32 %v3731_v52, %v6486_v47  ;;  %s4518_s21 = sld [smem:[#allocation7 + $0x17]] }
 0x2f2   : > { %v3372_v39 = vmul.f32 %v3371_v61, %v6482_v27  ;;  %v3406_v51 = vrot.slane %v3402_v11, 1  ;;  %v3405_v46 = vrot.slane %v3401_v6, 1  ;;  %v3749_v62 = vrot.slane %v3745_v19, 1  ;;  %s7557_s16 = sld [smem:[#allocation7 + $0x31]] }
 0x2f3   : > { %v3737_v61 = vrot.slane %v3733_v16, 1  ;;  %v3765_v14 = vstv %s7491_s0  ;;  %v3777_v16 = vstv %s4626_s4  ;;  %s7567_s0 = sld [smem:[#allocation7 + $0x86]] }
 0x2f4   : > { %v3767_v11 = vmul.f32 %v3765_v14, %v6486_v47  ;;  %v3766_v6 = vmul.f32 %v3765_v14, %v6482_v27  ;;  %s7582_s4 = sld [smem:[#allocation7 + $0x87]] }
 0x2f6   : > { %3269 = vrot.lane.b32.xlu2 %v6780_v21, %s8096_s30  ;;  %v3364_v21 = vstv %s4513_s2  ;;  %s7530_s2 = sld [smem:[#allocation7 + $0x27]] }
 0x2f9   : > { %3286 = vrot.lane.b32.xlu1 %v3284_v31, %s8096_s30  ;;  %3279 = vrot.lane.b32.xlu0 %v3277_v35, %s8097_s23  ;;  %v3744_v31 = vmul.f32 %v3743_v18, %v6482_v27  ;;  %v3732_v35 = vmul.f32 %v3731_v52, %v6482_v27 }
 0x2fe   : > { %3308 = vrot.lane.b32.xlu2 %v7216_v40, %s8097_s23  ;;  %v3365_v40 = vmul.f32 %v3364_v21, %v6482_v27  ;;  %v3422_v21 = vstv %s4609_s12  ;;  %s7561_s12 = sld [smem:[#allocation7 + $0x77]] }
 0x301   : > { %3342 = vrot.lane.b32.xlu1 %v7222_v23, %s8097_s23  ;;  %3320 = vrot.lane.b32.xlu0 %v7228_v5, %s8096_s30  ;;  %v3390_v23 = vmul.f32 %v3388_v13, %v6486_v47  ;;  %v3707_v5 = vstv %s4514_s22  ;;  %v3748_v13 = vrot.slane %v3744_v31, 1  ;;  %v3779_v31 = vmul.f32 %v3777_v16, %v6486_v47  ;;  %s7536_s22 = sld [smem:[#allocation7 + $0x57]] }
 0x302   : > { %v3708_v28 = vmul.f32 %v3707_v5, %v6482_v27  ;;  %v3423_v5 = vmul.f32 %v3422_v21, %v6482_v27 }
 0x303   : > { %v3394_v63 = vrot.slane %v3390_v23, 1  ;;  %v3736_v23 = vrot.slane %v3732_v35, 1  ;;  %v3770_v35 = vrot.slane %v3766_v6, 2 }
 0x304   : > { %v3427_v52 = vrot.slane %v3423_v5, 2  ;;  %v3449_v5 = vstv %s4517_s10  ;;  %s7613_s10 = sld [smem:[#allocation7 + $0x1a]] }
 0x305   : > { %v3395_v22 = vsel %vm777_vm0, %v3393_v59, %v3394_v63  ;;  %v3738_v50 = vsel %vm777_vm0, %v3736_v23, %v3737_v61  ;;  %v3456_v23 = vstv %s4533_s1  ;;  %s7610_s1 = sld [smem:[#allocation7 + $0x2a]] }
 0x306   : > { %3354 = vrot.lane.b32.xlu2 %v7233_v12, %s8096_s30  ;;  %v3714_v12 = vstv %s4530_s17  ;;  %s7540_s17 = sld [smem:[#allocation7 + $0x47]] }
 0x307   : > { %v3715_v7 = vmul.f32 %v3714_v12, %v6482_v27  ;;  %v3750_v12 = vsel %vm777_vm0, %v3748_v13, %v3749_v62  ;;  %v3778_v62 = vmul.f32 %v3777_v16, %v6482_v27 }
 0x309   : > { %3374 = vrot.lane.b32.xlu1 %v3372_v39, %s8096_s30  ;;  %3367 = vrot.lane.b32.xlu0 %v3365_v40, %s8097_s23  ;;  %v3407_v39 = vsel %vm777_vm0, %v3405_v46, %v3406_v51  ;;  %v3424_v40 = vmul.f32 %v3422_v21, %v6486_v47  ;;  %v3782_v13 = vrot.slane %v3778_v62, 2 }
 0x30e   : > { %3710 = vrot.lane.b32.xlu2 %v3708_v28, %s8097_s23  ;;  %v3434_v28 = vstv %s7495_s8  ;;  %s7579_s8 = sld [smem:[#allocation7 + $0x61]] }
 0x30f   : > { %v3436_v59 = vmul.f32 %v3434_v28, %v6486_v47  ;;  %v3435_v18 = vmul.f32 %v3434_v28, %v6482_v27  ;;  %v3457_v28 = vmul.f32 %v3456_v23, %v6586_v24 }
 0x311   : > { %3396 = vrot.lane.b32.xlu1 %v3395_v22, %s8097_s23  ;;  %3717 = vrot.lane.b32.xlu0 %v3715_v7, %s8096_s30  ;;  %v3428_v7 = vrot.slane %v3424_v40, 2  ;;  %v3771_v22 = vrot.slane %v3767_v11, 2  ;;  %v3440_v19 = vrot.slane %v3436_v59, 2  ;;  %v3439_v46 = vrot.slane %v3435_v18, 2 }
 0x312   : > { %v3783_v40 = vrot.slane %v3779_v31, 2  ;;  %v3792_v59 = vstv %s4518_s21  ;;  %v3485_v31 = vstv %s7532_s20  ;;  %s7628_s21 = sld [smem:[#allocation7 + $0x35]] }
 0x313   : > { %v3429_v51 = vsel %vm822_vm1, %v3427_v52, %v3428_v7  ;;  %v3772_v21 = vsel %vm822_vm1, %v3770_v35, %v3771_v22  ;;  %v3793_v22 = vmul.f32 %v3792_v59, %v6586_v24  ;;  %v3487_v35 = vmul.f32 %v3485_v31, %v6590_v48  ;;  %s4538_s20 = sld [smem:[#allocation7 + $0x2b]] }
 0x314   : > { %v3784_v14 = vsel %vm822_vm1, %v3782_v13, %v3783_v40  ;;  %v3816_v13 = vstv %s7540_s17  ;;  %s4504_s17 = sld [smem:[#allocation7 + $0x9]] }
 0x316   : > { %3408 = vrot.lane.b32.xlu2 %v3407_v39, %s8096_s30  ;;  %v3441_v39 = vsel %vm822_vm1, %v3439_v46, %v3440_v19 }
 0x317   : > { %v7510_v63 = vpop.permute.xlu2 %2965 }
 0x319   : > { %3751 = vrot.lane.b32.xlu1 %v3750_v12, %s8096_s30  ;;  %3739 = vrot.lane.b32.xlu0 %v3738_v50, %s8097_s23  ;;  %v3450_v12 = vmul.f32 %v3449_v5, %v6586_v24  ;;  %v3473_v50 = vstv %s4565_s15  ;;  %s7622_s15 = sld [smem:[#allocation7 + $0x5]] }
 0x31a   : > { %v3475_v7 = vmul.f32 %v3473_v50, %v6590_v48  ;;  %v3474_v6 = vmul.f32 %v3473_v50, %v6586_v24 }
 0x31c   : > { %v3479_v16 = vrot.slane %v3475_v7, 1  ;;  %v3478_v62 = vrot.slane %v3474_v6, 1  ;;  %v3817_v7 = vmul.f32 %v3816_v13, %v6586_v24 }
 0x31e   : > { %3430 = vrot.lane.b32.xlu2 %v3429_v51, %s8097_s23  ;;  %v3799_v51 = vstv %s7530_s2  ;;  %v3480_v5 = vsel %vm777_vm0, %v3478_v62, %v3479_v16  ;;  %v3507_v16 = vstv %s7554_s18  ;;  %v3821_v62 = vrot.slane %v3817_v7, 1  ;;  %s7632_s2 = sld [smem:[#allocation7 + $0x1b]] }
 0x31f   : > { %v7524_v61 = vpop.permute.xlu2 %3011  ;;  %s4525_s18 = sld [smem:[#allocation7 + $0x1e]] }
 0x321   : > { %3773 = vrot.lane.b32.xlu1 %v3772_v21, %s8097_s23  ;;  %3442 = vrot.lane.b32.xlu0 %v3441_v39, %s8096_s30  ;;  %v3828_v21 = vstv %s7536_s22  ;;  %v3800_v39 = vmul.f32 %v3799_v51, %v6586_v24  ;;  %s7640_s22 = sld [smem:[#allocation7 + $0x65]] }
 0x322   : > { %v3830_v40 = vmul.f32 %v3828_v21, %v6590_v48  ;;  %v3829_v50 = vmul.f32 %v3828_v21, %v6586_v24  ;;  %v3018_v21 = vstv %s7549_s19  ;;  %s4541_s19 = sld [smem:[#allocation7 + $0x2e]] }
 0x326   : > { %3785 = vrot.lane.b32.xlu2 %v3784_v14, %s8096_s30 }
 0x327   : > { %v7542_v11 = vpop.permute.xlu2 %3053 }
 0x329   : > { %3459 = vrot.lane.b32.xlu1 %v3457_v28, %s8096_s30  ;;  %3452 = vrot.lane.b32.xlu0 %v3450_v12, %s8097_s23  ;;  %v3818_v28 = vmul.f32 %v3816_v13, %v6590_v48  ;;  %v3491_v12 = vrot.slane %v3487_v35, 1  ;;  %v3035_v35 = vstv %s7557_s16  ;;  %v3850_v13 = vstv %s7561_s12  ;;  %s4526_s16 = sld [smem:[#allocation7 + $0x1f]] }
 0x32a   : > { %v2944_v18 = vpop.permute.xlu1 %2943  ;;  %v2937_v52 = vpop.permute.xlu0 %2936  ;;  %v3036_v7 = vmul.f32 %v3035_v35, %v6482_v27  ;;  %s4508_s12 = sld [smem:[#allocation7 + $0xd]] }
 0x32b   : > { %v2939_v19 = vadd.f32 %v2937_v52, %v7472_v0  ;;  %v3486_v0 = vmul.f32 %v3485_v31, %v6586_v24  ;;  %v3833_v31 = vrot.slane %v3829_v50, 1 }
 0x32d   : > { %v2946_v46 = vadd.f32 %v2944_v18, %v2939_v19  ;;  %v3490_v52 = vrot.slane %v3486_v0, 1  ;;  %v3822_v19 = vrot.slane %v3818_v28, 1 }
 0x32e   : > { %3795 = vrot.lane.b32.xlu2 %v3793_v22, %s8097_s23  ;;  %v3834_v22 = vrot.slane %v3830_v40, 1  ;;  %v3508_v40 = vmul.f32 %v3507_v16, %v6586_v24 }
 0x32f   : > { %v7569_v23 = vpop.permute.xlu2 %3099  ;;  %v2956_v14 = vadd.f32 %v7278_v25, %v2946_v46  ;;  %v3492_v51 = vsel %vm777_vm0, %v3490_v52, %v3491_v12  ;;  %v3823_v12 = vsel %vm777_vm0, %v3821_v62, %v3822_v19  ;;  %v3851_v52 = vmul.f32 %v3850_v13, %v6586_v24 }
 0x330   : > { %v3835_v0 = vsel %vm777_vm0, %v3833_v31, %v3834_v22  ;;  %v3069_v31 = vstv %s7579_s8  ;;  %s4497_s8 = sld [smem:[#allocation7 + $0x2]] }
 0x331   : > { %3481 = vrot.lane.b32.xlu1 %v3480_v5, %s8097_s23  ;;  %3802 = vrot.lane.b32.xlu0 %v3800_v39, %s8096_s30  ;;  %v2968_v59 = vadd.f32 %v7510_v63, %v2956_v14  ;;  %v3509_v63 = vmul.f32 %v3507_v16, %v6590_v48  ;;  %v3037_v39 = vmul.f32 %v3035_v35, %v6486_v47  ;;  %v3519_v5 = vstv %s7567_s0  ;;  %s4542_s0 = sld [smem:[#allocation7 + $0x2f]] }
 0x332   : > { %v3000_v6 = vpop.permute.xlu1 %2999  ;;  %v2978_v18 = vpop.permute.xlu0 %2977  ;;  %v3521_v50 = vmul.f32 %v3519_v5, %v6590_v48  ;;  %v3520_v22 = vmul.f32 %v3519_v5, %v6586_v24  ;;  %v3512_v16 = vrot.slane %v3508_v40, 2  ;;  %v3862_v35 = vstv %s7582_s4  ;;  %s4545_s4 = sld [smem:[#allocation7 + $0x32]] }
 0x333   : > { %v2980_v25 = vadd.f32 %v2978_v18, %v2968_v59  ;;  %v3513_v59 = vrot.slane %v3509_v63, 2 }
 0x334   : > { %v3525_v62 = vrot.slane %v3521_v50, 2  ;;  %v3524_v40 = vrot.slane %v3520_v22, 2 }
 0x335   : > { %v2990_v46 = vadd.f32 %v7281_v49, %v2980_v25  ;;  %v3852_v49 = vmul.f32 %v3850_v13, %v6590_v48  ;;  %v3864_v13 = vmul.f32 %v3862_v35, %v6590_v48 }
 0x336   : > { %3493 = vrot.lane.b32.xlu2 %v3492_v51, %s8096_s30  ;;  %v3041_v51 = vrot.slane %v3037_v39, 1  ;;  %v3855_v39 = vrot.slane %v3851_v52, 2 }
 0x337   : > { %v3002_v14 = vadd.f32 %v3000_v6, %v2990_v46  ;;  %v7595_v28 = vpop.permute.xlu2 %3138  ;;  %v3019_v6 = vmul.f32 %v3018_v21, %v6482_v27  ;;  %v3856_v63 = vrot.slane %v3852_v49, 2  ;;  %v3040_v21 = vrot.slane %v3036_v7, 1 }
 0x338   : > { %v3863_v49 = vmul.f32 %v3862_v35, %v6586_v24  ;;  %v3526_v7 = vsel %vm822_vm1, %v3524_v40, %v3525_v62  ;;  %v3868_v22 = vrot.slane %v3864_v13, 2  ;;  %v3534_v62 = vstv %s7613_s10  ;;  %s7714_s10 = sld [smem:[#allocation7 + $0x33]] }
 0x339   : > { %3836 = vrot.lane.b32.xlu1 %v3835_v0, %s8096_s30  ;;  %3824 = vrot.lane.b32.xlu0 %v3823_v12, %s8097_s23  ;;  %v7604_v18 = vadd.f32 %v7524_v61, %v3002_v14  ;;  %v3514_v61 = vsel %vm822_vm1, %v3512_v16, %v3513_v59  ;;  %v3071_v0 = vmul.f32 %v3069_v31, %v6486_v47  ;;  %v3103_v13 = vstv %s7622_s15  ;;  %s7729_s15 = sld [smem:[#allocation7 + $0x62]] }
 0x33a   : > { %v3032_v25 = vpop.permute.xlu1 %3031  ;;  %v3025_v19 = vpop.permute.xlu0 %3024  ;;  %v3042_v14 = vsel %vm777_vm0, %v3040_v21, %v3041_v51  ;;  %v3070_v12 = vmul.f32 %v3069_v31, %v6482_v27  ;;  %v3857_v59 = vsel %vm822_vm1, %v3855_v39, %v3856_v63  ;;  %v3867_v31 = vrot.slane %v3863_v49, 2 }
 0x33b   : > { %v3027_v46 = vadd.f32 %v3025_v19, %v3019_v6  ;;  %v3075_v52 = vrot.slane %v3071_v0, 2  ;;  %v3541_v63 = vstv %s7610_s1  ;;  %v3535_v0 = vmul.f32 %v3534_v62, %v6663_v38  ;;  %s7706_s1 = sld [smem:[#allocation7 + $0x3]] }
 0x33c   : > { %v3074_v16 = vrot.slane %v3070_v12, 2  ;;  %v3120_v40 = vstv %s7628_s21  ;;  %s4501_s21 = sld [smem:[#allocation7 + $0x6]] }
 0x33d   : > { %v3034_v5 = vadd.f32 %v3032_v25, %v3027_v46  ;;  %v3122_v12 = vmul.f32 %v3120_v40, %v6590_v48 }
 0x33e   : > { %3515 = vrot.lane.b32.xlu2 %v3514_v61, %s8097_s23  ;;  %v3076_v35 = vsel %vm822_vm1, %v3074_v16, %v3075_v52  ;;  %v3869_v61 = vsel %vm822_vm1, %v3867_v31, %v3868_v22  ;;  %v3121_v52 = vmul.f32 %v3120_v40, %v6586_v24  ;;  %v3154_v31 = vstv %s7640_s22  ;;  %s7771_s22 = sld [smem:[#allocation8]] }
 0x33f   : > { %v3044_v6 = vadd.f32 %v3042_v14, %v3034_v5  ;;  %v3877_v14 = vstv %s7632_s2  ;;  %v3126_v16 = vrot.slane %v3122_v12, 1  ;;  %s4502_s2 = sld [smem:[#allocation7 + $0x7]] }
 0x340   : > { %v7624_v50 = vpop.permute.xlu2 %3184 }
 0x341   : > { %3858 = vrot.lane.b32.xlu1 %v3857_v59, %s8097_s23  ;;  %3527 = vrot.lane.b32.xlu0 %v3526_v7, %s8096_s30  ;;  %v3056_v25 = vadd.f32 %v7542_v11, %v3044_v6  ;;  %v3542_v11 = vmul.f32 %v3541_v63, %v6663_v38  ;;  %v3104_v59 = vmul.f32 %v3103_v13, %v6586_v24  ;;  %v3125_v63 = vrot.slane %v3121_v52, 1 }
 0x342   : > { %v3088_v19 = vpop.permute.xlu1 %3087  ;;  %v3066_v51 = vpop.permute.xlu0 %3065 }
 0x343   : > { %v3068_v46 = vadd.f32 %v3066_v51, %v3056_v25  ;;  %v3878_v25 = vmul.f32 %v3877_v14, %v6663_v38 }
 0x345   : > { %v3078_v21 = vadd.f32 %v3076_v35, %v3068_v46 }
 0x346   : > { %3870 = vrot.lane.b32.xlu2 %v3869_v61, %s8096_s30  ;;  %v3127_v61 = vsel %vm777_vm0, %v3125_v63, %v3126_v16  ;;  %v8112_v16 = vld [vmem:[#allocation23_spill] sm:$0xff] }
 0x347   : > { %v3090_v5 = vadd.f32 %v3088_v19, %v3078_v21  ;;  %v3884_v19 = vstv %s4538_s20  ;;  %v3155_v21 = vmul.f32 %v3154_v31, %v6586_v24  ;;  %s4550_s20 = sld [smem:[#allocation7 + $0x37]] }
 0x348   : > { %v7645_v39 = vpop.permute.xlu2 %3223  ;;  %v3885_v46 = vmul.f32 %v3884_v19, %v6663_v38 }
 0x349   : > { %3544 = vrot.lane.b32.xlu1 %v3542_v11, %s8096_s30  ;;  %3537 = vrot.lane.b32.xlu0 %v3535_v0, %s8097_s23  ;;  %v3102_v49 = vadd.f32 %v7569_v23, %v3090_v5  ;;  %v3156_v23 = vmul.f32 %v3154_v31, %v6590_v48  ;;  %v3159_v14 = vrot.slane %v3155_v21, 2 }
 0x34a   : > { %v3117_v7 = vpop.permute.xlu1 %3116  ;;  %v3110_v6 = vpop.permute.xlu0 %3109 }
 0x34b   : > { %v3105_v22 = vadd.f32 %v3104_v59, %v3102_v49  ;;  %v3160_v13 = vrot.slane %v3156_v23, 2 }
 0x34d   : > { %v3112_v51 = vadd.f32 %v3110_v6, %v3105_v22  ;;  %v3188_v6 = vstv %s4504_s17  ;;  %s7777_s17 = sld [smem:[#allocation7 + $0x66]] }
 0x34e   : > { %3880 = vrot.lane.b32.xlu2 %v3878_v25, %s8097_s23  ;;  %v3189_v19 = vmul.f32 %v3188_v6, %v6663_v38 }
 0x34f   : > { %v3119_v62 = vadd.f32 %v3117_v7, %v3112_v51  ;;  %v8111_v7 = vld [vmem:[#allocation43_spill] sm:$0xff] }
 0x350   : > { %v3270_v35 = vpop.permute.xlu2 %3269 }
 0x351   : > { %3566 = vrot.lane.b32.xlu1 %v6866_v56, %s8097_s23  ;;  %3887 = vrot.lane.b32.xlu0 %v3885_v46, %s8096_s30  ;;  %v3129_v11 = vadd.f32 %v3127_v61, %v3119_v62  ;;  %v3161_v56 = vsel %vm822_vm1, %v3159_v14, %v3160_v13  ;;  %v3626_v62 = vstv %s4541_s19  ;;  %v3619_v61 = vstv %s4525_s18  ;;  %s7779_s19 = sld [smem:[#allocation8 + $0x1]] }
 0x352   : > { %v3173_v0 = vpop.permute.xlu1 %3172  ;;  %v3151_v5 = vpop.permute.xlu0 %3150  ;;  %v3273_v14 = vstv %s4508_s12  ;;  %s7783_s18 = sld [smem:[#allocation7 + $0x67]] }
 0x353   : > { %v3141_v40 = vadd.f32 %v7595_v28, %v3129_v11  ;;  %v3627_v11 = vmul.f32 %v3626_v62, %v7168_v30  ;;  %v8114_v62 = vld [vmem:[#allocation19_spill] sm:$0xff]  ;;  %s7788_s12 = sld [smem:[#allocation10 + $0x3]] }
 0x355   : > { %v3153_v12 = vadd.f32 %v3151_v5, %v3141_v40 }
 0x356   : > { %3578 = vrot.lane.b32.xlu2 %v6885_v15, %s8096_s30 }
 0x357   : > { %v3163_v49 = vadd.f32 %v3161_v56, %v3153_v12  ;;  %v3969_v56 = vstv %s4542_s0  ;;  %s7791_s0 = sld [smem:[#allocation10]] }
 0x358   : > { %v3309_v59 = vpop.permute.xlu2 %3308  ;;  %v3970_v6 = vmul.f32 %v3969_v56, %v7168_v30 }
 0x359   : > { %3921 = vrot.lane.b32.xlu1 %v6888_v54, %s8096_s30  ;;  %3909 = vrot.lane.b32.xlu0 %v8111_v7, %s8097_s23  ;;  %v3175_v52 = vadd.f32 %v3173_v0, %v3163_v49  ;;  %v8113_v54 = vld [vmem:[#allocation26_spill] sm:$0xff]  ;;  %v3620_v0 = vmul.f32 %v3619_v61, %v7168_v30  ;;  %v3274_v7 = vmul.f32 %v3273_v14, %v7168_v30  ;;  %v4063_v61 = vrot.slane %v8114_v62, 2 }
 0x35b   : > { %v3202_v22 = vpop.permute.xlu1 %3201  ;;  %v3195_v25 = vpop.permute.xlu0 %3194  ;;  %v3187_v28 = vadd.f32 %v7624_v50, %v3175_v52 }
 0x35d   : > { %v3190_v15 = vadd.f32 %v3189_v19, %v3187_v28 }
 0x35e   : > { %3600 = vrot.lane.b32.xlu2 %v8112_v16, %s8097_s23 }
 0x35f   : > { %v3197_v51 = vadd.f32 %v3195_v25, %v3190_v15 }
 0x360   : > { %v7677_v31 = vpop.permute.xlu2 %3354 }
 0x361   : > { %3943 = vrot.lane.b32.xlu1 %v8113_v54, %s8097_s23  ;;  %3612 = vrot.lane.b32.xlu0 %v6952_v3, %s8096_s30  ;;  %v3204_v46 = vadd.f32 %v3202_v22, %v3197_v51  ;;  %v3361_v51 = vstv %s4497_s8  ;;  %s7795_s8 = sld [smem:[#allocation10 + $0x1]] }
 0x363   : > { %v3258_v63 = vpop.permute.xlu1 %3257  ;;  %v3236_v50 = vpop.permute.xlu0 %3235  ;;  %v3214_v23 = vadd.f32 %v6958_v58, %v3204_v46  ;;  %v3962_v58 = vstv %s4526_s16  ;;  %s7785_s16 = sld [smem:[#allocation10 + $0x2]] }
 0x365   : > { %v3226_v21 = vadd.f32 %v7645_v39, %v3214_v23  ;;  %v4157_v23 = vrot.slane %v5271_v45, 2 }
 0x366   : > { %3955 = vrot.lane.b32.xlu2 %v6978_v4, %s8096_s30  ;;  %v3963_v4 = vmul.f32 %v3962_v58, %v7168_v30  ;;  %v3704_v58 = vstv %s7706_s1  ;;  %s7806_s1 = sld [smem:[#allocation10 + $0x7]] }
 0x367   : > { %v3238_v3 = vadd.f32 %v3236_v50, %v3226_v21  ;;  %v4126_v50 = vrot.slane %v5237_v9, 2  ;;  %v8115_v21 = vld [vmem:[#allocation20_spill] sm:$0xff]  ;;  %v4096_v9 = vrot.slane %v5201_v36, 2  ;;  %v3705_v56 = vmul.f32 %v3704_v58, %v6482_v27 }
 0x368   : > { %v7689_v13 = vpop.permute.xlu2 %3710 }
 0x369   : > { %3629 = vrot.lane.b32.xlu1 %v3627_v11, %s8096_s30  ;;  %3622 = vrot.lane.b32.xlu0 %v3620_v0, %s8097_s23  ;;  %v3248_v5 = vadd.f32 %v6973_v57, %v3238_v3  ;;  %v4064_v11 = vrot.slane %v8115_v21, 2 }
 0x36b   : > { %v3287_v40 = vpop.permute.xlu1 %3286  ;;  %v3280_v39 = vpop.permute.xlu0 %3279  ;;  %v3260_v12 = vadd.f32 %v3258_v63, %v3248_v5 }
 0x36d   : > { %v3272_v49 = vadd.f32 %v3270_v35, %v3260_v12 }
 0x36e   : > { %3965 = vrot.lane.b32.xlu2 %v3963_v4, %s8097_s23 }
 0x36f   : > { %v3275_v52 = vadd.f32 %v3274_v7, %v3272_v49 }
 0x370   : > { %v7698_v22 = vpop.permute.xlu2 %3408 }
 0x371   : > { %3651 = vrot.lane.b32.xlu1 %v7351_v29, %s8097_s23  ;;  %3972 = vrot.lane.b32.xlu0 %v3970_v6, %s8096_s30  ;;  %v3282_v57 = vadd.f32 %v3280_v39, %v3275_v52  ;;  %v3713_v52 = vadd.f32 %v7689_v13, %v3705_v56 }
 0x373   : > { %v3343_v25 = vpop.permute.xlu1 %3342  ;;  %v3321_v28 = vpop.permute.xlu0 %3320  ;;  %v3289_v35 = vadd.f32 %v3287_v40, %v3282_v57 }
 0x375   : > { %v3299_v19 = vadd.f32 %v7357_v42, %v3289_v35  ;;  %v3362_v42 = vmul.f32 %v3361_v51, %v6482_v27 }
 0x376   : > { %3663 = vrot.lane.b32.xlu2 %v7377_v53, %s8096_s30  ;;  %v3378_v53 = vstv %s4545_s4  ;;  %s7801_s4 = sld [smem:[#allocation10 + $0x6]] }
 0x377   : > { %v3311_v15 = vadd.f32 %v3309_v59, %v3299_v19  ;;  %v3380_v59 = vmul.f32 %v3378_v53, %v6486_v47 }
 0x378   : > { %v7708_v16 = vpop.permute.xlu2 %3430 }
 0x379   : > { %4006 = vrot.lane.b32.xlu1 %v7382_v34, %s8096_s30  ;;  %3994 = vrot.lane.b32.xlu0 %v7393_v17, %s8097_s23  ;;  %v3323_v29 = vadd.f32 %v3321_v28, %v3311_v15  ;;  %v4127_v34 = vrot.slane %v5235_v8, 2  ;;  %v4158_v17 = vrot.slane %v5269_v44, 2  ;;  %v3379_v8 = vmul.f32 %v3378_v53, %v6482_v27 }
 0x37b   : > { %v3375_v54 = vpop.permute.xlu1 %3374  ;;  %v3368_v46 = vpop.permute.xlu0 %3367  ;;  %v3333_v63 = vadd.f32 %v7366_v60, %v3323_v29  ;;  %v4095_v60 = vrot.slane %v5203_v37, 2  ;;  %v3721_v37 = vstv %s7714_s10  ;;  %v4128_v36 = vsel %vm822_vm1, %v4126_v50, %v4127_v34  ;;  %s7808_s10 = sld [smem:[#allocation10 + $0x4]] }
 0x37c   : > { %v3370_v3 = vadd.f32 %v3368_v46, %v3362_v42  ;;  %v4159_v40 = vsel %vm822_vm1, %v4157_v23, %v4158_v17  ;;  %v3383_v39 = vrot.slane %v3379_v8, 1  ;;  %v3722_v49 = vmul.f32 %v3721_v37, %v6482_v27 }
 0x37d   : > { %v3345_v0 = vadd.f32 %v3343_v25, %v3333_v63  ;;  %v4097_v14 = vsel %vm822_vm1, %v4095_v60, %v4096_v9  ;;  %v4797_v7 = vpack.i.bf16 %v4159_v40, %v4128_v36  ;;  %v3412_v25 = vstv %s7729_s15  ;;  %s7811_s15 = sld [smem:[#allocation10 + $0x5]] }
 0x37e   : > { %3685 = vrot.lane.b32.xlu2 %v7402_v26, %s8097_s23  ;;  %v3384_v26 = vrot.slane %v3380_v59, 1  ;;  %v3377_v5 = vadd.f32 %v3375_v54, %v3370_v3  ;;  %v3414_v35 = vmul.f32 %v3412_v25, %v6486_v47  ;;  %v3726_v29 = vrot.slane %v3722_v49, 1 }
 0x37f   : > { %v7733_v44 = vadd.f32 %v7677_v31, %v3345_v0  ;;  %v4065_v31 = vsel %vm822_vm1, %v4063_v61, %v4064_v11  ;;  %v3413_v54 = vmul.f32 %v3412_v25, %v6482_v27  ;;  %v3446_v8 = vstv %s4501_s21  ;;  %s4506_s21 = sld [smem:[#allocation7 + $0xb]] }
 0x380   : > { %v7735_v45 = vpop.permute.xlu2 %3785  ;;  %v4792_v6 = vpack.i.bf16 %v4097_v14, %v4065_v31 }
 0x381   : > { %4028 = vrot.lane.b32.xlu1 %v7415_v43, %s8097_s23  ;;  %3697 = vrot.lane.b32.xlu0 %v7428_v33, %s8096_s30  ;;  %v3723_v43 = vmul.f32 %v3721_v37, %v6486_v47  ;;  %s4594_s23 = sld [smem:[#allocation7 + $0x63]]  ;;  %v3385_v33 = vsel %vm777_vm0, %v3383_v39, %v3384_v26  ;;  %v3417_v34 = vrot.slane %v3413_v54, 2  ;;  %v3447_v37 = vmul.f32 %v3446_v8, %v6586_v24 }
 0x382   : > { %v3387_v57 = vadd.f32 %v3385_v33, %v3377_v5 }
 0x383   : > { %v3397_v12 = vpop.permute.xlu1 %3396  ;;  %v3718_v4 = vpop.permute.xlu0 %3717  ;;  %v3727_v28 = vrot.slane %v3723_v43, 1 }
 0x384   : > { %v3399_v19 = vadd.f32 %v3397_v12, %v3387_v57  ;;  %v3720_v15 = vadd.f32 %v3718_v4, %v3713_v52  ;;  %v3015_v57 = vstv %s7771_s22  ;;  %s4640_s22 = sld [smem:[#allocation8 + $0x2]] }
 0x385   : > { %v3728_v42 = vsel %vm777_vm0, %v3726_v29, %v3727_v28 }
 0x386   : > { %4040 = vrot.lane.b32.xlu2 %v7431_v1, %s8096_s30  ;;  %v3418_v1 = vrot.slane %v3414_v35, 2  ;;  %v3411_v53 = vadd.f32 %v7698_v22, %v3399_v19  ;;  %v3730_v63 = vadd.f32 %v3728_v42, %v3720_v15  ;;  %v3016_v42 = vadd.f32 %v3015_v57, %v7604_v18 }
 0x387   : > { %v3755_v59 = vstv %s4594_s23  ;;  %s7823_s23 = sld [smem:[#allocation7 + $0xa]] }
 0x388   : > { %v7756_v51 = vpop.permute.xlu2 %3795  ;;  %v3757_v50 = vmul.f32 %v3755_v59, %v6486_v47  ;;  %v3756_v17 = vmul.f32 %v3755_v59, %v6482_v27  ;;  %v3419_v62 = vsel %vm822_vm1, %v3417_v34, %v3418_v1  ;;  %v3840_v34 = vstv %s7783_s18  ;;  %s7857_s18 = sld [smem:[#allocation10 + $0xa]] }
 0x389   : > { %4798 = vrot.lane.b32.xlu1 %v4797_v7, %s8096_s30  ;;  %4793 = vrot.lane.b32.xlu0 %v4792_v6, %s8096_s30  ;;  %v3421_v21 = vadd.f32 %v3419_v62, %v3411_v53  ;;  %s4549_s30 = sld [smem:[#allocation7 + $0x36]]  ;;  %v3806_v6 = vstv %s4550_s20  ;;  %v3842_v62 = vmul.f32 %v3840_v34, %v6590_v48 }
 0x38a   : > { %v3761_v11 = vrot.slane %v3757_v50, 2  ;;  %v3760_v3 = vrot.slane %v3756_v17, 2  ;;  %v3807_v19 = vmul.f32 %v3806_v6, %v6586_v24  ;;  %s4641_s20 = sld [smem:[#allocation8 + $0x3]] }
 0x38b   : > { %v3752_v13 = vpop.permute.xlu1 %3751  ;;  %v3740_v46 = vpop.permute.xlu0 %3739  ;;  %v3433_v9 = vadd.f32 %v7708_v16, %v3421_v21  ;;  %v3789_v16 = vstv %s4502_s2  ;;  %s4510_s2 = sld [smem:[#allocation7 + $0xf]] }
 0x38c   : > { %v3742_v23 = vadd.f32 %v3740_v46, %v3730_v63  ;;  %v3762_v47 = vsel %vm822_vm1, %v3760_v3, %v3761_v11  ;;  %v3790_v56 = vmul.f32 %v3789_v16, %v6586_v24  ;;  %v3358_v46 = vstv %s7779_s19  ;;  %s7855_s19 = sld [smem:[#allocation10 + $0x9]] }
 0x38d   : > { %v3811_v50 = vrot.slane %v3807_v19, 1  ;;  %v3359_v18 = vadd.f32 %v3358_v46, %v7733_v44  ;;  %v4110_v3 = vstv %s7785_s16  ;;  %v4047_v44 = vstv %s7791_s0  ;;  %s7859_s16 = sld [smem:[#allocation10 + $0xb]] }
 0x38e   : > { %v3754_v0 = vadd.f32 %v3752_v13, %v3742_v23  ;;  %v3497_v13 = vstv %s7777_s17  ;;  %v3017_v23 = vmax.f32 %v3016_v42, 0.0  ;;  %v4144_v16 = vstv %s7806_s1  ;;  %s7853_s17 = sld [smem:[#allocation10 + $0x8]] }
 0x38f   : > { %v3463_v40 = vstv %s4549_s30  ;;  %v3499_v53 = vmul.f32 %v3497_v13, %v6590_v48  ;;  %v3360_v8 = vmax.f32 %v3359_v18, 0.0  ;;  %s4509_s30 = sld [smem:[#allocation7 + $0xe]] }
 0x390   : > { %v7766_v61 = vpop.permute.xlu2 %3493  ;;  %v3764_v58 = vadd.f32 %v3762_v47, %v3754_v0  ;;  %v3465_v39 = vmul.f32 %v3463_v40, %v6590_v48  ;;  %v3464_v43 = vmul.f32 %v3463_v40, %v6586_v24  ;;  %v4141_v47 = vstv %s7788_s12  ;;  %s7861_s12 = sld [smem:[#allocation10 + $0xe]] }
 0x391   : > { %v3503_v21 = vrot.slane %v3499_v53, 2  ;;  %v4142_v40 = vmul.f32 %v4141_v47, %v3017_v23  ;;  %s7864_s0 = sld [smem:[#allocation10 + $0xf]] }
 0x392   : > { %v3469_v33 = vrot.slane %v3465_v39, 1  ;;  %v3468_v52 = vrot.slane %v3464_v43, 1  ;;  %v4113_v39 = vstv %s7801_s4  ;;  %s7868_s4 = sld [smem:[#allocation10 + $0xd]] }
 0x393   : > { %v3774_v60 = vpop.permute.xlu1 %3773  ;;  %v3443_v22 = vpop.permute.xlu0 %3442  ;;  %s7870_s1 = sld [smem:[#allocation11 + $0x2]] }
 0x394   : > { %v3445_v26 = vadd.f32 %v3443_v22, %v3433_v9  ;;  %v3776_v27 = vadd.f32 %v3774_v60, %v3764_v58  ;;  %v3470_v25 = vsel %vm777_vm0, %v3468_v52, %v3469_v33  ;;  %v4145_v33 = vmul.f32 %v4144_v16, %v3360_v8 }
 0x396   : > { %v3448_v5 = vadd.f32 %v3447_v37, %v3445_v26  ;;  %v3788_v12 = vadd.f32 %v7735_v45, %v3776_v27  ;;  %v3808_v45 = vmul.f32 %v3806_v6, %v6590_v48  ;;  %v3841_v26 = vmul.f32 %v3840_v34, %v6586_v24 }
 0x397   : > { %v3846_v48 = vrot.slane %v3842_v62, 2 }
 0x398   : > { %v7773_v36 = vpop.permute.xlu2 %3515  ;;  %v3791_v7 = vadd.f32 %v3790_v56, %v3788_v12  ;;  %v3812_v1 = vrot.slane %v3808_v45, 1  ;;  %v4050_v12 = vstv %s7808_s10  ;;  %v4114_v56 = vmul.f32 %v4113_v39, %v3360_v8  ;;  %s7874_s10 = sld [smem:[#allocation11]] }
 0x399   : > { %v7832_v45 = vadd.f32 %v4145_v33, %v4142_v40 }
 0x39a   : > { %v3798_v54 = vadd.f32 %v7756_v51, %v3791_v7  ;;  %v3498_v51 = vmul.f32 %v3497_v13, %v6586_v24  ;;  %v3813_v17 = vsel %vm777_vm0, %v3811_v50, %v3812_v1  ;;  %v4051_v24 = vmul.f32 %v4050_v12, %v3360_v8 }
 0x39b   : > { %v3460_v31 = vpop.permute.xlu1 %3459  ;;  %v3453_v14 = vpop.permute.xlu0 %3452  ;;  %v3531_v13 = vstv %s7823_s23  ;;  %s4659_s23 = sld [smem:[#allocation11 + $0x3]]  ;;  %vm4075_vm0 = vcmask 130048  }
 0x39c   : > { %v3455_v4 = vadd.f32 %v3453_v14, %v3448_v5  ;;  %v3502_v9 = vrot.slane %v3498_v51, 2  ;;  %v4048_v14 = vmul.f32 %v4047_v44, %v3017_v23  ;;  %v3532_v53 = vmul.f32 %v3531_v13, %v6663_v38 }
 0x39e   : > { %v3462_v49 = vadd.f32 %v3460_v31, %v3455_v4  ;;  %v3504_v27 = vsel %vm822_vm1, %v3502_v9, %v3503_v21  ;;  %v4079_v31 = vstv %s7795_s8  ;;  %v4082_v4 = vstv %s7811_s15  ;;  %s7866_s8 = sld [smem:[#allocation10 + $0xc]] }
 0x39f   : > { %v4083_v7 = vmul.f32 %v4082_v4, %v3360_v8  ;;  %v4080_v6 = vmul.f32 %v4079_v31, %v3017_v23  ;;  %v7834_v57 = vadd.f32 %v4051_v24, %v4048_v14  ;;  %v3959_v31 = vstv %s4510_s2  ;;  %s7878_s15 = sld [smem:[#allocation11 + $0x1]] }
 0x3a0   : > { %v7797_v15 = vpop.permute.xlu2 %3870  ;;  %v3472_v29 = vadd.f32 %v3470_v25, %v3462_v49  ;;  %v3845_v49 = vrot.slane %v3841_v26, 2 }
 0x3a1   : > { %v7837_v19 = vadd.f32 %v4083_v7, %v4080_v6 }
 0x3a2   : > { %v3847_v25 = vsel %vm822_vm1, %v3845_v49, %v3846_v48  ;;  %vm4077_vm1 = vcmask 261120  }
 0x3a3   : > { %v3482_v28 = vpop.permute.xlu1 %3481  ;;  %v3803_v35 = vpop.permute.xlu0 %3802 }
 0x3a4   : > { %v3484_v63 = vadd.f32 %v3482_v28, %v3472_v29  ;;  %v3805_v59 = vadd.f32 %v3803_v35, %v3798_v54 }
 0x3a6   : > { %v3496_v11 = vadd.f32 %v7766_v61, %v3484_v63  ;;  %v3815_v0 = vadd.f32 %v3813_v17, %v3805_v59  ;;  %v4111_v61 = vmul.f32 %v4110_v3, %v3017_v23  ;;  %v3874_v63 = vstv %s4506_s21  ;;  %s4996_s21 = smov 124  }
 0x3a7   : > { %v3875_v23 = vmul.f32 %v3874_v63, %v6663_v38 }
 0x3a8   : > { %v3881_v37 = vpop.permute.xlu2 %3880  ;;  %v3506_v5 = vadd.f32 %v3504_v27, %v3496_v11  ;;  %v7830_v52 = vadd.f32 %v4114_v56, %v4111_v61  ;;  %v8117_v27 = vld [vmem:[#allocation47_spill] sm:$0xff]  ;;  %v3616_v61 = vstv %s4509_s30  ;;  %s370_s30 = sand.u32 1, %s4970_s25  }
 0x3a9   : > { %s4347_s2 = sshll.u32 %s370_s30, 5 }
 0x3aa   : > { %v3518_v54 = vadd.f32 %v7773_v36, %v3506_v5 }
 0x3ab   : > { %v3837_v60 = vpop.permute.xlu1 %3836  ;;  %v3825_v22 = vpop.permute.xlu0 %3824 }
 0x3ac   : > { %v3827_v58 = vadd.f32 %v3825_v22, %v3815_v0 }
 0x3ae   : > { %v3839_v43 = vadd.f32 %v3837_v60, %v3827_v58 }
 0x3b0   : > { %v3849_v29 = vadd.f32 %v3847_v25, %v3839_v43  ;;  %v3579_v1 = vpop.permute.xlu2 %3578  ;;  %v3960_v43 = vmul.f32 %v3959_v31, %v7168_v30 }
 0x3b3   : > { %v3859_v28 = vpop.permute.xlu1 %3858  ;;  %v3528_v35 = vpop.permute.xlu0 %3527 }
 0x3b4   : > { %v3861_v42 = vadd.f32 %v3859_v28, %v3849_v29  ;;  %v3530_v46 = vadd.f32 %v3528_v35, %v3518_v54 }
 0x3b6   : > { %v3873_v59 = vadd.f32 %v7797_v15, %v3861_v42  ;;  %v3533_v50 = vadd.f32 %v3532_v53, %v3530_v46  ;;  %v8116_v15 = vld [vmem:[#allocation48_spill] sm:$0xff] }
 0x3b8   : > { %v3876_v62 = vadd.f32 %v3875_v23, %v3873_v59  ;;  %v3601_v36 = vpop.permute.xlu2 %3600 }
 0x3ba   : > { %v3883_v11 = vadd.f32 %v3881_v37, %v3876_v62 }
 0x3bb   : > { %v3545_v51 = vpop.permute.xlu1 %3544  ;;  %v3538_v18 = vpop.permute.xlu0 %3537 }
 0x3bc   : > { %v3540_v34 = vadd.f32 %v3538_v18, %v3533_v50 }
 0x3be   : > { %v3547_v17 = vadd.f32 %v3545_v51, %v3540_v34  ;;  %v3701_v51 = vstv %s4640_s22  ;;  %s8118_s22 = sshll.u32 %s4978_s27, 3  ;;  %s4173_s27 = scalar_lea.sflag [#allocation3], %s370_s30 }
 0x3c0   : > { %v3557_v21 = vadd.f32 %v6992_v20, %v3547_v17  ;;  %v3956_v38 = vpop.permute.xlu2 %3955  ;;  %v4044_v17 = vstv %s4641_s20  ;;  %s372_s20 = scalar_lea.vmem [#allocation13], %s4347_s2 }
 0x3c3   : > { %v3567_v0 = vpop.permute.xlu1 %3566  ;;  %v3888_v3 = vpop.permute.xlu0 %3887 }
 0x3c4   : > { %v3569_v60 = vadd.f32 %v3567_v0, %v3557_v21  ;;  %v3890_v22 = vadd.f32 %v3888_v3, %v3883_v11  ;;  %v4116_v11 = vstv %s7857_s18  ;;  %v4085_v3 = vstv %s7855_s19  ;;  %s4185_s18 = scalar_lea.hbm %s7944_s7, %s8118_s22 }
 0x3c6   : > { %v3581_v9 = vadd.f32 %v3579_v1, %v3569_v60  ;;  %v3900_v47 = vadd.f32 %v7011_v55, %v3890_v22  ;;  %v3617_v55 = vmul.f32 %v3616_v61, %v7168_v30  ;;  %v4147_v60 = vstv %s7859_s16  ;;  %s4186_s16 = sshll.u32 %s372_s20, 4  ;;  %s4187_s16 = int_to_ptr.vmem [resolvable:$true] %s4186_s16 }
 0x3c8   : > { %v3591_v44 = vadd.f32 %v8116_v15, %v3581_v9  ;;  %v3966_v16 = vpop.permute.xlu2 %3965  ;;  %v4119_v9 = vstv %s7861_s12  ;;  %v4056_v15 = vstv %s7866_s8  ;;  %s4188_s12 = sshll.u32 %s4185_s18, 4  ;;  %s4189_s12 = int_to_ptr.hbm [resolvable:$true] %s4188_s12 }
 0x3ca   : > { %v3603_v37 = vadd.f32 %v3601_v36, %v3591_v44  ;;  %v4053_v36 = vstv %s7853_s17 }
 0x3cb   : > { %v3922_v8 = vpop.permute.xlu1 %3921  ;;  %v3910_v58 = vpop.permute.xlu0 %3909 }
 0x3cc   : > { %v3912_v26 = vadd.f32 %v3910_v58, %v3900_v47  ;;  %v4150_v47 = vstv %s7864_s0  ;;  %s4906_s0 = sshra.s32 %s4189_s12, 4  ;;  %s4907_s0 = int_to_ptr.hbm [resolvable:$true] %s4906_s0 }
 0x3cd   : > { %s4908_s8 = scalar_lea.hbm %s4907_s0, 32  ;;  %p4913_p5 = scmp.lt.s32.totalorder %s4907_s0, %s7944_s7 }
 0x3ce   : > { %v3924_v48 = vadd.f32 %v3922_v8, %v3912_v26  ;;  %p4909_p1 = scmp.ne.s32.totalorder %s4907_s0, %s4908_s8 }
 0x3d0   : > { %v3934_v20 = vadd.f32 %v8117_v27, %v3924_v48  ;;  %v3664_v6 = vpop.permute.xlu2 %3663  ;;  %p4910_p2 = pnand %p4909_p1, %p5080_p4 }
 0x3d2   : > { %p4911_p3 = pneg %p4910_p2 }
 0x3d3   : > { %v3944_v5 = vpop.permute.xlu1 %3943  ;;  %v3613_v40 = vpop.permute.xlu0 %3612 }
 0x3d4   : > { %v3946_v14 = vadd.f32 %v3944_v5, %v3934_v20  ;;  %v3615_v39 = vadd.f32 %v3613_v40, %v3603_v37  ;;  %v4122_v20 = vstv %s7870_s1 }
 0x3d6   : > { %v3958_v12 = vadd.f32 %v3956_v38, %v3946_v14  ;;  %v3618_v4 = vadd.f32 %v3617_v55, %v3615_v39  ;;  %v4088_v38 = vstv %s7868_s4 }
 0x3d8   : > { %v3961_v56 = vadd.f32 %v3960_v43, %v3958_v12  ;;  %v3686_v30 = vpop.permute.xlu2 %3685  ;;  %v4059_v43 = vstv %s7874_s10  ;;  %s4912_s10 = scalar_lea.hbm %s7944_s7, 64 }
 0x3d9   : > { %p4914_p6 = scmp.lt.s32.totalorder %s4912_s10, %s4908_s8 }
 0x3da   : > { %v3968_v28 = vadd.f32 %v3966_v16, %v3961_v56 }
 0x3db   : > { %v3630_v33 = vpop.permute.xlu1 %3629  ;;  %v3623_v24 = vpop.permute.xlu0 %3622  ;;  %p4915_p7 = por %p4914_p6, %p4913_p5 }
 0x3dc   : > { %v3625_v49 = vadd.f32 %v3623_v24, %v3618_v4  ;;  %v4091_v24 = vstv %s7878_s15 }
 0x3dd   : > { %p4916_p9 = pnand %p4915_p7, %p4911_p3 }
 0x3de   : > { %v3632_v7 = vadd.f32 %v3630_v33, %v3625_v49 }
 0x3e0   : > { %v3642_v25 = vadd.f32 %v7442_v2, %v3632_v7 }
 0x3e3   : > { %v3652_v35 = vpop.permute.xlu1 %3651  ;;  %v3973_v29 = vpop.permute.xlu0 %3972 }
 0x3e4   : > { %v3654_v54 = vadd.f32 %v3652_v35, %v3642_v25  ;;  %v3975_v13 = vadd.f32 %v3973_v29, %v3968_v28  ;;  %v4153_v28 = vstv %s4659_s23 }
 0x3e6   : > { %v3666_v42 = vadd.f32 %v3664_v6, %v3654_v54  ;;  %v3985_v46 = vadd.f32 %v7451_v41, %v3975_v13 }
 0x3e8   : > { %v3676_v1 = vadd.f32 %v7457_v32, %v3666_v42 }
 0x3ea   : > { %v3688_v32 = vadd.f32 %v3686_v30, %v3676_v1 }
 0x3eb   : > { %v4007_v53 = vpop.permute.xlu1 %4006  ;;  %v3995_v63 = vpop.permute.xlu0 %3994 }
 0x3ec   : > { %v3997_v59 = vadd.f32 %v3995_v63, %v3985_v46 }
 0x3ee   : > { %v4009_v2 = vadd.f32 %v4007_v53, %v3997_v59 }
 0x3f0   : > { %v4019_v41 = vadd.f32 %v7454_v10, %v4009_v2  ;;  %v4041_v10 = vpop.permute.xlu2 %4040 }
 0x3f3   : > { %v4029_v50 = vpop.permute.xlu1 %4028  ;;  %v3698_v18 = vpop.permute.xlu0 %3697 }
 0x3f4   : > { %v4031_v34 = vadd.f32 %v4029_v50, %v4019_v41  ;;  %v3700_v23 = vadd.f32 %v3698_v18, %v3688_v32 }
 0x3f6   : > { %v4043_v62 = vadd.f32 %v4041_v10, %v4031_v34  ;;  %v3702_v21 = vadd.f32 %v3701_v51, %v3700_v23 }
 0x3f8   : > { %v4045_v0 = vadd.f32 %v4044_v17, %v4043_v62  ;;  %v3703_v22 = vmax.f32 %v3702_v21, 0.0 }
 0x3fa   : > { %v4046_v44 = vmax.f32 %v4045_v0, 0.0  ;;  %v4054_v8 = vmul.f32 %v4053_v36, %v3703_v22  ;;  %v4117_v58 = vmul.f32 %v4116_v11, %v3703_v22  ;;  %v4086_v26 = vmul.f32 %v4085_v3, %v3703_v22 }
 0x3fb   : > { %v4148_v48 = vmul.f32 %v4147_v60, %v3703_v22  ;;  %v4799_v27 = vpop.permute.xlu1 %4798  ;;  %v4794_v39 = vpop.permute.xlu0 %4793 }
 0x3fc   : > { %v4118_v61 = vadd.f32 %v4117_v58, %v7830_v52  ;;  %v4120_v37 = vmul.f32 %v4119_v9, %v4046_v44  ;;  %v4151_v40 = vmul.f32 %v4150_v47, %v4046_v44  ;;  %v4057_v31 = vmul.f32 %v4056_v15, %v4046_v44 }
 0x3fd   : > { %v4149_v5 = vadd.f32 %v4148_v48, %v7832_v45  ;;  %v4089_v14 = vmul.f32 %v4088_v38, %v4046_v44  ;;  %v4800_v55 = vunpack.i.l.bf16 %v4799_v27  ;;  %v4055_v12 = vadd.f32 %v4054_v8, %v7834_v57 }
 0x3fe   : > { %v4121_v16 = vadd.f32 %v4120_v37, %v4118_v61  ;;  %v4087_v56 = vadd.f32 %v4086_v26, %v7837_v19  ;;  %v4795_v49 = vunpack.i.l.bf16 %v4794_v39  ;;  %v4796_v52 = vunpack.i.h.bf16 %v4794_v39 }
 0x3ff   : > { %v4152_v4 = vadd.f32 %v4151_v40, %v4149_v5  ;;  %v4058_v7 = vadd.f32 %v4057_v31, %v4055_v12  ;;  %v4801_v42 = vunpack.i.h.bf16 %v4799_v27 }
 0x400   : > { %v4123_v33 = vadd.f32 %v4122_v20, %v4121_v16  ;;  %v4090_v6 = vadd.f32 %v4089_v14, %v4087_v56 }
 0x401   : > { %v4060_v45 = vadd.f32 %v4059_v43, %v4058_v7  ;;  %v4154_v57 = vadd.f32 %v4153_v28, %v4152_v4 }
 0x402   : > { %v4132_v25 = vadd.f32 %v4800_v55, %v4123_v33  ;;  %v4092_v35 = vadd.f32 %v4091_v24, %v4090_v6 }
 0x403   : > { %v4069_v54 = vadd.f32 %v4795_v49, %v4060_v45  ;;  %v4163_v1 = vadd.f32 %v4801_v42, %v4154_v57 }
 0x404   : > { %v4133_v29 = vmax.f32 %v4132_v25, 0.0  ;;  %v4101_v13 = vadd.f32 %v4796_v52, %v4092_v35 }
 0x405   : > { %v4070_v46 = vmax.f32 %v4069_v54, 0.0  ;;  %v4164_v30 = vmax.f32 %v4163_v1, 0.0 }
 0x406   : > { %4135 = vrot.lane.b32.xlu1 %v4133_v29, %s4996_s21  ;;  %v4102_v19 = vmax.f32 %v4101_v13, 0.0 }
 0x407   : > { %4072 = vrot.lane.b32.xlu2 %v4070_v46, %s4996_s21 }
 0x408   : > { %4104 = vrot.lane.b32.xlu0 %v4102_v19, %s4996_s21 }
 0x40f   : > { %4166 = vrot.lane.b32.xlu2 %v4164_v30, %s4996_s21 }
 0x461   : > { %v4073_v53 = vpop.permute.xlu2 %4072 }
 0x462   : > { %v4076_v63 = vsel %vm4075_vm0, %v4070_v46, %v4073_v53 }
 0x463   : > { %4078 = vst.msk [vmem:[%s372_s20] sm:$0xff] %vm4077_vm1, %v4076_v63 }
 0x469   : > { %v4167_v59 = vpop.permute.xlu2 %4166 }
 0x46a   : > { %v4169_v2 = vsel %vm4075_vm0, %v4164_v30, %v4167_v59 }
 0x46b   : > { %4664 = vst.msk [vmem:[%s372_s20 + $0x18] sm:$0xff] %vm4077_vm1, %v4169_v2 }
 0x478   : > { %v4136_v41 = vpop.permute.xlu1 %4135 }
 0x479   : > { %v4138_v32 = vsel %vm4075_vm0, %v4133_v29, %v4136_v41 }
 0x47a   : > { %4663 = vst.msk [vmem:[%s372_s20 + $0x10] sm:$0xff] %vm4077_vm1, %v4138_v32  ;;  %v4105_v50 = vpop.permute.xlu0 %4104 }
 0x47b   : > { %v4107_v51 = vsel %vm4075_vm0, %v4102_v19, %v4105_v50 }
 0x47c   : > { %4662 = vst.msk [vmem:[%s372_s20 + $0x8] sm:$0xff] %vm4077_vm1, %v4107_v51 }
 0x47d   : > { %4919 = shalt.err (!%p4916_p9)
}
 0x47e   : > { %s4997_s21 = smov 128   ;;  %s4998_s30 = smov 256  }
 0x47f   : > { %s4999_s2 = smov 8  }
 0x480   : > { %4694 = dma.vmem_to_hbm [thread:$0]  (%p5080_p4), %s4187_s16, 512, %s4189_s12, %s4173_s27, %s4997_s21, %s4998_s30, %s4999_s2  }
 0x481 PF: > { %p4731_p10 = scmp.ge.s32.totalorder %s4986_s29, 2  ;;  %s4203_s20 = sand.u32 1, %s4966_s24  }
 0x482   : > { %s4204_s22 = scalar_lea.sflag [#allocation3], %s4203_s20 }
 0x483   : > { %p4716_p11 = pnand %p4731_p10, %p5087_p8 }
 0x485   : > { %p4717_p12 = pneg %p4716_p11 }
 0x487   : > { %4961 = dma.done.wait (%p4717_p12), %s4204_s22, 512  }
 0x488   : > { %4963 = vsyncadd (%p4717_p12), %s4204_s22, 4294966784  ;;  %s24_s29 = sadd.s32 1, %s4986_s29   ;;  %s8119_s24 = smov %s4970_s25 }
 0x489   : > { %p21_p13 = scmp.ge.s32.totalorder %s24_s29, 4   ;;  %s8120_s25 = smov %s4974_s26 }
 0x48a   : > { %s8121_s26 = smov %s5093_s14  ;;  %s8122_s27 = smov %s4982_s28 }
 0x48b   : > { %s8123_s28 = smov %s8125_s9  ;;  %23 = sbr.rel (!%p21_p13) target bundleno = 13 (0xd), region = 111 }
 0x490   :  { %4210 = vsyncpa [#allocation3], 1 }
 0x491   :  { %4212 = vsyncpa [#allocation3 + $0x1], 1 }
 0x492   :  { %4213 = vsyncpa [#allocation4], 1 }
 0x493   :  { %4215 = vsyncpa [#allocation4 + $0x1], 1 }
 0x494   :  { %4216 = vsyncpa [#allocation6], 1 }
 0x495   :  { %4217 = vsyncpa [#allocation9], 1 }
 0x496   :  { %4218 = vsyncpa [#allocation12], 1 }

</bundles_post_ra>
